<compile_context>
chip_gen: v7x
topology: tpu7x:2x2x1
jax: 0.10.0
libtpu: 0.0.40
codegen_flags: <defaults>
</compile_context>

<pallas_src>
import functools
import math

import jax
import jax.numpy as jnp
import numpy as np
from jax.experimental import pallas as pl
from jax.experimental.pallas import tpu as pltpu

# ----------------------------- model config (small) -----------------------------
D_MODEL = 32
NHEAD = 4
DHEAD = D_MODEL // NHEAD
NUM_ENC = 2
NUM_DEC = 2
D_FF = 64
SRC_VOCAB = 120
TGT_VOCAB = 100
VOCAB_PAD = 128              # padded embedding-table rows (one-hot gather K dim)
TGT_VOCAB_PAD = 128          # lane-dense padded logits width
MAX_LEN = 42
PAD_ID = 3
LN_EPS = 1e-5
ATTN_SCALE = 1.0 / math.sqrt(DHEAD)
SQRT_D = math.sqrt(D_MODEL)
NEG_INF = -1e30


# ----------------------------- in-kernel helpers -----------------------------
def _ln(x, g, b, eps=LN_EPS):
    """LayerNorm over the last dim. x: (N, D); g/b: (1, D)."""
    mu = jnp.mean(x, axis=-1, keepdims=True)
    xc = x - mu
    var = jnp.mean(xc * xc, axis=-1, keepdims=True)
    return xc * jax.lax.rsqrt(var + eps) * g + b


def _softmax_rows(s):
    m = jnp.max(s, axis=-1, keepdims=True)
    p = jnp.exp(s - m)
    return p * pl.reciprocal(jnp.sum(p, axis=-1, keepdims=True), approx=True)


def _mha(xq, xkv, w, bvec, *, B, Sq, Sk, mask):
    """Multi-head attention on batch-stacked rows.

    xq: (B*Sq, D), xkv: (B*Sk, D).
    w:    (D, 4D) lane-packed [Wq | Wk | Wv | Wo]   (x @ W convention)
    bvec: (1, 4D) lane-packed [bq | bk | bv | bo]
    mask: additive (Sq, Sk) bias or None.
    """
    D = D_MODEL
    if xq is xkv:
        # fused QKV: one (B*S, 32) @ (32, 96) matmul
        qkv = jnp.dot(xq, w[:, :3 * D], preferred_element_type=jnp.float32) + bvec[:, :3 * D]
        q, k, v = qkv[:, :D], qkv[:, D:2 * D], qkv[:, 2 * D:3 * D]
    else:
        q = jnp.dot(xq, w[:, :D], preferred_element_type=jnp.float32) + bvec[:, :D]
        kv = jnp.dot(xkv, w[:, D:3 * D], preferred_element_type=jnp.float32) + bvec[:, D:3 * D]
        k, v = kv[:, :D], kv[:, D:2 * D]

    ctx_rows = []
    for b in range(B):                                  # B=2, static
        qb = q[b * Sq:(b + 1) * Sq]
        kb = k[b * Sk:(b + 1) * Sk]
        vb = v[b * Sk:(b + 1) * Sk]
        heads = []
        for h in range(NHEAD):                          # H=4, static
            sl = slice(h * DHEAD, (h + 1) * DHEAD)
            s = jnp.dot(qb[:, sl], kb[:, sl].T,
                        preferred_element_type=jnp.float32) * ATTN_SCALE
            if mask is not None:
                s = s + mask
            p = _softmax_rows(s)
            heads.append(jnp.dot(p, vb[:, sl], preferred_element_type=jnp.float32))
        ctx_rows.append(jnp.concatenate(heads, axis=-1))        # (Sq, D)
    ctx = jnp.concatenate(ctx_rows, axis=0)                     # (B*Sq, D)
    # single output projection over all batches
    return jnp.dot(ctx, w[:, 3 * D:], preferred_element_type=jnp.float32) + bvec[:, 3 * D:]


def _ffn(h, w1, b1, w2, b2):
    f = jnp.maximum(jnp.dot(h, w1, preferred_element_type=jnp.float32) + b1, 0.0)
    return jnp.dot(f, w2, preferred_element_type=jnp.float32) + b2


def _embed(ids, emb, pe_s, *, B, S):
    """One-hot MXU gather + sqrt(d_model) scale + positional-encoding add.

    ids: (B*S, 1) int32; emb: (VOCAB_PAD, D); pe_s: (S, D) -> returns (B*S, D).
    """
    col = jax.lax.broadcasted_iota(jnp.int32, (B * S, VOCAB_PAD), 1)
    onehot = (col == ids).astype(jnp.float32)                   # (B*S, VOCAB_PAD)
    x = jnp.dot(onehot, emb, preferred_element_type=jnp.float32) * SQRT_D
    return x + jnp.concatenate([pe_s] * B, axis=0)


# ----------------------------- fully fused forward kernel -----------------------------
def _transformer_kernel(
        src_ids_ref, tgt_ids_ref,
        src_emb_ref, tgt_emb_ref, pe_ref,
        enc_aw_ref, enc_ab_ref, enc_w1_ref, enc_b1_ref, enc_w2_ref, enc_b2_ref,
        enc_ln_ref, enc_fn_ref,
        dec_sw_ref, dec_sb_ref, dec_cw_ref, dec_cb_ref,
        dec_w1_ref, dec_b1_ref, dec_w2_ref, dec_b2_ref,
        dec_ln_ref, dec_fn_ref,
        out_w_ref, out_b_ref,
        o_ref,
        *, B, Ss, St):
    # ---------------- encoder ----------------
    x = _embed(src_ids_ref[...], src_emb_ref[...], pe_ref[0:Ss, :], B=B, S=Ss)
    for l in range(NUM_ENC):                                    # static unroll
        w = enc_aw_ref[l]                                       # (32, 128)
        bb = enc_ab_ref[l]                                      # (1, 128)
        ln = enc_ln_ref[l]                                      # (4, 32)
        attn = _mha(x, x, w, bb, B=B, Sq=Ss, Sk=Ss, mask=None)
        h = _ln(x + attn, ln[0:1], ln[1:2])
        f = _ffn(h, enc_w1_ref[l], enc_b1_ref[l], enc_w2_ref[l], enc_b2_ref[l])
        x = _ln(h + f, ln[2:3], ln[3:4])
    memory = _ln(x, enc_fn_ref[0:1], enc_fn_ref[1:2])           # encoder-stack norm

    # ---------------- decoder ----------------
    y = _embed(tgt_ids_ref[...], tgt_emb_ref[...], pe_ref[0:St, :], B=B, S=St)
    row = jax.lax.broadcasted_iota(jnp.int32, (St, St), 0)
    col = jax.lax.broadcasted_iota(jnp.int32, (St, St), 1)
    causal = jnp.where(row >= col, 0.0, NEG_INF).astype(jnp.float32)
    for l in range(NUM_DEC):
        ln = dec_ln_ref[l]                                      # (6, 32)
        attn = _mha(y, y, dec_sw_ref[l], dec_sb_ref[l], B=B, Sq=St, Sk=St, mask=causal)
        h = _ln(y + attn, ln[0:1], ln[1:2])
        attn = _mha(h, memory, dec_cw_ref[l], dec_cb_ref[l], B=B, Sq=St, Sk=Ss, mask=None)
        h = _ln(h + attn, ln[2:3], ln[3:4])
        f = _ffn(h, dec_w1_ref[l], dec_b1_ref[l], dec_w2_ref[l], dec_b2_ref[l])
        y = _ln(h + f, ln[4:5], ln[5:6])
    y = _ln(y, dec_fn_ref[0:1], dec_fn_ref[1:2])                # decoder-stack norm

    # lane-dense (padded-to-128) logits projection
    logits = jnp.dot(y, out_w_ref[...], preferred_element_type=jnp.float32) + out_b_ref[...]
    for b in range(B):
        o_ref[b] = logits[b * St:(b + 1) * St, :].astype(o_ref.dtype)


# ----------------------------- pallas_call wrapper -----------------------------
def _full_spec(shape):
    rank = len(shape)
    return pl.BlockSpec(tuple(shape), lambda i, _r=rank: (0,) * _r)


def my_transformer_forward(packed, src_ids, tgt_ids):
    """src_ids/tgt_ids: (S, B) int32 (seq-first, as in the PyTorch module)."""
    Ss, B = src_ids.shape
    St, _ = tgt_ids.shape
    # batch-major row flattening of the token ids (tiny XLA op)
    src_flat = src_ids.T.reshape(B * Ss, 1).astype(jnp.int32)
    tgt_flat = tgt_ids.T.reshape(B * St, 1).astype(jnp.int32)

    args = (
        src_flat, tgt_flat,
        packed["src_emb"], packed["tgt_emb"], packed["pe"],
        packed["enc_aw"], packed["enc_ab"],
        packed["enc_w1"], packed["enc_b1"], packed["enc_w2"], packed["enc_b2"],
        packed["enc_ln"], packed["enc_fn"],
        packed["dec_sw"], packed["dec_sb"], packed["dec_cw"], packed["dec_cb"],
        packed["dec_w1"], packed["dec_b1"], packed["dec_w2"], packed["dec_b2"],
        packed["dec_ln"], packed["dec_fn"],
        packed["out_w"], packed["out_b"],
    )
    kernel = functools.partial(_transformer_kernel, B=B, Ss=Ss, St=St)
    out_shape = (B, St, TGT_VOCAB_PAD)
    logits = pl.pallas_call(
        kernel,
        out_shape=jax.ShapeDtypeStruct(out_shape, jnp.float32),
        grid=(1,),
        in_specs=[_full_spec(a.shape) for a in args],
        out_specs=_full_spec(out_shape),
        compiler_params=pltpu.CompilerParams(dimension_semantics=("arbitrary",)),
    )(*args)
    # drop lane padding + seq-first layout (2 KiB relayout, negligible)
    return jnp.transpose(logits[:, :, :TGT_VOCAB], (1, 0, 2))   # (St, B, V)


# ----------------------------- parameter init -----------------------------
class _KeyGen:
    def __init__(self, key):
        self.key = key
        self.i = 0

    def __call__(self):
        self.i += 1
        return jax.random.fold_in(self.key, self.i)


def _xavier(key, shape):
    fan_in, fan_out = shape[0], shape[1]
    limit = math.sqrt(6.0 / (fan_in + fan_out))
    return jax.random.uniform(key, shape, jnp.float32, -limit, limit)


def _make_pe(max_len, d_model):
    position = np.arange(max_len, dtype=np.float32)[:, None]
    div_term = np.exp(np.arange(0, d_model, 2, dtype=np.float32) * (-math.log(10000.0) / d_model))
    pe = np.zeros((max_len, d_model), np.float32)
    pe[:, 0::2] = np.sin(position * div_term)
    pe[:, 1::2] = np.cos(position * div_term)
    return jnp.asarray(pe)  # (max_len, d_model)


def _init_attn(kg):
    return {
        "wq": _xavier(kg(), (D_MODEL, D_MODEL)), "bq": jnp.zeros((D_MODEL,), jnp.float32),
        "wk": _xavier(kg(), (D_MODEL, D_MODEL)), "bk": jnp.zeros((D_MODEL,), jnp.float32),
        "wv": _xavier(kg(), (D_MODEL, D_MODEL)), "bv": jnp.zeros((D_MODEL,), jnp.float32),
        "wo": _xavier(kg(), (D_MODEL, D_MODEL)), "bo": jnp.zeros((D_MODEL,), jnp.float32),
    }


def _init_enc_layer(kg):
    return {
        "self_attn": _init_attn(kg),
        "w1": _xavier(kg(), (D_MODEL, D_FF)), "b1": jnp.zeros((D_FF,), jnp.float32),
        "w2": _xavier(kg(), (D_FF, D_MODEL)), "b2": jnp.zeros((D_MODEL,), jnp.float32),
        "ln1_g": jnp.ones((D_MODEL,), jnp.float32), "ln1_b": jnp.zeros((D_MODEL,), jnp.float32),
        "ln2_g": jnp.ones((D_MODEL,), jnp.float32), "ln2_b": jnp.zeros((D_MODEL,), jnp.float32),
    }


def _init_dec_layer(kg):
    d = _init_enc_layer(kg)
    d["cross_attn"] = _init_attn(kg)
    d["ln3_g"] = jnp.ones((D_MODEL,), jnp.float32)
    d["ln3_b"] = jnp.zeros((D_MODEL,), jnp.float32)
    return d


def init_params(seed=0):
    kg = _KeyGen(jax.random.PRNGKey(seed))
    src_emb = _xavier(kg(), (SRC_VOCAB, D_MODEL)).at[PAD_ID].set(0.0)  # padding_idx row = 0
    tgt_emb = _xavier(kg(), (TGT_VOCAB, D_MODEL)).at[PAD_ID].set(0.0)
    return {
        "src_emb": src_emb,
        "tgt_emb": tgt_emb,
        "pe": _make_pe(MAX_LEN, D_MODEL),
        "enc_layers": [_init_enc_layer(kg) for _ in range(NUM_ENC)],
        "enc_norm_g": jnp.ones((D_MODEL,), jnp.float32),
        "enc_norm_b": jnp.zeros((D_MODEL,), jnp.float32),
        "dec_layers": [_init_dec_layer(kg) for _ in range(NUM_DEC)],
        "dec_norm_g": jnp.ones((D_MODEL,), jnp.float32),
        "dec_norm_b": jnp.zeros((D_MODEL,), jnp.float32),
        "out_w": _xavier(kg(), (D_MODEL, TGT_VOCAB)),
        "out_b": jnp.zeros((TGT_VOCAB,), jnp.float32),
    }


# ----------------------------- one-time weight packing (host side) -----------------------------
def _pack_attn(a):
    # NOTE: x @ W convention (self-consistent with the local init). Transpose if loading
    # real PyTorch nn.MultiheadAttention weights.
    w = jnp.concatenate([a["wq"], a["wk"], a["wv"], a["wo"]], axis=1)            # (32, 128)
    b = jnp.concatenate([a["bq"], a["bk"], a["bv"], a["bo"]], axis=0)[None, :]   # (1, 128)
    return w, b


def pack_params(params):
    enc, dec = params["enc_layers"], params["dec_layers"]

    def stack_attn(layers, key):
        ws, bs = zip(*[_pack_attn(l[key]) for l in layers])
        return jnp.stack(ws), jnp.stack(bs)

    def stack_ffn(layers):
        return (jnp.stack([l["w1"] for l in layers]),
                jnp.stack([l["b1"][None, :] for l in layers]),
                jnp.stack([l["w2"] for l in layers]),
                jnp.stack([l["b2"][None, :] for l in layers]))

    enc_aw, enc_ab = stack_attn(enc, "self_attn")
    dec_sw, dec_sb = stack_attn(dec, "self_attn")
    dec_cw, dec_cb = stack_attn(dec, "cross_attn")
    enc_w1, enc_b1, enc_w2, enc_b2 = stack_ffn(enc)
    dec_w1, dec_b1, dec_w2, dec_b2 = stack_ffn(dec)

    enc_ln = jnp.stack([jnp.stack([l["ln1_g"], l["ln1_b"], l["ln2_g"], l["ln2_b"]]) for l in enc])
    dec_ln = jnp.stack([jnp.stack([l["ln1_g"], l["ln1_b"], l["ln2_g"], l["ln2_b"],
                                   l["ln3_g"], l["ln3_b"]]) for l in dec])

    src_emb = jnp.zeros((VOCAB_PAD, D_MODEL), jnp.float32).at[:SRC_VOCAB].set(params["src_emb"])
    tgt_emb = jnp.zeros((VOCAB_PAD, D_MODEL), jnp.float32).at[:TGT_VOCAB].set(params["tgt_emb"])
    out_w = jnp.zeros((D_MODEL, TGT_VOCAB_PAD), jnp.float32).at[:, :TGT_VOCAB].set(params["out_w"])
    out_b = jnp.zeros((1, TGT_VOCAB_PAD), jnp.float32).at[:, :TGT_VOCAB].set(params["out_b"][None, :])

    return {
        "src_emb": src_emb, "tgt_emb": tgt_emb, "pe": params["pe"],
        "enc_aw": enc_aw, "enc_ab": enc_ab,
        "enc_w1": enc_w1, "enc_b1": enc_b1, "enc_w2": enc_w2, "enc_b2": enc_b2,
        "enc_ln": enc_ln,
        "enc_fn": jnp.stack([params["enc_norm_g"], params["enc_norm_b"]]),
        "dec_sw": dec_sw, "dec_sb": dec_sb, "dec_cw": dec_cw, "dec_cb": dec_cb,
        "dec_w1": dec_w1, "dec_b1": dec_b1, "dec_w2": dec_w2, "dec_b2": dec_b2,
        "dec_ln": dec_ln,
        "dec_fn": jnp.stack([params["dec_norm_g"], params["dec_norm_b"]]),
        "out_w": out_w, "out_b": out_b,
    }


# ----------------------------- main -----------------------------
if __name__ == "__main__":
    params = init_params(0)
    packed = pack_params(params)   # one-time stacked / lane-dense weight packing (outside jit)

    key = jax.random.PRNGKey(0)
    k_src, k_tgt = jax.random.split(key)
    S_SRC, S_TGT, BATCH = 10, 8, 2
    src_ids = jax.random.randint(k_src, (S_SRC, BATCH), 0, SRC_VOCAB, dtype=jnp.int32)
    tgt_ids = jax.random.randint(k_tgt, (S_TGT, BATCH), 0, TGT_VOCAB, dtype=jnp.int32)

    fwd = jax.jit(my_transformer_forward)
    out = jax.block_until_ready(fwd(packed, src_ids, tgt_ids))

    assert out.shape == (S_TGT, BATCH, TGT_VOCAB), out.shape
    assert bool(jnp.all(jnp.isfinite(out)))
    print("KERNEL_OK")
</pallas_src>

<mosaic_0001>
module attributes {stable_mosaic.version = 11 : i64} {
  func.func @_transformer_kernel(%arg0: i32, %arg1: memref<20x1xi32, #tpu.memory_space<vmem>>, %arg2: memref<16x1xi32, #tpu.memory_space<vmem>>, %arg3: memref<128x32xf32, #tpu.memory_space<vmem>>, %arg4: memref<128x32xf32, #tpu.memory_space<vmem>>, %arg5: memref<42x32xf32, #tpu.memory_space<vmem>>, %arg6: memref<2x32x128xf32, #tpu.memory_space<vmem>>, %arg7: memref<2x1x128xf32, #tpu.memory_space<vmem>>, %arg8: memref<2x32x64xf32, #tpu.memory_space<vmem>>, %arg9: memref<2x1x64xf32, #tpu.memory_space<vmem>>, %arg10: memref<2x64x32xf32, #tpu.memory_space<vmem>>, %arg11: memref<2x1x32xf32, #tpu.memory_space<vmem>>, %arg12: memref<2x4x32xf32, #tpu.memory_space<vmem>>, %arg13: memref<2x32xf32, #tpu.memory_space<vmem>>, %arg14: memref<2x32x128xf32, #tpu.memory_space<vmem>>, %arg15: memref<2x1x128xf32, #tpu.memory_space<vmem>>, %arg16: memref<2x32x128xf32, #tpu.memory_space<vmem>>, %arg17: memref<2x1x128xf32, #tpu.memory_space<vmem>>, %arg18: memref<2x32x64xf32, #tpu.memory_space<vmem>>, %arg19: memref<2x1x64xf32, #tpu.memory_space<vmem>>, %arg20: memref<2x64x32xf32, #tpu.memory_space<vmem>>, %arg21: memref<2x1x32xf32, #tpu.memory_space<vmem>>, %arg22: memref<2x6x32xf32, #tpu.memory_space<vmem>>, %arg23: memref<2x32xf32, #tpu.memory_space<vmem>>, %arg24: memref<32x128xf32, #tpu.memory_space<vmem>>, %arg25: memref<1x128xf32, #tpu.memory_space<vmem>>, %arg26: memref<2x8x128xf32, #tpu.memory_space<vmem>>) attributes {dimension_semantics = [#tpu.dimension_semantics<arbitrary>], iteration_bounds = array<i64: 1>, scalar_prefetch = 0 : i64, scratch_operands = 0 : i64, tpu.core_type = #tpu.core_type<tc>, window_params = [{pipeline_mode = #tpu.pipeline_mode<synchronous>, transform_indices = @transform_0, window_bounds = array<i64: 20, 1>}, {pipeline_mode = #tpu.pipeline_mode<synchronous>, transform_indices = @transform_1, window_bounds = array<i64: 16, 1>}, {pipeline_mode = #tpu.pipeline_mode<synchronous>, transform_indices = @transform_2, window_bounds = array<i64: 128, 32>}, {pipeline_mode = #tpu.pipeline_mode<synchronous>, transform_indices = @transform_3, window_bounds = array<i64: 128, 32>}, {pipeline_mode = #tpu.pipeline_mode<synchronous>, transform_indices = @transform_4, window_bounds = array<i64: 42, 32>}, {pipeline_mode = #tpu.pipeline_mode<synchronous>, transform_indices = @transform_5, window_bounds = array<i64: 2, 32, 128>}, {pipeline_mode = #tpu.pipeline_mode<synchronous>, transform_indices = @transform_6, window_bounds = array<i64: 2, 1, 128>}, {pipeline_mode = #tpu.pipeline_mode<synchronous>, transform_indices = @transform_7, window_bounds = array<i64: 2, 32, 64>}, {pipeline_mode = #tpu.pipeline_mode<synchronous>, transform_indices = @transform_8, window_bounds = array<i64: 2, 1, 64>}, {pipeline_mode = #tpu.pipeline_mode<synchronous>, transform_indices = @transform_9, window_bounds = array<i64: 2, 64, 32>}, {pipeline_mode = #tpu.pipeline_mode<synchronous>, transform_indices = @transform_10, window_bounds = array<i64: 2, 1, 32>}, {pipeline_mode = #tpu.pipeline_mode<synchronous>, transform_indices = @transform_11, window_bounds = array<i64: 2, 4, 32>}, {pipeline_mode = #tpu.pipeline_mode<synchronous>, transform_indices = @transform_12, window_bounds = array<i64: 2, 32>}, {pipeline_mode = #tpu.pipeline_mode<synchronous>, transform_indices = @transform_13, window_bounds = array<i64: 2, 32, 128>}, {pipeline_mode = #tpu.pipeline_mode<synchronous>, transform_indices = @transform_14, window_bounds = array<i64: 2, 1, 128>}, {pipeline_mode = #tpu.pipeline_mode<synchronous>, transform_indices = @transform_15, window_bounds = array<i64: 2, 32, 128>}, {pipeline_mode = #tpu.pipeline_mode<synchronous>, transform_indices = @transform_16, window_bounds = array<i64: 2, 1, 128>}, {pipeline_mode = #tpu.pipeline_mode<synchronous>, transform_indices = @transform_17, window_bounds = array<i64: 2, 32, 64>}, {pipeline_mode = #tpu.pipeline_mode<synchronous>, transform_indices = @transform_18, window_bounds = array<i64: 2, 1, 64>}, {pipeline_mode = #tpu.pipeline_mode<synchronous>, transform_indices = @transform_19, window_bounds = array<i64: 2, 64, 32>}, {pipeline_mode = #tpu.pipeline_mode<synchronous>, transform_indices = @transform_20, window_bounds = array<i64: 2, 1, 32>}, {pipeline_mode = #tpu.pipeline_mode<synchronous>, transform_indices = @transform_21, window_bounds = array<i64: 2, 6, 32>}, {pipeline_mode = #tpu.pipeline_mode<synchronous>, transform_indices = @transform_22, window_bounds = array<i64: 2, 32>}, {pipeline_mode = #tpu.pipeline_mode<synchronous>, transform_indices = @transform_23, window_bounds = array<i64: 32, 128>}, {pipeline_mode = #tpu.pipeline_mode<synchronous>, transform_indices = @transform_24, window_bounds = array<i64: 1, 128>}, {pipeline_mode = #tpu.pipeline_mode<synchronous>, transform_indices = @transform_25, window_bounds = array<i64: 2, 8, 128>}]} {
    %c0 = arith.constant 0 : index
    %c0_0 = arith.constant 0 : index
    %0 = vector.load %arg1[%c0, %c0_0] : memref<20x1xi32, #tpu.memory_space<vmem>>, vector<20x1xi32>
    %c0_1 = arith.constant 0 : index
    %c0_2 = arith.constant 0 : index
    %1 = vector.load %arg3[%c0_1, %c0_2] : memref<128x32xf32, #tpu.memory_space<vmem>>, vector<128x32xf32>
    %c0_3 = arith.constant 0 : index
    %c0_4 = arith.constant 0 : index
    %2 = vector.load %arg5[%c0_3, %c0_4] : memref<42x32xf32, #tpu.memory_space<vmem>>, vector<10x32xf32>
    %3 = tpu.iota {dimensions = array<i32: 1>} : vector<20x128xi32>
    %4 = vector.broadcast %0 : vector<20x1xi32> to vector<20x128xi32>
    %5 = arith.cmpi eq, %3, %4 : vector<20x128xi32>
    %6 = arith.extui %5 : vector<20x128xi1> to vector<20x128xi32>
    %7 = arith.sitofp %6 : vector<20x128xi32> to vector<20x128xf32>
    %cst = arith.constant dense<0.000000e+00> : vector<20x32xf32>
    %8 = tpu.matmul %7, %1, %cst {dimension_numbers = #tpu.dot_dimension_numbers<[1], [0], [0], [1], [0, 0, 1, 1], [], []>} : vector<20x128xf32>, vector<128x32xf32>, vector<20x32xf32> -> vector<20x32xf32>
    %cst_5 = arith.constant 5.65685415 : f32
    %9 = vector.broadcast %cst_5 : f32 to vector<20x32xf32>
    %10 = arith.mulf %8, %9 : vector<20x32xf32>
    %11 = tpu.concatenate %2, %2 in 0 : vector<10x32xf32>, vector<10x32xf32> -> vector<20x32xf32>
    %12 = arith.addf %10, %11 : vector<20x32xf32>
    %c0_6 = arith.constant 0 : index
    %c0_7 = arith.constant 0 : index
    %c0_8 = arith.constant 0 : index
    %13 = vector.load %arg6[%c0_6, %c0_7, %c0_8] : memref<2x32x128xf32, #tpu.memory_space<vmem>>, vector<1x32x128xf32>
    %14 = vector.shape_cast %13 : vector<1x32x128xf32> to vector<32x128xf32>
    %c0_9 = arith.constant 0 : index
    %c0_10 = arith.constant 0 : index
    %c0_11 = arith.constant 0 : index
    %15 = vector.load %arg7[%c0_9, %c0_10, %c0_11] : memref<2x1x128xf32, #tpu.memory_space<vmem>>, vector<1x1x128xf32>
    %16 = vector.shape_cast %15 : vector<1x1x128xf32> to vector<1x128xf32>
    %c0_12 = arith.constant 0 : index
    %c0_13 = arith.constant 0 : index
    %c0_14 = arith.constant 0 : index
    %17 = vector.load %arg12[%c0_12, %c0_13, %c0_14] : memref<2x4x32xf32, #tpu.memory_space<vmem>>, vector<1x4x32xf32>
    %18 = vector.shape_cast %17 : vector<1x4x32xf32> to vector<4x32xf32>
    %19 = vector.extract_strided_slice %14 {offsets = [0, 0], sizes = [32, 96], strides = [1, 1]} : vector<32x128xf32> to vector<32x96xf32>
    %cst_15 = arith.constant dense<0.000000e+00> : vector<20x96xf32>
    %20 = tpu.matmul %12, %19, %cst_15 {dimension_numbers = #tpu.dot_dimension_numbers<[1], [0], [0], [1], [0, 0, 1, 1], [], []>} : vector<20x32xf32>, vector<32x96xf32>, vector<20x96xf32> -> vector<20x96xf32>
    %21 = vector.extract_strided_slice %16 {offsets = [0, 0], sizes = [1, 96], strides = [1, 1]} : vector<1x128xf32> to vector<1x96xf32>
    %22 = vector.broadcast %21 : vector<1x96xf32> to vector<20x96xf32>
    %23 = arith.addf %20, %22 : vector<20x96xf32>
    %24 = vector.extract_strided_slice %23 {offsets = [0, 0], sizes = [20, 32], strides = [1, 1]} : vector<20x96xf32> to vector<20x32xf32>
    %25 = vector.extract_strided_slice %23 {offsets = [0, 32], sizes = [20, 32], strides = [1, 1]} : vector<20x96xf32> to vector<20x32xf32>
    %26 = vector.extract_strided_slice %23 {offsets = [0, 64], sizes = [20, 32], strides = [1, 1]} : vector<20x96xf32> to vector<20x32xf32>
    %27 = vector.extract_strided_slice %24 {offsets = [0, 0], sizes = [10, 32], strides = [1, 1]} : vector<20x32xf32> to vector<10x32xf32>
    %28 = vector.extract_strided_slice %25 {offsets = [0, 0], sizes = [10, 32], strides = [1, 1]} : vector<20x32xf32> to vector<10x32xf32>
    %29 = vector.extract_strided_slice %26 {offsets = [0, 0], sizes = [10, 32], strides = [1, 1]} : vector<20x32xf32> to vector<10x32xf32>
    %30 = vector.extract_strided_slice %27 {offsets = [0, 0], sizes = [10, 8], strides = [1, 1]} : vector<10x32xf32> to vector<10x8xf32>
    %31 = vector.extract_strided_slice %28 {offsets = [0, 0], sizes = [10, 8], strides = [1, 1]} : vector<10x32xf32> to vector<10x8xf32>
    %32 = tpu.transpose %31, [1, 0] : vector<10x8xf32> -> vector<8x10xf32>
    %cst_16 = arith.constant dense<0.000000e+00> : vector<10x10xf32>
    %33 = tpu.matmul %30, %32, %cst_16 {dimension_numbers = #tpu.dot_dimension_numbers<[1], [0], [0], [1], [0, 0, 1, 1], [], []>} : vector<10x8xf32>, vector<8x10xf32>, vector<10x10xf32> -> vector<10x10xf32>
    %cst_17 = arith.constant 0.353553385 : f32
    %34 = vector.broadcast %cst_17 : f32 to vector<10x10xf32>
    %35 = arith.mulf %33, %34 : vector<10x10xf32>
    %cst_18 = arith.constant dense<0xFF800000> : vector<10xf32>
    %36 = vector.multi_reduction <maximumf>, %35, %cst_18 [1] : vector<10x10xf32> to vector<10xf32>
    %37 = vector.shape_cast %36 : vector<10xf32> to vector<10x1xf32>
    %38 = vector.broadcast %37 : vector<10x1xf32> to vector<10x10xf32>
    %39 = arith.subf %35, %38 : vector<10x10xf32>
    %40 = math.exp %39 : vector<10x10xf32>
    %cst_19 = arith.constant dense<0.000000e+00> : vector<10xf32>
    %41 = vector.multi_reduction <add>, %40, %cst_19 [1] : vector<10x10xf32> to vector<10xf32>
    %42 = vector.shape_cast %41 : vector<10xf32> to vector<10x1xf32>
    %43 = tpu.reciprocal %42 {approx = true} : vector<10x1xf32> -> vector<10x1xf32>
    %44 = vector.broadcast %43 : vector<10x1xf32> to vector<10x10xf32>
    %45 = arith.mulf %40, %44 : vector<10x10xf32>
    %46 = vector.extract_strided_slice %29 {offsets = [0, 0], sizes = [10, 8], strides = [1, 1]} : vector<10x32xf32> to vector<10x8xf32>
    %cst_20 = arith.constant dense<0.000000e+00> : vector<10x8xf32>
    %47 = tpu.matmul %45, %46, %cst_20 {dimension_numbers = #tpu.dot_dimension_numbers<[1], [0], [0], [1], [0, 0, 1, 1], [], []>} : vector<10x10xf32>, vector<10x8xf32>, vector<10x8xf32> -> vector<10x8xf32>
    %48 = vector.extract_strided_slice %27 {offsets = [0, 8], sizes = [10, 8], strides = [1, 1]} : vector<10x32xf32> to vector<10x8xf32>
    %49 = vector.extract_strided_slice %28 {offsets = [0, 8], sizes = [10, 8], strides = [1, 1]} : vector<10x32xf32> to vector<10x8xf32>
    %50 = tpu.transpose %49, [1, 0] : vector<10x8xf32> -> vector<8x10xf32>
    %cst_21 = arith.constant dense<0.000000e+00> : vector<10x10xf32>
    %51 = tpu.matmul %48, %50, %cst_21 {dimension_numbers = #tpu.dot_dimension_numbers<[1], [0], [0], [1], [0, 0, 1, 1], [], []>} : vector<10x8xf32>, vector<8x10xf32>, vector<10x10xf32> -> vector<10x10xf32>
    %cst_22 = arith.constant 0.353553385 : f32
    %52 = vector.broadcast %cst_22 : f32 to vector<10x10xf32>
    %53 = arith.mulf %51, %52 : vector<10x10xf32>
    %cst_23 = arith.constant dense<0xFF800000> : vector<10xf32>
    %54 = vector.multi_reduction <maximumf>, %53, %cst_23 [1] : vector<10x10xf32> to vector<10xf32>
    %55 = vector.shape_cast %54 : vector<10xf32> to vector<10x1xf32>
    %56 = vector.broadcast %55 : vector<10x1xf32> to vector<10x10xf32>
    %57 = arith.subf %53, %56 : vector<10x10xf32>
    %58 = math.exp %57 : vector<10x10xf32>
    %cst_24 = arith.constant dense<0.000000e+00> : vector<10xf32>
    %59 = vector.multi_reduction <add>, %58, %cst_24 [1] : vector<10x10xf32> to vector<10xf32>
    %60 = vector.shape_cast %59 : vector<10xf32> to vector<10x1xf32>
    %61 = tpu.reciprocal %60 {approx = true} : vector<10x1xf32> -> vector<10x1xf32>
    %62 = vector.broadcast %61 : vector<10x1xf32> to vector<10x10xf32>
    %63 = arith.mulf %58, %62 : vector<10x10xf32>
    %64 = vector.extract_strided_slice %29 {offsets = [0, 8], sizes = [10, 8], strides = [1, 1]} : vector<10x32xf32> to vector<10x8xf32>
    %cst_25 = arith.constant dense<0.000000e+00> : vector<10x8xf32>
    %65 = tpu.matmul %63, %64, %cst_25 {dimension_numbers = #tpu.dot_dimension_numbers<[1], [0], [0], [1], [0, 0, 1, 1], [], []>} : vector<10x10xf32>, vector<10x8xf32>, vector<10x8xf32> -> vector<10x8xf32>
    %66 = vector.extract_strided_slice %27 {offsets = [0, 16], sizes = [10, 8], strides = [1, 1]} : vector<10x32xf32> to vector<10x8xf32>
    %67 = vector.extract_strided_slice %28 {offsets = [0, 16], sizes = [10, 8], strides = [1, 1]} : vector<10x32xf32> to vector<10x8xf32>
    %68 = tpu.transpose %67, [1, 0] : vector<10x8xf32> -> vector<8x10xf32>
    %cst_26 = arith.constant dense<0.000000e+00> : vector<10x10xf32>
    %69 = tpu.matmul %66, %68, %cst_26 {dimension_numbers = #tpu.dot_dimension_numbers<[1], [0], [0], [1], [0, 0, 1, 1], [], []>} : vector<10x8xf32>, vector<8x10xf32>, vector<10x10xf32> -> vector<10x10xf32>
    %cst_27 = arith.constant 0.353553385 : f32
    %70 = vector.broadcast %cst_27 : f32 to vector<10x10xf32>
    %71 = arith.mulf %69, %70 : vector<10x10xf32>
    %cst_28 = arith.constant dense<0xFF800000> : vector<10xf32>
    %72 = vector.multi_reduction <maximumf>, %71, %cst_28 [1] : vector<10x10xf32> to vector<10xf32>
    %73 = vector.shape_cast %72 : vector<10xf32> to vector<10x1xf32>
    %74 = vector.broadcast %73 : vector<10x1xf32> to vector<10x10xf32>
    %75 = arith.subf %71, %74 : vector<10x10xf32>
    %76 = math.exp %75 : vector<10x10xf32>
    %cst_29 = arith.constant dense<0.000000e+00> : vector<10xf32>
    %77 = vector.multi_reduction <add>, %76, %cst_29 [1] : vector<10x10xf32> to vector<10xf32>
    %78 = vector.shape_cast %77 : vector<10xf32> to vector<10x1xf32>
    %79 = tpu.reciprocal %78 {approx = true} : vector<10x1xf32> -> vector<10x1xf32>
    %80 = vector.broadcast %79 : vector<10x1xf32> to vector<10x10xf32>
    %81 = arith.mulf %76, %80 : vector<10x10xf32>
    %82 = vector.extract_strided_slice %29 {offsets = [0, 16], sizes = [10, 8], strides = [1, 1]} : vector<10x32xf32> to vector<10x8xf32>
    %cst_30 = arith.constant dense<0.000000e+00> : vector<10x8xf32>
    %83 = tpu.matmul %81, %82, %cst_30 {dimension_numbers = #tpu.dot_dimension_numbers<[1], [0], [0], [1], [0, 0, 1, 1], [], []>} : vector<10x10xf32>, vector<10x8xf32>, vector<10x8xf32> -> vector<10x8xf32>
    %84 = vector.extract_strided_slice %27 {offsets = [0, 24], sizes = [10, 8], strides = [1, 1]} : vector<10x32xf32> to vector<10x8xf32>
    %85 = vector.extract_strided_slice %28 {offsets = [0, 24], sizes = [10, 8], strides = [1, 1]} : vector<10x32xf32> to vector<10x8xf32>
    %86 = tpu.transpose %85, [1, 0] : vector<10x8xf32> -> vector<8x10xf32>
    %cst_31 = arith.constant dense<0.000000e+00> : vector<10x10xf32>
    %87 = tpu.matmul %84, %86, %cst_31 {dimension_numbers = #tpu.dot_dimension_numbers<[1], [0], [0], [1], [0, 0, 1, 1], [], []>} : vector<10x8xf32>, vector<8x10xf32>, vector<10x10xf32> -> vector<10x10xf32>
    %cst_32 = arith.constant 0.353553385 : f32
    %88 = vector.broadcast %cst_32 : f32 to vector<10x10xf32>
    %89 = arith.mulf %87, %88 : vector<10x10xf32>
    %cst_33 = arith.constant dense<0xFF800000> : vector<10xf32>
    %90 = vector.multi_reduction <maximumf>, %89, %cst_33 [1] : vector<10x10xf32> to vector<10xf32>
    %91 = vector.shape_cast %90 : vector<10xf32> to vector<10x1xf32>
    %92 = vector.broadcast %91 : vector<10x1xf32> to vector<10x10xf32>
    %93 = arith.subf %89, %92 : vector<10x10xf32>
    %94 = math.exp %93 : vector<10x10xf32>
    %cst_34 = arith.constant dense<0.000000e+00> : vector<10xf32>
    %95 = vector.multi_reduction <add>, %94, %cst_34 [1] : vector<10x10xf32> to vector<10xf32>
    %96 = vector.shape_cast %95 : vector<10xf32> to vector<10x1xf32>
    %97 = tpu.reciprocal %96 {approx = true} : vector<10x1xf32> -> vector<10x1xf32>
    %98 = vector.broadcast %97 : vector<10x1xf32> to vector<10x10xf32>
    %99 = arith.mulf %94, %98 : vector<10x10xf32>
    %100 = vector.extract_strided_slice %29 {offsets = [0, 24], sizes = [10, 8], strides = [1, 1]} : vector<10x32xf32> to vector<10x8xf32>
    %cst_35 = arith.constant dense<0.000000e+00> : vector<10x8xf32>
    %101 = tpu.matmul %99, %100, %cst_35 {dimension_numbers = #tpu.dot_dimension_numbers<[1], [0], [0], [1], [0, 0, 1, 1], [], []>} : vector<10x10xf32>, vector<10x8xf32>, vector<10x8xf32> -> vector<10x8xf32>
    %102 = tpu.concatenate %47, %65, %83, %101 in 1 : vector<10x8xf32>, vector<10x8xf32>, vector<10x8xf32>, vector<10x8xf32> -> vector<10x32xf32>
    %103 = vector.extract_strided_slice %24 {offsets = [10, 0], sizes = [10, 32], strides = [1, 1]} : vector<20x32xf32> to vector<10x32xf32>
    %104 = vector.extract_strided_slice %25 {offsets = [10, 0], sizes = [10, 32], strides = [1, 1]} : vector<20x32xf32> to vector<10x32xf32>
    %105 = vector.extract_strided_slice %26 {offsets = [10, 0], sizes = [10, 32], strides = [1, 1]} : vector<20x32xf32> to vector<10x32xf32>
    %106 = vector.extract_strided_slice %103 {offsets = [0, 0], sizes = [10, 8], strides = [1, 1]} : vector<10x32xf32> to vector<10x8xf32>
    %107 = vector.extract_strided_slice %104 {offsets = [0, 0], sizes = [10, 8], strides = [1, 1]} : vector<10x32xf32> to vector<10x8xf32>
    %108 = tpu.transpose %107, [1, 0] : vector<10x8xf32> -> vector<8x10xf32>
    %cst_36 = arith.constant dense<0.000000e+00> : vector<10x10xf32>
    %109 = tpu.matmul %106, %108, %cst_36 {dimension_numbers = #tpu.dot_dimension_numbers<[1], [0], [0], [1], [0, 0, 1, 1], [], []>} : vector<10x8xf32>, vector<8x10xf32>, vector<10x10xf32> -> vector<10x10xf32>
    %cst_37 = arith.constant 0.353553385 : f32
    %110 = vector.broadcast %cst_37 : f32 to vector<10x10xf32>
    %111 = arith.mulf %109, %110 : vector<10x10xf32>
    %cst_38 = arith.constant dense<0xFF800000> : vector<10xf32>
    %112 = vector.multi_reduction <maximumf>, %111, %cst_38 [1] : vector<10x10xf32> to vector<10xf32>
    %113 = vector.shape_cast %112 : vector<10xf32> to vector<10x1xf32>
    %114 = vector.broadcast %113 : vector<10x1xf32> to vector<10x10xf32>
    %115 = arith.subf %111, %114 : vector<10x10xf32>
    %116 = math.exp %115 : vector<10x10xf32>
    %cst_39 = arith.constant dense<0.000000e+00> : vector<10xf32>
    %117 = vector.multi_reduction <add>, %116, %cst_39 [1] : vector<10x10xf32> to vector<10xf32>
    %118 = vector.shape_cast %117 : vector<10xf32> to vector<10x1xf32>
    %119 = tpu.reciprocal %118 {approx = true} : vector<10x1xf32> -> vector<10x1xf32>
    %120 = vector.broadcast %119 : vector<10x1xf32> to vector<10x10xf32>
    %121 = arith.mulf %116, %120 : vector<10x10xf32>
    %122 = vector.extract_strided_slice %105 {offsets = [0, 0], sizes = [10, 8], strides = [1, 1]} : vector<10x32xf32> to vector<10x8xf32>
    %cst_40 = arith.constant dense<0.000000e+00> : vector<10x8xf32>
    %123 = tpu.matmul %121, %122, %cst_40 {dimension_numbers = #tpu.dot_dimension_numbers<[1], [0], [0], [1], [0, 0, 1, 1], [], []>} : vector<10x10xf32>, vector<10x8xf32>, vector<10x8xf32> -> vector<10x8xf32>
    %124 = vector.extract_strided_slice %103 {offsets = [0, 8], sizes = [10, 8], strides = [1, 1]} : vector<10x32xf32> to vector<10x8xf32>
    %125 = vector.extract_strided_slice %104 {offsets = [0, 8], sizes = [10, 8], strides = [1, 1]} : vector<10x32xf32> to vector<10x8xf32>
    %126 = tpu.transpose %125, [1, 0] : vector<10x8xf32> -> vector<8x10xf32>
    %cst_41 = arith.constant dense<0.000000e+00> : vector<10x10xf32>
    %127 = tpu.matmul %124, %126, %cst_41 {dimension_numbers = #tpu.dot_dimension_numbers<[1], [0], [0], [1], [0, 0, 1, 1], [], []>} : vector<10x8xf32>, vector<8x10xf32>, vector<10x10xf32> -> vector<10x10xf32>
    %cst_42 = arith.constant 0.353553385 : f32
    %128 = vector.broadcast %cst_42 : f32 to vector<10x10xf32>
    %129 = arith.mulf %127, %128 : vector<10x10xf32>
    %cst_43 = arith.constant dense<0xFF800000> : vector<10xf32>
    %130 = vector.multi_reduction <maximumf>, %129, %cst_43 [1] : vector<10x10xf32> to vector<10xf32>
    %131 = vector.shape_cast %130 : vector<10xf32> to vector<10x1xf32>
    %132 = vector.broadcast %131 : vector<10x1xf32> to vector<10x10xf32>
    %133 = arith.subf %129, %132 : vector<10x10xf32>
    %134 = math.exp %133 : vector<10x10xf32>
    %cst_44 = arith.constant dense<0.000000e+00> : vector<10xf32>
    %135 = vector.multi_reduction <add>, %134, %cst_44 [1] : vector<10x10xf32> to vector<10xf32>
    %136 = vector.shape_cast %135 : vector<10xf32> to vector<10x1xf32>
    %137 = tpu.reciprocal %136 {approx = true} : vector<10x1xf32> -> vector<10x1xf32>
    %138 = vector.broadcast %137 : vector<10x1xf32> to vector<10x10xf32>
    %139 = arith.mulf %134, %138 : vector<10x10xf32>
    %140 = vector.extract_strided_slice %105 {offsets = [0, 8], sizes = [10, 8], strides = [1, 1]} : vector<10x32xf32> to vector<10x8xf32>
    %cst_45 = arith.constant dense<0.000000e+00> : vector<10x8xf32>
    %141 = tpu.matmul %139, %140, %cst_45 {dimension_numbers = #tpu.dot_dimension_numbers<[1], [0], [0], [1], [0, 0, 1, 1], [], []>} : vector<10x10xf32>, vector<10x8xf32>, vector<10x8xf32> -> vector<10x8xf32>
    %142 = vector.extract_strided_slice %103 {offsets = [0, 16], sizes = [10, 8], strides = [1, 1]} : vector<10x32xf32> to vector<10x8xf32>
    %143 = vector.extract_strided_slice %104 {offsets = [0, 16], sizes = [10, 8], strides = [1, 1]} : vector<10x32xf32> to vector<10x8xf32>
    %144 = tpu.transpose %143, [1, 0] : vector<10x8xf32> -> vector<8x10xf32>
    %cst_46 = arith.constant dense<0.000000e+00> : vector<10x10xf32>
    %145 = tpu.matmul %142, %144, %cst_46 {dimension_numbers = #tpu.dot_dimension_numbers<[1], [0], [0], [1], [0, 0, 1, 1], [], []>} : vector<10x8xf32>, vector<8x10xf32>, vector<10x10xf32> -> vector<10x10xf32>
    %cst_47 = arith.constant 0.353553385 : f32
    %146 = vector.broadcast %cst_47 : f32 to vector<10x10xf32>
    %147 = arith.mulf %145, %146 : vector<10x10xf32>
    %cst_48 = arith.constant dense<0xFF800000> : vector<10xf32>
    %148 = vector.multi_reduction <maximumf>, %147, %cst_48 [1] : vector<10x10xf32> to vector<10xf32>
    %149 = vector.shape_cast %148 : vector<10xf32> to vector<10x1xf32>
    %150 = vector.broadcast %149 : vector<10x1xf32> to vector<10x10xf32>
    %151 = arith.subf %147, %150 : vector<10x10xf32>
    %152 = math.exp %151 : vector<10x10xf32>
    %cst_49 = arith.constant dense<0.000000e+00> : vector<10xf32>
    %153 = vector.multi_reduction <add>, %152, %cst_49 [1] : vector<10x10xf32> to vector<10xf32>
    %154 = vector.shape_cast %153 : vector<10xf32> to vector<10x1xf32>
    %155 = tpu.reciprocal %154 {approx = true} : vector<10x1xf32> -> vector<10x1xf32>
    %156 = vector.broadcast %155 : vector<10x1xf32> to vector<10x10xf32>
    %157 = arith.mulf %152, %156 : vector<10x10xf32>
    %158 = vector.extract_strided_slice %105 {offsets = [0, 16], sizes = [10, 8], strides = [1, 1]} : vector<10x32xf32> to vector<10x8xf32>
    %cst_50 = arith.constant dense<0.000000e+00> : vector<10x8xf32>
    %159 = tpu.matmul %157, %158, %cst_50 {dimension_numbers = #tpu.dot_dimension_numbers<[1], [0], [0], [1], [0, 0, 1, 1], [], []>} : vector<10x10xf32>, vector<10x8xf32>, vector<10x8xf32> -> vector<10x8xf32>
    %160 = vector.extract_strided_slice %103 {offsets = [0, 24], sizes = [10, 8], strides = [1, 1]} : vector<10x32xf32> to vector<10x8xf32>
    %161 = vector.extract_strided_slice %104 {offsets = [0, 24], sizes = [10, 8], strides = [1, 1]} : vector<10x32xf32> to vector<10x8xf32>
    %162 = tpu.transpose %161, [1, 0] : vector<10x8xf32> -> vector<8x10xf32>
    %cst_51 = arith.constant dense<0.000000e+00> : vector<10x10xf32>
    %163 = tpu.matmul %160, %162, %cst_51 {dimension_numbers = #tpu.dot_dimension_numbers<[1], [0], [0], [1], [0, 0, 1, 1], [], []>} : vector<10x8xf32>, vector<8x10xf32>, vector<10x10xf32> -> vector<10x10xf32>
    %cst_52 = arith.constant 0.353553385 : f32
    %164 = vector.broadcast %cst_52 : f32 to vector<10x10xf32>
    %165 = arith.mulf %163, %164 : vector<10x10xf32>
    %cst_53 = arith.constant dense<0xFF800000> : vector<10xf32>
    %166 = vector.multi_reduction <maximumf>, %165, %cst_53 [1] : vector<10x10xf32> to vector<10xf32>
    %167 = vector.shape_cast %166 : vector<10xf32> to vector<10x1xf32>
    %168 = vector.broadcast %167 : vector<10x1xf32> to vector<10x10xf32>
    %169 = arith.subf %165, %168 : vector<10x10xf32>
    %170 = math.exp %169 : vector<10x10xf32>
    %cst_54 = arith.constant dense<0.000000e+00> : vector<10xf32>
    %171 = vector.multi_reduction <add>, %170, %cst_54 [1] : vector<10x10xf32> to vector<10xf32>
    %172 = vector.shape_cast %171 : vector<10xf32> to vector<10x1xf32>
    %173 = tpu.reciprocal %172 {approx = true} : vector<10x1xf32> -> vector<10x1xf32>
    %174 = vector.broadcast %173 : vector<10x1xf32> to vector<10x10xf32>
    %175 = arith.mulf %170, %174 : vector<10x10xf32>
    %176 = vector.extract_strided_slice %105 {offsets = [0, 24], sizes = [10, 8], strides = [1, 1]} : vector<10x32xf32> to vector<10x8xf32>
    %cst_55 = arith.constant dense<0.000000e+00> : vector<10x8xf32>
    %177 = tpu.matmul %175, %176, %cst_55 {dimension_numbers = #tpu.dot_dimension_numbers<[1], [0], [0], [1], [0, 0, 1, 1], [], []>} : vector<10x10xf32>, vector<10x8xf32>, vector<10x8xf32> -> vector<10x8xf32>
    %178 = tpu.concatenate %123, %141, %159, %177 in 1 : vector<10x8xf32>, vector<10x8xf32>, vector<10x8xf32>, vector<10x8xf32> -> vector<10x32xf32>
    %179 = tpu.concatenate %102, %178 in 0 : vector<10x32xf32>, vector<10x32xf32> -> vector<20x32xf32>
    %180 = vector.extract_strided_slice %14 {offsets = [0, 96], sizes = [32, 32], strides = [1, 1]} : vector<32x128xf32> to vector<32x32xf32>
    %cst_56 = arith.constant dense<0.000000e+00> : vector<20x32xf32>
    %181 = tpu.matmul %179, %180, %cst_56 {dimension_numbers = #tpu.dot_dimension_numbers<[1], [0], [0], [1], [0, 0, 1, 1], [], []>} : vector<20x32xf32>, vector<32x32xf32>, vector<20x32xf32> -> vector<20x32xf32>
    %182 = vector.extract_strided_slice %16 {offsets = [0, 96], sizes = [1, 32], strides = [1, 1]} : vector<1x128xf32> to vector<1x32xf32>
    %183 = vector.broadcast %182 : vector<1x32xf32> to vector<20x32xf32>
    %184 = arith.addf %181, %183 : vector<20x32xf32>
    %185 = arith.addf %12, %184 : vector<20x32xf32>
    %186 = vector.extract_strided_slice %18 {offsets = [0, 0], sizes = [1, 32], strides = [1, 1]} : vector<4x32xf32> to vector<1x32xf32>
    %187 = vector.extract_strided_slice %18 {offsets = [1, 0], sizes = [1, 32], strides = [1, 1]} : vector<4x32xf32> to vector<1x32xf32>
    %cst_57 = arith.constant dense<0.000000e+00> : vector<20xf32>
    %188 = vector.multi_reduction <add>, %185, %cst_57 [1] : vector<20x32xf32> to vector<20xf32>
    %189 = vector.shape_cast %188 : vector<20xf32> to vector<20x1xf32>
    %cst_58 = arith.constant 3.200000e+01 : f32
    %190 = vector.broadcast %cst_58 : f32 to vector<20x1xf32>
    %191 = arith.divf %189, %190 : vector<20x1xf32>
    %192 = vector.broadcast %191 : vector<20x1xf32> to vector<20x32xf32>
    %193 = arith.subf %185, %192 : vector<20x32xf32>
    %194 = arith.mulf %193, %193 : vector<20x32xf32>
    %cst_59 = arith.constant dense<0.000000e+00> : vector<20xf32>
    %195 = vector.multi_reduction <add>, %194, %cst_59 [1] : vector<20x32xf32> to vector<20xf32>
    %196 = vector.shape_cast %195 : vector<20xf32> to vector<20x1xf32>
    %cst_60 = arith.constant 3.200000e+01 : f32
    %197 = vector.broadcast %cst_60 : f32 to vector<20x1xf32>
    %198 = arith.divf %196, %197 : vector<20x1xf32>
    %cst_61 = arith.constant 9.99999974E-6 : f32
    %199 = vector.broadcast %cst_61 : f32 to vector<20x1xf32>
    %200 = arith.addf %198, %199 : vector<20x1xf32>
    %201 = math.rsqrt %200 : vector<20x1xf32>
    %202 = vector.broadcast %201 : vector<20x1xf32> to vector<20x32xf32>
    %203 = arith.mulf %193, %202 : vector<20x32xf32>
    %204 = vector.broadcast %186 : vector<1x32xf32> to vector<20x32xf32>
    %205 = arith.mulf %203, %204 : vector<20x32xf32>
    %206 = vector.broadcast %187 : vector<1x32xf32> to vector<20x32xf32>
    %207 = arith.addf %205, %206 : vector<20x32xf32>
    %c0_62 = arith.constant 0 : index
    %c0_63 = arith.constant 0 : index
    %c0_64 = arith.constant 0 : index
    %208 = vector.load %arg8[%c0_62, %c0_63, %c0_64] : memref<2x32x64xf32, #tpu.memory_space<vmem>>, vector<1x32x64xf32>
    %209 = vector.shape_cast %208 : vector<1x32x64xf32> to vector<32x64xf32>
    %c0_65 = arith.constant 0 : index
    %c0_66 = arith.constant 0 : index
    %c0_67 = arith.constant 0 : index
    %210 = vector.load %arg9[%c0_65, %c0_66, %c0_67] : memref<2x1x64xf32, #tpu.memory_space<vmem>>, vector<1x1x64xf32>
    %211 = vector.shape_cast %210 : vector<1x1x64xf32> to vector<1x64xf32>
    %c0_68 = arith.constant 0 : index
    %c0_69 = arith.constant 0 : index
    %c0_70 = arith.constant 0 : index
    %212 = vector.load %arg10[%c0_68, %c0_69, %c0_70] : memref<2x64x32xf32, #tpu.memory_space<vmem>>, vector<1x64x32xf32>
    %213 = vector.shape_cast %212 : vector<1x64x32xf32> to vector<64x32xf32>
    %c0_71 = arith.constant 0 : index
    %c0_72 = arith.constant 0 : index
    %c0_73 = arith.constant 0 : index
    %214 = vector.load %arg11[%c0_71, %c0_72, %c0_73] : memref<2x1x32xf32, #tpu.memory_space<vmem>>, vector<1x1x32xf32>
    %215 = vector.shape_cast %214 : vector<1x1x32xf32> to vector<1x32xf32>
    %cst_74 = arith.constant dense<0.000000e+00> : vector<20x64xf32>
    %216 = tpu.matmul %207, %209, %cst_74 {dimension_numbers = #tpu.dot_dimension_numbers<[1], [0], [0], [1], [0, 0, 1, 1], [], []>} : vector<20x32xf32>, vector<32x64xf32>, vector<20x64xf32> -> vector<20x64xf32>
    %217 = vector.broadcast %211 : vector<1x64xf32> to vector<20x64xf32>
    %218 = arith.addf %216, %217 : vector<20x64xf32>
    %cst_75 = arith.constant 0.000000e+00 : f32
    %219 = vector.broadcast %cst_75 : f32 to vector<20x64xf32>
    %220 = arith.maximumf %218, %219 : vector<20x64xf32>
    %cst_76 = arith.constant dense<0.000000e+00> : vector<20x32xf32>
    %221 = tpu.matmul %220, %213, %cst_76 {dimension_numbers = #tpu.dot_dimension_numbers<[1], [0], [0], [1], [0, 0, 1, 1], [], []>} : vector<20x64xf32>, vector<64x32xf32>, vector<20x32xf32> -> vector<20x32xf32>
    %222 = vector.broadcast %215 : vector<1x32xf32> to vector<20x32xf32>
    %223 = arith.addf %221, %222 : vector<20x32xf32>
    %224 = arith.addf %207, %223 : vector<20x32xf32>
    %225 = vector.extract_strided_slice %18 {offsets = [2, 0], sizes = [1, 32], strides = [1, 1]} : vector<4x32xf32> to vector<1x32xf32>
    %226 = vector.extract_strided_slice %18 {offsets = [3, 0], sizes = [1, 32], strides = [1, 1]} : vector<4x32xf32> to vector<1x32xf32>
    %cst_77 = arith.constant dense<0.000000e+00> : vector<20xf32>
    %227 = vector.multi_reduction <add>, %224, %cst_77 [1] : vector<20x32xf32> to vector<20xf32>
    %228 = vector.shape_cast %227 : vector<20xf32> to vector<20x1xf32>
    %cst_78 = arith.constant 3.200000e+01 : f32
    %229 = vector.broadcast %cst_78 : f32 to vector<20x1xf32>
    %230 = arith.divf %228, %229 : vector<20x1xf32>
    %231 = vector.broadcast %230 : vector<20x1xf32> to vector<20x32xf32>
    %232 = arith.subf %224, %231 : vector<20x32xf32>
    %233 = arith.mulf %232, %232 : vector<20x32xf32>
    %cst_79 = arith.constant dense<0.000000e+00> : vector<20xf32>
    %234 = vector.multi_reduction <add>, %233, %cst_79 [1] : vector<20x32xf32> to vector<20xf32>
    %235 = vector.shape_cast %234 : vector<20xf32> to vector<20x1xf32>
    %cst_80 = arith.constant 3.200000e+01 : f32
    %236 = vector.broadcast %cst_80 : f32 to vector<20x1xf32>
    %237 = arith.divf %235, %236 : vector<20x1xf32>
    %cst_81 = arith.constant 9.99999974E-6 : f32
    %238 = vector.broadcast %cst_81 : f32 to vector<20x1xf32>
    %239 = arith.addf %237, %238 : vector<20x1xf32>
    %240 = math.rsqrt %239 : vector<20x1xf32>
    %241 = vector.broadcast %240 : vector<20x1xf32> to vector<20x32xf32>
    %242 = arith.mulf %232, %241 : vector<20x32xf32>
    %243 = vector.broadcast %225 : vector<1x32xf32> to vector<20x32xf32>
    %244 = arith.mulf %242, %243 : vector<20x32xf32>
    %245 = vector.broadcast %226 : vector<1x32xf32> to vector<20x32xf32>
    %246 = arith.addf %244, %245 : vector<20x32xf32>
    %c1 = arith.constant 1 : index
    %c0_82 = arith.constant 0 : index
    %c0_83 = arith.constant 0 : index
    %247 = vector.load %arg6[%c1, %c0_82, %c0_83] : memref<2x32x128xf32, #tpu.memory_space<vmem>>, vector<1x32x128xf32>
    %248 = vector.shape_cast %247 : vector<1x32x128xf32> to vector<32x128xf32>
    %c1_84 = arith.constant 1 : index
    %c0_85 = arith.constant 0 : index
    %c0_86 = arith.constant 0 : index
    %249 = vector.load %arg7[%c1_84, %c0_85, %c0_86] : memref<2x1x128xf32, #tpu.memory_space<vmem>>, vector<1x1x128xf32>
    %250 = vector.shape_cast %249 : vector<1x1x128xf32> to vector<1x128xf32>
    %c1_87 = arith.constant 1 : index
    %c0_88 = arith.constant 0 : index
    %c0_89 = arith.constant 0 : index
    %251 = vector.load %arg12[%c1_87, %c0_88, %c0_89] : memref<2x4x32xf32, #tpu.memory_space<vmem>>, vector<1x4x32xf32>
    %252 = vector.shape_cast %251 : vector<1x4x32xf32> to vector<4x32xf32>
    %253 = vector.extract_strided_slice %248 {offsets = [0, 0], sizes = [32, 96], strides = [1, 1]} : vector<32x128xf32> to vector<32x96xf32>
    %cst_90 = arith.constant dense<0.000000e+00> : vector<20x96xf32>
    %254 = tpu.matmul %246, %253, %cst_90 {dimension_numbers = #tpu.dot_dimension_numbers<[1], [0], [0], [1], [0, 0, 1, 1], [], []>} : vector<20x32xf32>, vector<32x96xf32>, vector<20x96xf32> -> vector<20x96xf32>
    %255 = vector.extract_strided_slice %250 {offsets = [0, 0], sizes = [1, 96], strides = [1, 1]} : vector<1x128xf32> to vector<1x96xf32>
    %256 = vector.broadcast %255 : vector<1x96xf32> to vector<20x96xf32>
    %257 = arith.addf %254, %256 : vector<20x96xf32>
    %258 = vector.extract_strided_slice %257 {offsets = [0, 0], sizes = [20, 32], strides = [1, 1]} : vector<20x96xf32> to vector<20x32xf32>
    %259 = vector.extract_strided_slice %257 {offsets = [0, 32], sizes = [20, 32], strides = [1, 1]} : vector<20x96xf32> to vector<20x32xf32>
    %260 = vector.extract_strided_slice %257 {offsets = [0, 64], sizes = [20, 32], strides = [1, 1]} : vector<20x96xf32> to vector<20x32xf32>
    %261 = vector.extract_strided_slice %258 {offsets = [0, 0], sizes = [10, 32], strides = [1, 1]} : vector<20x32xf32> to vector<10x32xf32>
    %262 = vector.extract_strided_slice %259 {offsets = [0, 0], sizes = [10, 32], strides = [1, 1]} : vector<20x32xf32> to vector<10x32xf32>
    %263 = vector.extract_strided_slice %260 {offsets = [0, 0], sizes = [10, 32], strides = [1, 1]} : vector<20x32xf32> to vector<10x32xf32>
    %264 = vector.extract_strided_slice %261 {offsets = [0, 0], sizes = [10, 8], strides = [1, 1]} : vector<10x32xf32> to vector<10x8xf32>
    %265 = vector.extract_strided_slice %262 {offsets = [0, 0], sizes = [10, 8], strides = [1, 1]} : vector<10x32xf32> to vector<10x8xf32>
    %266 = tpu.transpose %265, [1, 0] : vector<10x8xf32> -> vector<8x10xf32>
    %cst_91 = arith.constant dense<0.000000e+00> : vector<10x10xf32>
    %267 = tpu.matmul %264, %266, %cst_91 {dimension_numbers = #tpu.dot_dimension_numbers<[1], [0], [0], [1], [0, 0, 1, 1], [], []>} : vector<10x8xf32>, vector<8x10xf32>, vector<10x10xf32> -> vector<10x10xf32>
    %cst_92 = arith.constant 0.353553385 : f32
    %268 = vector.broadcast %cst_92 : f32 to vector<10x10xf32>
    %269 = arith.mulf %267, %268 : vector<10x10xf32>
    %cst_93 = arith.constant dense<0xFF800000> : vector<10xf32>
    %270 = vector.multi_reduction <maximumf>, %269, %cst_93 [1] : vector<10x10xf32> to vector<10xf32>
    %271 = vector.shape_cast %270 : vector<10xf32> to vector<10x1xf32>
    %272 = vector.broadcast %271 : vector<10x1xf32> to vector<10x10xf32>
    %273 = arith.subf %269, %272 : vector<10x10xf32>
    %274 = math.exp %273 : vector<10x10xf32>
    %cst_94 = arith.constant dense<0.000000e+00> : vector<10xf32>
    %275 = vector.multi_reduction <add>, %274, %cst_94 [1] : vector<10x10xf32> to vector<10xf32>
    %276 = vector.shape_cast %275 : vector<10xf32> to vector<10x1xf32>
    %277 = tpu.reciprocal %276 {approx = true} : vector<10x1xf32> -> vector<10x1xf32>
    %278 = vector.broadcast %277 : vector<10x1xf32> to vector<10x10xf32>
    %279 = arith.mulf %274, %278 : vector<10x10xf32>
    %280 = vector.extract_strided_slice %263 {offsets = [0, 0], sizes = [10, 8], strides = [1, 1]} : vector<10x32xf32> to vector<10x8xf32>
    %cst_95 = arith.constant dense<0.000000e+00> : vector<10x8xf32>
    %281 = tpu.matmul %279, %280, %cst_95 {dimension_numbers = #tpu.dot_dimension_numbers<[1], [0], [0], [1], [0, 0, 1, 1], [], []>} : vector<10x10xf32>, vector<10x8xf32>, vector<10x8xf32> -> vector<10x8xf32>
    %282 = vector.extract_strided_slice %261 {offsets = [0, 8], sizes = [10, 8], strides = [1, 1]} : vector<10x32xf32> to vector<10x8xf32>
    %283 = vector.extract_strided_slice %262 {offsets = [0, 8], sizes = [10, 8], strides = [1, 1]} : vector<10x32xf32> to vector<10x8xf32>
    %284 = tpu.transpose %283, [1, 0] : vector<10x8xf32> -> vector<8x10xf32>
    %cst_96 = arith.constant dense<0.000000e+00> : vector<10x10xf32>
    %285 = tpu.matmul %282, %284, %cst_96 {dimension_numbers = #tpu.dot_dimension_numbers<[1], [0], [0], [1], [0, 0, 1, 1], [], []>} : vector<10x8xf32>, vector<8x10xf32>, vector<10x10xf32> -> vector<10x10xf32>
    %cst_97 = arith.constant 0.353553385 : f32
    %286 = vector.broadcast %cst_97 : f32 to vector<10x10xf32>
    %287 = arith.mulf %285, %286 : vector<10x10xf32>
    %cst_98 = arith.constant dense<0xFF800000> : vector<10xf32>
    %288 = vector.multi_reduction <maximumf>, %287, %cst_98 [1] : vector<10x10xf32> to vector<10xf32>
    %289 = vector.shape_cast %288 : vector<10xf32> to vector<10x1xf32>
    %290 = vector.broadcast %289 : vector<10x1xf32> to vector<10x10xf32>
    %291 = arith.subf %287, %290 : vector<10x10xf32>
    %292 = math.exp %291 : vector<10x10xf32>
    %cst_99 = arith.constant dense<0.000000e+00> : vector<10xf32>
    %293 = vector.multi_reduction <add>, %292, %cst_99 [1] : vector<10x10xf32> to vector<10xf32>
    %294 = vector.shape_cast %293 : vector<10xf32> to vector<10x1xf32>
    %295 = tpu.reciprocal %294 {approx = true} : vector<10x1xf32> -> vector<10x1xf32>
    %296 = vector.broadcast %295 : vector<10x1xf32> to vector<10x10xf32>
    %297 = arith.mulf %292, %296 : vector<10x10xf32>
    %298 = vector.extract_strided_slice %263 {offsets = [0, 8], sizes = [10, 8], strides = [1, 1]} : vector<10x32xf32> to vector<10x8xf32>
    %cst_100 = arith.constant dense<0.000000e+00> : vector<10x8xf32>
    %299 = tpu.matmul %297, %298, %cst_100 {dimension_numbers = #tpu.dot_dimension_numbers<[1], [0], [0], [1], [0, 0, 1, 1], [], []>} : vector<10x10xf32>, vector<10x8xf32>, vector<10x8xf32> -> vector<10x8xf32>
    %300 = vector.extract_strided_slice %261 {offsets = [0, 16], sizes = [10, 8], strides = [1, 1]} : vector<10x32xf32> to vector<10x8xf32>
    %301 = vector.extract_strided_slice %262 {offsets = [0, 16], sizes = [10, 8], strides = [1, 1]} : vector<10x32xf32> to vector<10x8xf32>
    %302 = tpu.transpose %301, [1, 0] : vector<10x8xf32> -> vector<8x10xf32>
    %cst_101 = arith.constant dense<0.000000e+00> : vector<10x10xf32>
    %303 = tpu.matmul %300, %302, %cst_101 {dimension_numbers = #tpu.dot_dimension_numbers<[1], [0], [0], [1], [0, 0, 1, 1], [], []>} : vector<10x8xf32>, vector<8x10xf32>, vector<10x10xf32> -> vector<10x10xf32>
    %cst_102 = arith.constant 0.353553385 : f32
    %304 = vector.broadcast %cst_102 : f32 to vector<10x10xf32>
    %305 = arith.mulf %303, %304 : vector<10x10xf32>
    %cst_103 = arith.constant dense<0xFF800000> : vector<10xf32>
    %306 = vector.multi_reduction <maximumf>, %305, %cst_103 [1] : vector<10x10xf32> to vector<10xf32>
    %307 = vector.shape_cast %306 : vector<10xf32> to vector<10x1xf32>
    %308 = vector.broadcast %307 : vector<10x1xf32> to vector<10x10xf32>
    %309 = arith.subf %305, %308 : vector<10x10xf32>
    %310 = math.exp %309 : vector<10x10xf32>
    %cst_104 = arith.constant dense<0.000000e+00> : vector<10xf32>
    %311 = vector.multi_reduction <add>, %310, %cst_104 [1] : vector<10x10xf32> to vector<10xf32>
    %312 = vector.shape_cast %311 : vector<10xf32> to vector<10x1xf32>
    %313 = tpu.reciprocal %312 {approx = true} : vector<10x1xf32> -> vector<10x1xf32>
    %314 = vector.broadcast %313 : vector<10x1xf32> to vector<10x10xf32>
    %315 = arith.mulf %310, %314 : vector<10x10xf32>
    %316 = vector.extract_strided_slice %263 {offsets = [0, 16], sizes = [10, 8], strides = [1, 1]} : vector<10x32xf32> to vector<10x8xf32>
    %cst_105 = arith.constant dense<0.000000e+00> : vector<10x8xf32>
    %317 = tpu.matmul %315, %316, %cst_105 {dimension_numbers = #tpu.dot_dimension_numbers<[1], [0], [0], [1], [0, 0, 1, 1], [], []>} : vector<10x10xf32>, vector<10x8xf32>, vector<10x8xf32> -> vector<10x8xf32>
    %318 = vector.extract_strided_slice %261 {offsets = [0, 24], sizes = [10, 8], strides = [1, 1]} : vector<10x32xf32> to vector<10x8xf32>
    %319 = vector.extract_strided_slice %262 {offsets = [0, 24], sizes = [10, 8], strides = [1, 1]} : vector<10x32xf32> to vector<10x8xf32>
    %320 = tpu.transpose %319, [1, 0] : vector<10x8xf32> -> vector<8x10xf32>
    %cst_106 = arith.constant dense<0.000000e+00> : vector<10x10xf32>
    %321 = tpu.matmul %318, %320, %cst_106 {dimension_numbers = #tpu.dot_dimension_numbers<[1], [0], [0], [1], [0, 0, 1, 1], [], []>} : vector<10x8xf32>, vector<8x10xf32>, vector<10x10xf32> -> vector<10x10xf32>
    %cst_107 = arith.constant 0.353553385 : f32
    %322 = vector.broadcast %cst_107 : f32 to vector<10x10xf32>
    %323 = arith.mulf %321, %322 : vector<10x10xf32>
    %cst_108 = arith.constant dense<0xFF800000> : vector<10xf32>
    %324 = vector.multi_reduction <maximumf>, %323, %cst_108 [1] : vector<10x10xf32> to vector<10xf32>
    %325 = vector.shape_cast %324 : vector<10xf32> to vector<10x1xf32>
    %326 = vector.broadcast %325 : vector<10x1xf32> to vector<10x10xf32>
    %327 = arith.subf %323, %326 : vector<10x10xf32>
    %328 = math.exp %327 : vector<10x10xf32>
    %cst_109 = arith.constant dense<0.000000e+00> : vector<10xf32>
    %329 = vector.multi_reduction <add>, %328, %cst_109 [1] : vector<10x10xf32> to vector<10xf32>
    %330 = vector.shape_cast %329 : vector<10xf32> to vector<10x1xf32>
    %331 = tpu.reciprocal %330 {approx = true} : vector<10x1xf32> -> vector<10x1xf32>
    %332 = vector.broadcast %331 : vector<10x1xf32> to vector<10x10xf32>
    %333 = arith.mulf %328, %332 : vector<10x10xf32>
    %334 = vector.extract_strided_slice %263 {offsets = [0, 24], sizes = [10, 8], strides = [1, 1]} : vector<10x32xf32> to vector<10x8xf32>
    %cst_110 = arith.constant dense<0.000000e+00> : vector<10x8xf32>
    %335 = tpu.matmul %333, %334, %cst_110 {dimension_numbers = #tpu.dot_dimension_numbers<[1], [0], [0], [1], [0, 0, 1, 1], [], []>} : vector<10x10xf32>, vector<10x8xf32>, vector<10x8xf32> -> vector<10x8xf32>
    %336 = tpu.concatenate %281, %299, %317, %335 in 1 : vector<10x8xf32>, vector<10x8xf32>, vector<10x8xf32>, vector<10x8xf32> -> vector<10x32xf32>
    %337 = vector.extract_strided_slice %258 {offsets = [10, 0], sizes = [10, 32], strides = [1, 1]} : vector<20x32xf32> to vector<10x32xf32>
    %338 = vector.extract_strided_slice %259 {offsets = [10, 0], sizes = [10, 32], strides = [1, 1]} : vector<20x32xf32> to vector<10x32xf32>
    %339 = vector.extract_strided_slice %260 {offsets = [10, 0], sizes = [10, 32], strides = [1, 1]} : vector<20x32xf32> to vector<10x32xf32>
    %340 = vector.extract_strided_slice %337 {offsets = [0, 0], sizes = [10, 8], strides = [1, 1]} : vector<10x32xf32> to vector<10x8xf32>
    %341 = vector.extract_strided_slice %338 {offsets = [0, 0], sizes = [10, 8], strides = [1, 1]} : vector<10x32xf32> to vector<10x8xf32>
    %342 = tpu.transpose %341, [1, 0] : vector<10x8xf32> -> vector<8x10xf32>
    %cst_111 = arith.constant dense<0.000000e+00> : vector<10x10xf32>
    %343 = tpu.matmul %340, %342, %cst_111 {dimension_numbers = #tpu.dot_dimension_numbers<[1], [0], [0], [1], [0, 0, 1, 1], [], []>} : vector<10x8xf32>, vector<8x10xf32>, vector<10x10xf32> -> vector<10x10xf32>
    %cst_112 = arith.constant 0.353553385 : f32
    %344 = vector.broadcast %cst_112 : f32 to vector<10x10xf32>
    %345 = arith.mulf %343, %344 : vector<10x10xf32>
    %cst_113 = arith.constant dense<0xFF800000> : vector<10xf32>
    %346 = vector.multi_reduction <maximumf>, %345, %cst_113 [1] : vector<10x10xf32> to vector<10xf32>
    %347 = vector.shape_cast %346 : vector<10xf32> to vector<10x1xf32>
    %348 = vector.broadcast %347 : vector<10x1xf32> to vector<10x10xf32>
    %349 = arith.subf %345, %348 : vector<10x10xf32>
    %350 = math.exp %349 : vector<10x10xf32>
    %cst_114 = arith.constant dense<0.000000e+00> : vector<10xf32>
    %351 = vector.multi_reduction <add>, %350, %cst_114 [1] : vector<10x10xf32> to vector<10xf32>
    %352 = vector.shape_cast %351 : vector<10xf32> to vector<10x1xf32>
    %353 = tpu.reciprocal %352 {approx = true} : vector<10x1xf32> -> vector<10x1xf32>
    %354 = vector.broadcast %353 : vector<10x1xf32> to vector<10x10xf32>
    %355 = arith.mulf %350, %354 : vector<10x10xf32>
    %356 = vector.extract_strided_slice %339 {offsets = [0, 0], sizes = [10, 8], strides = [1, 1]} : vector<10x32xf32> to vector<10x8xf32>
    %cst_115 = arith.constant dense<0.000000e+00> : vector<10x8xf32>
    %357 = tpu.matmul %355, %356, %cst_115 {dimension_numbers = #tpu.dot_dimension_numbers<[1], [0], [0], [1], [0, 0, 1, 1], [], []>} : vector<10x10xf32>, vector<10x8xf32>, vector<10x8xf32> -> vector<10x8xf32>
    %358 = vector.extract_strided_slice %337 {offsets = [0, 8], sizes = [10, 8], strides = [1, 1]} : vector<10x32xf32> to vector<10x8xf32>
    %359 = vector.extract_strided_slice %338 {offsets = [0, 8], sizes = [10, 8], strides = [1, 1]} : vector<10x32xf32> to vector<10x8xf32>
    %360 = tpu.transpose %359, [1, 0] : vector<10x8xf32> -> vector<8x10xf32>
    %cst_116 = arith.constant dense<0.000000e+00> : vector<10x10xf32>
    %361 = tpu.matmul %358, %360, %cst_116 {dimension_numbers = #tpu.dot_dimension_numbers<[1], [0], [0], [1], [0, 0, 1, 1], [], []>} : vector<10x8xf32>, vector<8x10xf32>, vector<10x10xf32> -> vector<10x10xf32>
    %cst_117 = arith.constant 0.353553385 : f32
    %362 = vector.broadcast %cst_117 : f32 to vector<10x10xf32>
    %363 = arith.mulf %361, %362 : vector<10x10xf32>
    %cst_118 = arith.constant dense<0xFF800000> : vector<10xf32>
    %364 = vector.multi_reduction <maximumf>, %363, %cst_118 [1] : vector<10x10xf32> to vector<10xf32>
    %365 = vector.shape_cast %364 : vector<10xf32> to vector<10x1xf32>
    %366 = vector.broadcast %365 : vector<10x1xf32> to vector<10x10xf32>
    %367 = arith.subf %363, %366 : vector<10x10xf32>
    %368 = math.exp %367 : vector<10x10xf32>
    %cst_119 = arith.constant dense<0.000000e+00> : vector<10xf32>
    %369 = vector.multi_reduction <add>, %368, %cst_119 [1] : vector<10x10xf32> to vector<10xf32>
    %370 = vector.shape_cast %369 : vector<10xf32> to vector<10x1xf32>
    %371 = tpu.reciprocal %370 {approx = true} : vector<10x1xf32> -> vector<10x1xf32>
    %372 = vector.broadcast %371 : vector<10x1xf32> to vector<10x10xf32>
    %373 = arith.mulf %368, %372 : vector<10x10xf32>
    %374 = vector.extract_strided_slice %339 {offsets = [0, 8], sizes = [10, 8], strides = [1, 1]} : vector<10x32xf32> to vector<10x8xf32>
    %cst_120 = arith.constant dense<0.000000e+00> : vector<10x8xf32>
    %375 = tpu.matmul %373, %374, %cst_120 {dimension_numbers = #tpu.dot_dimension_numbers<[1], [0], [0], [1], [0, 0, 1, 1], [], []>} : vector<10x10xf32>, vector<10x8xf32>, vector<10x8xf32> -> vector<10x8xf32>
    %376 = vector.extract_strided_slice %337 {offsets = [0, 16], sizes = [10, 8], strides = [1, 1]} : vector<10x32xf32> to vector<10x8xf32>
    %377 = vector.extract_strided_slice %338 {offsets = [0, 16], sizes = [10, 8], strides = [1, 1]} : vector<10x32xf32> to vector<10x8xf32>
    %378 = tpu.transpose %377, [1, 0] : vector<10x8xf32> -> vector<8x10xf32>
    %cst_121 = arith.constant dense<0.000000e+00> : vector<10x10xf32>
    %379 = tpu.matmul %376, %378, %cst_121 {dimension_numbers = #tpu.dot_dimension_numbers<[1], [0], [0], [1], [0, 0, 1, 1], [], []>} : vector<10x8xf32>, vector<8x10xf32>, vector<10x10xf32> -> vector<10x10xf32>
    %cst_122 = arith.constant 0.353553385 : f32
    %380 = vector.broadcast %cst_122 : f32 to vector<10x10xf32>
    %381 = arith.mulf %379, %380 : vector<10x10xf32>
    %cst_123 = arith.constant dense<0xFF800000> : vector<10xf32>
    %382 = vector.multi_reduction <maximumf>, %381, %cst_123 [1] : vector<10x10xf32> to vector<10xf32>
    %383 = vector.shape_cast %382 : vector<10xf32> to vector<10x1xf32>
    %384 = vector.broadcast %383 : vector<10x1xf32> to vector<10x10xf32>
    %385 = arith.subf %381, %384 : vector<10x10xf32>
    %386 = math.exp %385 : vector<10x10xf32>
    %cst_124 = arith.constant dense<0.000000e+00> : vector<10xf32>
    %387 = vector.multi_reduction <add>, %386, %cst_124 [1] : vector<10x10xf32> to vector<10xf32>
    %388 = vector.shape_cast %387 : vector<10xf32> to vector<10x1xf32>
    %389 = tpu.reciprocal %388 {approx = true} : vector<10x1xf32> -> vector<10x1xf32>
    %390 = vector.broadcast %389 : vector<10x1xf32> to vector<10x10xf32>
    %391 = arith.mulf %386, %390 : vector<10x10xf32>
    %392 = vector.extract_strided_slice %339 {offsets = [0, 16], sizes = [10, 8], strides = [1, 1]} : vector<10x32xf32> to vector<10x8xf32>
    %cst_125 = arith.constant dense<0.000000e+00> : vector<10x8xf32>
    %393 = tpu.matmul %391, %392, %cst_125 {dimension_numbers = #tpu.dot_dimension_numbers<[1], [0], [0], [1], [0, 0, 1, 1], [], []>} : vector<10x10xf32>, vector<10x8xf32>, vector<10x8xf32> -> vector<10x8xf32>
    %394 = vector.extract_strided_slice %337 {offsets = [0, 24], sizes = [10, 8], strides = [1, 1]} : vector<10x32xf32> to vector<10x8xf32>
    %395 = vector.extract_strided_slice %338 {offsets = [0, 24], sizes = [10, 8], strides = [1, 1]} : vector<10x32xf32> to vector<10x8xf32>
    %396 = tpu.transpose %395, [1, 0] : vector<10x8xf32> -> vector<8x10xf32>
    %cst_126 = arith.constant dense<0.000000e+00> : vector<10x10xf32>
    %397 = tpu.matmul %394, %396, %cst_126 {dimension_numbers = #tpu.dot_dimension_numbers<[1], [0], [0], [1], [0, 0, 1, 1], [], []>} : vector<10x8xf32>, vector<8x10xf32>, vector<10x10xf32> -> vector<10x10xf32>
    %cst_127 = arith.constant 0.353553385 : f32
    %398 = vector.broadcast %cst_127 : f32 to vector<10x10xf32>
    %399 = arith.mulf %397, %398 : vector<10x10xf32>
    %cst_128 = arith.constant dense<0xFF800000> : vector<10xf32>
    %400 = vector.multi_reduction <maximumf>, %399, %cst_128 [1] : vector<10x10xf32> to vector<10xf32>
    %401 = vector.shape_cast %400 : vector<10xf32> to vector<10x1xf32>
    %402 = vector.broadcast %401 : vector<10x1xf32> to vector<10x10xf32>
    %403 = arith.subf %399, %402 : vector<10x10xf32>
    %404 = math.exp %403 : vector<10x10xf32>
    %cst_129 = arith.constant dense<0.000000e+00> : vector<10xf32>
    %405 = vector.multi_reduction <add>, %404, %cst_129 [1] : vector<10x10xf32> to vector<10xf32>
    %406 = vector.shape_cast %405 : vector<10xf32> to vector<10x1xf32>
    %407 = tpu.reciprocal %406 {approx = true} : vector<10x1xf32> -> vector<10x1xf32>
    %408 = vector.broadcast %407 : vector<10x1xf32> to vector<10x10xf32>
    %409 = arith.mulf %404, %408 : vector<10x10xf32>
    %410 = vector.extract_strided_slice %339 {offsets = [0, 24], sizes = [10, 8], strides = [1, 1]} : vector<10x32xf32> to vector<10x8xf32>
    %cst_130 = arith.constant dense<0.000000e+00> : vector<10x8xf32>
    %411 = tpu.matmul %409, %410, %cst_130 {dimension_numbers = #tpu.dot_dimension_numbers<[1], [0], [0], [1], [0, 0, 1, 1], [], []>} : vector<10x10xf32>, vector<10x8xf32>, vector<10x8xf32> -> vector<10x8xf32>
    %412 = tpu.concatenate %357, %375, %393, %411 in 1 : vector<10x8xf32>, vector<10x8xf32>, vector<10x8xf32>, vector<10x8xf32> -> vector<10x32xf32>
    %413 = tpu.concatenate %336, %412 in 0 : vector<10x32xf32>, vector<10x32xf32> -> vector<20x32xf32>
    %414 = vector.extract_strided_slice %248 {offsets = [0, 96], sizes = [32, 32], strides = [1, 1]} : vector<32x128xf32> to vector<32x32xf32>
    %cst_131 = arith.constant dense<0.000000e+00> : vector<20x32xf32>
    %415 = tpu.matmul %413, %414, %cst_131 {dimension_numbers = #tpu.dot_dimension_numbers<[1], [0], [0], [1], [0, 0, 1, 1], [], []>} : vector<20x32xf32>, vector<32x32xf32>, vector<20x32xf32> -> vector<20x32xf32>
    %416 = vector.extract_strided_slice %250 {offsets = [0, 96], sizes = [1, 32], strides = [1, 1]} : vector<1x128xf32> to vector<1x32xf32>
    %417 = vector.broadcast %416 : vector<1x32xf32> to vector<20x32xf32>
    %418 = arith.addf %415, %417 : vector<20x32xf32>
    %419 = arith.addf %246, %418 : vector<20x32xf32>
    %420 = vector.extract_strided_slice %252 {offsets = [0, 0], sizes = [1, 32], strides = [1, 1]} : vector<4x32xf32> to vector<1x32xf32>
    %421 = vector.extract_strided_slice %252 {offsets = [1, 0], sizes = [1, 32], strides = [1, 1]} : vector<4x32xf32> to vector<1x32xf32>
    %cst_132 = arith.constant dense<0.000000e+00> : vector<20xf32>
    %422 = vector.multi_reduction <add>, %419, %cst_132 [1] : vector<20x32xf32> to vector<20xf32>
    %423 = vector.shape_cast %422 : vector<20xf32> to vector<20x1xf32>
    %cst_133 = arith.constant 3.200000e+01 : f32
    %424 = vector.broadcast %cst_133 : f32 to vector<20x1xf32>
    %425 = arith.divf %423, %424 : vector<20x1xf32>
    %426 = vector.broadcast %425 : vector<20x1xf32> to vector<20x32xf32>
    %427 = arith.subf %419, %426 : vector<20x32xf32>
    %428 = arith.mulf %427, %427 : vector<20x32xf32>
    %cst_134 = arith.constant dense<0.000000e+00> : vector<20xf32>
    %429 = vector.multi_reduction <add>, %428, %cst_134 [1] : vector<20x32xf32> to vector<20xf32>
    %430 = vector.shape_cast %429 : vector<20xf32> to vector<20x1xf32>
    %cst_135 = arith.constant 3.200000e+01 : f32
    %431 = vector.broadcast %cst_135 : f32 to vector<20x1xf32>
    %432 = arith.divf %430, %431 : vector<20x1xf32>
    %cst_136 = arith.constant 9.99999974E-6 : f32
    %433 = vector.broadcast %cst_136 : f32 to vector<20x1xf32>
    %434 = arith.addf %432, %433 : vector<20x1xf32>
    %435 = math.rsqrt %434 : vector<20x1xf32>
    %436 = vector.broadcast %435 : vector<20x1xf32> to vector<20x32xf32>
    %437 = arith.mulf %427, %436 : vector<20x32xf32>
    %438 = vector.broadcast %420 : vector<1x32xf32> to vector<20x32xf32>
    %439 = arith.mulf %437, %438 : vector<20x32xf32>
    %440 = vector.broadcast %421 : vector<1x32xf32> to vector<20x32xf32>
    %441 = arith.addf %439, %440 : vector<20x32xf32>
    %c1_137 = arith.constant 1 : index
    %c0_138 = arith.constant 0 : index
    %c0_139 = arith.constant 0 : index
    %442 = vector.load %arg8[%c1_137, %c0_138, %c0_139] : memref<2x32x64xf32, #tpu.memory_space<vmem>>, vector<1x32x64xf32>
    %443 = vector.shape_cast %442 : vector<1x32x64xf32> to vector<32x64xf32>
    %c1_140 = arith.constant 1 : index
    %c0_141 = arith.constant 0 : index
    %c0_142 = arith.constant 0 : index
    %444 = vector.load %arg9[%c1_140, %c0_141, %c0_142] : memref<2x1x64xf32, #tpu.memory_space<vmem>>, vector<1x1x64xf32>
    %445 = vector.shape_cast %444 : vector<1x1x64xf32> to vector<1x64xf32>
    %c1_143 = arith.constant 1 : index
    %c0_144 = arith.constant 0 : index
    %c0_145 = arith.constant 0 : index
    %446 = vector.load %arg10[%c1_143, %c0_144, %c0_145] : memref<2x64x32xf32, #tpu.memory_space<vmem>>, vector<1x64x32xf32>
    %447 = vector.shape_cast %446 : vector<1x64x32xf32> to vector<64x32xf32>
    %c1_146 = arith.constant 1 : index
    %c0_147 = arith.constant 0 : index
    %c0_148 = arith.constant 0 : index
    %448 = vector.load %arg11[%c1_146, %c0_147, %c0_148] : memref<2x1x32xf32, #tpu.memory_space<vmem>>, vector<1x1x32xf32>
    %449 = vector.shape_cast %448 : vector<1x1x32xf32> to vector<1x32xf32>
    %cst_149 = arith.constant dense<0.000000e+00> : vector<20x64xf32>
    %450 = tpu.matmul %441, %443, %cst_149 {dimension_numbers = #tpu.dot_dimension_numbers<[1], [0], [0], [1], [0, 0, 1, 1], [], []>} : vector<20x32xf32>, vector<32x64xf32>, vector<20x64xf32> -> vector<20x64xf32>
    %451 = vector.broadcast %445 : vector<1x64xf32> to vector<20x64xf32>
    %452 = arith.addf %450, %451 : vector<20x64xf32>
    %cst_150 = arith.constant 0.000000e+00 : f32
    %453 = vector.broadcast %cst_150 : f32 to vector<20x64xf32>
    %454 = arith.maximumf %452, %453 : vector<20x64xf32>
    %cst_151 = arith.constant dense<0.000000e+00> : vector<20x32xf32>
    %455 = tpu.matmul %454, %447, %cst_151 {dimension_numbers = #tpu.dot_dimension_numbers<[1], [0], [0], [1], [0, 0, 1, 1], [], []>} : vector<20x64xf32>, vector<64x32xf32>, vector<20x32xf32> -> vector<20x32xf32>
    %456 = vector.broadcast %449 : vector<1x32xf32> to vector<20x32xf32>
    %457 = arith.addf %455, %456 : vector<20x32xf32>
    %458 = arith.addf %441, %457 : vector<20x32xf32>
    %459 = vector.extract_strided_slice %252 {offsets = [2, 0], sizes = [1, 32], strides = [1, 1]} : vector<4x32xf32> to vector<1x32xf32>
    %460 = vector.extract_strided_slice %252 {offsets = [3, 0], sizes = [1, 32], strides = [1, 1]} : vector<4x32xf32> to vector<1x32xf32>
    %cst_152 = arith.constant dense<0.000000e+00> : vector<20xf32>
    %461 = vector.multi_reduction <add>, %458, %cst_152 [1] : vector<20x32xf32> to vector<20xf32>
    %462 = vector.shape_cast %461 : vector<20xf32> to vector<20x1xf32>
    %cst_153 = arith.constant 3.200000e+01 : f32
    %463 = vector.broadcast %cst_153 : f32 to vector<20x1xf32>
    %464 = arith.divf %462, %463 : vector<20x1xf32>
    %465 = vector.broadcast %464 : vector<20x1xf32> to vector<20x32xf32>
    %466 = arith.subf %458, %465 : vector<20x32xf32>
    %467 = arith.mulf %466, %466 : vector<20x32xf32>
    %cst_154 = arith.constant dense<0.000000e+00> : vector<20xf32>
    %468 = vector.multi_reduction <add>, %467, %cst_154 [1] : vector<20x32xf32> to vector<20xf32>
    %469 = vector.shape_cast %468 : vector<20xf32> to vector<20x1xf32>
    %cst_155 = arith.constant 3.200000e+01 : f32
    %470 = vector.broadcast %cst_155 : f32 to vector<20x1xf32>
    %471 = arith.divf %469, %470 : vector<20x1xf32>
    %cst_156 = arith.constant 9.99999974E-6 : f32
    %472 = vector.broadcast %cst_156 : f32 to vector<20x1xf32>
    %473 = arith.addf %471, %472 : vector<20x1xf32>
    %474 = math.rsqrt %473 : vector<20x1xf32>
    %475 = vector.broadcast %474 : vector<20x1xf32> to vector<20x32xf32>
    %476 = arith.mulf %466, %475 : vector<20x32xf32>
    %477 = vector.broadcast %459 : vector<1x32xf32> to vector<20x32xf32>
    %478 = arith.mulf %476, %477 : vector<20x32xf32>
    %479 = vector.broadcast %460 : vector<1x32xf32> to vector<20x32xf32>
    %480 = arith.addf %478, %479 : vector<20x32xf32>
    %c0_157 = arith.constant 0 : index
    %c0_158 = arith.constant 0 : index
    %481 = vector.load %arg13[%c0_157, %c0_158] : memref<2x32xf32, #tpu.memory_space<vmem>>, vector<1x32xf32>
    %c1_159 = arith.constant 1 : index
    %c0_160 = arith.constant 0 : index
    %482 = vector.load %arg13[%c1_159, %c0_160] : memref<2x32xf32, #tpu.memory_space<vmem>>, vector<1x32xf32>
    %cst_161 = arith.constant dense<0.000000e+00> : vector<20xf32>
    %483 = vector.multi_reduction <add>, %480, %cst_161 [1] : vector<20x32xf32> to vector<20xf32>
    %484 = vector.shape_cast %483 : vector<20xf32> to vector<20x1xf32>
    %cst_162 = arith.constant 3.200000e+01 : f32
    %485 = vector.broadcast %cst_162 : f32 to vector<20x1xf32>
    %486 = arith.divf %484, %485 : vector<20x1xf32>
    %487 = vector.broadcast %486 : vector<20x1xf32> to vector<20x32xf32>
    %488 = arith.subf %480, %487 : vector<20x32xf32>
    %489 = arith.mulf %488, %488 : vector<20x32xf32>
    %cst_163 = arith.constant dense<0.000000e+00> : vector<20xf32>
    %490 = vector.multi_reduction <add>, %489, %cst_163 [1] : vector<20x32xf32> to vector<20xf32>
    %491 = vector.shape_cast %490 : vector<20xf32> to vector<20x1xf32>
    %cst_164 = arith.constant 3.200000e+01 : f32
    %492 = vector.broadcast %cst_164 : f32 to vector<20x1xf32>
    %493 = arith.divf %491, %492 : vector<20x1xf32>
    %cst_165 = arith.constant 9.99999974E-6 : f32
    %494 = vector.broadcast %cst_165 : f32 to vector<20x1xf32>
    %495 = arith.addf %493, %494 : vector<20x1xf32>
    %496 = math.rsqrt %495 : vector<20x1xf32>
    %497 = vector.broadcast %496 : vector<20x1xf32> to vector<20x32xf32>
    %498 = arith.mulf %488, %497 : vector<20x32xf32>
    %499 = vector.broadcast %481 : vector<1x32xf32> to vector<20x32xf32>
    %500 = arith.mulf %498, %499 : vector<20x32xf32>
    %501 = vector.broadcast %482 : vector<1x32xf32> to vector<20x32xf32>
    %502 = arith.addf %500, %501 : vector<20x32xf32>
    %c0_166 = arith.constant 0 : index
    %c0_167 = arith.constant 0 : index
    %503 = vector.load %arg2[%c0_166, %c0_167] : memref<16x1xi32, #tpu.memory_space<vmem>>, vector<16x1xi32>
    %c0_168 = arith.constant 0 : index
    %c0_169 = arith.constant 0 : index
    %504 = vector.load %arg4[%c0_168, %c0_169] : memref<128x32xf32, #tpu.memory_space<vmem>>, vector<128x32xf32>
    %c0_170 = arith.constant 0 : index
    %c0_171 = arith.constant 0 : index
    %505 = vector.load %arg5[%c0_170, %c0_171] : memref<42x32xf32, #tpu.memory_space<vmem>>, vector<8x32xf32>
    %506 = tpu.iota {dimensions = array<i32: 1>} : vector<16x128xi32>
    %507 = vector.broadcast %503 : vector<16x1xi32> to vector<16x128xi32>
    %508 = arith.cmpi eq, %506, %507 : vector<16x128xi32>
    %509 = arith.extui %508 : vector<16x128xi1> to vector<16x128xi32>
    %510 = arith.sitofp %509 : vector<16x128xi32> to vector<16x128xf32>
    %cst_172 = arith.constant dense<0.000000e+00> : vector<16x32xf32>
    %511 = tpu.matmul %510, %504, %cst_172 {dimension_numbers = #tpu.dot_dimension_numbers<[1], [0], [0], [1], [0, 0, 1, 1], [], []>} : vector<16x128xf32>, vector<128x32xf32>, vector<16x32xf32> -> vector<16x32xf32>
    %cst_173 = arith.constant 5.65685415 : f32
    %512 = vector.broadcast %cst_173 : f32 to vector<16x32xf32>
    %513 = arith.mulf %511, %512 : vector<16x32xf32>
    %514 = tpu.concatenate %505, %505 in 0 : vector<8x32xf32>, vector<8x32xf32> -> vector<16x32xf32>
    %515 = arith.addf %513, %514 : vector<16x32xf32>
    %516 = tpu.iota {dimensions = array<i32: 0>} : vector<8x8xi32>
    %517 = tpu.iota {dimensions = array<i32: 1>} : vector<8x8xi32>
    %518 = arith.cmpi sge, %516, %517 : vector<8x8xi32>
    %cst_174 = arith.constant 0.000000e+00 : f32
    %cst_175 = arith.constant -1.000000e+30 : f32
    %519 = vector.broadcast %cst_174 : f32 to vector<8x8xf32>
    %520 = vector.broadcast %cst_175 : f32 to vector<8x8xf32>
    %521 = arith.select %518, %519, %520 : vector<8x8xi1>, vector<8x8xf32>
    %c0_176 = arith.constant 0 : index
    %c0_177 = arith.constant 0 : index
    %c0_178 = arith.constant 0 : index
    %522 = vector.load %arg22[%c0_176, %c0_177, %c0_178] : memref<2x6x32xf32, #tpu.memory_space<vmem>>, vector<1x6x32xf32>
    %523 = vector.shape_cast %522 : vector<1x6x32xf32> to vector<6x32xf32>
    %c0_179 = arith.constant 0 : index
    %c0_180 = arith.constant 0 : index
    %c0_181 = arith.constant 0 : index
    %524 = vector.load %arg14[%c0_179, %c0_180, %c0_181] : memref<2x32x128xf32, #tpu.memory_space<vmem>>, vector<1x32x128xf32>
    %525 = vector.shape_cast %524 : vector<1x32x128xf32> to vector<32x128xf32>
    %c0_182 = arith.constant 0 : index
    %c0_183 = arith.constant 0 : index
    %c0_184 = arith.constant 0 : index
    %526 = vector.load %arg15[%c0_182, %c0_183, %c0_184] : memref<2x1x128xf32, #tpu.memory_space<vmem>>, vector<1x1x128xf32>
    %527 = vector.shape_cast %526 : vector<1x1x128xf32> to vector<1x128xf32>
    %528 = vector.extract_strided_slice %525 {offsets = [0, 0], sizes = [32, 96], strides = [1, 1]} : vector<32x128xf32> to vector<32x96xf32>
    %cst_185 = arith.constant dense<0.000000e+00> : vector<16x96xf32>
    %529 = tpu.matmul %515, %528, %cst_185 {dimension_numbers = #tpu.dot_dimension_numbers<[1], [0], [0], [1], [0, 0, 1, 1], [], []>} : vector<16x32xf32>, vector<32x96xf32>, vector<16x96xf32> -> vector<16x96xf32>
    %530 = vector.extract_strided_slice %527 {offsets = [0, 0], sizes = [1, 96], strides = [1, 1]} : vector<1x128xf32> to vector<1x96xf32>
    %531 = vector.broadcast %530 : vector<1x96xf32> to vector<16x96xf32>
    %532 = arith.addf %529, %531 : vector<16x96xf32>
    %533 = vector.extract_strided_slice %532 {offsets = [0, 0], sizes = [16, 32], strides = [1, 1]} : vector<16x96xf32> to vector<16x32xf32>
    %534 = vector.extract_strided_slice %532 {offsets = [0, 32], sizes = [16, 32], strides = [1, 1]} : vector<16x96xf32> to vector<16x32xf32>
    %535 = vector.extract_strided_slice %532 {offsets = [0, 64], sizes = [16, 32], strides = [1, 1]} : vector<16x96xf32> to vector<16x32xf32>
    %536 = vector.extract_strided_slice %533 {offsets = [0, 0], sizes = [8, 32], strides = [1, 1]} : vector<16x32xf32> to vector<8x32xf32>
    %537 = vector.extract_strided_slice %534 {offsets = [0, 0], sizes = [8, 32], strides = [1, 1]} : vector<16x32xf32> to vector<8x32xf32>
    %538 = vector.extract_strided_slice %535 {offsets = [0, 0], sizes = [8, 32], strides = [1, 1]} : vector<16x32xf32> to vector<8x32xf32>
    %539 = vector.extract_strided_slice %536 {offsets = [0, 0], sizes = [8, 8], strides = [1, 1]} : vector<8x32xf32> to vector<8x8xf32>
    %540 = vector.extract_strided_slice %537 {offsets = [0, 0], sizes = [8, 8], strides = [1, 1]} : vector<8x32xf32> to vector<8x8xf32>
    %541 = tpu.transpose %540, [1, 0] : vector<8x8xf32> -> vector<8x8xf32>
    %cst_186 = arith.constant dense<0.000000e+00> : vector<8x8xf32>
    %542 = tpu.matmul %539, %541, %cst_186 {dimension_numbers = #tpu.dot_dimension_numbers<[1], [0], [0], [1], [0, 0, 1, 1], [], []>} : vector<8x8xf32>, vector<8x8xf32>, vector<8x8xf32> -> vector<8x8xf32>
    %cst_187 = arith.constant 0.353553385 : f32
    %543 = vector.broadcast %cst_187 : f32 to vector<8x8xf32>
    %544 = arith.mulf %542, %543 : vector<8x8xf32>
    %545 = arith.addf %544, %521 : vector<8x8xf32>
    %cst_188 = arith.constant dense<0xFF800000> : vector<8xf32>
    %546 = vector.multi_reduction <maximumf>, %545, %cst_188 [1] : vector<8x8xf32> to vector<8xf32>
    %547 = vector.shape_cast %546 : vector<8xf32> to vector<8x1xf32>
    %548 = vector.broadcast %547 : vector<8x1xf32> to vector<8x8xf32>
    %549 = arith.subf %545, %548 : vector<8x8xf32>
    %550 = math.exp %549 : vector<8x8xf32>
    %cst_189 = arith.constant dense<0.000000e+00> : vector<8xf32>
    %551 = vector.multi_reduction <add>, %550, %cst_189 [1] : vector<8x8xf32> to vector<8xf32>
    %552 = vector.shape_cast %551 : vector<8xf32> to vector<8x1xf32>
    %553 = tpu.reciprocal %552 {approx = true} : vector<8x1xf32> -> vector<8x1xf32>
    %554 = vector.broadcast %553 : vector<8x1xf32> to vector<8x8xf32>
    %555 = arith.mulf %550, %554 : vector<8x8xf32>
    %556 = vector.extract_strided_slice %538 {offsets = [0, 0], sizes = [8, 8], strides = [1, 1]} : vector<8x32xf32> to vector<8x8xf32>
    %cst_190 = arith.constant dense<0.000000e+00> : vector<8x8xf32>
    %557 = tpu.matmul %555, %556, %cst_190 {dimension_numbers = #tpu.dot_dimension_numbers<[1], [0], [0], [1], [0, 0, 1, 1], [], []>} : vector<8x8xf32>, vector<8x8xf32>, vector<8x8xf32> -> vector<8x8xf32>
    %558 = vector.extract_strided_slice %536 {offsets = [0, 8], sizes = [8, 8], strides = [1, 1]} : vector<8x32xf32> to vector<8x8xf32>
    %559 = vector.extract_strided_slice %537 {offsets = [0, 8], sizes = [8, 8], strides = [1, 1]} : vector<8x32xf32> to vector<8x8xf32>
    %560 = tpu.transpose %559, [1, 0] : vector<8x8xf32> -> vector<8x8xf32>
    %cst_191 = arith.constant dense<0.000000e+00> : vector<8x8xf32>
    %561 = tpu.matmul %558, %560, %cst_191 {dimension_numbers = #tpu.dot_dimension_numbers<[1], [0], [0], [1], [0, 0, 1, 1], [], []>} : vector<8x8xf32>, vector<8x8xf32>, vector<8x8xf32> -> vector<8x8xf32>
    %cst_192 = arith.constant 0.353553385 : f32
    %562 = vector.broadcast %cst_192 : f32 to vector<8x8xf32>
    %563 = arith.mulf %561, %562 : vector<8x8xf32>
    %564 = arith.addf %563, %521 : vector<8x8xf32>
    %cst_193 = arith.constant dense<0xFF800000> : vector<8xf32>
    %565 = vector.multi_reduction <maximumf>, %564, %cst_193 [1] : vector<8x8xf32> to vector<8xf32>
    %566 = vector.shape_cast %565 : vector<8xf32> to vector<8x1xf32>
    %567 = vector.broadcast %566 : vector<8x1xf32> to vector<8x8xf32>
    %568 = arith.subf %564, %567 : vector<8x8xf32>
    %569 = math.exp %568 : vector<8x8xf32>
    %cst_194 = arith.constant dense<0.000000e+00> : vector<8xf32>
    %570 = vector.multi_reduction <add>, %569, %cst_194 [1] : vector<8x8xf32> to vector<8xf32>
    %571 = vector.shape_cast %570 : vector<8xf32> to vector<8x1xf32>
    %572 = tpu.reciprocal %571 {approx = true} : vector<8x1xf32> -> vector<8x1xf32>
    %573 = vector.broadcast %572 : vector<8x1xf32> to vector<8x8xf32>
    %574 = arith.mulf %569, %573 : vector<8x8xf32>
    %575 = vector.extract_strided_slice %538 {offsets = [0, 8], sizes = [8, 8], strides = [1, 1]} : vector<8x32xf32> to vector<8x8xf32>
    %cst_195 = arith.constant dense<0.000000e+00> : vector<8x8xf32>
    %576 = tpu.matmul %574, %575, %cst_195 {dimension_numbers = #tpu.dot_dimension_numbers<[1], [0], [0], [1], [0, 0, 1, 1], [], []>} : vector<8x8xf32>, vector<8x8xf32>, vector<8x8xf32> -> vector<8x8xf32>
    %577 = vector.extract_strided_slice %536 {offsets = [0, 16], sizes = [8, 8], strides = [1, 1]} : vector<8x32xf32> to vector<8x8xf32>
    %578 = vector.extract_strided_slice %537 {offsets = [0, 16], sizes = [8, 8], strides = [1, 1]} : vector<8x32xf32> to vector<8x8xf32>
    %579 = tpu.transpose %578, [1, 0] : vector<8x8xf32> -> vector<8x8xf32>
    %cst_196 = arith.constant dense<0.000000e+00> : vector<8x8xf32>
    %580 = tpu.matmul %577, %579, %cst_196 {dimension_numbers = #tpu.dot_dimension_numbers<[1], [0], [0], [1], [0, 0, 1, 1], [], []>} : vector<8x8xf32>, vector<8x8xf32>, vector<8x8xf32> -> vector<8x8xf32>
    %cst_197 = arith.constant 0.353553385 : f32
    %581 = vector.broadcast %cst_197 : f32 to vector<8x8xf32>
    %582 = arith.mulf %580, %581 : vector<8x8xf32>
    %583 = arith.addf %582, %521 : vector<8x8xf32>
    %cst_198 = arith.constant dense<0xFF800000> : vector<8xf32>
    %584 = vector.multi_reduction <maximumf>, %583, %cst_198 [1] : vector<8x8xf32> to vector<8xf32>
    %585 = vector.shape_cast %584 : vector<8xf32> to vector<8x1xf32>
    %586 = vector.broadcast %585 : vector<8x1xf32> to vector<8x8xf32>
    %587 = arith.subf %583, %586 : vector<8x8xf32>
    %588 = math.exp %587 : vector<8x8xf32>
    %cst_199 = arith.constant dense<0.000000e+00> : vector<8xf32>
    %589 = vector.multi_reduction <add>, %588, %cst_199 [1] : vector<8x8xf32> to vector<8xf32>
    %590 = vector.shape_cast %589 : vector<8xf32> to vector<8x1xf32>
    %591 = tpu.reciprocal %590 {approx = true} : vector<8x1xf32> -> vector<8x1xf32>
    %592 = vector.broadcast %591 : vector<8x1xf32> to vector<8x8xf32>
    %593 = arith.mulf %588, %592 : vector<8x8xf32>
    %594 = vector.extract_strided_slice %538 {offsets = [0, 16], sizes = [8, 8], strides = [1, 1]} : vector<8x32xf32> to vector<8x8xf32>
    %cst_200 = arith.constant dense<0.000000e+00> : vector<8x8xf32>
    %595 = tpu.matmul %593, %594, %cst_200 {dimension_numbers = #tpu.dot_dimension_numbers<[1], [0], [0], [1], [0, 0, 1, 1], [], []>} : vector<8x8xf32>, vector<8x8xf32>, vector<8x8xf32> -> vector<8x8xf32>
    %596 = vector.extract_strided_slice %536 {offsets = [0, 24], sizes = [8, 8], strides = [1, 1]} : vector<8x32xf32> to vector<8x8xf32>
    %597 = vector.extract_strided_slice %537 {offsets = [0, 24], sizes = [8, 8], strides = [1, 1]} : vector<8x32xf32> to vector<8x8xf32>
    %598 = tpu.transpose %597, [1, 0] : vector<8x8xf32> -> vector<8x8xf32>
    %cst_201 = arith.constant dense<0.000000e+00> : vector<8x8xf32>
    %599 = tpu.matmul %596, %598, %cst_201 {dimension_numbers = #tpu.dot_dimension_numbers<[1], [0], [0], [1], [0, 0, 1, 1], [], []>} : vector<8x8xf32>, vector<8x8xf32>, vector<8x8xf32> -> vector<8x8xf32>
    %cst_202 = arith.constant 0.353553385 : f32
    %600 = vector.broadcast %cst_202 : f32 to vector<8x8xf32>
    %601 = arith.mulf %599, %600 : vector<8x8xf32>
    %602 = arith.addf %601, %521 : vector<8x8xf32>
    %cst_203 = arith.constant dense<0xFF800000> : vector<8xf32>
    %603 = vector.multi_reduction <maximumf>, %602, %cst_203 [1] : vector<8x8xf32> to vector<8xf32>
    %604 = vector.shape_cast %603 : vector<8xf32> to vector<8x1xf32>
    %605 = vector.broadcast %604 : vector<8x1xf32> to vector<8x8xf32>
    %606 = arith.subf %602, %605 : vector<8x8xf32>
    %607 = math.exp %606 : vector<8x8xf32>
    %cst_204 = arith.constant dense<0.000000e+00> : vector<8xf32>
    %608 = vector.multi_reduction <add>, %607, %cst_204 [1] : vector<8x8xf32> to vector<8xf32>
    %609 = vector.shape_cast %608 : vector<8xf32> to vector<8x1xf32>
    %610 = tpu.reciprocal %609 {approx = true} : vector<8x1xf32> -> vector<8x1xf32>
    %611 = vector.broadcast %610 : vector<8x1xf32> to vector<8x8xf32>
    %612 = arith.mulf %607, %611 : vector<8x8xf32>
    %613 = vector.extract_strided_slice %538 {offsets = [0, 24], sizes = [8, 8], strides = [1, 1]} : vector<8x32xf32> to vector<8x8xf32>
    %cst_205 = arith.constant dense<0.000000e+00> : vector<8x8xf32>
    %614 = tpu.matmul %612, %613, %cst_205 {dimension_numbers = #tpu.dot_dimension_numbers<[1], [0], [0], [1], [0, 0, 1, 1], [], []>} : vector<8x8xf32>, vector<8x8xf32>, vector<8x8xf32> -> vector<8x8xf32>
    %615 = tpu.concatenate %557, %576, %595, %614 in 1 : vector<8x8xf32>, vector<8x8xf32>, vector<8x8xf32>, vector<8x8xf32> -> vector<8x32xf32>
    %616 = vector.extract_strided_slice %533 {offsets = [8, 0], sizes = [8, 32], strides = [1, 1]} : vector<16x32xf32> to vector<8x32xf32>
    %617 = vector.extract_strided_slice %534 {offsets = [8, 0], sizes = [8, 32], strides = [1, 1]} : vector<16x32xf32> to vector<8x32xf32>
    %618 = vector.extract_strided_slice %535 {offsets = [8, 0], sizes = [8, 32], strides = [1, 1]} : vector<16x32xf32> to vector<8x32xf32>
    %619 = vector.extract_strided_slice %616 {offsets = [0, 0], sizes = [8, 8], strides = [1, 1]} : vector<8x32xf32> to vector<8x8xf32>
    %620 = vector.extract_strided_slice %617 {offsets = [0, 0], sizes = [8, 8], strides = [1, 1]} : vector<8x32xf32> to vector<8x8xf32>
    %621 = tpu.transpose %620, [1, 0] : vector<8x8xf32> -> vector<8x8xf32>
    %cst_206 = arith.constant dense<0.000000e+00> : vector<8x8xf32>
    %622 = tpu.matmul %619, %621, %cst_206 {dimension_numbers = #tpu.dot_dimension_numbers<[1], [0], [0], [1], [0, 0, 1, 1], [], []>} : vector<8x8xf32>, vector<8x8xf32>, vector<8x8xf32> -> vector<8x8xf32>
    %cst_207 = arith.constant 0.353553385 : f32
    %623 = vector.broadcast %cst_207 : f32 to vector<8x8xf32>
    %624 = arith.mulf %622, %623 : vector<8x8xf32>
    %625 = arith.addf %624, %521 : vector<8x8xf32>
    %cst_208 = arith.constant dense<0xFF800000> : vector<8xf32>
    %626 = vector.multi_reduction <maximumf>, %625, %cst_208 [1] : vector<8x8xf32> to vector<8xf32>
    %627 = vector.shape_cast %626 : vector<8xf32> to vector<8x1xf32>
    %628 = vector.broadcast %627 : vector<8x1xf32> to vector<8x8xf32>
    %629 = arith.subf %625, %628 : vector<8x8xf32>
    %630 = math.exp %629 : vector<8x8xf32>
    %cst_209 = arith.constant dense<0.000000e+00> : vector<8xf32>
    %631 = vector.multi_reduction <add>, %630, %cst_209 [1] : vector<8x8xf32> to vector<8xf32>
    %632 = vector.shape_cast %631 : vector<8xf32> to vector<8x1xf32>
    %633 = tpu.reciprocal %632 {approx = true} : vector<8x1xf32> -> vector<8x1xf32>
    %634 = vector.broadcast %633 : vector<8x1xf32> to vector<8x8xf32>
    %635 = arith.mulf %630, %634 : vector<8x8xf32>
    %636 = vector.extract_strided_slice %618 {offsets = [0, 0], sizes = [8, 8], strides = [1, 1]} : vector<8x32xf32> to vector<8x8xf32>
    %cst_210 = arith.constant dense<0.000000e+00> : vector<8x8xf32>
    %637 = tpu.matmul %635, %636, %cst_210 {dimension_numbers = #tpu.dot_dimension_numbers<[1], [0], [0], [1], [0, 0, 1, 1], [], []>} : vector<8x8xf32>, vector<8x8xf32>, vector<8x8xf32> -> vector<8x8xf32>
    %638 = vector.extract_strided_slice %616 {offsets = [0, 8], sizes = [8, 8], strides = [1, 1]} : vector<8x32xf32> to vector<8x8xf32>
    %639 = vector.extract_strided_slice %617 {offsets = [0, 8], sizes = [8, 8], strides = [1, 1]} : vector<8x32xf32> to vector<8x8xf32>
    %640 = tpu.transpose %639, [1, 0] : vector<8x8xf32> -> vector<8x8xf32>
    %cst_211 = arith.constant dense<0.000000e+00> : vector<8x8xf32>
    %641 = tpu.matmul %638, %640, %cst_211 {dimension_numbers = #tpu.dot_dimension_numbers<[1], [0], [0], [1], [0, 0, 1, 1], [], []>} : vector<8x8xf32>, vector<8x8xf32>, vector<8x8xf32> -> vector<8x8xf32>
    %cst_212 = arith.constant 0.353553385 : f32
    %642 = vector.broadcast %cst_212 : f32 to vector<8x8xf32>
    %643 = arith.mulf %641, %642 : vector<8x8xf32>
    %644 = arith.addf %643, %521 : vector<8x8xf32>
    %cst_213 = arith.constant dense<0xFF800000> : vector<8xf32>
    %645 = vector.multi_reduction <maximumf>, %644, %cst_213 [1] : vector<8x8xf32> to vector<8xf32>
    %646 = vector.shape_cast %645 : vector<8xf32> to vector<8x1xf32>
    %647 = vector.broadcast %646 : vector<8x1xf32> to vector<8x8xf32>
    %648 = arith.subf %644, %647 : vector<8x8xf32>
    %649 = math.exp %648 : vector<8x8xf32>
    %cst_214 = arith.constant dense<0.000000e+00> : vector<8xf32>
    %650 = vector.multi_reduction <add>, %649, %cst_214 [1] : vector<8x8xf32> to vector<8xf32>
    %651 = vector.shape_cast %650 : vector<8xf32> to vector<8x1xf32>
    %652 = tpu.reciprocal %651 {approx = true} : vector<8x1xf32> -> vector<8x1xf32>
    %653 = vector.broadcast %652 : vector<8x1xf32> to vector<8x8xf32>
    %654 = arith.mulf %649, %653 : vector<8x8xf32>
    %655 = vector.extract_strided_slice %618 {offsets = [0, 8], sizes = [8, 8], strides = [1, 1]} : vector<8x32xf32> to vector<8x8xf32>
    %cst_215 = arith.constant dense<0.000000e+00> : vector<8x8xf32>
    %656 = tpu.matmul %654, %655, %cst_215 {dimension_numbers = #tpu.dot_dimension_numbers<[1], [0], [0], [1], [0, 0, 1, 1], [], []>} : vector<8x8xf32>, vector<8x8xf32>, vector<8x8xf32> -> vector<8x8xf32>
    %657 = vector.extract_strided_slice %616 {offsets = [0, 16], sizes = [8, 8], strides = [1, 1]} : vector<8x32xf32> to vector<8x8xf32>
    %658 = vector.extract_strided_slice %617 {offsets = [0, 16], sizes = [8, 8], strides = [1, 1]} : vector<8x32xf32> to vector<8x8xf32>
    %659 = tpu.transpose %658, [1, 0] : vector<8x8xf32> -> vector<8x8xf32>
    %cst_216 = arith.constant dense<0.000000e+00> : vector<8x8xf32>
    %660 = tpu.matmul %657, %659, %cst_216 {dimension_numbers = #tpu.dot_dimension_numbers<[1], [0], [0], [1], [0, 0, 1, 1], [], []>} : vector<8x8xf32>, vector<8x8xf32>, vector<8x8xf32> -> vector<8x8xf32>
    %cst_217 = arith.constant 0.353553385 : f32
    %661 = vector.broadcast %cst_217 : f32 to vector<8x8xf32>
    %662 = arith.mulf %660, %661 : vector<8x8xf32>
    %663 = arith.addf %662, %521 : vector<8x8xf32>
    %cst_218 = arith.constant dense<0xFF800000> : vector<8xf32>
    %664 = vector.multi_reduction <maximumf>, %663, %cst_218 [1] : vector<8x8xf32> to vector<8xf32>
    %665 = vector.shape_cast %664 : vector<8xf32> to vector<8x1xf32>
    %666 = vector.broadcast %665 : vector<8x1xf32> to vector<8x8xf32>
    %667 = arith.subf %663, %666 : vector<8x8xf32>
    %668 = math.exp %667 : vector<8x8xf32>
    %cst_219 = arith.constant dense<0.000000e+00> : vector<8xf32>
    %669 = vector.multi_reduction <add>, %668, %cst_219 [1] : vector<8x8xf32> to vector<8xf32>
    %670 = vector.shape_cast %669 : vector<8xf32> to vector<8x1xf32>
    %671 = tpu.reciprocal %670 {approx = true} : vector<8x1xf32> -> vector<8x1xf32>
    %672 = vector.broadcast %671 : vector<8x1xf32> to vector<8x8xf32>
    %673 = arith.mulf %668, %672 : vector<8x8xf32>
    %674 = vector.extract_strided_slice %618 {offsets = [0, 16], sizes = [8, 8], strides = [1, 1]} : vector<8x32xf32> to vector<8x8xf32>
    %cst_220 = arith.constant dense<0.000000e+00> : vector<8x8xf32>
    %675 = tpu.matmul %673, %674, %cst_220 {dimension_numbers = #tpu.dot_dimension_numbers<[1], [0], [0], [1], [0, 0, 1, 1], [], []>} : vector<8x8xf32>, vector<8x8xf32>, vector<8x8xf32> -> vector<8x8xf32>
    %676 = vector.extract_strided_slice %616 {offsets = [0, 24], sizes = [8, 8], strides = [1, 1]} : vector<8x32xf32> to vector<8x8xf32>
    %677 = vector.extract_strided_slice %617 {offsets = [0, 24], sizes = [8, 8], strides = [1, 1]} : vector<8x32xf32> to vector<8x8xf32>
    %678 = tpu.transpose %677, [1, 0] : vector<8x8xf32> -> vector<8x8xf32>
    %cst_221 = arith.constant dense<0.000000e+00> : vector<8x8xf32>
    %679 = tpu.matmul %676, %678, %cst_221 {dimension_numbers = #tpu.dot_dimension_numbers<[1], [0], [0], [1], [0, 0, 1, 1], [], []>} : vector<8x8xf32>, vector<8x8xf32>, vector<8x8xf32> -> vector<8x8xf32>
    %cst_222 = arith.constant 0.353553385 : f32
    %680 = vector.broadcast %cst_222 : f32 to vector<8x8xf32>
    %681 = arith.mulf %679, %680 : vector<8x8xf32>
    %682 = arith.addf %681, %521 : vector<8x8xf32>
    %cst_223 = arith.constant dense<0xFF800000> : vector<8xf32>
    %683 = vector.multi_reduction <maximumf>, %682, %cst_223 [1] : vector<8x8xf32> to vector<8xf32>
    %684 = vector.shape_cast %683 : vector<8xf32> to vector<8x1xf32>
    %685 = vector.broadcast %684 : vector<8x1xf32> to vector<8x8xf32>
    %686 = arith.subf %682, %685 : vector<8x8xf32>
    %687 = math.exp %686 : vector<8x8xf32>
    %cst_224 = arith.constant dense<0.000000e+00> : vector<8xf32>
    %688 = vector.multi_reduction <add>, %687, %cst_224 [1] : vector<8x8xf32> to vector<8xf32>
    %689 = vector.shape_cast %688 : vector<8xf32> to vector<8x1xf32>
    %690 = tpu.reciprocal %689 {approx = true} : vector<8x1xf32> -> vector<8x1xf32>
    %691 = vector.broadcast %690 : vector<8x1xf32> to vector<8x8xf32>
    %692 = arith.mulf %687, %691 : vector<8x8xf32>
    %693 = vector.extract_strided_slice %618 {offsets = [0, 24], sizes = [8, 8], strides = [1, 1]} : vector<8x32xf32> to vector<8x8xf32>
    %cst_225 = arith.constant dense<0.000000e+00> : vector<8x8xf32>
    %694 = tpu.matmul %692, %693, %cst_225 {dimension_numbers = #tpu.dot_dimension_numbers<[1], [0], [0], [1], [0, 0, 1, 1], [], []>} : vector<8x8xf32>, vector<8x8xf32>, vector<8x8xf32> -> vector<8x8xf32>
    %695 = tpu.concatenate %637, %656, %675, %694 in 1 : vector<8x8xf32>, vector<8x8xf32>, vector<8x8xf32>, vector<8x8xf32> -> vector<8x32xf32>
    %696 = tpu.concatenate %615, %695 in 0 : vector<8x32xf32>, vector<8x32xf32> -> vector<16x32xf32>
    %697 = vector.extract_strided_slice %525 {offsets = [0, 96], sizes = [32, 32], strides = [1, 1]} : vector<32x128xf32> to vector<32x32xf32>
    %cst_226 = arith.constant dense<0.000000e+00> : vector<16x32xf32>
    %698 = tpu.matmul %696, %697, %cst_226 {dimension_numbers = #tpu.dot_dimension_numbers<[1], [0], [0], [1], [0, 0, 1, 1], [], []>} : vector<16x32xf32>, vector<32x32xf32>, vector<16x32xf32> -> vector<16x32xf32>
    %699 = vector.extract_strided_slice %527 {offsets = [0, 96], sizes = [1, 32], strides = [1, 1]} : vector<1x128xf32> to vector<1x32xf32>
    %700 = vector.broadcast %699 : vector<1x32xf32> to vector<16x32xf32>
    %701 = arith.addf %698, %700 : vector<16x32xf32>
    %702 = arith.addf %515, %701 : vector<16x32xf32>
    %703 = vector.extract_strided_slice %523 {offsets = [0, 0], sizes = [1, 32], strides = [1, 1]} : vector<6x32xf32> to vector<1x32xf32>
    %704 = vector.extract_strided_slice %523 {offsets = [1, 0], sizes = [1, 32], strides = [1, 1]} : vector<6x32xf32> to vector<1x32xf32>
    %cst_227 = arith.constant dense<0.000000e+00> : vector<16xf32>
    %705 = vector.multi_reduction <add>, %702, %cst_227 [1] : vector<16x32xf32> to vector<16xf32>
    %706 = vector.shape_cast %705 : vector<16xf32> to vector<16x1xf32>
    %cst_228 = arith.constant 3.200000e+01 : f32
    %707 = vector.broadcast %cst_228 : f32 to vector<16x1xf32>
    %708 = arith.divf %706, %707 : vector<16x1xf32>
    %709 = vector.broadcast %708 : vector<16x1xf32> to vector<16x32xf32>
    %710 = arith.subf %702, %709 : vector<16x32xf32>
    %711 = arith.mulf %710, %710 : vector<16x32xf32>
    %cst_229 = arith.constant dense<0.000000e+00> : vector<16xf32>
    %712 = vector.multi_reduction <add>, %711, %cst_229 [1] : vector<16x32xf32> to vector<16xf32>
    %713 = vector.shape_cast %712 : vector<16xf32> to vector<16x1xf32>
    %cst_230 = arith.constant 3.200000e+01 : f32
    %714 = vector.broadcast %cst_230 : f32 to vector<16x1xf32>
    %715 = arith.divf %713, %714 : vector<16x1xf32>
    %cst_231 = arith.constant 9.99999974E-6 : f32
    %716 = vector.broadcast %cst_231 : f32 to vector<16x1xf32>
    %717 = arith.addf %715, %716 : vector<16x1xf32>
    %718 = math.rsqrt %717 : vector<16x1xf32>
    %719 = vector.broadcast %718 : vector<16x1xf32> to vector<16x32xf32>
    %720 = arith.mulf %710, %719 : vector<16x32xf32>
    %721 = vector.broadcast %703 : vector<1x32xf32> to vector<16x32xf32>
    %722 = arith.mulf %720, %721 : vector<16x32xf32>
    %723 = vector.broadcast %704 : vector<1x32xf32> to vector<16x32xf32>
    %724 = arith.addf %722, %723 : vector<16x32xf32>
    %c0_232 = arith.constant 0 : index
    %c0_233 = arith.constant 0 : index
    %c0_234 = arith.constant 0 : index
    %725 = vector.load %arg16[%c0_232, %c0_233, %c0_234] : memref<2x32x128xf32, #tpu.memory_space<vmem>>, vector<1x32x128xf32>
    %726 = vector.shape_cast %725 : vector<1x32x128xf32> to vector<32x128xf32>
    %c0_235 = arith.constant 0 : index
    %c0_236 = arith.constant 0 : index
    %c0_237 = arith.constant 0 : index
    %727 = vector.load %arg17[%c0_235, %c0_236, %c0_237] : memref<2x1x128xf32, #tpu.memory_space<vmem>>, vector<1x1x128xf32>
    %728 = vector.shape_cast %727 : vector<1x1x128xf32> to vector<1x128xf32>
    %729 = vector.extract_strided_slice %726 {offsets = [0, 0], sizes = [32, 32], strides = [1, 1]} : vector<32x128xf32> to vector<32x32xf32>
    %cst_238 = arith.constant dense<0.000000e+00> : vector<16x32xf32>
    %730 = tpu.matmul %724, %729, %cst_238 {dimension_numbers = #tpu.dot_dimension_numbers<[1], [0], [0], [1], [0, 0, 1, 1], [], []>} : vector<16x32xf32>, vector<32x32xf32>, vector<16x32xf32> -> vector<16x32xf32>
    %731 = vector.extract_strided_slice %728 {offsets = [0, 0], sizes = [1, 32], strides = [1, 1]} : vector<1x128xf32> to vector<1x32xf32>
    %732 = vector.broadcast %731 : vector<1x32xf32> to vector<16x32xf32>
    %733 = arith.addf %730, %732 : vector<16x32xf32>
    %734 = vector.extract_strided_slice %726 {offsets = [0, 32], sizes = [32, 64], strides = [1, 1]} : vector<32x128xf32> to vector<32x64xf32>
    %cst_239 = arith.constant dense<0.000000e+00> : vector<20x64xf32>
    %735 = tpu.matmul %502, %734, %cst_239 {dimension_numbers = #tpu.dot_dimension_numbers<[1], [0], [0], [1], [0, 0, 1, 1], [], []>} : vector<20x32xf32>, vector<32x64xf32>, vector<20x64xf32> -> vector<20x64xf32>
    %736 = vector.extract_strided_slice %728 {offsets = [0, 32], sizes = [1, 64], strides = [1, 1]} : vector<1x128xf32> to vector<1x64xf32>
    %737 = vector.broadcast %736 : vector<1x64xf32> to vector<20x64xf32>
    %738 = arith.addf %735, %737 : vector<20x64xf32>
    %739 = vector.extract_strided_slice %738 {offsets = [0, 0], sizes = [20, 32], strides = [1, 1]} : vector<20x64xf32> to vector<20x32xf32>
    %740 = vector.extract_strided_slice %738 {offsets = [0, 32], sizes = [20, 32], strides = [1, 1]} : vector<20x64xf32> to vector<20x32xf32>
    %741 = vector.extract_strided_slice %733 {offsets = [0, 0], sizes = [8, 32], strides = [1, 1]} : vector<16x32xf32> to vector<8x32xf32>
    %742 = vector.extract_strided_slice %739 {offsets = [0, 0], sizes = [10, 32], strides = [1, 1]} : vector<20x32xf32> to vector<10x32xf32>
    %743 = vector.extract_strided_slice %740 {offsets = [0, 0], sizes = [10, 32], strides = [1, 1]} : vector<20x32xf32> to vector<10x32xf32>
    %744 = vector.extract_strided_slice %741 {offsets = [0, 0], sizes = [8, 8], strides = [1, 1]} : vector<8x32xf32> to vector<8x8xf32>
    %745 = vector.extract_strided_slice %742 {offsets = [0, 0], sizes = [10, 8], strides = [1, 1]} : vector<10x32xf32> to vector<10x8xf32>
    %746 = tpu.transpose %745, [1, 0] : vector<10x8xf32> -> vector<8x10xf32>
    %cst_240 = arith.constant dense<0.000000e+00> : vector<8x10xf32>
    %747 = tpu.matmul %744, %746, %cst_240 {dimension_numbers = #tpu.dot_dimension_numbers<[1], [0], [0], [1], [0, 0, 1, 1], [], []>} : vector<8x8xf32>, vector<8x10xf32>, vector<8x10xf32> -> vector<8x10xf32>
    %cst_241 = arith.constant 0.353553385 : f32
    %748 = vector.broadcast %cst_241 : f32 to vector<8x10xf32>
    %749 = arith.mulf %747, %748 : vector<8x10xf32>
    %cst_242 = arith.constant dense<0xFF800000> : vector<8xf32>
    %750 = vector.multi_reduction <maximumf>, %749, %cst_242 [1] : vector<8x10xf32> to vector<8xf32>
    %751 = vector.shape_cast %750 : vector<8xf32> to vector<8x1xf32>
    %752 = vector.broadcast %751 : vector<8x1xf32> to vector<8x10xf32>
    %753 = arith.subf %749, %752 : vector<8x10xf32>
    %754 = math.exp %753 : vector<8x10xf32>
    %cst_243 = arith.constant dense<0.000000e+00> : vector<8xf32>
    %755 = vector.multi_reduction <add>, %754, %cst_243 [1] : vector<8x10xf32> to vector<8xf32>
    %756 = vector.shape_cast %755 : vector<8xf32> to vector<8x1xf32>
    %757 = tpu.reciprocal %756 {approx = true} : vector<8x1xf32> -> vector<8x1xf32>
    %758 = vector.broadcast %757 : vector<8x1xf32> to vector<8x10xf32>
    %759 = arith.mulf %754, %758 : vector<8x10xf32>
    %760 = vector.extract_strided_slice %743 {offsets = [0, 0], sizes = [10, 8], strides = [1, 1]} : vector<10x32xf32> to vector<10x8xf32>
    %cst_244 = arith.constant dense<0.000000e+00> : vector<8x8xf32>
    %761 = tpu.matmul %759, %760, %cst_244 {dimension_numbers = #tpu.dot_dimension_numbers<[1], [0], [0], [1], [0, 0, 1, 1], [], []>} : vector<8x10xf32>, vector<10x8xf32>, vector<8x8xf32> -> vector<8x8xf32>
    %762 = vector.extract_strided_slice %741 {offsets = [0, 8], sizes = [8, 8], strides = [1, 1]} : vector<8x32xf32> to vector<8x8xf32>
    %763 = vector.extract_strided_slice %742 {offsets = [0, 8], sizes = [10, 8], strides = [1, 1]} : vector<10x32xf32> to vector<10x8xf32>
    %764 = tpu.transpose %763, [1, 0] : vector<10x8xf32> -> vector<8x10xf32>
    %cst_245 = arith.constant dense<0.000000e+00> : vector<8x10xf32>
    %765 = tpu.matmul %762, %764, %cst_245 {dimension_numbers = #tpu.dot_dimension_numbers<[1], [0], [0], [1], [0, 0, 1, 1], [], []>} : vector<8x8xf32>, vector<8x10xf32>, vector<8x10xf32> -> vector<8x10xf32>
    %cst_246 = arith.constant 0.353553385 : f32
    %766 = vector.broadcast %cst_246 : f32 to vector<8x10xf32>
    %767 = arith.mulf %765, %766 : vector<8x10xf32>
    %cst_247 = arith.constant dense<0xFF800000> : vector<8xf32>
    %768 = vector.multi_reduction <maximumf>, %767, %cst_247 [1] : vector<8x10xf32> to vector<8xf32>
    %769 = vector.shape_cast %768 : vector<8xf32> to vector<8x1xf32>
    %770 = vector.broadcast %769 : vector<8x1xf32> to vector<8x10xf32>
    %771 = arith.subf %767, %770 : vector<8x10xf32>
    %772 = math.exp %771 : vector<8x10xf32>
    %cst_248 = arith.constant dense<0.000000e+00> : vector<8xf32>
    %773 = vector.multi_reduction <add>, %772, %cst_248 [1] : vector<8x10xf32> to vector<8xf32>
    %774 = vector.shape_cast %773 : vector<8xf32> to vector<8x1xf32>
    %775 = tpu.reciprocal %774 {approx = true} : vector<8x1xf32> -> vector<8x1xf32>
    %776 = vector.broadcast %775 : vector<8x1xf32> to vector<8x10xf32>
    %777 = arith.mulf %772, %776 : vector<8x10xf32>
    %778 = vector.extract_strided_slice %743 {offsets = [0, 8], sizes = [10, 8], strides = [1, 1]} : vector<10x32xf32> to vector<10x8xf32>
    %cst_249 = arith.constant dense<0.000000e+00> : vector<8x8xf32>
    %779 = tpu.matmul %777, %778, %cst_249 {dimension_numbers = #tpu.dot_dimension_numbers<[1], [0], [0], [1], [0, 0, 1, 1], [], []>} : vector<8x10xf32>, vector<10x8xf32>, vector<8x8xf32> -> vector<8x8xf32>
    %780 = vector.extract_strided_slice %741 {offsets = [0, 16], sizes = [8, 8], strides = [1, 1]} : vector<8x32xf32> to vector<8x8xf32>
    %781 = vector.extract_strided_slice %742 {offsets = [0, 16], sizes = [10, 8], strides = [1, 1]} : vector<10x32xf32> to vector<10x8xf32>
    %782 = tpu.transpose %781, [1, 0] : vector<10x8xf32> -> vector<8x10xf32>
    %cst_250 = arith.constant dense<0.000000e+00> : vector<8x10xf32>
    %783 = tpu.matmul %780, %782, %cst_250 {dimension_numbers = #tpu.dot_dimension_numbers<[1], [0], [0], [1], [0, 0, 1, 1], [], []>} : vector<8x8xf32>, vector<8x10xf32>, vector<8x10xf32> -> vector<8x10xf32>
    %cst_251 = arith.constant 0.353553385 : f32
    %784 = vector.broadcast %cst_251 : f32 to vector<8x10xf32>
    %785 = arith.mulf %783, %784 : vector<8x10xf32>
    %cst_252 = arith.constant dense<0xFF800000> : vector<8xf32>
    %786 = vector.multi_reduction <maximumf>, %785, %cst_252 [1] : vector<8x10xf32> to vector<8xf32>
    %787 = vector.shape_cast %786 : vector<8xf32> to vector<8x1xf32>
    %788 = vector.broadcast %787 : vector<8x1xf32> to vector<8x10xf32>
    %789 = arith.subf %785, %788 : vector<8x10xf32>
    %790 = math.exp %789 : vector<8x10xf32>
    %cst_253 = arith.constant dense<0.000000e+00> : vector<8xf32>
    %791 = vector.multi_reduction <add>, %790, %cst_253 [1] : vector<8x10xf32> to vector<8xf32>
    %792 = vector.shape_cast %791 : vector<8xf32> to vector<8x1xf32>
    %793 = tpu.reciprocal %792 {approx = true} : vector<8x1xf32> -> vector<8x1xf32>
    %794 = vector.broadcast %793 : vector<8x1xf32> to vector<8x10xf32>
    %795 = arith.mulf %790, %794 : vector<8x10xf32>
    %796 = vector.extract_strided_slice %743 {offsets = [0, 16], sizes = [10, 8], strides = [1, 1]} : vector<10x32xf32> to vector<10x8xf32>
    %cst_254 = arith.constant dense<0.000000e+00> : vector<8x8xf32>
    %797 = tpu.matmul %795, %796, %cst_254 {dimension_numbers = #tpu.dot_dimension_numbers<[1], [0], [0], [1], [0, 0, 1, 1], [], []>} : vector<8x10xf32>, vector<10x8xf32>, vector<8x8xf32> -> vector<8x8xf32>
    %798 = vector.extract_strided_slice %741 {offsets = [0, 24], sizes = [8, 8], strides = [1, 1]} : vector<8x32xf32> to vector<8x8xf32>
    %799 = vector.extract_strided_slice %742 {offsets = [0, 24], sizes = [10, 8], strides = [1, 1]} : vector<10x32xf32> to vector<10x8xf32>
    %800 = tpu.transpose %799, [1, 0] : vector<10x8xf32> -> vector<8x10xf32>
    %cst_255 = arith.constant dense<0.000000e+00> : vector<8x10xf32>
    %801 = tpu.matmul %798, %800, %cst_255 {dimension_numbers = #tpu.dot_dimension_numbers<[1], [0], [0], [1], [0, 0, 1, 1], [], []>} : vector<8x8xf32>, vector<8x10xf32>, vector<8x10xf32> -> vector<8x10xf32>
    %cst_256 = arith.constant 0.353553385 : f32
    %802 = vector.broadcast %cst_256 : f32 to vector<8x10xf32>
    %803 = arith.mulf %801, %802 : vector<8x10xf32>
    %cst_257 = arith.constant dense<0xFF800000> : vector<8xf32>
    %804 = vector.multi_reduction <maximumf>, %803, %cst_257 [1] : vector<8x10xf32> to vector<8xf32>
    %805 = vector.shape_cast %804 : vector<8xf32> to vector<8x1xf32>
    %806 = vector.broadcast %805 : vector<8x1xf32> to vector<8x10xf32>
    %807 = arith.subf %803, %806 : vector<8x10xf32>
    %808 = math.exp %807 : vector<8x10xf32>
    %cst_258 = arith.constant dense<0.000000e+00> : vector<8xf32>
    %809 = vector.multi_reduction <add>, %808, %cst_258 [1] : vector<8x10xf32> to vector<8xf32>
    %810 = vector.shape_cast %809 : vector<8xf32> to vector<8x1xf32>
    %811 = tpu.reciprocal %810 {approx = true} : vector<8x1xf32> -> vector<8x1xf32>
    %812 = vector.broadcast %811 : vector<8x1xf32> to vector<8x10xf32>
    %813 = arith.mulf %808, %812 : vector<8x10xf32>
    %814 = vector.extract_strided_slice %743 {offsets = [0, 24], sizes = [10, 8], strides = [1, 1]} : vector<10x32xf32> to vector<10x8xf32>
    %cst_259 = arith.constant dense<0.000000e+00> : vector<8x8xf32>
    %815 = tpu.matmul %813, %814, %cst_259 {dimension_numbers = #tpu.dot_dimension_numbers<[1], [0], [0], [1], [0, 0, 1, 1], [], []>} : vector<8x10xf32>, vector<10x8xf32>, vector<8x8xf32> -> vector<8x8xf32>
    %816 = tpu.concatenate %761, %779, %797, %815 in 1 : vector<8x8xf32>, vector<8x8xf32>, vector<8x8xf32>, vector<8x8xf32> -> vector<8x32xf32>
    %817 = vector.extract_strided_slice %733 {offsets = [8, 0], sizes = [8, 32], strides = [1, 1]} : vector<16x32xf32> to vector<8x32xf32>
    %818 = vector.extract_strided_slice %739 {offsets = [10, 0], sizes = [10, 32], strides = [1, 1]} : vector<20x32xf32> to vector<10x32xf32>
    %819 = vector.extract_strided_slice %740 {offsets = [10, 0], sizes = [10, 32], strides = [1, 1]} : vector<20x32xf32> to vector<10x32xf32>
    %820 = vector.extract_strided_slice %817 {offsets = [0, 0], sizes = [8, 8], strides = [1, 1]} : vector<8x32xf32> to vector<8x8xf32>
    %821 = vector.extract_strided_slice %818 {offsets = [0, 0], sizes = [10, 8], strides = [1, 1]} : vector<10x32xf32> to vector<10x8xf32>
    %822 = tpu.transpose %821, [1, 0] : vector<10x8xf32> -> vector<8x10xf32>
    %cst_260 = arith.constant dense<0.000000e+00> : vector<8x10xf32>
    %823 = tpu.matmul %820, %822, %cst_260 {dimension_numbers = #tpu.dot_dimension_numbers<[1], [0], [0], [1], [0, 0, 1, 1], [], []>} : vector<8x8xf32>, vector<8x10xf32>, vector<8x10xf32> -> vector<8x10xf32>
    %cst_261 = arith.constant 0.353553385 : f32
    %824 = vector.broadcast %cst_261 : f32 to vector<8x10xf32>
    %825 = arith.mulf %823, %824 : vector<8x10xf32>
    %cst_262 = arith.constant dense<0xFF800000> : vector<8xf32>
    %826 = vector.multi_reduction <maximumf>, %825, %cst_262 [1] : vector<8x10xf32> to vector<8xf32>
    %827 = vector.shape_cast %826 : vector<8xf32> to vector<8x1xf32>
    %828 = vector.broadcast %827 : vector<8x1xf32> to vector<8x10xf32>
    %829 = arith.subf %825, %828 : vector<8x10xf32>
    %830 = math.exp %829 : vector<8x10xf32>
    %cst_263 = arith.constant dense<0.000000e+00> : vector<8xf32>
    %831 = vector.multi_reduction <add>, %830, %cst_263 [1] : vector<8x10xf32> to vector<8xf32>
    %832 = vector.shape_cast %831 : vector<8xf32> to vector<8x1xf32>
    %833 = tpu.reciprocal %832 {approx = true} : vector<8x1xf32> -> vector<8x1xf32>
    %834 = vector.broadcast %833 : vector<8x1xf32> to vector<8x10xf32>
    %835 = arith.mulf %830, %834 : vector<8x10xf32>
    %836 = vector.extract_strided_slice %819 {offsets = [0, 0], sizes = [10, 8], strides = [1, 1]} : vector<10x32xf32> to vector<10x8xf32>
    %cst_264 = arith.constant dense<0.000000e+00> : vector<8x8xf32>
    %837 = tpu.matmul %835, %836, %cst_264 {dimension_numbers = #tpu.dot_dimension_numbers<[1], [0], [0], [1], [0, 0, 1, 1], [], []>} : vector<8x10xf32>, vector<10x8xf32>, vector<8x8xf32> -> vector<8x8xf32>
    %838 = vector.extract_strided_slice %817 {offsets = [0, 8], sizes = [8, 8], strides = [1, 1]} : vector<8x32xf32> to vector<8x8xf32>
    %839 = vector.extract_strided_slice %818 {offsets = [0, 8], sizes = [10, 8], strides = [1, 1]} : vector<10x32xf32> to vector<10x8xf32>
    %840 = tpu.transpose %839, [1, 0] : vector<10x8xf32> -> vector<8x10xf32>
    %cst_265 = arith.constant dense<0.000000e+00> : vector<8x10xf32>
    %841 = tpu.matmul %838, %840, %cst_265 {dimension_numbers = #tpu.dot_dimension_numbers<[1], [0], [0], [1], [0, 0, 1, 1], [], []>} : vector<8x8xf32>, vector<8x10xf32>, vector<8x10xf32> -> vector<8x10xf32>
    %cst_266 = arith.constant 0.353553385 : f32
    %842 = vector.broadcast %cst_266 : f32 to vector<8x10xf32>
    %843 = arith.mulf %841, %842 : vector<8x10xf32>
    %cst_267 = arith.constant dense<0xFF800000> : vector<8xf32>
    %844 = vector.multi_reduction <maximumf>, %843, %cst_267 [1] : vector<8x10xf32> to vector<8xf32>
    %845 = vector.shape_cast %844 : vector<8xf32> to vector<8x1xf32>
    %846 = vector.broadcast %845 : vector<8x1xf32> to vector<8x10xf32>
    %847 = arith.subf %843, %846 : vector<8x10xf32>
    %848 = math.exp %847 : vector<8x10xf32>
    %cst_268 = arith.constant dense<0.000000e+00> : vector<8xf32>
    %849 = vector.multi_reduction <add>, %848, %cst_268 [1] : vector<8x10xf32> to vector<8xf32>
    %850 = vector.shape_cast %849 : vector<8xf32> to vector<8x1xf32>
    %851 = tpu.reciprocal %850 {approx = true} : vector<8x1xf32> -> vector<8x1xf32>
    %852 = vector.broadcast %851 : vector<8x1xf32> to vector<8x10xf32>
    %853 = arith.mulf %848, %852 : vector<8x10xf32>
    %854 = vector.extract_strided_slice %819 {offsets = [0, 8], sizes = [10, 8], strides = [1, 1]} : vector<10x32xf32> to vector<10x8xf32>
    %cst_269 = arith.constant dense<0.000000e+00> : vector<8x8xf32>
    %855 = tpu.matmul %853, %854, %cst_269 {dimension_numbers = #tpu.dot_dimension_numbers<[1], [0], [0], [1], [0, 0, 1, 1], [], []>} : vector<8x10xf32>, vector<10x8xf32>, vector<8x8xf32> -> vector<8x8xf32>
    %856 = vector.extract_strided_slice %817 {offsets = [0, 16], sizes = [8, 8], strides = [1, 1]} : vector<8x32xf32> to vector<8x8xf32>
    %857 = vector.extract_strided_slice %818 {offsets = [0, 16], sizes = [10, 8], strides = [1, 1]} : vector<10x32xf32> to vector<10x8xf32>
    %858 = tpu.transpose %857, [1, 0] : vector<10x8xf32> -> vector<8x10xf32>
    %cst_270 = arith.constant dense<0.000000e+00> : vector<8x10xf32>
    %859 = tpu.matmul %856, %858, %cst_270 {dimension_numbers = #tpu.dot_dimension_numbers<[1], [0], [0], [1], [0, 0, 1, 1], [], []>} : vector<8x8xf32>, vector<8x10xf32>, vector<8x10xf32> -> vector<8x10xf32>
    %cst_271 = arith.constant 0.353553385 : f32
    %860 = vector.broadcast %cst_271 : f32 to vector<8x10xf32>
    %861 = arith.mulf %859, %860 : vector<8x10xf32>
    %cst_272 = arith.constant dense<0xFF800000> : vector<8xf32>
    %862 = vector.multi_reduction <maximumf>, %861, %cst_272 [1] : vector<8x10xf32> to vector<8xf32>
    %863 = vector.shape_cast %862 : vector<8xf32> to vector<8x1xf32>
    %864 = vector.broadcast %863 : vector<8x1xf32> to vector<8x10xf32>
    %865 = arith.subf %861, %864 : vector<8x10xf32>
    %866 = math.exp %865 : vector<8x10xf32>
    %cst_273 = arith.constant dense<0.000000e+00> : vector<8xf32>
    %867 = vector.multi_reduction <add>, %866, %cst_273 [1] : vector<8x10xf32> to vector<8xf32>
    %868 = vector.shape_cast %867 : vector<8xf32> to vector<8x1xf32>
    %869 = tpu.reciprocal %868 {approx = true} : vector<8x1xf32> -> vector<8x1xf32>
    %870 = vector.broadcast %869 : vector<8x1xf32> to vector<8x10xf32>
    %871 = arith.mulf %866, %870 : vector<8x10xf32>
    %872 = vector.extract_strided_slice %819 {offsets = [0, 16], sizes = [10, 8], strides = [1, 1]} : vector<10x32xf32> to vector<10x8xf32>
    %cst_274 = arith.constant dense<0.000000e+00> : vector<8x8xf32>
    %873 = tpu.matmul %871, %872, %cst_274 {dimension_numbers = #tpu.dot_dimension_numbers<[1], [0], [0], [1], [0, 0, 1, 1], [], []>} : vector<8x10xf32>, vector<10x8xf32>, vector<8x8xf32> -> vector<8x8xf32>
    %874 = vector.extract_strided_slice %817 {offsets = [0, 24], sizes = [8, 8], strides = [1, 1]} : vector<8x32xf32> to vector<8x8xf32>
    %875 = vector.extract_strided_slice %818 {offsets = [0, 24], sizes = [10, 8], strides = [1, 1]} : vector<10x32xf32> to vector<10x8xf32>
    %876 = tpu.transpose %875, [1, 0] : vector<10x8xf32> -> vector<8x10xf32>
    %cst_275 = arith.constant dense<0.000000e+00> : vector<8x10xf32>
    %877 = tpu.matmul %874, %876, %cst_275 {dimension_numbers = #tpu.dot_dimension_numbers<[1], [0], [0], [1], [0, 0, 1, 1], [], []>} : vector<8x8xf32>, vector<8x10xf32>, vector<8x10xf32> -> vector<8x10xf32>
    %cst_276 = arith.constant 0.353553385 : f32
    %878 = vector.broadcast %cst_276 : f32 to vector<8x10xf32>
    %879 = arith.mulf %877, %878 : vector<8x10xf32>
    %cst_277 = arith.constant dense<0xFF800000> : vector<8xf32>
    %880 = vector.multi_reduction <maximumf>, %879, %cst_277 [1] : vector<8x10xf32> to vector<8xf32>
    %881 = vector.shape_cast %880 : vector<8xf32> to vector<8x1xf32>
    %882 = vector.broadcast %881 : vector<8x1xf32> to vector<8x10xf32>
    %883 = arith.subf %879, %882 : vector<8x10xf32>
    %884 = math.exp %883 : vector<8x10xf32>
    %cst_278 = arith.constant dense<0.000000e+00> : vector<8xf32>
    %885 = vector.multi_reduction <add>, %884, %cst_278 [1] : vector<8x10xf32> to vector<8xf32>
    %886 = vector.shape_cast %885 : vector<8xf32> to vector<8x1xf32>
    %887 = tpu.reciprocal %886 {approx = true} : vector<8x1xf32> -> vector<8x1xf32>
    %888 = vector.broadcast %887 : vector<8x1xf32> to vector<8x10xf32>
    %889 = arith.mulf %884, %888 : vector<8x10xf32>
    %890 = vector.extract_strided_slice %819 {offsets = [0, 24], sizes = [10, 8], strides = [1, 1]} : vector<10x32xf32> to vector<10x8xf32>
    %cst_279 = arith.constant dense<0.000000e+00> : vector<8x8xf32>
    %891 = tpu.matmul %889, %890, %cst_279 {dimension_numbers = #tpu.dot_dimension_numbers<[1], [0], [0], [1], [0, 0, 1, 1], [], []>} : vector<8x10xf32>, vector<10x8xf32>, vector<8x8xf32> -> vector<8x8xf32>
    %892 = tpu.concatenate %837, %855, %873, %891 in 1 : vector<8x8xf32>, vector<8x8xf32>, vector<8x8xf32>, vector<8x8xf32> -> vector<8x32xf32>
    %893 = tpu.concatenate %816, %892 in 0 : vector<8x32xf32>, vector<8x32xf32> -> vector<16x32xf32>
    %894 = vector.extract_strided_slice %726 {offsets = [0, 96], sizes = [32, 32], strides = [1, 1]} : vector<32x128xf32> to vector<32x32xf32>
    %cst_280 = arith.constant dense<0.000000e+00> : vector<16x32xf32>
    %895 = tpu.matmul %893, %894, %cst_280 {dimension_numbers = #tpu.dot_dimension_numbers<[1], [0], [0], [1], [0, 0, 1, 1], [], []>} : vector<16x32xf32>, vector<32x32xf32>, vector<16x32xf32> -> vector<16x32xf32>
    %896 = vector.extract_strided_slice %728 {offsets = [0, 96], sizes = [1, 32], strides = [1, 1]} : vector<1x128xf32> to vector<1x32xf32>
    %897 = vector.broadcast %896 : vector<1x32xf32> to vector<16x32xf32>
    %898 = arith.addf %895, %897 : vector<16x32xf32>
    %899 = arith.addf %724, %898 : vector<16x32xf32>
    %900 = vector.extract_strided_slice %523 {offsets = [2, 0], sizes = [1, 32], strides = [1, 1]} : vector<6x32xf32> to vector<1x32xf32>
    %901 = vector.extract_strided_slice %523 {offsets = [3, 0], sizes = [1, 32], strides = [1, 1]} : vector<6x32xf32> to vector<1x32xf32>
    %cst_281 = arith.constant dense<0.000000e+00> : vector<16xf32>
    %902 = vector.multi_reduction <add>, %899, %cst_281 [1] : vector<16x32xf32> to vector<16xf32>
    %903 = vector.shape_cast %902 : vector<16xf32> to vector<16x1xf32>
    %cst_282 = arith.constant 3.200000e+01 : f32
    %904 = vector.broadcast %cst_282 : f32 to vector<16x1xf32>
    %905 = arith.divf %903, %904 : vector<16x1xf32>
    %906 = vector.broadcast %905 : vector<16x1xf32> to vector<16x32xf32>
    %907 = arith.subf %899, %906 : vector<16x32xf32>
    %908 = arith.mulf %907, %907 : vector<16x32xf32>
    %cst_283 = arith.constant dense<0.000000e+00> : vector<16xf32>
    %909 = vector.multi_reduction <add>, %908, %cst_283 [1] : vector<16x32xf32> to vector<16xf32>
    %910 = vector.shape_cast %909 : vector<16xf32> to vector<16x1xf32>
    %cst_284 = arith.constant 3.200000e+01 : f32
    %911 = vector.broadcast %cst_284 : f32 to vector<16x1xf32>
    %912 = arith.divf %910, %911 : vector<16x1xf32>
    %cst_285 = arith.constant 9.99999974E-6 : f32
    %913 = vector.broadcast %cst_285 : f32 to vector<16x1xf32>
    %914 = arith.addf %912, %913 : vector<16x1xf32>
    %915 = math.rsqrt %914 : vector<16x1xf32>
    %916 = vector.broadcast %915 : vector<16x1xf32> to vector<16x32xf32>
    %917 = arith.mulf %907, %916 : vector<16x32xf32>
    %918 = vector.broadcast %900 : vector<1x32xf32> to vector<16x32xf32>
    %919 = arith.mulf %917, %918 : vector<16x32xf32>
    %920 = vector.broadcast %901 : vector<1x32xf32> to vector<16x32xf32>
    %921 = arith.addf %919, %920 : vector<16x32xf32>
    %c0_286 = arith.constant 0 : index
    %c0_287 = arith.constant 0 : index
    %c0_288 = arith.constant 0 : index
    %922 = vector.load %arg18[%c0_286, %c0_287, %c0_288] : memref<2x32x64xf32, #tpu.memory_space<vmem>>, vector<1x32x64xf32>
    %923 = vector.shape_cast %922 : vector<1x32x64xf32> to vector<32x64xf32>
    %c0_289 = arith.constant 0 : index
    %c0_290 = arith.constant 0 : index
    %c0_291 = arith.constant 0 : index
    %924 = vector.load %arg19[%c0_289, %c0_290, %c0_291] : memref<2x1x64xf32, #tpu.memory_space<vmem>>, vector<1x1x64xf32>
    %925 = vector.shape_cast %924 : vector<1x1x64xf32> to vector<1x64xf32>
    %c0_292 = arith.constant 0 : index
    %c0_293 = arith.constant 0 : index
    %c0_294 = arith.constant 0 : index
    %926 = vector.load %arg20[%c0_292, %c0_293, %c0_294] : memref<2x64x32xf32, #tpu.memory_space<vmem>>, vector<1x64x32xf32>
    %927 = vector.shape_cast %926 : vector<1x64x32xf32> to vector<64x32xf32>
    %c0_295 = arith.constant 0 : index
    %c0_296 = arith.constant 0 : index
    %c0_297 = arith.constant 0 : index
    %928 = vector.load %arg21[%c0_295, %c0_296, %c0_297] : memref<2x1x32xf32, #tpu.memory_space<vmem>>, vector<1x1x32xf32>
    %929 = vector.shape_cast %928 : vector<1x1x32xf32> to vector<1x32xf32>
    %cst_298 = arith.constant dense<0.000000e+00> : vector<16x64xf32>
    %930 = tpu.matmul %921, %923, %cst_298 {dimension_numbers = #tpu.dot_dimension_numbers<[1], [0], [0], [1], [0, 0, 1, 1], [], []>} : vector<16x32xf32>, vector<32x64xf32>, vector<16x64xf32> -> vector<16x64xf32>
    %931 = vector.broadcast %925 : vector<1x64xf32> to vector<16x64xf32>
    %932 = arith.addf %930, %931 : vector<16x64xf32>
    %cst_299 = arith.constant 0.000000e+00 : f32
    %933 = vector.broadcast %cst_299 : f32 to vector<16x64xf32>
    %934 = arith.maximumf %932, %933 : vector<16x64xf32>
    %cst_300 = arith.constant dense<0.000000e+00> : vector<16x32xf32>
    %935 = tpu.matmul %934, %927, %cst_300 {dimension_numbers = #tpu.dot_dimension_numbers<[1], [0], [0], [1], [0, 0, 1, 1], [], []>} : vector<16x64xf32>, vector<64x32xf32>, vector<16x32xf32> -> vector<16x32xf32>
    %936 = vector.broadcast %929 : vector<1x32xf32> to vector<16x32xf32>
    %937 = arith.addf %935, %936 : vector<16x32xf32>
    %938 = arith.addf %921, %937 : vector<16x32xf32>
    %939 = vector.extract_strided_slice %523 {offsets = [4, 0], sizes = [1, 32], strides = [1, 1]} : vector<6x32xf32> to vector<1x32xf32>
    %940 = vector.extract_strided_slice %523 {offsets = [5, 0], sizes = [1, 32], strides = [1, 1]} : vector<6x32xf32> to vector<1x32xf32>
    %cst_301 = arith.constant dense<0.000000e+00> : vector<16xf32>
    %941 = vector.multi_reduction <add>, %938, %cst_301 [1] : vector<16x32xf32> to vector<16xf32>
    %942 = vector.shape_cast %941 : vector<16xf32> to vector<16x1xf32>
    %cst_302 = arith.constant 3.200000e+01 : f32
    %943 = vector.broadcast %cst_302 : f32 to vector<16x1xf32>
    %944 = arith.divf %942, %943 : vector<16x1xf32>
    %945 = vector.broadcast %944 : vector<16x1xf32> to vector<16x32xf32>
    %946 = arith.subf %938, %945 : vector<16x32xf32>
    %947 = arith.mulf %946, %946 : vector<16x32xf32>
    %cst_303 = arith.constant dense<0.000000e+00> : vector<16xf32>
    %948 = vector.multi_reduction <add>, %947, %cst_303 [1] : vector<16x32xf32> to vector<16xf32>
    %949 = vector.shape_cast %948 : vector<16xf32> to vector<16x1xf32>
    %cst_304 = arith.constant 3.200000e+01 : f32
    %950 = vector.broadcast %cst_304 : f32 to vector<16x1xf32>
    %951 = arith.divf %949, %950 : vector<16x1xf32>
    %cst_305 = arith.constant 9.99999974E-6 : f32
    %952 = vector.broadcast %cst_305 : f32 to vector<16x1xf32>
    %953 = arith.addf %951, %952 : vector<16x1xf32>
    %954 = math.rsqrt %953 : vector<16x1xf32>
    %955 = vector.broadcast %954 : vector<16x1xf32> to vector<16x32xf32>
    %956 = arith.mulf %946, %955 : vector<16x32xf32>
    %957 = vector.broadcast %939 : vector<1x32xf32> to vector<16x32xf32>
    %958 = arith.mulf %956, %957 : vector<16x32xf32>
    %959 = vector.broadcast %940 : vector<1x32xf32> to vector<16x32xf32>
    %960 = arith.addf %958, %959 : vector<16x32xf32>
    %c1_306 = arith.constant 1 : index
    %c0_307 = arith.constant 0 : index
    %c0_308 = arith.constant 0 : index
    %961 = vector.load %arg22[%c1_306, %c0_307, %c0_308] : memref<2x6x32xf32, #tpu.memory_space<vmem>>, vector<1x6x32xf32>
    %962 = vector.shape_cast %961 : vector<1x6x32xf32> to vector<6x32xf32>
    %c1_309 = arith.constant 1 : index
    %c0_310 = arith.constant 0 : index
    %c0_311 = arith.constant 0 : index
    %963 = vector.load %arg14[%c1_309, %c0_310, %c0_311] : memref<2x32x128xf32, #tpu.memory_space<vmem>>, vector<1x32x128xf32>
    %964 = vector.shape_cast %963 : vector<1x32x128xf32> to vector<32x128xf32>
    %c1_312 = arith.constant 1 : index
    %c0_313 = arith.constant 0 : index
    %c0_314 = arith.constant 0 : index
    %965 = vector.load %arg15[%c1_312, %c0_313, %c0_314] : memref<2x1x128xf32, #tpu.memory_space<vmem>>, vector<1x1x128xf32>
    %966 = vector.shape_cast %965 : vector<1x1x128xf32> to vector<1x128xf32>
    %967 = vector.extract_strided_slice %964 {offsets = [0, 0], sizes = [32, 96], strides = [1, 1]} : vector<32x128xf32> to vector<32x96xf32>
    %cst_315 = arith.constant dense<0.000000e+00> : vector<16x96xf32>
    %968 = tpu.matmul %960, %967, %cst_315 {dimension_numbers = #tpu.dot_dimension_numbers<[1], [0], [0], [1], [0, 0, 1, 1], [], []>} : vector<16x32xf32>, vector<32x96xf32>, vector<16x96xf32> -> vector<16x96xf32>
    %969 = vector.extract_strided_slice %966 {offsets = [0, 0], sizes = [1, 96], strides = [1, 1]} : vector<1x128xf32> to vector<1x96xf32>
    %970 = vector.broadcast %969 : vector<1x96xf32> to vector<16x96xf32>
    %971 = arith.addf %968, %970 : vector<16x96xf32>
    %972 = vector.extract_strided_slice %971 {offsets = [0, 0], sizes = [16, 32], strides = [1, 1]} : vector<16x96xf32> to vector<16x32xf32>
    %973 = vector.extract_strided_slice %971 {offsets = [0, 32], sizes = [16, 32], strides = [1, 1]} : vector<16x96xf32> to vector<16x32xf32>
    %974 = vector.extract_strided_slice %971 {offsets = [0, 64], sizes = [16, 32], strides = [1, 1]} : vector<16x96xf32> to vector<16x32xf32>
    %975 = vector.extract_strided_slice %972 {offsets = [0, 0], sizes = [8, 32], strides = [1, 1]} : vector<16x32xf32> to vector<8x32xf32>
    %976 = vector.extract_strided_slice %973 {offsets = [0, 0], sizes = [8, 32], strides = [1, 1]} : vector<16x32xf32> to vector<8x32xf32>
    %977 = vector.extract_strided_slice %974 {offsets = [0, 0], sizes = [8, 32], strides = [1, 1]} : vector<16x32xf32> to vector<8x32xf32>
    %978 = vector.extract_strided_slice %975 {offsets = [0, 0], sizes = [8, 8], strides = [1, 1]} : vector<8x32xf32> to vector<8x8xf32>
    %979 = vector.extract_strided_slice %976 {offsets = [0, 0], sizes = [8, 8], strides = [1, 1]} : vector<8x32xf32> to vector<8x8xf32>
    %980 = tpu.transpose %979, [1, 0] : vector<8x8xf32> -> vector<8x8xf32>
    %cst_316 = arith.constant dense<0.000000e+00> : vector<8x8xf32>
    %981 = tpu.matmul %978, %980, %cst_316 {dimension_numbers = #tpu.dot_dimension_numbers<[1], [0], [0], [1], [0, 0, 1, 1], [], []>} : vector<8x8xf32>, vector<8x8xf32>, vector<8x8xf32> -> vector<8x8xf32>
    %cst_317 = arith.constant 0.353553385 : f32
    %982 = vector.broadcast %cst_317 : f32 to vector<8x8xf32>
    %983 = arith.mulf %981, %982 : vector<8x8xf32>
    %984 = arith.addf %983, %521 : vector<8x8xf32>
    %cst_318 = arith.constant dense<0xFF800000> : vector<8xf32>
    %985 = vector.multi_reduction <maximumf>, %984, %cst_318 [1] : vector<8x8xf32> to vector<8xf32>
    %986 = vector.shape_cast %985 : vector<8xf32> to vector<8x1xf32>
    %987 = vector.broadcast %986 : vector<8x1xf32> to vector<8x8xf32>
    %988 = arith.subf %984, %987 : vector<8x8xf32>
    %989 = math.exp %988 : vector<8x8xf32>
    %cst_319 = arith.constant dense<0.000000e+00> : vector<8xf32>
    %990 = vector.multi_reduction <add>, %989, %cst_319 [1] : vector<8x8xf32> to vector<8xf32>
    %991 = vector.shape_cast %990 : vector<8xf32> to vector<8x1xf32>
    %992 = tpu.reciprocal %991 {approx = true} : vector<8x1xf32> -> vector<8x1xf32>
    %993 = vector.broadcast %992 : vector<8x1xf32> to vector<8x8xf32>
    %994 = arith.mulf %989, %993 : vector<8x8xf32>
    %995 = vector.extract_strided_slice %977 {offsets = [0, 0], sizes = [8, 8], strides = [1, 1]} : vector<8x32xf32> to vector<8x8xf32>
    %cst_320 = arith.constant dense<0.000000e+00> : vector<8x8xf32>
    %996 = tpu.matmul %994, %995, %cst_320 {dimension_numbers = #tpu.dot_dimension_numbers<[1], [0], [0], [1], [0, 0, 1, 1], [], []>} : vector<8x8xf32>, vector<8x8xf32>, vector<8x8xf32> -> vector<8x8xf32>
    %997 = vector.extract_strided_slice %975 {offsets = [0, 8], sizes = [8, 8], strides = [1, 1]} : vector<8x32xf32> to vector<8x8xf32>
    %998 = vector.extract_strided_slice %976 {offsets = [0, 8], sizes = [8, 8], strides = [1, 1]} : vector<8x32xf32> to vector<8x8xf32>
    %999 = tpu.transpose %998, [1, 0] : vector<8x8xf32> -> vector<8x8xf32>
    %cst_321 = arith.constant dense<0.000000e+00> : vector<8x8xf32>
    %1000 = tpu.matmul %997, %999, %cst_321 {dimension_numbers = #tpu.dot_dimension_numbers<[1], [0], [0], [1], [0, 0, 1, 1], [], []>} : vector<8x8xf32>, vector<8x8xf32>, vector<8x8xf32> -> vector<8x8xf32>
    %cst_322 = arith.constant 0.353553385 : f32
    %1001 = vector.broadcast %cst_322 : f32 to vector<8x8xf32>
    %1002 = arith.mulf %1000, %1001 : vector<8x8xf32>
    %1003 = arith.addf %1002, %521 : vector<8x8xf32>
    %cst_323 = arith.constant dense<0xFF800000> : vector<8xf32>
    %1004 = vector.multi_reduction <maximumf>, %1003, %cst_323 [1] : vector<8x8xf32> to vector<8xf32>
    %1005 = vector.shape_cast %1004 : vector<8xf32> to vector<8x1xf32>
    %1006 = vector.broadcast %1005 : vector<8x1xf32> to vector<8x8xf32>
    %1007 = arith.subf %1003, %1006 : vector<8x8xf32>
    %1008 = math.exp %1007 : vector<8x8xf32>
    %cst_324 = arith.constant dense<0.000000e+00> : vector<8xf32>
    %1009 = vector.multi_reduction <add>, %1008, %cst_324 [1] : vector<8x8xf32> to vector<8xf32>
    %1010 = vector.shape_cast %1009 : vector<8xf32> to vector<8x1xf32>
    %1011 = tpu.reciprocal %1010 {approx = true} : vector<8x1xf32> -> vector<8x1xf32>
    %1012 = vector.broadcast %1011 : vector<8x1xf32> to vector<8x8xf32>
    %1013 = arith.mulf %1008, %1012 : vector<8x8xf32>
    %1014 = vector.extract_strided_slice %977 {offsets = [0, 8], sizes = [8, 8], strides = [1, 1]} : vector<8x32xf32> to vector<8x8xf32>
    %cst_325 = arith.constant dense<0.000000e+00> : vector<8x8xf32>
    %1015 = tpu.matmul %1013, %1014, %cst_325 {dimension_numbers = #tpu.dot_dimension_numbers<[1], [0], [0], [1], [0, 0, 1, 1], [], []>} : vector<8x8xf32>, vector<8x8xf32>, vector<8x8xf32> -> vector<8x8xf32>
    %1016 = vector.extract_strided_slice %975 {offsets = [0, 16], sizes = [8, 8], strides = [1, 1]} : vector<8x32xf32> to vector<8x8xf32>
    %1017 = vector.extract_strided_slice %976 {offsets = [0, 16], sizes = [8, 8], strides = [1, 1]} : vector<8x32xf32> to vector<8x8xf32>
    %1018 = tpu.transpose %1017, [1, 0] : vector<8x8xf32> -> vector<8x8xf32>
    %cst_326 = arith.constant dense<0.000000e+00> : vector<8x8xf32>
    %1019 = tpu.matmul %1016, %1018, %cst_326 {dimension_numbers = #tpu.dot_dimension_numbers<[1], [0], [0], [1], [0, 0, 1, 1], [], []>} : vector<8x8xf32>, vector<8x8xf32>, vector<8x8xf32> -> vector<8x8xf32>
    %cst_327 = arith.constant 0.353553385 : f32
    %1020 = vector.broadcast %cst_327 : f32 to vector<8x8xf32>
    %1021 = arith.mulf %1019, %1020 : vector<8x8xf32>
    %1022 = arith.addf %1021, %521 : vector<8x8xf32>
    %cst_328 = arith.constant dense<0xFF800000> : vector<8xf32>
    %1023 = vector.multi_reduction <maximumf>, %1022, %cst_328 [1] : vector<8x8xf32> to vector<8xf32>
    %1024 = vector.shape_cast %1023 : vector<8xf32> to vector<8x1xf32>
    %1025 = vector.broadcast %1024 : vector<8x1xf32> to vector<8x8xf32>
    %1026 = arith.subf %1022, %1025 : vector<8x8xf32>
    %1027 = math.exp %1026 : vector<8x8xf32>
    %cst_329 = arith.constant dense<0.000000e+00> : vector<8xf32>
    %1028 = vector.multi_reduction <add>, %1027, %cst_329 [1] : vector<8x8xf32> to vector<8xf32>
    %1029 = vector.shape_cast %1028 : vector<8xf32> to vector<8x1xf32>
    %1030 = tpu.reciprocal %1029 {approx = true} : vector<8x1xf32> -> vector<8x1xf32>
    %1031 = vector.broadcast %1030 : vector<8x1xf32> to vector<8x8xf32>
    %1032 = arith.mulf %1027, %1031 : vector<8x8xf32>
    %1033 = vector.extract_strided_slice %977 {offsets = [0, 16], sizes = [8, 8], strides = [1, 1]} : vector<8x32xf32> to vector<8x8xf32>
    %cst_330 = arith.constant dense<0.000000e+00> : vector<8x8xf32>
    %1034 = tpu.matmul %1032, %1033, %cst_330 {dimension_numbers = #tpu.dot_dimension_numbers<[1], [0], [0], [1], [0, 0, 1, 1], [], []>} : vector<8x8xf32>, vector<8x8xf32>, vector<8x8xf32> -> vector<8x8xf32>
    %1035 = vector.extract_strided_slice %975 {offsets = [0, 24], sizes = [8, 8], strides = [1, 1]} : vector<8x32xf32> to vector<8x8xf32>
    %1036 = vector.extract_strided_slice %976 {offsets = [0, 24], sizes = [8, 8], strides = [1, 1]} : vector<8x32xf32> to vector<8x8xf32>
    %1037 = tpu.transpose %1036, [1, 0] : vector<8x8xf32> -> vector<8x8xf32>
    %cst_331 = arith.constant dense<0.000000e+00> : vector<8x8xf32>
    %1038 = tpu.matmul %1035, %1037, %cst_331 {dimension_numbers = #tpu.dot_dimension_numbers<[1], [0], [0], [1], [0, 0, 1, 1], [], []>} : vector<8x8xf32>, vector<8x8xf32>, vector<8x8xf32> -> vector<8x8xf32>
    %cst_332 = arith.constant 0.353553385 : f32
    %1039 = vector.broadcast %cst_332 : f32 to vector<8x8xf32>
    %1040 = arith.mulf %1038, %1039 : vector<8x8xf32>
    %1041 = arith.addf %1040, %521 : vector<8x8xf32>
    %cst_333 = arith.constant dense<0xFF800000> : vector<8xf32>
    %1042 = vector.multi_reduction <maximumf>, %1041, %cst_333 [1] : vector<8x8xf32> to vector<8xf32>
    %1043 = vector.shape_cast %1042 : vector<8xf32> to vector<8x1xf32>
    %1044 = vector.broadcast %1043 : vector<8x1xf32> to vector<8x8xf32>
    %1045 = arith.subf %1041, %1044 : vector<8x8xf32>
    %1046 = math.exp %1045 : vector<8x8xf32>
    %cst_334 = arith.constant dense<0.000000e+00> : vector<8xf32>
    %1047 = vector.multi_reduction <add>, %1046, %cst_334 [1] : vector<8x8xf32> to vector<8xf32>
    %1048 = vector.shape_cast %1047 : vector<8xf32> to vector<8x1xf32>
    %1049 = tpu.reciprocal %1048 {approx = true} : vector<8x1xf32> -> vector<8x1xf32>
    %1050 = vector.broadcast %1049 : vector<8x1xf32> to vector<8x8xf32>
    %1051 = arith.mulf %1046, %1050 : vector<8x8xf32>
    %1052 = vector.extract_strided_slice %977 {offsets = [0, 24], sizes = [8, 8], strides = [1, 1]} : vector<8x32xf32> to vector<8x8xf32>
    %cst_335 = arith.constant dense<0.000000e+00> : vector<8x8xf32>
    %1053 = tpu.matmul %1051, %1052, %cst_335 {dimension_numbers = #tpu.dot_dimension_numbers<[1], [0], [0], [1], [0, 0, 1, 1], [], []>} : vector<8x8xf32>, vector<8x8xf32>, vector<8x8xf32> -> vector<8x8xf32>
    %1054 = tpu.concatenate %996, %1015, %1034, %1053 in 1 : vector<8x8xf32>, vector<8x8xf32>, vector<8x8xf32>, vector<8x8xf32> -> vector<8x32xf32>
    %1055 = vector.extract_strided_slice %972 {offsets = [8, 0], sizes = [8, 32], strides = [1, 1]} : vector<16x32xf32> to vector<8x32xf32>
    %1056 = vector.extract_strided_slice %973 {offsets = [8, 0], sizes = [8, 32], strides = [1, 1]} : vector<16x32xf32> to vector<8x32xf32>
    %1057 = vector.extract_strided_slice %974 {offsets = [8, 0], sizes = [8, 32], strides = [1, 1]} : vector<16x32xf32> to vector<8x32xf32>
    %1058 = vector.extract_strided_slice %1055 {offsets = [0, 0], sizes = [8, 8], strides = [1, 1]} : vector<8x32xf32> to vector<8x8xf32>
    %1059 = vector.extract_strided_slice %1056 {offsets = [0, 0], sizes = [8, 8], strides = [1, 1]} : vector<8x32xf32> to vector<8x8xf32>
    %1060 = tpu.transpose %1059, [1, 0] : vector<8x8xf32> -> vector<8x8xf32>
    %cst_336 = arith.constant dense<0.000000e+00> : vector<8x8xf32>
    %1061 = tpu.matmul %1058, %1060, %cst_336 {dimension_numbers = #tpu.dot_dimension_numbers<[1], [0], [0], [1], [0, 0, 1, 1], [], []>} : vector<8x8xf32>, vector<8x8xf32>, vector<8x8xf32> -> vector<8x8xf32>
    %cst_337 = arith.constant 0.353553385 : f32
    %1062 = vector.broadcast %cst_337 : f32 to vector<8x8xf32>
    %1063 = arith.mulf %1061, %1062 : vector<8x8xf32>
    %1064 = arith.addf %1063, %521 : vector<8x8xf32>
    %cst_338 = arith.constant dense<0xFF800000> : vector<8xf32>
    %1065 = vector.multi_reduction <maximumf>, %1064, %cst_338 [1] : vector<8x8xf32> to vector<8xf32>
    %1066 = vector.shape_cast %1065 : vector<8xf32> to vector<8x1xf32>
    %1067 = vector.broadcast %1066 : vector<8x1xf32> to vector<8x8xf32>
    %1068 = arith.subf %1064, %1067 : vector<8x8xf32>
    %1069 = math.exp %1068 : vector<8x8xf32>
    %cst_339 = arith.constant dense<0.000000e+00> : vector<8xf32>
    %1070 = vector.multi_reduction <add>, %1069, %cst_339 [1] : vector<8x8xf32> to vector<8xf32>
    %1071 = vector.shape_cast %1070 : vector<8xf32> to vector<8x1xf32>
    %1072 = tpu.reciprocal %1071 {approx = true} : vector<8x1xf32> -> vector<8x1xf32>
    %1073 = vector.broadcast %1072 : vector<8x1xf32> to vector<8x8xf32>
    %1074 = arith.mulf %1069, %1073 : vector<8x8xf32>
    %1075 = vector.extract_strided_slice %1057 {offsets = [0, 0], sizes = [8, 8], strides = [1, 1]} : vector<8x32xf32> to vector<8x8xf32>
    %cst_340 = arith.constant dense<0.000000e+00> : vector<8x8xf32>
    %1076 = tpu.matmul %1074, %1075, %cst_340 {dimension_numbers = #tpu.dot_dimension_numbers<[1], [0], [0], [1], [0, 0, 1, 1], [], []>} : vector<8x8xf32>, vector<8x8xf32>, vector<8x8xf32> -> vector<8x8xf32>
    %1077 = vector.extract_strided_slice %1055 {offsets = [0, 8], sizes = [8, 8], strides = [1, 1]} : vector<8x32xf32> to vector<8x8xf32>
    %1078 = vector.extract_strided_slice %1056 {offsets = [0, 8], sizes = [8, 8], strides = [1, 1]} : vector<8x32xf32> to vector<8x8xf32>
    %1079 = tpu.transpose %1078, [1, 0] : vector<8x8xf32> -> vector<8x8xf32>
    %cst_341 = arith.constant dense<0.000000e+00> : vector<8x8xf32>
    %1080 = tpu.matmul %1077, %1079, %cst_341 {dimension_numbers = #tpu.dot_dimension_numbers<[1], [0], [0], [1], [0, 0, 1, 1], [], []>} : vector<8x8xf32>, vector<8x8xf32>, vector<8x8xf32> -> vector<8x8xf32>
    %cst_342 = arith.constant 0.353553385 : f32
    %1081 = vector.broadcast %cst_342 : f32 to vector<8x8xf32>
    %1082 = arith.mulf %1080, %1081 : vector<8x8xf32>
    %1083 = arith.addf %1082, %521 : vector<8x8xf32>
    %cst_343 = arith.constant dense<0xFF800000> : vector<8xf32>
    %1084 = vector.multi_reduction <maximumf>, %1083, %cst_343 [1] : vector<8x8xf32> to vector<8xf32>
    %1085 = vector.shape_cast %1084 : vector<8xf32> to vector<8x1xf32>
    %1086 = vector.broadcast %1085 : vector<8x1xf32> to vector<8x8xf32>
    %1087 = arith.subf %1083, %1086 : vector<8x8xf32>
    %1088 = math.exp %1087 : vector<8x8xf32>
    %cst_344 = arith.constant dense<0.000000e+00> : vector<8xf32>
    %1089 = vector.multi_reduction <add>, %1088, %cst_344 [1] : vector<8x8xf32> to vector<8xf32>
    %1090 = vector.shape_cast %1089 : vector<8xf32> to vector<8x1xf32>
    %1091 = tpu.reciprocal %1090 {approx = true} : vector<8x1xf32> -> vector<8x1xf32>
    %1092 = vector.broadcast %1091 : vector<8x1xf32> to vector<8x8xf32>
    %1093 = arith.mulf %1088, %1092 : vector<8x8xf32>
    %1094 = vector.extract_strided_slice %1057 {offsets = [0, 8], sizes = [8, 8], strides = [1, 1]} : vector<8x32xf32> to vector<8x8xf32>
    %cst_345 = arith.constant dense<0.000000e+00> : vector<8x8xf32>
    %1095 = tpu.matmul %1093, %1094, %cst_345 {dimension_numbers = #tpu.dot_dimension_numbers<[1], [0], [0], [1], [0, 0, 1, 1], [], []>} : vector<8x8xf32>, vector<8x8xf32>, vector<8x8xf32> -> vector<8x8xf32>
    %1096 = vector.extract_strided_slice %1055 {offsets = [0, 16], sizes = [8, 8], strides = [1, 1]} : vector<8x32xf32> to vector<8x8xf32>
    %1097 = vector.extract_strided_slice %1056 {offsets = [0, 16], sizes = [8, 8], strides = [1, 1]} : vector<8x32xf32> to vector<8x8xf32>
    %1098 = tpu.transpose %1097, [1, 0] : vector<8x8xf32> -> vector<8x8xf32>
    %cst_346 = arith.constant dense<0.000000e+00> : vector<8x8xf32>
    %1099 = tpu.matmul %1096, %1098, %cst_346 {dimension_numbers = #tpu.dot_dimension_numbers<[1], [0], [0], [1], [0, 0, 1, 1], [], []>} : vector<8x8xf32>, vector<8x8xf32>, vector<8x8xf32> -> vector<8x8xf32>
    %cst_347 = arith.constant 0.353553385 : f32
    %1100 = vector.broadcast %cst_347 : f32 to vector<8x8xf32>
    %1101 = arith.mulf %1099, %1100 : vector<8x8xf32>
    %1102 = arith.addf %1101, %521 : vector<8x8xf32>
    %cst_348 = arith.constant dense<0xFF800000> : vector<8xf32>
    %1103 = vector.multi_reduction <maximumf>, %1102, %cst_348 [1] : vector<8x8xf32> to vector<8xf32>
    %1104 = vector.shape_cast %1103 : vector<8xf32> to vector<8x1xf32>
    %1105 = vector.broadcast %1104 : vector<8x1xf32> to vector<8x8xf32>
    %1106 = arith.subf %1102, %1105 : vector<8x8xf32>
    %1107 = math.exp %1106 : vector<8x8xf32>
    %cst_349 = arith.constant dense<0.000000e+00> : vector<8xf32>
    %1108 = vector.multi_reduction <add>, %1107, %cst_349 [1] : vector<8x8xf32> to vector<8xf32>
    %1109 = vector.shape_cast %1108 : vector<8xf32> to vector<8x1xf32>
    %1110 = tpu.reciprocal %1109 {approx = true} : vector<8x1xf32> -> vector<8x1xf32>
    %1111 = vector.broadcast %1110 : vector<8x1xf32> to vector<8x8xf32>
    %1112 = arith.mulf %1107, %1111 : vector<8x8xf32>
    %1113 = vector.extract_strided_slice %1057 {offsets = [0, 16], sizes = [8, 8], strides = [1, 1]} : vector<8x32xf32> to vector<8x8xf32>
    %cst_350 = arith.constant dense<0.000000e+00> : vector<8x8xf32>
    %1114 = tpu.matmul %1112, %1113, %cst_350 {dimension_numbers = #tpu.dot_dimension_numbers<[1], [0], [0], [1], [0, 0, 1, 1], [], []>} : vector<8x8xf32>, vector<8x8xf32>, vector<8x8xf32> -> vector<8x8xf32>
    %1115 = vector.extract_strided_slice %1055 {offsets = [0, 24], sizes = [8, 8], strides = [1, 1]} : vector<8x32xf32> to vector<8x8xf32>
    %1116 = vector.extract_strided_slice %1056 {offsets = [0, 24], sizes = [8, 8], strides = [1, 1]} : vector<8x32xf32> to vector<8x8xf32>
    %1117 = tpu.transpose %1116, [1, 0] : vector<8x8xf32> -> vector<8x8xf32>
    %cst_351 = arith.constant dense<0.000000e+00> : vector<8x8xf32>
    %1118 = tpu.matmul %1115, %1117, %cst_351 {dimension_numbers = #tpu.dot_dimension_numbers<[1], [0], [0], [1], [0, 0, 1, 1], [], []>} : vector<8x8xf32>, vector<8x8xf32>, vector<8x8xf32> -> vector<8x8xf32>
    %cst_352 = arith.constant 0.353553385 : f32
    %1119 = vector.broadcast %cst_352 : f32 to vector<8x8xf32>
    %1120 = arith.mulf %1118, %1119 : vector<8x8xf32>
    %1121 = arith.addf %1120, %521 : vector<8x8xf32>
    %cst_353 = arith.constant dense<0xFF800000> : vector<8xf32>
    %1122 = vector.multi_reduction <maximumf>, %1121, %cst_353 [1] : vector<8x8xf32> to vector<8xf32>
    %1123 = vector.shape_cast %1122 : vector<8xf32> to vector<8x1xf32>
    %1124 = vector.broadcast %1123 : vector<8x1xf32> to vector<8x8xf32>
    %1125 = arith.subf %1121, %1124 : vector<8x8xf32>
    %1126 = math.exp %1125 : vector<8x8xf32>
    %cst_354 = arith.constant dense<0.000000e+00> : vector<8xf32>
    %1127 = vector.multi_reduction <add>, %1126, %cst_354 [1] : vector<8x8xf32> to vector<8xf32>
    %1128 = vector.shape_cast %1127 : vector<8xf32> to vector<8x1xf32>
    %1129 = tpu.reciprocal %1128 {approx = true} : vector<8x1xf32> -> vector<8x1xf32>
    %1130 = vector.broadcast %1129 : vector<8x1xf32> to vector<8x8xf32>
    %1131 = arith.mulf %1126, %1130 : vector<8x8xf32>
    %1132 = vector.extract_strided_slice %1057 {offsets = [0, 24], sizes = [8, 8], strides = [1, 1]} : vector<8x32xf32> to vector<8x8xf32>
    %cst_355 = arith.constant dense<0.000000e+00> : vector<8x8xf32>
    %1133 = tpu.matmul %1131, %1132, %cst_355 {dimension_numbers = #tpu.dot_dimension_numbers<[1], [0], [0], [1], [0, 0, 1, 1], [], []>} : vector<8x8xf32>, vector<8x8xf32>, vector<8x8xf32> -> vector<8x8xf32>
    %1134 = tpu.concatenate %1076, %1095, %1114, %1133 in 1 : vector<8x8xf32>, vector<8x8xf32>, vector<8x8xf32>, vector<8x8xf32> -> vector<8x32xf32>
    %1135 = tpu.concatenate %1054, %1134 in 0 : vector<8x32xf32>, vector<8x32xf32> -> vector<16x32xf32>
    %1136 = vector.extract_strided_slice %964 {offsets = [0, 96], sizes = [32, 32], strides = [1, 1]} : vector<32x128xf32> to vector<32x32xf32>
    %cst_356 = arith.constant dense<0.000000e+00> : vector<16x32xf32>
    %1137 = tpu.matmul %1135, %1136, %cst_356 {dimension_numbers = #tpu.dot_dimension_numbers<[1], [0], [0], [1], [0, 0, 1, 1], [], []>} : vector<16x32xf32>, vector<32x32xf32>, vector<16x32xf32> -> vector<16x32xf32>
    %1138 = vector.extract_strided_slice %966 {offsets = [0, 96], sizes = [1, 32], strides = [1, 1]} : vector<1x128xf32> to vector<1x32xf32>
    %1139 = vector.broadcast %1138 : vector<1x32xf32> to vector<16x32xf32>
    %1140 = arith.addf %1137, %1139 : vector<16x32xf32>
    %1141 = arith.addf %960, %1140 : vector<16x32xf32>
    %1142 = vector.extract_strided_slice %962 {offsets = [0, 0], sizes = [1, 32], strides = [1, 1]} : vector<6x32xf32> to vector<1x32xf32>
    %1143 = vector.extract_strided_slice %962 {offsets = [1, 0], sizes = [1, 32], strides = [1, 1]} : vector<6x32xf32> to vector<1x32xf32>
    %cst_357 = arith.constant dense<0.000000e+00> : vector<16xf32>
    %1144 = vector.multi_reduction <add>, %1141, %cst_357 [1] : vector<16x32xf32> to vector<16xf32>
    %1145 = vector.shape_cast %1144 : vector<16xf32> to vector<16x1xf32>
    %cst_358 = arith.constant 3.200000e+01 : f32
    %1146 = vector.broadcast %cst_358 : f32 to vector<16x1xf32>
    %1147 = arith.divf %1145, %1146 : vector<16x1xf32>
    %1148 = vector.broadcast %1147 : vector<16x1xf32> to vector<16x32xf32>
    %1149 = arith.subf %1141, %1148 : vector<16x32xf32>
    %1150 = arith.mulf %1149, %1149 : vector<16x32xf32>
    %cst_359 = arith.constant dense<0.000000e+00> : vector<16xf32>
    %1151 = vector.multi_reduction <add>, %1150, %cst_359 [1] : vector<16x32xf32> to vector<16xf32>
    %1152 = vector.shape_cast %1151 : vector<16xf32> to vector<16x1xf32>
    %cst_360 = arith.constant 3.200000e+01 : f32
    %1153 = vector.broadcast %cst_360 : f32 to vector<16x1xf32>
    %1154 = arith.divf %1152, %1153 : vector<16x1xf32>
    %cst_361 = arith.constant 9.99999974E-6 : f32
    %1155 = vector.broadcast %cst_361 : f32 to vector<16x1xf32>
    %1156 = arith.addf %1154, %1155 : vector<16x1xf32>
    %1157 = math.rsqrt %1156 : vector<16x1xf32>
    %1158 = vector.broadcast %1157 : vector<16x1xf32> to vector<16x32xf32>
    %1159 = arith.mulf %1149, %1158 : vector<16x32xf32>
    %1160 = vector.broadcast %1142 : vector<1x32xf32> to vector<16x32xf32>
    %1161 = arith.mulf %1159, %1160 : vector<16x32xf32>
    %1162 = vector.broadcast %1143 : vector<1x32xf32> to vector<16x32xf32>
    %1163 = arith.addf %1161, %1162 : vector<16x32xf32>
    %c1_362 = arith.constant 1 : index
    %c0_363 = arith.constant 0 : index
    %c0_364 = arith.constant 0 : index
    %1164 = vector.load %arg16[%c1_362, %c0_363, %c0_364] : memref<2x32x128xf32, #tpu.memory_space<vmem>>, vector<1x32x128xf32>
    %1165 = vector.shape_cast %1164 : vector<1x32x128xf32> to vector<32x128xf32>
    %c1_365 = arith.constant 1 : index
    %c0_366 = arith.constant 0 : index
    %c0_367 = arith.constant 0 : index
    %1166 = vector.load %arg17[%c1_365, %c0_366, %c0_367] : memref<2x1x128xf32, #tpu.memory_space<vmem>>, vector<1x1x128xf32>
    %1167 = vector.shape_cast %1166 : vector<1x1x128xf32> to vector<1x128xf32>
    %1168 = vector.extract_strided_slice %1165 {offsets = [0, 0], sizes = [32, 32], strides = [1, 1]} : vector<32x128xf32> to vector<32x32xf32>
    %cst_368 = arith.constant dense<0.000000e+00> : vector<16x32xf32>
    %1169 = tpu.matmul %1163, %1168, %cst_368 {dimension_numbers = #tpu.dot_dimension_numbers<[1], [0], [0], [1], [0, 0, 1, 1], [], []>} : vector<16x32xf32>, vector<32x32xf32>, vector<16x32xf32> -> vector<16x32xf32>
    %1170 = vector.extract_strided_slice %1167 {offsets = [0, 0], sizes = [1, 32], strides = [1, 1]} : vector<1x128xf32> to vector<1x32xf32>
    %1171 = vector.broadcast %1170 : vector<1x32xf32> to vector<16x32xf32>
    %1172 = arith.addf %1169, %1171 : vector<16x32xf32>
    %1173 = vector.extract_strided_slice %1165 {offsets = [0, 32], sizes = [32, 64], strides = [1, 1]} : vector<32x128xf32> to vector<32x64xf32>
    %cst_369 = arith.constant dense<0.000000e+00> : vector<20x64xf32>
    %1174 = tpu.matmul %502, %1173, %cst_369 {dimension_numbers = #tpu.dot_dimension_numbers<[1], [0], [0], [1], [0, 0, 1, 1], [], []>} : vector<20x32xf32>, vector<32x64xf32>, vector<20x64xf32> -> vector<20x64xf32>
    %1175 = vector.extract_strided_slice %1167 {offsets = [0, 32], sizes = [1, 64], strides = [1, 1]} : vector<1x128xf32> to vector<1x64xf32>
    %1176 = vector.broadcast %1175 : vector<1x64xf32> to vector<20x64xf32>
    %1177 = arith.addf %1174, %1176 : vector<20x64xf32>
    %1178 = vector.extract_strided_slice %1177 {offsets = [0, 0], sizes = [20, 32], strides = [1, 1]} : vector<20x64xf32> to vector<20x32xf32>
    %1179 = vector.extract_strided_slice %1177 {offsets = [0, 32], sizes = [20, 32], strides = [1, 1]} : vector<20x64xf32> to vector<20x32xf32>
    %1180 = vector.extract_strided_slice %1172 {offsets = [0, 0], sizes = [8, 32], strides = [1, 1]} : vector<16x32xf32> to vector<8x32xf32>
    %1181 = vector.extract_strided_slice %1178 {offsets = [0, 0], sizes = [10, 32], strides = [1, 1]} : vector<20x32xf32> to vector<10x32xf32>
    %1182 = vector.extract_strided_slice %1179 {offsets = [0, 0], sizes = [10, 32], strides = [1, 1]} : vector<20x32xf32> to vector<10x32xf32>
    %1183 = vector.extract_strided_slice %1180 {offsets = [0, 0], sizes = [8, 8], strides = [1, 1]} : vector<8x32xf32> to vector<8x8xf32>
    %1184 = vector.extract_strided_slice %1181 {offsets = [0, 0], sizes = [10, 8], strides = [1, 1]} : vector<10x32xf32> to vector<10x8xf32>
    %1185 = tpu.transpose %1184, [1, 0] : vector<10x8xf32> -> vector<8x10xf32>
    %cst_370 = arith.constant dense<0.000000e+00> : vector<8x10xf32>
    %1186 = tpu.matmul %1183, %1185, %cst_370 {dimension_numbers = #tpu.dot_dimension_numbers<[1], [0], [0], [1], [0, 0, 1, 1], [], []>} : vector<8x8xf32>, vector<8x10xf32>, vector<8x10xf32> -> vector<8x10xf32>
    %cst_371 = arith.constant 0.353553385 : f32
    %1187 = vector.broadcast %cst_371 : f32 to vector<8x10xf32>
    %1188 = arith.mulf %1186, %1187 : vector<8x10xf32>
    %cst_372 = arith.constant dense<0xFF800000> : vector<8xf32>
    %1189 = vector.multi_reduction <maximumf>, %1188, %cst_372 [1] : vector<8x10xf32> to vector<8xf32>
    %1190 = vector.shape_cast %1189 : vector<8xf32> to vector<8x1xf32>
    %1191 = vector.broadcast %1190 : vector<8x1xf32> to vector<8x10xf32>
    %1192 = arith.subf %1188, %1191 : vector<8x10xf32>
    %1193 = math.exp %1192 : vector<8x10xf32>
    %cst_373 = arith.constant dense<0.000000e+00> : vector<8xf32>
    %1194 = vector.multi_reduction <add>, %1193, %cst_373 [1] : vector<8x10xf32> to vector<8xf32>
    %1195 = vector.shape_cast %1194 : vector<8xf32> to vector<8x1xf32>
    %1196 = tpu.reciprocal %1195 {approx = true} : vector<8x1xf32> -> vector<8x1xf32>
    %1197 = vector.broadcast %1196 : vector<8x1xf32> to vector<8x10xf32>
    %1198 = arith.mulf %1193, %1197 : vector<8x10xf32>
    %1199 = vector.extract_strided_slice %1182 {offsets = [0, 0], sizes = [10, 8], strides = [1, 1]} : vector<10x32xf32> to vector<10x8xf32>
    %cst_374 = arith.constant dense<0.000000e+00> : vector<8x8xf32>
    %1200 = tpu.matmul %1198, %1199, %cst_374 {dimension_numbers = #tpu.dot_dimension_numbers<[1], [0], [0], [1], [0, 0, 1, 1], [], []>} : vector<8x10xf32>, vector<10x8xf32>, vector<8x8xf32> -> vector<8x8xf32>
    %1201 = vector.extract_strided_slice %1180 {offsets = [0, 8], sizes = [8, 8], strides = [1, 1]} : vector<8x32xf32> to vector<8x8xf32>
    %1202 = vector.extract_strided_slice %1181 {offsets = [0, 8], sizes = [10, 8], strides = [1, 1]} : vector<10x32xf32> to vector<10x8xf32>
    %1203 = tpu.transpose %1202, [1, 0] : vector<10x8xf32> -> vector<8x10xf32>
    %cst_375 = arith.constant dense<0.000000e+00> : vector<8x10xf32>
    %1204 = tpu.matmul %1201, %1203, %cst_375 {dimension_numbers = #tpu.dot_dimension_numbers<[1], [0], [0], [1], [0, 0, 1, 1], [], []>} : vector<8x8xf32>, vector<8x10xf32>, vector<8x10xf32> -> vector<8x10xf32>
    %cst_376 = arith.constant 0.353553385 : f32
    %1205 = vector.broadcast %cst_376 : f32 to vector<8x10xf32>
    %1206 = arith.mulf %1204, %1205 : vector<8x10xf32>
    %cst_377 = arith.constant dense<0xFF800000> : vector<8xf32>
    %1207 = vector.multi_reduction <maximumf>, %1206, %cst_377 [1] : vector<8x10xf32> to vector<8xf32>
    %1208 = vector.shape_cast %1207 : vector<8xf32> to vector<8x1xf32>
    %1209 = vector.broadcast %1208 : vector<8x1xf32> to vector<8x10xf32>
    %1210 = arith.subf %1206, %1209 : vector<8x10xf32>
    %1211 = math.exp %1210 : vector<8x10xf32>
    %cst_378 = arith.constant dense<0.000000e+00> : vector<8xf32>
    %1212 = vector.multi_reduction <add>, %1211, %cst_378 [1] : vector<8x10xf32> to vector<8xf32>
    %1213 = vector.shape_cast %1212 : vector<8xf32> to vector<8x1xf32>
    %1214 = tpu.reciprocal %1213 {approx = true} : vector<8x1xf32> -> vector<8x1xf32>
    %1215 = vector.broadcast %1214 : vector<8x1xf32> to vector<8x10xf32>
    %1216 = arith.mulf %1211, %1215 : vector<8x10xf32>
    %1217 = vector.extract_strided_slice %1182 {offsets = [0, 8], sizes = [10, 8], strides = [1, 1]} : vector<10x32xf32> to vector<10x8xf32>
    %cst_379 = arith.constant dense<0.000000e+00> : vector<8x8xf32>
    %1218 = tpu.matmul %1216, %1217, %cst_379 {dimension_numbers = #tpu.dot_dimension_numbers<[1], [0], [0], [1], [0, 0, 1, 1], [], []>} : vector<8x10xf32>, vector<10x8xf32>, vector<8x8xf32> -> vector<8x8xf32>
    %1219 = vector.extract_strided_slice %1180 {offsets = [0, 16], sizes = [8, 8], strides = [1, 1]} : vector<8x32xf32> to vector<8x8xf32>
    %1220 = vector.extract_strided_slice %1181 {offsets = [0, 16], sizes = [10, 8], strides = [1, 1]} : vector<10x32xf32> to vector<10x8xf32>
    %1221 = tpu.transpose %1220, [1, 0] : vector<10x8xf32> -> vector<8x10xf32>
    %cst_380 = arith.constant dense<0.000000e+00> : vector<8x10xf32>
    %1222 = tpu.matmul %1219, %1221, %cst_380 {dimension_numbers = #tpu.dot_dimension_numbers<[1], [0], [0], [1], [0, 0, 1, 1], [], []>} : vector<8x8xf32>, vector<8x10xf32>, vector<8x10xf32> -> vector<8x10xf32>
    %cst_381 = arith.constant 0.353553385 : f32
    %1223 = vector.broadcast %cst_381 : f32 to vector<8x10xf32>
    %1224 = arith.mulf %1222, %1223 : vector<8x10xf32>
    %cst_382 = arith.constant dense<0xFF800000> : vector<8xf32>
    %1225 = vector.multi_reduction <maximumf>, %1224, %cst_382 [1] : vector<8x10xf32> to vector<8xf32>
    %1226 = vector.shape_cast %1225 : vector<8xf32> to vector<8x1xf32>
    %1227 = vector.broadcast %1226 : vector<8x1xf32> to vector<8x10xf32>
    %1228 = arith.subf %1224, %1227 : vector<8x10xf32>
    %1229 = math.exp %1228 : vector<8x10xf32>
    %cst_383 = arith.constant dense<0.000000e+00> : vector<8xf32>
    %1230 = vector.multi_reduction <add>, %1229, %cst_383 [1] : vector<8x10xf32> to vector<8xf32>
    %1231 = vector.shape_cast %1230 : vector<8xf32> to vector<8x1xf32>
    %1232 = tpu.reciprocal %1231 {approx = true} : vector<8x1xf32> -> vector<8x1xf32>
    %1233 = vector.broadcast %1232 : vector<8x1xf32> to vector<8x10xf32>
    %1234 = arith.mulf %1229, %1233 : vector<8x10xf32>
    %1235 = vector.extract_strided_slice %1182 {offsets = [0, 16], sizes = [10, 8], strides = [1, 1]} : vector<10x32xf32> to vector<10x8xf32>
    %cst_384 = arith.constant dense<0.000000e+00> : vector<8x8xf32>
    %1236 = tpu.matmul %1234, %1235, %cst_384 {dimension_numbers = #tpu.dot_dimension_numbers<[1], [0], [0], [1], [0, 0, 1, 1], [], []>} : vector<8x10xf32>, vector<10x8xf32>, vector<8x8xf32> -> vector<8x8xf32>
    %1237 = vector.extract_strided_slice %1180 {offsets = [0, 24], sizes = [8, 8], strides = [1, 1]} : vector<8x32xf32> to vector<8x8xf32>
    %1238 = vector.extract_strided_slice %1181 {offsets = [0, 24], sizes = [10, 8], strides = [1, 1]} : vector<10x32xf32> to vector<10x8xf32>
    %1239 = tpu.transpose %1238, [1, 0] : vector<10x8xf32> -> vector<8x10xf32>
    %cst_385 = arith.constant dense<0.000000e+00> : vector<8x10xf32>
    %1240 = tpu.matmul %1237, %1239, %cst_385 {dimension_numbers = #tpu.dot_dimension_numbers<[1], [0], [0], [1], [0, 0, 1, 1], [], []>} : vector<8x8xf32>, vector<8x10xf32>, vector<8x10xf32> -> vector<8x10xf32>
    %cst_386 = arith.constant 0.353553385 : f32
    %1241 = vector.broadcast %cst_386 : f32 to vector<8x10xf32>
    %1242 = arith.mulf %1240, %1241 : vector<8x10xf32>
    %cst_387 = arith.constant dense<0xFF800000> : vector<8xf32>
    %1243 = vector.multi_reduction <maximumf>, %1242, %cst_387 [1] : vector<8x10xf32> to vector<8xf32>
    %1244 = vector.shape_cast %1243 : vector<8xf32> to vector<8x1xf32>
    %1245 = vector.broadcast %1244 : vector<8x1xf32> to vector<8x10xf32>
    %1246 = arith.subf %1242, %1245 : vector<8x10xf32>
    %1247 = math.exp %1246 : vector<8x10xf32>
    %cst_388 = arith.constant dense<0.000000e+00> : vector<8xf32>
    %1248 = vector.multi_reduction <add>, %1247, %cst_388 [1] : vector<8x10xf32> to vector<8xf32>
    %1249 = vector.shape_cast %1248 : vector<8xf32> to vector<8x1xf32>
    %1250 = tpu.reciprocal %1249 {approx = true} : vector<8x1xf32> -> vector<8x1xf32>
    %1251 = vector.broadcast %1250 : vector<8x1xf32> to vector<8x10xf32>
    %1252 = arith.mulf %1247, %1251 : vector<8x10xf32>
    %1253 = vector.extract_strided_slice %1182 {offsets = [0, 24], sizes = [10, 8], strides = [1, 1]} : vector<10x32xf32> to vector<10x8xf32>
    %cst_389 = arith.constant dense<0.000000e+00> : vector<8x8xf32>
    %1254 = tpu.matmul %1252, %1253, %cst_389 {dimension_numbers = #tpu.dot_dimension_numbers<[1], [0], [0], [1], [0, 0, 1, 1], [], []>} : vector<8x10xf32>, vector<10x8xf32>, vector<8x8xf32> -> vector<8x8xf32>
    %1255 = tpu.concatenate %1200, %1218, %1236, %1254 in 1 : vector<8x8xf32>, vector<8x8xf32>, vector<8x8xf32>, vector<8x8xf32> -> vector<8x32xf32>
    %1256 = vector.extract_strided_slice %1172 {offsets = [8, 0], sizes = [8, 32], strides = [1, 1]} : vector<16x32xf32> to vector<8x32xf32>
    %1257 = vector.extract_strided_slice %1178 {offsets = [10, 0], sizes = [10, 32], strides = [1, 1]} : vector<20x32xf32> to vector<10x32xf32>
    %1258 = vector.extract_strided_slice %1179 {offsets = [10, 0], sizes = [10, 32], strides = [1, 1]} : vector<20x32xf32> to vector<10x32xf32>
    %1259 = vector.extract_strided_slice %1256 {offsets = [0, 0], sizes = [8, 8], strides = [1, 1]} : vector<8x32xf32> to vector<8x8xf32>
    %1260 = vector.extract_strided_slice %1257 {offsets = [0, 0], sizes = [10, 8], strides = [1, 1]} : vector<10x32xf32> to vector<10x8xf32>
    %1261 = tpu.transpose %1260, [1, 0] : vector<10x8xf32> -> vector<8x10xf32>
    %cst_390 = arith.constant dense<0.000000e+00> : vector<8x10xf32>
    %1262 = tpu.matmul %1259, %1261, %cst_390 {dimension_numbers = #tpu.dot_dimension_numbers<[1], [0], [0], [1], [0, 0, 1, 1], [], []>} : vector<8x8xf32>, vector<8x10xf32>, vector<8x10xf32> -> vector<8x10xf32>
    %cst_391 = arith.constant 0.353553385 : f32
    %1263 = vector.broadcast %cst_391 : f32 to vector<8x10xf32>
    %1264 = arith.mulf %1262, %1263 : vector<8x10xf32>
    %cst_392 = arith.constant dense<0xFF800000> : vector<8xf32>
    %1265 = vector.multi_reduction <maximumf>, %1264, %cst_392 [1] : vector<8x10xf32> to vector<8xf32>
    %1266 = vector.shape_cast %1265 : vector<8xf32> to vector<8x1xf32>
    %1267 = vector.broadcast %1266 : vector<8x1xf32> to vector<8x10xf32>
    %1268 = arith.subf %1264, %1267 : vector<8x10xf32>
    %1269 = math.exp %1268 : vector<8x10xf32>
    %cst_393 = arith.constant dense<0.000000e+00> : vector<8xf32>
    %1270 = vector.multi_reduction <add>, %1269, %cst_393 [1] : vector<8x10xf32> to vector<8xf32>
    %1271 = vector.shape_cast %1270 : vector<8xf32> to vector<8x1xf32>
    %1272 = tpu.reciprocal %1271 {approx = true} : vector<8x1xf32> -> vector<8x1xf32>
    %1273 = vector.broadcast %1272 : vector<8x1xf32> to vector<8x10xf32>
    %1274 = arith.mulf %1269, %1273 : vector<8x10xf32>
    %1275 = vector.extract_strided_slice %1258 {offsets = [0, 0], sizes = [10, 8], strides = [1, 1]} : vector<10x32xf32> to vector<10x8xf32>
    %cst_394 = arith.constant dense<0.000000e+00> : vector<8x8xf32>
    %1276 = tpu.matmul %1274, %1275, %cst_394 {dimension_numbers = #tpu.dot_dimension_numbers<[1], [0], [0], [1], [0, 0, 1, 1], [], []>} : vector<8x10xf32>, vector<10x8xf32>, vector<8x8xf32> -> vector<8x8xf32>
    %1277 = vector.extract_strided_slice %1256 {offsets = [0, 8], sizes = [8, 8], strides = [1, 1]} : vector<8x32xf32> to vector<8x8xf32>
    %1278 = vector.extract_strided_slice %1257 {offsets = [0, 8], sizes = [10, 8], strides = [1, 1]} : vector<10x32xf32> to vector<10x8xf32>
    %1279 = tpu.transpose %1278, [1, 0] : vector<10x8xf32> -> vector<8x10xf32>
    %cst_395 = arith.constant dense<0.000000e+00> : vector<8x10xf32>
    %1280 = tpu.matmul %1277, %1279, %cst_395 {dimension_numbers = #tpu.dot_dimension_numbers<[1], [0], [0], [1], [0, 0, 1, 1], [], []>} : vector<8x8xf32>, vector<8x10xf32>, vector<8x10xf32> -> vector<8x10xf32>
    %cst_396 = arith.constant 0.353553385 : f32
    %1281 = vector.broadcast %cst_396 : f32 to vector<8x10xf32>
    %1282 = arith.mulf %1280, %1281 : vector<8x10xf32>
    %cst_397 = arith.constant dense<0xFF800000> : vector<8xf32>
    %1283 = vector.multi_reduction <maximumf>, %1282, %cst_397 [1] : vector<8x10xf32> to vector<8xf32>
    %1284 = vector.shape_cast %1283 : vector<8xf32> to vector<8x1xf32>
    %1285 = vector.broadcast %1284 : vector<8x1xf32> to vector<8x10xf32>
    %1286 = arith.subf %1282, %1285 : vector<8x10xf32>
    %1287 = math.exp %1286 : vector<8x10xf32>
    %cst_398 = arith.constant dense<0.000000e+00> : vector<8xf32>
    %1288 = vector.multi_reduction <add>, %1287, %cst_398 [1] : vector<8x10xf32> to vector<8xf32>
    %1289 = vector.shape_cast %1288 : vector<8xf32> to vector<8x1xf32>
    %1290 = tpu.reciprocal %1289 {approx = true} : vector<8x1xf32> -> vector<8x1xf32>
    %1291 = vector.broadcast %1290 : vector<8x1xf32> to vector<8x10xf32>
    %1292 = arith.mulf %1287, %1291 : vector<8x10xf32>
    %1293 = vector.extract_strided_slice %1258 {offsets = [0, 8], sizes = [10, 8], strides = [1, 1]} : vector<10x32xf32> to vector<10x8xf32>
    %cst_399 = arith.constant dense<0.000000e+00> : vector<8x8xf32>
    %1294 = tpu.matmul %1292, %1293, %cst_399 {dimension_numbers = #tpu.dot_dimension_numbers<[1], [0], [0], [1], [0, 0, 1, 1], [], []>} : vector<8x10xf32>, vector<10x8xf32>, vector<8x8xf32> -> vector<8x8xf32>
    %1295 = vector.extract_strided_slice %1256 {offsets = [0, 16], sizes = [8, 8], strides = [1, 1]} : vector<8x32xf32> to vector<8x8xf32>
    %1296 = vector.extract_strided_slice %1257 {offsets = [0, 16], sizes = [10, 8], strides = [1, 1]} : vector<10x32xf32> to vector<10x8xf32>
    %1297 = tpu.transpose %1296, [1, 0] : vector<10x8xf32> -> vector<8x10xf32>
    %cst_400 = arith.constant dense<0.000000e+00> : vector<8x10xf32>
    %1298 = tpu.matmul %1295, %1297, %cst_400 {dimension_numbers = #tpu.dot_dimension_numbers<[1], [0], [0], [1], [0, 0, 1, 1], [], []>} : vector<8x8xf32>, vector<8x10xf32>, vector<8x10xf32> -> vector<8x10xf32>
    %cst_401 = arith.constant 0.353553385 : f32
    %1299 = vector.broadcast %cst_401 : f32 to vector<8x10xf32>
    %1300 = arith.mulf %1298, %1299 : vector<8x10xf32>
    %cst_402 = arith.constant dense<0xFF800000> : vector<8xf32>
    %1301 = vector.multi_reduction <maximumf>, %1300, %cst_402 [1] : vector<8x10xf32> to vector<8xf32>
    %1302 = vector.shape_cast %1301 : vector<8xf32> to vector<8x1xf32>
    %1303 = vector.broadcast %1302 : vector<8x1xf32> to vector<8x10xf32>
    %1304 = arith.subf %1300, %1303 : vector<8x10xf32>
    %1305 = math.exp %1304 : vector<8x10xf32>
    %cst_403 = arith.constant dense<0.000000e+00> : vector<8xf32>
    %1306 = vector.multi_reduction <add>, %1305, %cst_403 [1] : vector<8x10xf32> to vector<8xf32>
    %1307 = vector.shape_cast %1306 : vector<8xf32> to vector<8x1xf32>
    %1308 = tpu.reciprocal %1307 {approx = true} : vector<8x1xf32> -> vector<8x1xf32>
    %1309 = vector.broadcast %1308 : vector<8x1xf32> to vector<8x10xf32>
    %1310 = arith.mulf %1305, %1309 : vector<8x10xf32>
    %1311 = vector.extract_strided_slice %1258 {offsets = [0, 16], sizes = [10, 8], strides = [1, 1]} : vector<10x32xf32> to vector<10x8xf32>
    %cst_404 = arith.constant dense<0.000000e+00> : vector<8x8xf32>
    %1312 = tpu.matmul %1310, %1311, %cst_404 {dimension_numbers = #tpu.dot_dimension_numbers<[1], [0], [0], [1], [0, 0, 1, 1], [], []>} : vector<8x10xf32>, vector<10x8xf32>, vector<8x8xf32> -> vector<8x8xf32>
    %1313 = vector.extract_strided_slice %1256 {offsets = [0, 24], sizes = [8, 8], strides = [1, 1]} : vector<8x32xf32> to vector<8x8xf32>
    %1314 = vector.extract_strided_slice %1257 {offsets = [0, 24], sizes = [10, 8], strides = [1, 1]} : vector<10x32xf32> to vector<10x8xf32>
    %1315 = tpu.transpose %1314, [1, 0] : vector<10x8xf32> -> vector<8x10xf32>
    %cst_405 = arith.constant dense<0.000000e+00> : vector<8x10xf32>
    %1316 = tpu.matmul %1313, %1315, %cst_405 {dimension_numbers = #tpu.dot_dimension_numbers<[1], [0], [0], [1], [0, 0, 1, 1], [], []>} : vector<8x8xf32>, vector<8x10xf32>, vector<8x10xf32> -> vector<8x10xf32>
    %cst_406 = arith.constant 0.353553385 : f32
    %1317 = vector.broadcast %cst_406 : f32 to vector<8x10xf32>
    %1318 = arith.mulf %1316, %1317 : vector<8x10xf32>
    %cst_407 = arith.constant dense<0xFF800000> : vector<8xf32>
    %1319 = vector.multi_reduction <maximumf>, %1318, %cst_407 [1] : vector<8x10xf32> to vector<8xf32>
    %1320 = vector.shape_cast %1319 : vector<8xf32> to vector<8x1xf32>
    %1321 = vector.broadcast %1320 : vector<8x1xf32> to vector<8x10xf32>
    %1322 = arith.subf %1318, %1321 : vector<8x10xf32>
    %1323 = math.exp %1322 : vector<8x10xf32>
    %cst_408 = arith.constant dense<0.000000e+00> : vector<8xf32>
    %1324 = vector.multi_reduction <add>, %1323, %cst_408 [1] : vector<8x10xf32> to vector<8xf32>
    %1325 = vector.shape_cast %1324 : vector<8xf32> to vector<8x1xf32>
    %1326 = tpu.reciprocal %1325 {approx = true} : vector<8x1xf32> -> vector<8x1xf32>
    %1327 = vector.broadcast %1326 : vector<8x1xf32> to vector<8x10xf32>
    %1328 = arith.mulf %1323, %1327 : vector<8x10xf32>
    %1329 = vector.extract_strided_slice %1258 {offsets = [0, 24], sizes = [10, 8], strides = [1, 1]} : vector<10x32xf32> to vector<10x8xf32>
    %cst_409 = arith.constant dense<0.000000e+00> : vector<8x8xf32>
    %1330 = tpu.matmul %1328, %1329, %cst_409 {dimension_numbers = #tpu.dot_dimension_numbers<[1], [0], [0], [1], [0, 0, 1, 1], [], []>} : vector<8x10xf32>, vector<10x8xf32>, vector<8x8xf32> -> vector<8x8xf32>
    %1331 = tpu.concatenate %1276, %1294, %1312, %1330 in 1 : vector<8x8xf32>, vector<8x8xf32>, vector<8x8xf32>, vector<8x8xf32> -> vector<8x32xf32>
    %1332 = tpu.concatenate %1255, %1331 in 0 : vector<8x32xf32>, vector<8x32xf32> -> vector<16x32xf32>
    %1333 = vector.extract_strided_slice %1165 {offsets = [0, 96], sizes = [32, 32], strides = [1, 1]} : vector<32x128xf32> to vector<32x32xf32>
    %cst_410 = arith.constant dense<0.000000e+00> : vector<16x32xf32>
    %1334 = tpu.matmul %1332, %1333, %cst_410 {dimension_numbers = #tpu.dot_dimension_numbers<[1], [0], [0], [1], [0, 0, 1, 1], [], []>} : vector<16x32xf32>, vector<32x32xf32>, vector<16x32xf32> -> vector<16x32xf32>
    %1335 = vector.extract_strided_slice %1167 {offsets = [0, 96], sizes = [1, 32], strides = [1, 1]} : vector<1x128xf32> to vector<1x32xf32>
    %1336 = vector.broadcast %1335 : vector<1x32xf32> to vector<16x32xf32>
    %1337 = arith.addf %1334, %1336 : vector<16x32xf32>
    %1338 = arith.addf %1163, %1337 : vector<16x32xf32>
    %1339 = vector.extract_strided_slice %962 {offsets = [2, 0], sizes = [1, 32], strides = [1, 1]} : vector<6x32xf32> to vector<1x32xf32>
    %1340 = vector.extract_strided_slice %962 {offsets = [3, 0], sizes = [1, 32], strides = [1, 1]} : vector<6x32xf32> to vector<1x32xf32>
    %cst_411 = arith.constant dense<0.000000e+00> : vector<16xf32>
    %1341 = vector.multi_reduction <add>, %1338, %cst_411 [1] : vector<16x32xf32> to vector<16xf32>
    %1342 = vector.shape_cast %1341 : vector<16xf32> to vector<16x1xf32>
    %cst_412 = arith.constant 3.200000e+01 : f32
    %1343 = vector.broadcast %cst_412 : f32 to vector<16x1xf32>
    %1344 = arith.divf %1342, %1343 : vector<16x1xf32>
    %1345 = vector.broadcast %1344 : vector<16x1xf32> to vector<16x32xf32>
    %1346 = arith.subf %1338, %1345 : vector<16x32xf32>
    %1347 = arith.mulf %1346, %1346 : vector<16x32xf32>
    %cst_413 = arith.constant dense<0.000000e+00> : vector<16xf32>
    %1348 = vector.multi_reduction <add>, %1347, %cst_413 [1] : vector<16x32xf32> to vector<16xf32>
    %1349 = vector.shape_cast %1348 : vector<16xf32> to vector<16x1xf32>
    %cst_414 = arith.constant 3.200000e+01 : f32
    %1350 = vector.broadcast %cst_414 : f32 to vector<16x1xf32>
    %1351 = arith.divf %1349, %1350 : vector<16x1xf32>
    %cst_415 = arith.constant 9.99999974E-6 : f32
    %1352 = vector.broadcast %cst_415 : f32 to vector<16x1xf32>
    %1353 = arith.addf %1351, %1352 : vector<16x1xf32>
    %1354 = math.rsqrt %1353 : vector<16x1xf32>
    %1355 = vector.broadcast %1354 : vector<16x1xf32> to vector<16x32xf32>
    %1356 = arith.mulf %1346, %1355 : vector<16x32xf32>
    %1357 = vector.broadcast %1339 : vector<1x32xf32> to vector<16x32xf32>
    %1358 = arith.mulf %1356, %1357 : vector<16x32xf32>
    %1359 = vector.broadcast %1340 : vector<1x32xf32> to vector<16x32xf32>
    %1360 = arith.addf %1358, %1359 : vector<16x32xf32>
    %c1_416 = arith.constant 1 : index
    %c0_417 = arith.constant 0 : index
    %c0_418 = arith.constant 0 : index
    %1361 = vector.load %arg18[%c1_416, %c0_417, %c0_418] : memref<2x32x64xf32, #tpu.memory_space<vmem>>, vector<1x32x64xf32>
    %1362 = vector.shape_cast %1361 : vector<1x32x64xf32> to vector<32x64xf32>
    %c1_419 = arith.constant 1 : index
    %c0_420 = arith.constant 0 : index
    %c0_421 = arith.constant 0 : index
    %1363 = vector.load %arg19[%c1_419, %c0_420, %c0_421] : memref<2x1x64xf32, #tpu.memory_space<vmem>>, vector<1x1x64xf32>
    %1364 = vector.shape_cast %1363 : vector<1x1x64xf32> to vector<1x64xf32>
    %c1_422 = arith.constant 1 : index
    %c0_423 = arith.constant 0 : index
    %c0_424 = arith.constant 0 : index
    %1365 = vector.load %arg20[%c1_422, %c0_423, %c0_424] : memref<2x64x32xf32, #tpu.memory_space<vmem>>, vector<1x64x32xf32>
    %1366 = vector.shape_cast %1365 : vector<1x64x32xf32> to vector<64x32xf32>
    %c1_425 = arith.constant 1 : index
    %c0_426 = arith.constant 0 : index
    %c0_427 = arith.constant 0 : index
    %1367 = vector.load %arg21[%c1_425, %c0_426, %c0_427] : memref<2x1x32xf32, #tpu.memory_space<vmem>>, vector<1x1x32xf32>
    %1368 = vector.shape_cast %1367 : vector<1x1x32xf32> to vector<1x32xf32>
    %cst_428 = arith.constant dense<0.000000e+00> : vector<16x64xf32>
    %1369 = tpu.matmul %1360, %1362, %cst_428 {dimension_numbers = #tpu.dot_dimension_numbers<[1], [0], [0], [1], [0, 0, 1, 1], [], []>} : vector<16x32xf32>, vector<32x64xf32>, vector<16x64xf32> -> vector<16x64xf32>
    %1370 = vector.broadcast %1364 : vector<1x64xf32> to vector<16x64xf32>
    %1371 = arith.addf %1369, %1370 : vector<16x64xf32>
    %cst_429 = arith.constant 0.000000e+00 : f32
    %1372 = vector.broadcast %cst_429 : f32 to vector<16x64xf32>
    %1373 = arith.maximumf %1371, %1372 : vector<16x64xf32>
    %cst_430 = arith.constant dense<0.000000e+00> : vector<16x32xf32>
    %1374 = tpu.matmul %1373, %1366, %cst_430 {dimension_numbers = #tpu.dot_dimension_numbers<[1], [0], [0], [1], [0, 0, 1, 1], [], []>} : vector<16x64xf32>, vector<64x32xf32>, vector<16x32xf32> -> vector<16x32xf32>
    %1375 = vector.broadcast %1368 : vector<1x32xf32> to vector<16x32xf32>
    %1376 = arith.addf %1374, %1375 : vector<16x32xf32>
    %1377 = arith.addf %1360, %1376 : vector<16x32xf32>
    %1378 = vector.extract_strided_slice %962 {offsets = [4, 0], sizes = [1, 32], strides = [1, 1]} : vector<6x32xf32> to vector<1x32xf32>
    %1379 = vector.extract_strided_slice %962 {offsets = [5, 0], sizes = [1, 32], strides = [1, 1]} : vector<6x32xf32> to vector<1x32xf32>
    %cst_431 = arith.constant dense<0.000000e+00> : vector<16xf32>
    %1380 = vector.multi_reduction <add>, %1377, %cst_431 [1] : vector<16x32xf32> to vector<16xf32>
    %1381 = vector.shape_cast %1380 : vector<16xf32> to vector<16x1xf32>
    %cst_432 = arith.constant 3.200000e+01 : f32
    %1382 = vector.broadcast %cst_432 : f32 to vector<16x1xf32>
    %1383 = arith.divf %1381, %1382 : vector<16x1xf32>
    %1384 = vector.broadcast %1383 : vector<16x1xf32> to vector<16x32xf32>
    %1385 = arith.subf %1377, %1384 : vector<16x32xf32>
    %1386 = arith.mulf %1385, %1385 : vector<16x32xf32>
    %cst_433 = arith.constant dense<0.000000e+00> : vector<16xf32>
    %1387 = vector.multi_reduction <add>, %1386, %cst_433 [1] : vector<16x32xf32> to vector<16xf32>
    %1388 = vector.shape_cast %1387 : vector<16xf32> to vector<16x1xf32>
    %cst_434 = arith.constant 3.200000e+01 : f32
    %1389 = vector.broadcast %cst_434 : f32 to vector<16x1xf32>
    %1390 = arith.divf %1388, %1389 : vector<16x1xf32>
    %cst_435 = arith.constant 9.99999974E-6 : f32
    %1391 = vector.broadcast %cst_435 : f32 to vector<16x1xf32>
    %1392 = arith.addf %1390, %1391 : vector<16x1xf32>
    %1393 = math.rsqrt %1392 : vector<16x1xf32>
    %1394 = vector.broadcast %1393 : vector<16x1xf32> to vector<16x32xf32>
    %1395 = arith.mulf %1385, %1394 : vector<16x32xf32>
    %1396 = vector.broadcast %1378 : vector<1x32xf32> to vector<16x32xf32>
    %1397 = arith.mulf %1395, %1396 : vector<16x32xf32>
    %1398 = vector.broadcast %1379 : vector<1x32xf32> to vector<16x32xf32>
    %1399 = arith.addf %1397, %1398 : vector<16x32xf32>
    %c0_436 = arith.constant 0 : index
    %c0_437 = arith.constant 0 : index
    %1400 = vector.load %arg23[%c0_436, %c0_437] : memref<2x32xf32, #tpu.memory_space<vmem>>, vector<1x32xf32>
    %c1_438 = arith.constant 1 : index
    %c0_439 = arith.constant 0 : index
    %1401 = vector.load %arg23[%c1_438, %c0_439] : memref<2x32xf32, #tpu.memory_space<vmem>>, vector<1x32xf32>
    %cst_440 = arith.constant dense<0.000000e+00> : vector<16xf32>
    %1402 = vector.multi_reduction <add>, %1399, %cst_440 [1] : vector<16x32xf32> to vector<16xf32>
    %1403 = vector.shape_cast %1402 : vector<16xf32> to vector<16x1xf32>
    %cst_441 = arith.constant 3.200000e+01 : f32
    %1404 = vector.broadcast %cst_441 : f32 to vector<16x1xf32>
    %1405 = arith.divf %1403, %1404 : vector<16x1xf32>
    %1406 = vector.broadcast %1405 : vector<16x1xf32> to vector<16x32xf32>
    %1407 = arith.subf %1399, %1406 : vector<16x32xf32>
    %1408 = arith.mulf %1407, %1407 : vector<16x32xf32>
    %cst_442 = arith.constant dense<0.000000e+00> : vector<16xf32>
    %1409 = vector.multi_reduction <add>, %1408, %cst_442 [1] : vector<16x32xf32> to vector<16xf32>
    %1410 = vector.shape_cast %1409 : vector<16xf32> to vector<16x1xf32>
    %cst_443 = arith.constant 3.200000e+01 : f32
    %1411 = vector.broadcast %cst_443 : f32 to vector<16x1xf32>
    %1412 = arith.divf %1410, %1411 : vector<16x1xf32>
    %cst_444 = arith.constant 9.99999974E-6 : f32
    %1413 = vector.broadcast %cst_444 : f32 to vector<16x1xf32>
    %1414 = arith.addf %1412, %1413 : vector<16x1xf32>
    %1415 = math.rsqrt %1414 : vector<16x1xf32>
    %1416 = vector.broadcast %1415 : vector<16x1xf32> to vector<16x32xf32>
    %1417 = arith.mulf %1407, %1416 : vector<16x32xf32>
    %1418 = vector.broadcast %1400 : vector<1x32xf32> to vector<16x32xf32>
    %1419 = arith.mulf %1417, %1418 : vector<16x32xf32>
    %1420 = vector.broadcast %1401 : vector<1x32xf32> to vector<16x32xf32>
    %1421 = arith.addf %1419, %1420 : vector<16x32xf32>
    %c0_445 = arith.constant 0 : index
    %c0_446 = arith.constant 0 : index
    %1422 = vector.load %arg24[%c0_445, %c0_446] : memref<32x128xf32, #tpu.memory_space<vmem>>, vector<32x128xf32>
    %cst_447 = arith.constant dense<0.000000e+00> : vector<16x128xf32>
    %1423 = tpu.matmul %1421, %1422, %cst_447 {dimension_numbers = #tpu.dot_dimension_numbers<[1], [0], [0], [1], [0, 0, 1, 1], [], []>} : vector<16x32xf32>, vector<32x128xf32>, vector<16x128xf32> -> vector<16x128xf32>
    %c0_448 = arith.constant 0 : index
    %c0_449 = arith.constant 0 : index
    %1424 = vector.load %arg25[%c0_448, %c0_449] : memref<1x128xf32, #tpu.memory_space<vmem>>, vector<1x128xf32>
    %1425 = vector.broadcast %1424 : vector<1x128xf32> to vector<16x128xf32>
    %1426 = arith.addf %1423, %1425 : vector<16x128xf32>
    %1427 = vector.extract_strided_slice %1426 {offsets = [0, 0], sizes = [8, 128], strides = [1, 1]} : vector<16x128xf32> to vector<8x128xf32>
    %c0_450 = arith.constant 0 : index
    %c0_451 = arith.constant 0 : index
    %c0_452 = arith.constant 0 : index
    %1428 = vector.load %arg26[%c0_450, %c0_451, %c0_452] : memref<2x8x128xf32, #tpu.memory_space<vmem>>, vector<1x8x128xf32>
    %1429 = vector.shape_cast %1428 : vector<1x8x128xf32> to vector<8x128xf32>
    %1430 = vector.shape_cast %1427 : vector<8x128xf32> to vector<1x8x128xf32>
    tpu.vector_store %arg26[%c0_450, %c0_451, %c0_452], %1430 {strides = array<i32>} : memref<2x8x128xf32, #tpu.memory_space<vmem>>, vector<1x8x128xf32>,
    %1431 = vector.extract_strided_slice %1426 {offsets = [8, 0], sizes = [8, 128], strides = [1, 1]} : vector<16x128xf32> to vector<8x128xf32>
    %c1_453 = arith.constant 1 : index
    %c0_454 = arith.constant 0 : index
    %c0_455 = arith.constant 0 : index
    %1432 = vector.load %arg26[%c1_453, %c0_454, %c0_455] : memref<2x8x128xf32, #tpu.memory_space<vmem>>, vector<1x8x128xf32>
    %1433 = vector.shape_cast %1432 : vector<1x8x128xf32> to vector<8x128xf32>
    %1434 = vector.shape_cast %1431 : vector<8x128xf32> to vector<1x8x128xf32>
    tpu.vector_store %arg26[%c1_453, %c0_454, %c0_455], %1434 {strides = array<i32>} : memref<2x8x128xf32, #tpu.memory_space<vmem>>, vector<1x8x128xf32>,
    return
  }
  func.func @transform_0(%arg0: i32) -> (i32, i32) {
    %c0_i32 = arith.constant 0 : i32
    %c0_i32_0 = arith.constant 0 : i32
    %c0_i32_1 = arith.constant 0 : i32
    return %c0_i32, %c0_i32_0 : i32, i32
  }
  func.func @transform_1(%arg0: i32) -> (i32, i32) {
    %c0_i32 = arith.constant 0 : i32
    %c0_i32_0 = arith.constant 0 : i32
    %c0_i32_1 = arith.constant 0 : i32
    return %c0_i32, %c0_i32_0 : i32, i32
  }
  func.func @transform_2(%arg0: i32) -> (i32, i32) {
    %c0_i32 = arith.constant 0 : i32
    %c0_i32_0 = arith.constant 0 : i32
    %c0_i32_1 = arith.constant 0 : i32
    return %c0_i32, %c0_i32_0 : i32, i32
  }
  func.func @transform_3(%arg0: i32) -> (i32, i32) {
    %c0_i32 = arith.constant 0 : i32
    %c0_i32_0 = arith.constant 0 : i32
    %c0_i32_1 = arith.constant 0 : i32
    return %c0_i32, %c0_i32_0 : i32, i32
  }
  func.func @transform_4(%arg0: i32) -> (i32, i32) {
    %c0_i32 = arith.constant 0 : i32
    %c0_i32_0 = arith.constant 0 : i32
    %c0_i32_1 = arith.constant 0 : i32
    return %c0_i32, %c0_i32_0 : i32, i32
  }
  func.func @transform_5(%arg0: i32) -> (i32, i32, i32) {
    %c0_i32 = arith.constant 0 : i32
    %c0_i32_0 = arith.constant 0 : i32
    %c0_i32_1 = arith.constant 0 : i32
    %c0_i32_2 = arith.constant 0 : i32
    return %c0_i32, %c0_i32_0, %c0_i32_1 : i32, i32, i32
  }
  func.func @transform_6(%arg0: i32) -> (i32, i32, i32) {
    %c0_i32 = arith.constant 0 : i32
    %c0_i32_0 = arith.constant 0 : i32
    %c0_i32_1 = arith.constant 0 : i32
    %c0_i32_2 = arith.constant 0 : i32
    return %c0_i32, %c0_i32_0, %c0_i32_1 : i32, i32, i32
  }
  func.func @transform_7(%arg0: i32) -> (i32, i32, i32) {
    %c0_i32 = arith.constant 0 : i32
    %c0_i32_0 = arith.constant 0 : i32
    %c0_i32_1 = arith.constant 0 : i32
    %c0_i32_2 = arith.constant 0 : i32
    return %c0_i32, %c0_i32_0, %c0_i32_1 : i32, i32, i32
  }
  func.func @transform_8(%arg0: i32) -> (i32, i32, i32) {
    %c0_i32 = arith.constant 0 : i32
    %c0_i32_0 = arith.constant 0 : i32
    %c0_i32_1 = arith.constant 0 : i32
    %c0_i32_2 = arith.constant 0 : i32
    return %c0_i32, %c0_i32_0, %c0_i32_1 : i32, i32, i32
  }
  func.func @transform_9(%arg0: i32) -> (i32, i32, i32) {
    %c0_i32 = arith.constant 0 : i32
    %c0_i32_0 = arith.constant 0 : i32
    %c0_i32_1 = arith.constant 0 : i32
    %c0_i32_2 = arith.constant 0 : i32
    return %c0_i32, %c0_i32_0, %c0_i32_1 : i32, i32, i32
  }
  func.func @transform_10(%arg0: i32) -> (i32, i32, i32) {
    %c0_i32 = arith.constant 0 : i32
    %c0_i32_0 = arith.constant 0 : i32
    %c0_i32_1 = arith.constant 0 : i32
    %c0_i32_2 = arith.constant 0 : i32
    return %c0_i32, %c0_i32_0, %c0_i32_1 : i32, i32, i32
  }
  func.func @transform_11(%arg0: i32) -> (i32, i32, i32) {
    %c0_i32 = arith.constant 0 : i32
    %c0_i32_0 = arith.constant 0 : i32
    %c0_i32_1 = arith.constant 0 : i32
    %c0_i32_2 = arith.constant 0 : i32
    return %c0_i32, %c0_i32_0, %c0_i32_1 : i32, i32, i32
  }
  func.func @transform_12(%arg0: i32) -> (i32, i32) {
    %c0_i32 = arith.constant 0 : i32
    %c0_i32_0 = arith.constant 0 : i32
    %c0_i32_1 = arith.constant 0 : i32
    return %c0_i32, %c0_i32_0 : i32, i32
  }
  func.func @transform_13(%arg0: i32) -> (i32, i32, i32) {
    %c0_i32 = arith.constant 0 : i32
    %c0_i32_0 = arith.constant 0 : i32
    %c0_i32_1 = arith.constant 0 : i32
    %c0_i32_2 = arith.constant 0 : i32
    return %c0_i32, %c0_i32_0, %c0_i32_1 : i32, i32, i32
  }
  func.func @transform_14(%arg0: i32) -> (i32, i32, i32) {
    %c0_i32 = arith.constant 0 : i32
    %c0_i32_0 = arith.constant 0 : i32
    %c0_i32_1 = arith.constant 0 : i32
    %c0_i32_2 = arith.constant 0 : i32
    return %c0_i32, %c0_i32_0, %c0_i32_1 : i32, i32, i32
  }
  func.func @transform_15(%arg0: i32) -> (i32, i32, i32) {
    %c0_i32 = arith.constant 0 : i32
    %c0_i32_0 = arith.constant 0 : i32
    %c0_i32_1 = arith.constant 0 : i32
    %c0_i32_2 = arith.constant 0 : i32
    return %c0_i32, %c0_i32_0, %c0_i32_1 : i32, i32, i32
  }
  func.func @transform_16(%arg0: i32) -> (i32, i32, i32) {
    %c0_i32 = arith.constant 0 : i32
    %c0_i32_0 = arith.constant 0 : i32
    %c0_i32_1 = arith.constant 0 : i32
    %c0_i32_2 = arith.constant 0 : i32
    return %c0_i32, %c0_i32_0, %c0_i32_1 : i32, i32, i32
  }
  func.func @transform_17(%arg0: i32) -> (i32, i32, i32) {
    %c0_i32 = arith.constant 0 : i32
    %c0_i32_0 = arith.constant 0 : i32
    %c0_i32_1 = arith.constant 0 : i32
    %c0_i32_2 = arith.constant 0 : i32
    return %c0_i32, %c0_i32_0, %c0_i32_1 : i32, i32, i32
  }
  func.func @transform_18(%arg0: i32) -> (i32, i32, i32) {
    %c0_i32 = arith.constant 0 : i32
    %c0_i32_0 = arith.constant 0 : i32
    %c0_i32_1 = arith.constant 0 : i32
    %c0_i32_2 = arith.constant 0 : i32
    return %c0_i32, %c0_i32_0, %c0_i32_1 : i32, i32, i32
  }
  func.func @transform_19(%arg0: i32) -> (i32, i32, i32) {
    %c0_i32 = arith.constant 0 : i32
    %c0_i32_0 = arith.constant 0 : i32
    %c0_i32_1 = arith.constant 0 : i32
    %c0_i32_2 = arith.constant 0 : i32
    return %c0_i32, %c0_i32_0, %c0_i32_1 : i32, i32, i32
  }
  func.func @transform_20(%arg0: i32) -> (i32, i32, i32) {
    %c0_i32 = arith.constant 0 : i32
    %c0_i32_0 = arith.constant 0 : i32
    %c0_i32_1 = arith.constant 0 : i32
    %c0_i32_2 = arith.constant 0 : i32
    return %c0_i32, %c0_i32_0, %c0_i32_1 : i32, i32, i32
  }
  func.func @transform_21(%arg0: i32) -> (i32, i32, i32) {
    %c0_i32 = arith.constant 0 : i32
    %c0_i32_0 = arith.constant 0 : i32
    %c0_i32_1 = arith.constant 0 : i32
    %c0_i32_2 = arith.constant 0 : i32
    return %c0_i32, %c0_i32_0, %c0_i32_1 : i32, i32, i32
  }
  func.func @transform_22(%arg0: i32) -> (i32, i32) {
    %c0_i32 = arith.constant 0 : i32
    %c0_i32_0 = arith.constant 0 : i32
    %c0_i32_1 = arith.constant 0 : i32
    return %c0_i32, %c0_i32_0 : i32, i32
  }
  func.func @transform_23(%arg0: i32) -> (i32, i32) {
    %c0_i32 = arith.constant 0 : i32
    %c0_i32_0 = arith.constant 0 : i32
    %c0_i32_1 = arith.constant 0 : i32
    return %c0_i32, %c0_i32_0 : i32, i32
  }
  func.func @transform_24(%arg0: i32) -> (i32, i32) {
    %c0_i32 = arith.constant 0 : i32
    %c0_i32_0 = arith.constant 0 : i32
    %c0_i32_1 = arith.constant 0 : i32
    return %c0_i32, %c0_i32_0 : i32, i32
  }
  func.func @transform_25(%arg0: i32) -> (i32, i32, i32) {
    %c0_i32 = arith.constant 0 : i32
    %c0_i32_0 = arith.constant 0 : i32
    %c0_i32_1 = arith.constant 0 : i32
    %c0_i32_2 = arith.constant 0 : i32
    return %c0_i32, %c0_i32_0, %c0_i32_1 : i32, i32, i32
  }
}

</mosaic_0001>

<bundles_post_ra>
// kernel: my_transformer_forward.1
= control target key start
LH: loop header
LB: loop body
LE: loop exit
PB: predicated region body
PF: predicated region fallthrough
CT: control target
= control target key end

     0   :  { %v15311_v0 = vmov 0   ;;  %v15312_v7 = vmov 0.0|0.0   ;;  %vm15313_vm0 = vmmov 0   ;;  %v15314_v10 = vmov 0.0   ;;  %s17919_s30 = smov 80   ;;  %s17899_s26 = smov 48   ;;  %s17863_s0 = inlined_call_operand.vmem [shape: s32[20,1], index: 0, kind: input, shape index: {}]   ;;  %s17864_s2 = inlined_call_operand.vmem [shape: f32[128,32], index: 2, kind: input, shape index: {}]   ;;  %s17865_s5 = inlined_call_operand.vmem [shape: f32[2,32,128], index: 5, kind: input, shape index: {}]   ;;  %s17866_s4 = inlined_call_operand.vmem [shape: f32[42,32], index: 4, kind: input, shape index: {}]   ;;  %s17867_s6 = inlined_call_operand.vmem [shape: f32[2,1,128], index: 6, kind: input, shape index: {}]   ;;  %s17868_s7 = inlined_call_operand.vmem [shape: f32[2,32,64], index: 7, kind: input, shape index: {}]   ;;  %s17869_s11 = inlined_call_operand.vmem [shape: f32[2,4,32], index: 11, kind: input, shape index: {}]   ;;  %s17870_s9 = inlined_call_operand.vmem [shape: f32[2,64,32], index: 9, kind: input, shape index: {}]   ;;  %s17871_s8 = inlined_call_operand.vmem [shape: f32[2,1,64], index: 8, kind: input, shape index: {}]   ;;  %s17872_s10 = inlined_call_operand.vmem [shape: f32[2,1,32], index: 10, kind: input, shape index: {}]   ;;  %s17873_s3 = inlined_call_operand.vmem [shape: f32[128,32], index: 3, kind: input, shape index: {}]   ;;  %s17874_s1 = inlined_call_operand.vmem [shape: s32[16,1], index: 1, kind: input, shape index: {}]   ;;  %s17875_s13 = inlined_call_operand.vmem [shape: f32[2,32,128], index: 13, kind: input, shape index: {}]   ;;  %s17876_s14 = inlined_call_operand.vmem [shape: f32[2,1,128], index: 14, kind: input, shape index: {}]   ;;  %s17877_s15 = inlined_call_operand.vmem [shape: f32[2,32,128], index: 15, kind: input, shape index: {}]   ;;  %s17878_s12 = inlined_call_operand.vmem [shape: f32[2,32], index: 12, kind: input, shape index: {}]   ;;  %s17879_s21 = inlined_call_operand.vmem [shape: f32[2,6,32], index: 21, kind: input, shape index: {}]   ;;  %s17880_s16 = inlined_call_operand.vmem [shape: f32[2,1,128], index: 16, kind: input, shape index: {}]   ;;  %s17881_s17 = inlined_call_operand.vmem [shape: f32[2,32,64], index: 17, kind: input, shape index: {}]   ;;  %s17882_s19 = inlined_call_operand.vmem [shape: f32[2,64,32], index: 19, kind: input, shape index: {}]   ;;  %s17883_s18 = inlined_call_operand.vmem [shape: f32[2,1,64], index: 18, kind: input, shape index: {}]   ;;  %s17884_s20 = inlined_call_operand.vmem [shape: f32[2,1,32], index: 20, kind: input, shape index: {}]   ;;  %s17885_s23 = inlined_call_operand.vmem [shape: f32[32,128], index: 23, kind: input, shape index: {}]   ;;  %s17886_s22 = inlined_call_operand.vmem [shape: f32[2,32], index: 22, kind: input, shape index: {}]   ;;  %s17887_s24 = inlined_call_operand.vmem [shape: f32[1,128], index: 24, kind: input, shape index: {}]   ;;  %s17888_s25 = inlined_call_operand.vmem [shape: f32[2,8,128], index: 25, kind: output, shape index: {}]  }
   0x1   :  { %17941 = sst [smem:[#allocation2_spill]] %s17863_s0  ;;  %14614 = vset.pattern.permute.xlu0 %v15311_v0  ;;  %14615 = vset.pattern.permute.xlu1 %v15311_v0  ;;  %v101_v34 = vlaneseq  ;;  %v15315_v37 = vmov 1.0   ;;  %vm206_vm4 = vcmask 1041408   ;;  %vm228_vm5 = vcmask 261120   ;;  %s17901_s28 = smov 104  }
   0x2   :  { %17942 = sst [smem:[#allocation3_spill]] %s17864_s2  ;;  %14024 = vmatprep.subr.bf16.mxu0 %v15312_v7  ;;  %13027 = vmatprep.mubr.msk.f32.mxu0 %vm15313_vm0, %v15314_v10  ;;  %vm324_vm6 = vcmask 64512   ;;  %vm414_vm8 = vcmask 74752   ;;  %vm410_vm9 = vcmask 80896   ;;  %vm15321_vm10 = vmmov 1   ;;  %s17911_s0 = smov 32  }
   0x3   :  { %17943 = sst [smem:[#allocation4_spill]] %s17865_s5  ;;  %s17964_s2 = sld [smem:[#allocation3_spill]]  ;;  %14048 = vmatprep.subr.bf16.mxu1 %v15312_v7  ;;  %13044 = vmatprep.mubr.msk.f32.mxu1 %vm15313_vm0, %v15314_v10  ;;  %v15549_v35 = vand.u32 127, %v101_v34  ;;  %vm15620_vm7 = vmpackc.low %vm324_vm6, %vm324_vm6  ;;  %vm1164_vm12 = vcmask 1045504   ;;  %vm1160_vm13 = vcmask 195584   ;;  %vm1157_vm14 = vcmask 130048  }
   0x4   :  { %17944 = sst [smem:[#allocation5_spill]] %s17866_s4  ;;  %s17927_s5 = smov 96   ;;  %vm15641_vm11 = vmpackc.low %vm206_vm4, %vm15321_vm10  ;;  %vm2129_vm15 = vcmask 257024  }
   0x5   :  { %17945 = sst [smem:[#allocation6_spill]] %s17867_s6  ;;  %s17966_s27 = sld [smem:[#allocation5_spill]] }
   0x6   :  { %17946 = sst [smem:[#allocation7_spill]] %s17868_s7  ;;  %s17967_s29 = sld [smem:[#allocation6_spill]] }
   0x7   :  { %17947 = sst [smem:[#allocation8_spill]] %s17869_s11  ;;  %s17963_s11 = sld [smem:[#allocation2_spill]] }
   0x8   :  { %17948 = sst [smem:[#allocation9_spill]] %s17870_s9  ;;  %s17915_s9 = smov 112  }
   0x9   :  { %17949 = sst [smem:[#allocation10_spill]] %s17871_s8  ;;  %v83_v3 = vld [vmem:[%s17964_s2] sm:$0xff]  ;;  %v84_v4 = vld [vmem:[%s17964_s2 + $0x8] sm:$0xff]  ;;  %v85_v5 = vld [vmem:[%s17964_s2 + $0x10] sm:$0xff]  ;;  %s17925_s4 = smov 88  }
   0xa   :  { %17950 = sst [smem:[#allocation11_spill]] %s17872_s10  ;;  %v14025_v8 = vpack.c.bf16 %v84_v4, %v83_v3  ;;  %v86_v9 = vld [vmem:[%s17964_s2 + $0x18] sm:$0xff]  ;;  %v87_v12 = vld [vmem:[%s17964_s2 + $0x20] sm:$0xff]  ;;  %v88_v13 = vld [vmem:[%s17964_s2 + $0x28] sm:$0xff]  ;;  %s17965_s10 = sld [smem:[#allocation4_spill]] }
   0xb   :  { %17951 = sst [smem:[#allocation12_spill]] %s17877_s15  ;;  %v14028_v11 = vpack.c.bf16 %v86_v9, %v85_v5  ;;  %v14031_v14 = vpack.c.bf16 %v88_v13, %v87_v12  ;;  %v89_v15 = vld [vmem:[%s17964_s2 + $0x30] sm:$0xff]  ;;  %v90_v16 = vld [vmem:[%s17964_s2 + $0x38] sm:$0xff]  ;;  %v91_v22 = vld [vmem:[%s17964_s2 + $0x40] sm:$0xff]  ;;  %s17913_s8 = smov 72  }
   0xc   :  { %17952 = sst [smem:[#allocation13_spill]] %s17878_s12  ;;  %14026 = vmatpush3.bf16.msra.mxu0 %v14025_v8  ;;  %v14034_v19 = vpack.c.bf16 %v90_v16, %v89_v15  ;;  %v92_v23 = vld [vmem:[%s17964_s2 + $0x48] sm:$0xff]  ;;  %v93_v25 = vld [vmem:[%s17964_s2 + $0x50] sm:$0xff]  ;;  %v94_v26 = vld [vmem:[%s17964_s2 + $0x58] sm:$0xff]  ;;  %s17917_s6 = smov 56  }
   0xd   :  { %17953 = sst [smem:[#allocation14_spill]] %s17879_s21  ;;  %v80_v1 = vld [vmem:[%s17963_s11] sm:$0xff]  ;;  %v82_v2 = vld [vmem:[%s17963_s11 + $0x10] sm:$0xf]  ;;  %v81_v6 = vld [vmem:[%s17963_s11 + $0x8] sm:$0xff]  ;;  %14027 = vmatprep.subr.bf16.mxu0 %v15312_v7  ;;  %v14037_v24 = vpack.c.bf16 %v92_v23, %v91_v22  ;;  %v14040_v27 = vpack.c.bf16 %v94_v26, %v93_v25  ;;  %s17921_s11 = smov 64  }
   0xe   :  { %17954 = sst [smem:[#allocation15_spill]] %s17880_s16  ;;  %104 = vperm.xlu0 %14614, %v80_v1   ;;  %110 = vperm.xlu1 %14615, %v82_v2   ;;  %v95_v28 = vld [vmem:[%s17964_s2 + $0x60] sm:$0xff]  ;;  %v96_v29 = vld [vmem:[%s17964_s2 + $0x68] sm:$0xff]  ;;  %v97_v31 = vld [vmem:[%s17964_s2 + $0x70] sm:$0xff]  ;;  %s17903_s7 = smov 40  }
   0xf   :  { %17955 = sst [smem:[#allocation16_spill]] %s17881_s17  ;;  %v14043_v30 = vpack.c.bf16 %v96_v29, %v95_v28  ;;  %v98_v32 = vld [vmem:[%s17964_s2 + $0x78] sm:$0xff]  ;;  %v99_v43 = vld [vmem:[%s17966_s27] sm:$0xff]  ;;  %v100_v48 = vld [vmem:[%s17966_s27 + $0x8] sm:$0x3]  ;;  %s17923_s2 = smov 120  }
  0x10   :  { %17956 = sst [smem:[#allocation17_spill]] %s17882_s19  ;;  %14029 = vmatpush3.bf16.msra.mxu0 %v14028_v11  ;;  %v15507_v17 = vld [vmem:[%s17965_s10] sm:$0xff]  ;;  %v15512_v18 = vld [vmem:[%s17965_s10 + $0x8] sm:$0xff]  ;;  %v14046_v33 = vpack.c.bf16 %v98_v32, %v97_v31  ;;  %v15564_v40 = vld [vmem:[%s17965_s10 + $0x10] sm:$0xff]  ;;  %v207_v45 = vrot.slane %v99_v43, 6  ;;  %v208_v51 = vrot.slane %v100_v48, 6 }
  0x11   :  { %17957 = sst [smem:[#allocation18_spill]] %s17883_s18  ;;  %14030 = vmatprep.subr.bf16.mxu0 %v15312_v7  ;;  %v14696_v20 = vpack.i.bf16 %v15512_v18, %v15507_v17  ;;  %v14049_v21 = vpack.c.bf16 %v15512_v18, %v15507_v17  ;;  %v15569_v41 = vld [vmem:[%s17965_s10 + $0x18] sm:$0xff]  ;;  %v15600_v61 = vld [vmem:[%s17967_s29] ss:$0 sm:$0xff]  ;;  %s17991_s18 = smov 24  }
  0x12   :  { %17958 = sst [smem:[#allocation19_spill]] %s17884_s20  ;;  %107 = vperm.xlu0 %14614, %v81_v6   ;;  %v14052_v42 = vpack.c.bf16 %v15569_v41, %v15564_v40  ;;  %v212_v52 = vsel %vm206_vm4, %v100_v48, %v207_v45  ;;  %v209_v57 = vsel %vm206_vm4, %v207_v45, %v208_v51  ;;  %s17990_s20 = smov 8  }
  0x13   :  { %17959 = sst [smem:[#allocation20_spill]] %s17885_s23  ;;  %14050 = vmatpush3.bf16.msra.mxu1 %v14049_v21  ;;  %s17989_s23 = smov 16  }
  0x14   :  { %17960 = sst [smem:[#allocation21_spill]] %s17886_s22  ;;  %14032 = vmatpush3.bf16.msra.mxu0 %v14031_v14  ;;  %14051 = vmatprep.subr.bf16.mxu1 %v15312_v7  ;;  %s17988_s22 = smov 32  }
  0x15   :  { %17961 = sst [smem:[#allocation22_spill]] %s17887_s24  ;;  %14033 = vmatprep.subr.bf16.mxu0 %v15312_v7  ;;  %s17987_s24 = smov 40  }
  0x16   :  { %17962 = sst [smem:[#allocation23_spill]] %s17888_s25  ;;  %s17986_s25 = smov 48  }
  0x17   :  { %14053 = vmatpush3.bf16.msra.mxu1 %v14052_v42  ;;  %s17992_s12 = smov 24   ;;  %s17994_s17 = sld [smem:[#allocation12_spill]] }
  0x18   :  { %14035 = vmatpush3.bf16.msra.mxu0 %v14034_v19  ;;  %s17996_s15 = sld [smem:[#allocation14_spill]]  ;;  %s17997_s21 = sld [smem:[#allocation15_spill]] }
  0x19   :  { %14036 = vmatprep.subr.bf16.mxu0 %v15312_v7  ;;  %s18000_s16 = sld [smem:[#allocation18_spill]]  ;;  %s18001_s19 = sld [smem:[#allocation19_spill]] }
  0x1c   :  { %14038 = vmatpush3.bf16.msra.mxu0 %v14037_v24 }
  0x1d   :  { %14039 = vmatprep.subr.bf16.mxu0 %v15312_v7 }
  0x20   :  { %14041 = vmatpush3.bf16.msra.mxu0 %v14040_v27 }
  0x21   :  { %14042 = vmatprep.subr.bf16.mxu0 %v15312_v7 }
  0x24   :  { %14044 = vmatpush3.bf16.msra.mxu0 %v14043_v30 }
  0x25   :  { %14045 = vmatprep.subr.bf16.mxu0 %v15312_v7 }
  0x28   :  { %14047 = vmatpush3.bf16.msra.mxu0 %v14046_v33 }
  0x8d   :  { %v105_v36 = vpop.permute.xlu0 %104  ;;  %v111_v39 = vpop.permute.xlu1 %110 }
  0x8e   :  { %vm112_vm1 = vcmp.eq.s32.totalorder %v15549_v35, %v105_v36  ;;  %vm114_vm3 = vcmp.eq.s32.totalorder %v15549_v35, %v111_v39 }
  0x8f   :  { %13028 = vmatmul.mubr.msk.f32.vlgmr.msra.gmra.mrb[0].mxu0 %vm112_vm1, %v15315_v37  ;;  %vm2296_vm1 = vcmask 523264  }
  0x90   :  { %13030 = vmatprep.mubr.msk.f32.mxu0 %vm15313_vm0, %v15314_v10 }
  0x91   :  { %v108_v38 = vpop.permute.xlu0 %107 }
  0x92   :  { %vm113_vm2 = vcmp.eq.s32.totalorder %v15549_v35, %v108_v38 }
  0x93   :  { %13031 = vmatmul.mubr.msk.f32.gmra.mrb[2].mxu0 %vm113_vm2, %v15315_v37 }
  0x94   :  { %13033 = vmatprep.mubr.msk.f32.mxu0 %vm15313_vm0, %v15314_v10 }
  0x97   :  { %13034 = vmatmul.mubr.msk.f32.gmra.mrb[4].mxu0 %vm114_vm3, %v15315_v37 }
 0x162   :  { %v187_v44 = vpop.f32.mrb[0].mxu0 }
 0x163   :  { %v201_v46 = vmul.f32 5.656854, %v187_v44  ;;  %v13029_v47 = vpop.f32.mrb[1].mxu0 }
 0x165   :  { %v15579_v49 = vadd.f32 %v201_v46, %v99_v43 }
 0x166   :  { %v192_v50 = vpop.f32.mrb[2].mxu0 }
 0x167   :  { %v202_v53 = vmul.f32 5.656854, %v192_v50  ;;  %v13032_v54 = vpop.f32.mrb[3].mxu0  ;;  %13045 = vmatmul.mubr.msk.f32.vlgmr.msra.gmra.mrb[0].mxu1 %vm228_vm5, %v15579_v49 }
 0x168   :  { %13047 = vmatprep.mubr.msk.f32.mxu1 %vm15313_vm0, %v15314_v10 }
 0x169   :  { %v15586_v55 = vadd.f32 %v212_v52, %v202_v53 }
 0x16a   :  { %v197_v56 = vpop.f32.mrb[4].mxu0 }
 0x16b   :  { %v203_v58 = vmul.f32 5.656854, %v197_v56  ;;  %13048 = vmatmul.mubr.msk.f32.gmra.mrb[2].mxu1 %vm228_vm5, %v15586_v55  ;;  %v13035_v59 = vpop.f32.mrb[5].mxu0 }
 0x16c   :  { %13050 = vmatprep.mubr.msk.f32.mxu1 %vm15313_vm0, %v15314_v10 }
 0x16d   :  { %v15593_v60 = vadd.f32 %v209_v57, %v203_v58 }
 0x16f   :  { %13051 = vmatmul.mubr.msk.f32.gmra.mrb[4].mxu1 %vm228_vm5, %v15593_v60 }
 0x23a   :  { %v304_v62 = vpop.f32.mrb[0].mxu1 }
 0x23b   :  { %v15603_v63 = vadd.f32 %v15600_v61, %v304_v62  ;;  %v13046_v0 = vpop.f32.mrb[1].mxu1 }
 0x23d   :  { %13057 = vmatprep.mubr.msk.f32.mxu1 %vm324_vm6, %v15603_v63 }
 0x23e   :  { %v309_v1 = vpop.f32.mrb[2].mxu1 }
 0x23f   :  { %v15608_v2 = vadd.f32 %v15600_v61, %v309_v1  ;;  %v13049_v3 = vpop.f32.mrb[3].mxu1 }
 0x241   :  { %v15612_v4 = vpack.i.bf16 %v15608_v2, %v15603_v63 }
 0x242   :  { %v15614_v5 = vpop.f32.mrb[4].mxu1 }
 0x243   :  { %14617 = vrot.lane.b32.xlu1 %v15612_v4, %s17927_s5  ;;  %v13052_v6 = vpop.f32.mrb[5].mxu1 }
 0x2b5   :  { %v14618_v8 = vpop.permute.xlu1 %14617 }
 0x2b6   :  { %v14620_v9 = vunpack.i.h.bf16 %v14618_v8  ;;  %v14619_v11 = vunpack.i.l.bf16 %v14618_v8 }
 0x2b8   :  { %v14054_v13 = vpack.c.bf16 %v14620_v9, %v14619_v11 }
 0x2ba   :  { %14056 = vmatprep.subr.msk.bf16.mxu1 %vm15620_vm7, %v14054_v13 }
 0x2bb   :  { %14059 = vmatpush3.bf16.xpose.msk.msra.mxu1 %vm15620_vm7, %v14054_v13 }
 0x2c2   :  { %13058 = vmatmul.mubr.msk.f32.vlgmr.msra.gmra.mrb[6].mxu1 %vm324_vm6, %v15608_v2 }
 0x395   :  { %v13059_v14 = vpop.f32.mrb[6].mxu1 }
 0x396   :  { %v409_v15 = vmul.f32 0.35355338, %v13059_v14  ;;  %v399_v16 = vpop.f32.mrb[7].mxu1 }
 0x397   :  { %v408_v19 = vmul.f32 0.35355338, %v399_v16 }
 0x398   :  { %v415_v21 = vsel %vm414_vm8, %v409_v15, -inf }
 0x399   :  { %416 = vmax.xlane.f32.xlu1 %v415_v21  ;;  %v411_v22 = vsel %vm410_vm9, %v408_v19, -inf }
 0x39a   :  { %412 = vmax.xlane.f32.xlu0 %v411_v22 }
 0x3aa   :  { %14622 = vrot.lane.b32.xlu1 %v15612_v4, %s17921_s11 }
 0x3ae   :  { %522 = vrot.lane.b32.xlu1 %v15603_v63, %s17923_s2 }
 0x3b2   :  { %14632 = vrot.lane.b32.xlu1 %v15612_v4, %s17919_s30 }
 0x3b6   :  { %725 = vrot.lane.b32.xlu1 %v15603_v63, %s17915_s9 }
 0x426   :  { %v417_v23 = vpop.xlane.xlu1 %416 }
 0x427   :  { %v419_v24 = vsub.f32 %v409_v15, %v417_v23  ;;  %v413_v25 = vpop.xlane.xlu0 %412 }
 0x428   :  { %v418_v26 = vsub.f32 %v408_v19, %v413_v25 }
 0x429   :  { %v422_v27 = vmul.f32 1.442695, %v419_v24 }
 0x42a   :  { %v420_v28 = vmul.f32 1.442695, %v418_v26  ;;  %v14623_v29 = vpop.permute.xlu1 %14622 }
 0x42b   :  { %14996 = vpow2.f32 %v422_v27  ;;  %v14625_v30 = vunpack.i.h.bf16 %v14623_v29  ;;  %v14624_v31 = vunpack.i.l.bf16 %v14623_v29 }
 0x42c   :  { %14998 = vpow2.f32 %v420_v28 }
 0x42d   :  { %v14060_v33 = vpack.c.bf16 %v14625_v30, %v14624_v31 }
 0x42e   :  { %v523_v36 = vpop.permute.xlu1 %522 }
 0x42f   :  { %14062 = vmatprep.subr.msk.bf16.mxu1 %vm15641_vm11, %v14060_v33 }
 0x430   :  { %14065 = vmatpush3.bf16.msk.msra.mxu1 %vm15641_vm11, %v14060_v33 }
 0x432   :  { %v14633_v38 = vpop.permute.xlu1 %14632 }
 0x433   :  { %v14635_v39 = vunpack.i.h.bf16 %v14633_v38  ;;  %v14634_v42 = vunpack.i.l.bf16 %v14633_v38 }
 0x435   :  { %v14997_v43 = vpop.eup %14996  ;;  %v14078_v44 = vpack.c.bf16 %v14635_v39, %v14634_v42 }
 0x436   :  { %v726_v45 = vpop.permute.xlu1 %725  ;;  %v427_v46 = vsel %vm414_vm8, %v14997_v43, 0.0  ;;  %v14999_v47 = vpop.eup %14998 }
 0x437   :  { %14080 = vmatprep.subr.msk.bf16.mxu0 %vm15620_vm7, %v14078_v44  ;;  %13085 = vmatprep.mubr.msk.f32.mxu0 %vm324_vm6, %v726_v45  ;;  %v424_v48 = vsel %vm410_vm9, %v14999_v47, 0.0 }
 0x438   :  { %428 = vadd.xlane.f32.xlu0 %v427_v46  ;;  %14083 = vmatpush3.bf16.xpose.msk.msra.mxu0 %vm15620_vm7, %v14078_v44 }
 0x43c   :  { %425 = vadd.xlane.f32.xlu0 %v424_v48 }
 0x452   :  { %14627 = vrot.lane.b32.xlu0 %v15612_v4, %s17925_s4 }
 0x456   :  { %524 = vrot.lane.b32.xlu0 %v15608_v2, %s17923_s2 }
 0x45a   :  { %727 = vrot.lane.b32.xlu0 %v15608_v2, %s17915_s9 }
 0x4c5   :  { %v429_v50 = vpop.xlane.xlu0 %428 }
 0x4c6   :  { %15000 = vrcp.f32 %v429_v50 }
 0x4c9   :  { %v426_v51 = vpop.xlane.xlu0 %425 }
 0x4ca   :  { %15002 = vrcp.f32 %v426_v51 }
 0x4cd   :  { %v14628_v52 = vpop.permute.xlu0 %14627 }
 0x4ce   :  { %v14630_v53 = vunpack.i.h.bf16 %v14628_v52  ;;  %v14629_v54 = vunpack.i.l.bf16 %v14628_v52 }
 0x4d0   :  { %v14066_v56 = vpack.c.bf16 %v14630_v53, %v14629_v54  ;;  %v15001_v58 = vpop.eup %15000 }
 0x4d1   :  { %v525_v57 = vpop.permute.xlu0 %524  ;;  %v433_v1 = vmul.f32 %v15001_v58, %v14997_v43 }
 0x4d2   :  { %14068 = vmatprep.subr.msk.bf16.mxu1 %vm15620_vm7, %v14066_v56 }
 0x4d4   :  { %v15003_v59 = vpop.eup %15002 }
 0x4d5   :  { %v728_v62 = vpop.permute.xlu0 %727  ;;  %v432_v0 = vmul.f32 %v15003_v59, %v14999_v47 }
 0x4d6   :  { %13086 = vmatmul.mubr.msk.f32.vlgmr.msra.gmra.mrb[6].mxu0 %vm324_vm6, %v728_v62 }
 0x4d7   :  { %13064 = vmatprep.mubr.msk.f32.mxu1 %vm410_vm9, %v432_v0 }
 0x4d8   :  { %13065 = vmatmul.mubr.msk.f32.vlgmr.msra.gmra.mrb[8].mxu1 %vm410_vm9, %v433_v1 }
 0x4d9   :  { %14071 = vmatpush3.bf16.xpose.msk.msra.mxu1 %vm15620_vm7, %v14066_v56  ;;  %13071 = vmatprep.mubr.msk.f32.mxu1 %vm324_vm6, %v523_v36 }
 0x4e0   :  { %13072 = vmatmul.mubr.msk.f32.vlgmr.msra.gmra.mrb[10].mxu1 %vm324_vm6, %v525_v57 }
 0x5a9   :  { %v13087_v3 = vpop.f32.mrb[6].mxu0 }
 0x5aa   :  { %v807_v6 = vpop.f32.mrb[7].mxu0  ;;  %v817_v21 = vmul.f32 0.35355338, %v13087_v3 }
 0x5ab   :  { %v15671_v8 = vpop.f32.mrb[8].mxu1  ;;  %v816_v16 = vmul.f32 0.35355338, %v807_v6 }
 0x5ac   :  { %v15673_v9 = vpop.f32.mrb[9].mxu1  ;;  %v821_v24 = vsel %vm414_vm8, %v817_v21, -inf }
 0x5ad   :  { %v818_v23 = vsel %vm410_vm9, %v816_v16, -inf }
 0x5b3   :  { %v13073_v11 = vpop.f32.mrb[10].mxu1 }
 0x5b4   :  { %v614_v13 = vmul.f32 0.35355338, %v13073_v11  ;;  %v604_v14 = vpop.f32.mrb[11].mxu1 }
 0x5b5   :  { %v613_v15 = vmul.f32 0.35355338, %v604_v14 }
 0x5b6   :  { %v618_v19 = vsel %vm414_vm8, %v614_v13, -inf }
 0x5b7   :  { %619 = vmax.xlane.f32.xlu0 %v618_v19  ;;  %v615_v22 = vsel %vm410_vm9, %v613_v15, -inf }
 0x5b8   :  { %616 = vmax.xlane.f32.xlu1 %v615_v22 }
 0x5bb   :  { %819 = vmax.xlane.f32.xlu0 %v818_v23 }
 0x5bc   :  { %822 = vmax.xlane.f32.xlu1 %v821_v24 }
 0x644   :  { %v620_v25 = vpop.xlane.xlu0 %619 }
 0x645   :  { %v617_v26 = vpop.xlane.xlu1 %616  ;;  %v622_v28 = vsub.f32 %v614_v13, %v620_v25 }
 0x646   :  { %v621_v27 = vsub.f32 %v613_v15, %v617_v26 }
 0x647   :  { %v625_v39 = vmul.f32 1.442695, %v622_v28 }
 0x648   :  { %v820_v29 = vpop.xlane.xlu0 %819  ;;  %v623_v36 = vmul.f32 1.442695, %v621_v27 }
 0x649   :  { %v824_v30 = vsub.f32 %v816_v16, %v820_v29  ;;  %v823_v31 = vpop.xlane.xlu1 %822 }
 0x64a   :  { %v825_v33 = vsub.f32 %v817_v21, %v823_v31 }
 0x64b   :  { %v826_v38 = vmul.f32 1.442695, %v824_v30 }
 0x64c   :  { %v828_v42 = vmul.f32 1.442695, %v825_v33 }
 0x64d   :  { %15004 = vpow2.f32 %v826_v38 }
 0x64e   :  { %15006 = vpow2.f32 %v828_v42 }
 0x64f   :  { %15008 = vpow2.f32 %v623_v36 }
 0x650   :  { %15010 = vpow2.f32 %v625_v39 }
 0x657   :  { %v15005_v43 = vpop.eup %15004 }
 0x658   :  { %v15007_v44 = vpop.eup %15006  ;;  %v830_v45 = vsel %vm410_vm9, %v15005_v43, 0.0 }
 0x659   :  { %v15009_v46 = vpop.eup %15008  ;;  %831 = vadd.xlane.f32.xlu0 %v830_v45  ;;  %v833_v47 = vsel %vm414_vm8, %v15007_v44, 0.0 }
 0x65a   :  { %v15011_v48 = vpop.eup %15010  ;;  %834 = vadd.xlane.f32.xlu1 %v833_v47  ;;  %v627_v50 = vsel %vm410_vm9, %v15009_v46, 0.0 }
 0x65b   :  { %v630_v51 = vsel %vm414_vm8, %v15011_v48, 0.0 }
 0x65d   :  { %628 = vadd.xlane.f32.xlu0 %v627_v50 }
 0x65e   :  { %631 = vadd.xlane.f32.xlu1 %v630_v51 }
 0x66f   :  { %14642 = vrot.lane.b32.xlu1 %v15612_v4, %s17899_s26 }
 0x673   :  { %14647 = vrot.lane.b32.xlu1 %v15612_v4, %s17913_s8  ;;  %14637 = vrot.lane.b32.xlu0 %v15612_v4, %s17917_s6 }
 0x677   :  { %930 = vrot.lane.b32.xlu1 %v15608_v2, %s17901_s28  ;;  %928 = vrot.lane.b32.xlu0 %v15603_v63, %s17901_s28 }
 0x6e6   :  { %v832_v52 = vpop.xlane.xlu0 %831 }
 0x6e7   :  { %v835_v53 = vpop.xlane.xlu1 %834  ;;  %15012 = vrcp.f32 %v832_v52 }
 0x6ea   :  { %v629_v54 = vpop.xlane.xlu0 %628 }
 0x6eb   :  { %15014 = vrcp.f32 %v629_v54  ;;  %v632_v56 = vpop.xlane.xlu1 %631 }
 0x6ec   :  { %15016 = vrcp.f32 %v632_v56 }
 0x6ed   :  { %15018 = vrcp.f32 %v835_v53 }
 0x6ee   :  { %v14638_v57 = vpop.permute.xlu0 %14637 }
 0x6ef   :  { %v14640_v58 = vunpack.i.h.bf16 %v14638_v57  ;;  %v14639_v59 = vunpack.i.l.bf16 %v14638_v57  ;;  %v14643_v62 = vpop.permute.xlu1 %14642 }
 0x6f0   :  { %v14645_v0 = vunpack.i.h.bf16 %v14643_v62  ;;  %v14644_v1 = vunpack.i.l.bf16 %v14643_v62 }
 0x6f1   :  { %v14072_v3 = vpack.c.bf16 %v14640_v58, %v14639_v59  ;;  %v15013_v63 = vpop.eup %15012  ;;  %v315_v59 = vadd.f32 %v15600_v61, %v15614_v5 }
 0x6f2   :  { %v14084_v6 = vpack.c.bf16 %v14645_v0, %v14644_v1  ;;  %v838_v23 = vmul.f32 %v15013_v63, %v15005_v43  ;;  %v929_v26 = vpop.permute.xlu0 %928  ;;  %v1165_v0 = vrot.slane %v15608_v2, 2 }
 0x6f3   :  { %v14648_v11 = vpop.permute.xlu1 %14647  ;;  %14074 = vmatprep.subr.msk.bf16.mxu1 %vm15641_vm11, %v14072_v3  ;;  %v15731_v62 = vrot.slane %v315_v59, 2 }
 0x6f4   :  { %14077 = vmatpush3.bf16.msk.msra.mxu1 %vm15641_vm11, %v14072_v3  ;;  %v14650_v14 = vunpack.i.h.bf16 %v14648_v11  ;;  %v14649_v15 = vunpack.i.l.bf16 %v14648_v11 }
 0x6f5   :  { %v15015_v13 = vpop.eup %15014  ;;  %14086 = vmatprep.subr.msk.bf16.mxu1 %vm15641_vm11, %v14084_v6  ;;  %v15736_v1 = vsel %vm1164_vm12, %v1165_v0, %v15731_v62 }
 0x6f6   :  { %v15017_v16 = vpop.eup %15016  ;;  %v635_v19 = vmul.f32 %v15015_v13, %v15009_v46  ;;  %v14090_v24 = vpack.c.bf16 %v14650_v14, %v14649_v15  ;;  %v15740_v3 = vpack.i.bf16 %v15731_v62, %v15736_v1 }
 0x6f7   :  { %v636_v21 = vmul.f32 %v15017_v16, %v15011_v48  ;;  %v15019_v22 = vpop.eup %15018  ;;  %v931_v27 = vpop.permute.xlu1 %930 }
 0x6f8   :  { %13078 = vmatprep.mubr.msk.f32.mxu1 %vm410_vm9, %v635_v19  ;;  %v839_v25 = vmul.f32 %v15019_v22, %v15007_v44 }
 0x6f9   :  { %13079 = vmatmul.mubr.msk.f32.vlgmr.msra.gmra.mrb[12].mxu1 %vm410_vm9, %v636_v21 }
 0x6fa   :  { %14089 = vmatpush3.bf16.msk.msra.mxu1 %vm15641_vm11, %v14084_v6  ;;  %13092 = vmatprep.mubr.msk.f32.mxu1 %vm410_vm9, %v838_v23 }
 0x6fb   :  { %14092 = vmatprep.subr.msk.bf16.mxu1 %vm15620_vm7, %v14090_v24 }
 0x6fd   :  { %13093 = vmatmul.mubr.msk.f32.vlgmr.msra.gmra.mrb[14].mxu1 %vm410_vm9, %v839_v25 }
 0x6fe   :  { %13099 = vmatprep.mubr.msk.f32.mxu1 %vm324_vm6, %v929_v26 }
 0x703   :  { %14095 = vmatpush3.bf16.xpose.msk.msra.mxu1 %vm15620_vm7, %v14090_v24 }
 0x70a   :  { %13100 = vmatmul.mubr.msk.f32.vlgmr.msra.gmra.mrb[16].mxu1 %vm324_vm6, %v931_v27 }
 0x7cc   :  { %v15711_v28 = vpop.f32.mrb[12].mxu1 }
 0x7cd   :  { %v15713_v29 = vpop.f32.mrb[13].mxu1 }
 0x7d0   :  { %v15715_v30 = vpop.f32.mrb[14].mxu1 }
 0x7d1   :  { %v15717_v31 = vpop.f32.mrb[15].mxu1 }
 0x7dd   :  { %v13101_v33 = vpop.f32.mrb[16].mxu1 }
 0x7de   :  { %v1020_v36 = vmul.f32 0.35355338, %v13101_v33  ;;  %v1010_v38 = vpop.f32.mrb[17].mxu1 }
 0x7df   :  { %v1019_v39 = vmul.f32 0.35355338, %v1010_v38 }
 0x7e0   :  { %v1024_v42 = vsel %vm414_vm8, %v1020_v36, -inf }
 0x7e1   :  { %1025 = vmax.xlane.f32.xlu1 %v1024_v42  ;;  %v1021_v43 = vsel %vm410_vm9, %v1019_v39, -inf }
 0x7e2   :  { %1022 = vmax.xlane.f32.xlu0 %v1021_v43 }
 0x7f2   :  { %14652 = vrot.lane.b32.xlu1 %v15612_v4, %s17903_s7 }
 0x86e   :  { %v1026_v44 = vpop.xlane.xlu1 %1025 }
 0x86f   :  { %v1028_v45 = vsub.f32 %v1020_v36, %v1026_v44  ;;  %v1023_v46 = vpop.xlane.xlu0 %1022 }
 0x870   :  { %v1027_v47 = vsub.f32 %v1019_v39, %v1023_v46 }
 0x871   :  { %v1031_v48 = vmul.f32 1.442695, %v1028_v45 }
 0x872   :  { %v1029_v50 = vmul.f32 1.442695, %v1027_v47  ;;  %v14653_v51 = vpop.permute.xlu1 %14652 }
 0x873   :  { %15020 = vpow2.f32 %v1031_v48  ;;  %v14655_v52 = vunpack.i.h.bf16 %v14653_v51  ;;  %v14654_v53 = vunpack.i.l.bf16 %v14653_v51 }
 0x874   :  { %15022 = vpow2.f32 %v1029_v50 }
 0x875   :  { %v14096_v54 = vpack.c.bf16 %v14655_v52, %v14654_v53 }
 0x877   :  { %14098 = vmatprep.subr.msk.bf16.mxu0 %vm15641_vm11, %v14096_v54 }
 0x878   :  { %14101 = vmatpush3.bf16.msk.msra.mxu0 %vm15641_vm11, %v14096_v54 }
 0x87d   :  { %v15021_v56 = vpop.eup %15020 }
 0x87e   :  { %v1036_v4 = vsel %vm414_vm8, %v15021_v56, 0.0  ;;  %v15023_v57 = vpop.eup %15022 }
 0x87f   :  { %1037 = vadd.xlane.f32.xlu0 %v1036_v4  ;;  %v1033_v58 = vsel %vm410_vm9, %v15023_v57, 0.0 }
 0x883   :  { %1034 = vadd.xlane.f32.xlu0 %v1033_v58 }
 0x899   :  { %14657 = vrot.lane.b32.xlu0 %v15740_v3, %s17927_s5  ;;  %s17979_s5 = smov 120  }
 0x90c   :  { %v1038_v6 = vpop.xlane.xlu0 %1037 }
 0x90d   :  { %15024 = vrcp.f32 %v1038_v6 }
 0x910   :  { %v1035_v11 = vpop.xlane.xlu0 %1034 }
 0x911   :  { %15026 = vrcp.f32 %v1035_v11 }
 0x914   :  { %v14658_v5 = vpop.permute.xlu0 %14657 }
 0x915   :  { %v14660_v63 = vunpack.i.h.bf16 %v14658_v5  ;;  %v14659_v13 = vunpack.i.l.bf16 %v14658_v5 }
 0x917   :  { %v14102_v14 = vpack.c.bf16 %v14660_v63, %v14659_v13  ;;  %v15025_v2 = vpop.eup %15024 }
 0x918   :  { %v1042_v19 = vmul.f32 %v15025_v2, %v15021_v56 }
 0x919   :  { %14104 = vmatprep.subr.msk.bf16.mxu0 %vm15620_vm7, %v14102_v14 }
 0x91b   :  { %v15027_v15 = vpop.eup %15026 }
 0x91c   :  { %v1041_v16 = vmul.f32 %v15027_v15, %v15023_v57 }
 0x91e   :  { %13106 = vmatprep.mubr.msk.f32.mxu0 %vm410_vm9, %v1041_v16 }
 0x91f   :  { %13107 = vmatmul.mubr.msk.f32.vlgmr.msra.gmra.mrb[8].mxu0 %vm410_vm9, %v1042_v19 }
 0x920   :  { %14107 = vmatpush3.bf16.xpose.msk.msra.mxu0 %vm15620_vm7, %v14102_v14  ;;  %13113 = vmatprep.mubr.msk.f32.mxu0 %vm324_vm6, %v15736_v1 }
 0x927   :  { %13114 = vmatmul.mubr.msk.f32.vlgmr.msra.gmra.mrb[10].mxu0 %vm324_vm6, %v15731_v62 }
 0x9f2   :  { %v15754_v21 = vpop.f32.mrb[8].mxu0 }
 0x9f3   :  { %v15756_v22 = vpop.f32.mrb[9].mxu0 }
 0x9fa   :  { %v13115_v23 = vpop.f32.mrb[10].mxu0 }
 0x9fb   :  { %v1256_v24 = vmul.f32 0.35355338, %v13115_v23  ;;  %v1246_v25 = vpop.f32.mrb[11].mxu0 }
 0x9fc   :  { %v1255_v26 = vmul.f32 0.35355338, %v1246_v25 }
 0x9fd   :  { %v1260_v27 = vsel %vm414_vm8, %v1256_v24, -inf }
 0x9fe   :  { %1261 = vmax.xlane.f32.xlu0 %v1260_v27  ;;  %v1257_v33 = vsel %vm410_vm9, %v1255_v26, -inf }
 0x9ff   :  { %1258 = vmax.xlane.f32.xlu1 %v1257_v33 }
 0xa10   :  { %14662 = vrot.lane.b32.xlu1 %v15740_v3, %s17921_s11  ;;  %s17978_s11 = smov 88  }
 0xa14   :  { %1367 = vrot.lane.b32.xlu1 %v15736_v1, %s17923_s2 }
 0xa8b   :  { %v1262_v36 = vpop.xlane.xlu0 %1261 }
 0xa8c   :  { %v1264_v38 = vsub.f32 %v1256_v24, %v1262_v36  ;;  %v1259_v39 = vpop.xlane.xlu1 %1258 }
 0xa8d   :  { %v1263_v42 = vsub.f32 %v1255_v26, %v1259_v39 }
 0xa8e   :  { %v1267_v43 = vmul.f32 1.442695, %v1264_v38 }
 0xa8f   :  { %v1265_v44 = vmul.f32 1.442695, %v1263_v42 }
 0xa90   :  { %15028 = vpow2.f32 %v1267_v43  ;;  %v14663_v45 = vpop.permute.xlu1 %14662 }
 0xa91   :  { %15030 = vpow2.f32 %v1265_v44  ;;  %v14665_v46 = vunpack.i.h.bf16 %v14663_v45  ;;  %v14664_v47 = vunpack.i.l.bf16 %v14663_v45 }
 0xa93   :  { %v14108_v48 = vpack.c.bf16 %v14665_v46, %v14664_v47 }
 0xa94   :  { %v1368_v54 = vpop.permute.xlu1 %1367 }
 0xa95   :  { %14110 = vmatprep.subr.msk.bf16.mxu1 %vm15641_vm11, %v14108_v48 }
 0xa96   :  { %14113 = vmatpush3.bf16.msk.msra.mxu1 %vm15641_vm11, %v14108_v48 }
 0xa9a   :  { %v15029_v50 = vpop.eup %15028 }
 0xa9b   :  { %v15031_v51 = vpop.eup %15030  ;;  %v1272_v52 = vsel %vm414_vm8, %v15029_v50, 0.0 }
 0xa9c   :  { %1273 = vadd.xlane.f32.xlu0 %v1272_v52  ;;  %v1269_v53 = vsel %vm410_vm9, %v15031_v51, 0.0 }
 0xa9d   :  { %1270 = vadd.xlane.f32.xlu1 %v1269_v53 }
 0xaae   :  { %1369 = vrot.lane.b32.xlu1 %v15731_v62, %s17923_s2  ;;  %s17976_s2 = sld [smem:[#allocation11_spill]] }
 0xab2   :  { %14667 = vrot.lane.b32.xlu0 %v15740_v3, %s17925_s4  ;;  %s17983_s4 = smov 112  }
 0xb29   :  { %v1274_v56 = vpop.xlane.xlu0 %1273 }
 0xb2a   :  { %15032 = vrcp.f32 %v1274_v56  ;;  %v1271_v4 = vpop.xlane.xlu1 %1270 }
 0xb2b   :  { %15034 = vrcp.f32 %v1271_v4 }
 0xb2d   :  { %v14668_v57 = vpop.permute.xlu0 %14667 }
 0xb2e   :  { %v14670_v58 = vunpack.i.h.bf16 %v14668_v57  ;;  %v14669_v59 = vunpack.i.l.bf16 %v14668_v57  ;;  %v1370_v13 = vpop.permute.xlu1 %1369 }
 0xb30   :  { %v14114_v0 = vpack.c.bf16 %v14670_v58, %v14669_v59 }
 0xb32   :  { %14116 = vmatprep.subr.msk.bf16.mxu1 %vm15620_vm7, %v14114_v0 }
 0xb34   :  { %v15033_v6 = vpop.eup %15032 }
 0xb35   :  { %v15035_v11 = vpop.eup %15034  ;;  %v1278_v63 = vmul.f32 %v15033_v6, %v15029_v50 }
 0xb36   :  { %v1277_v5 = vmul.f32 %v15035_v11, %v15031_v51 }
 0xb38   :  { %13120 = vmatprep.mubr.msk.f32.mxu1 %vm410_vm9, %v1277_v5 }
 0xb39   :  { %13121 = vmatmul.mubr.msk.f32.vlgmr.msra.gmra.mrb[18].mxu1 %vm410_vm9, %v1278_v63 }
 0xb3a   :  { %14119 = vmatpush3.bf16.xpose.msk.msra.mxu1 %vm15620_vm7, %v14114_v0  ;;  %13127 = vmatprep.mubr.msk.f32.mxu1 %vm324_vm6, %v1368_v54 }
 0xb41   :  { %13128 = vmatmul.mubr.msk.f32.vlgmr.msra.gmra.mrb[20].mxu1 %vm324_vm6, %v1370_v13 }
 0xc0c   :  { %v15782_v14 = vpop.f32.mrb[18].mxu1 }
 0xc0d   :  { %v15784_v2 = vpop.f32.mrb[19].mxu1 }
 0xc14   :  { %v13129_v15 = vpop.f32.mrb[20].mxu1 }
 0xc15   :  { %v1459_v16 = vmul.f32 0.35355338, %v13129_v15  ;;  %v1449_v19 = vpop.f32.mrb[21].mxu1 }
 0xc16   :  { %v1458_v23 = vmul.f32 0.35355338, %v1449_v19 }
 0xc17   :  { %v1463_v24 = vsel %vm414_vm8, %v1459_v16, -inf }
 0xc18   :  { %1464 = vmax.xlane.f32.xlu1 %v1463_v24  ;;  %v1460_v25 = vsel %vm410_vm9, %v1458_v23, -inf }
 0xc19   :  { %1461 = vmax.xlane.f32.xlu0 %v1460_v25 }
 0xc29   :  { %14672 = vrot.lane.b32.xlu1 %v15740_v3, %s17917_s6  ;;  %s17974_s6 = sld [smem:[#allocation9_spill]] }
 0xc2d   :  { %1570 = vrot.lane.b32.xlu1 %v15736_v1, %s17915_s9 }
 0xc31   :  { %1572 = vrot.lane.b32.xlu1 %v15731_v62, %s17915_s9  ;;  %s17973_s9 = sld [smem:[#allocation8_spill]] }
 0xca5   :  { %v1465_v26 = vpop.xlane.xlu1 %1464 }
 0xca6   :  { %v1467_v27 = vsub.f32 %v1459_v16, %v1465_v26  ;;  %v1462_v33 = vpop.xlane.xlu0 %1461 }
 0xca7   :  { %v1466_v36 = vsub.f32 %v1458_v23, %v1462_v33 }
 0xca8   :  { %v1470_v38 = vmul.f32 1.442695, %v1467_v27 }
 0xca9   :  { %v1468_v39 = vmul.f32 1.442695, %v1466_v36  ;;  %v14673_v42 = vpop.permute.xlu1 %14672 }
 0xcaa   :  { %15036 = vpow2.f32 %v1470_v38  ;;  %v14675_v43 = vunpack.i.h.bf16 %v14673_v42  ;;  %v14674_v44 = vunpack.i.l.bf16 %v14673_v42 }
 0xcab   :  { %15038 = vpow2.f32 %v1468_v39 }
 0xcac   :  { %v14120_v45 = vpack.c.bf16 %v14675_v43, %v14674_v44 }
 0xcad   :  { %v1571_v6 = vpop.permute.xlu1 %1570 }
 0xcae   :  { %14122 = vmatprep.subr.msk.bf16.mxu0 %vm15641_vm11, %v14120_v45 }
 0xcaf   :  { %14125 = vmatpush3.bf16.msk.msra.mxu0 %vm15641_vm11, %v14120_v45 }
 0xcb1   :  { %v1573_v11 = vpop.permute.xlu1 %1572 }
 0xcb4   :  { %v15037_v46 = vpop.eup %15036 }
 0xcb5   :  { %v1475_v47 = vsel %vm414_vm8, %v15037_v46, 0.0  ;;  %v15039_v48 = vpop.eup %15038 }
 0xcb6   :  { %1476 = vadd.xlane.f32.xlu0 %v1475_v47  ;;  %v1472_v50 = vsel %vm410_vm9, %v15039_v48, 0.0 }
 0xcba   :  { %1473 = vadd.xlane.f32.xlu0 %v1472_v50 }
 0xcd0   :  { %14677 = vrot.lane.b32.xlu0 %v15740_v3, %s17919_s30  ;;  %s17980_s30 = smov 64  }
 0xd43   :  { %v1477_v51 = vpop.xlane.xlu0 %1476 }
 0xd44   :  { %15040 = vrcp.f32 %v1477_v51 }
 0xd47   :  { %v1474_v52 = vpop.xlane.xlu0 %1473 }
 0xd48   :  { %15042 = vrcp.f32 %v1474_v52 }
 0xd4b   :  { %v14678_v53 = vpop.permute.xlu0 %14677 }
 0xd4c   :  { %v14680_v54 = vunpack.i.h.bf16 %v14678_v53  ;;  %v14679_v56 = vunpack.i.l.bf16 %v14678_v53 }
 0xd4e   :  { %v14126_v4 = vpack.c.bf16 %v14680_v54, %v14679_v56  ;;  %v15041_v57 = vpop.eup %15040 }
 0xd4f   :  { %v1481_v0 = vmul.f32 %v15041_v57, %v15037_v46 }
 0xd50   :  { %14128 = vmatprep.subr.msk.bf16.mxu0 %vm15620_vm7, %v14126_v4 }
 0xd52   :  { %v15043_v58 = vpop.eup %15042 }
 0xd53   :  { %v1480_v59 = vmul.f32 %v15043_v58, %v15039_v48 }
 0xd55   :  { %13134 = vmatprep.mubr.msk.f32.mxu0 %vm410_vm9, %v1480_v59 }
 0xd56   :  { %13135 = vmatmul.mubr.msk.f32.vlgmr.msra.gmra.mrb[12].mxu0 %vm410_vm9, %v1481_v0 }
 0xd57   :  { %14131 = vmatpush3.bf16.xpose.msk.msra.mxu0 %vm15620_vm7, %v14126_v4  ;;  %13141 = vmatprep.mubr.msk.f32.mxu0 %vm324_vm6, %v1571_v6 }
 0xd5e   :  { %13142 = vmatmul.mubr.msk.f32.vlgmr.msra.gmra.mrb[14].mxu0 %vm324_vm6, %v1573_v11 }
 0xe29   :  { %v15810_v5 = vpop.f32.mrb[12].mxu0 }
 0xe2a   :  { %v15812_v63 = vpop.f32.mrb[13].mxu0 }
 0xe31   :  { %v13143_v13 = vpop.f32.mrb[14].mxu0 }
 0xe32   :  { %v1662_v15 = vmul.f32 0.35355338, %v13143_v13  ;;  %v1652_v16 = vpop.f32.mrb[15].mxu0 }
 0xe33   :  { %v1661_v19 = vmul.f32 0.35355338, %v1652_v16 }
 0xe34   :  { %v1666_v23 = vsel %vm414_vm8, %v1662_v15, -inf }
 0xe35   :  { %1667 = vmax.xlane.f32.xlu1 %v1666_v23  ;;  %v1663_v24 = vsel %vm410_vm9, %v1661_v19, -inf }
 0xe36   :  { %1664 = vmax.xlane.f32.xlu0 %v1663_v24  ;;  %v14701_v24 = vpack.i.bf16 %v15569_v41, %v15564_v40 }
 0xe46   :  { %14682 = vrot.lane.b32.xlu1 %v15740_v3, %s17899_s26  ;;  %s17907_s26 = smov 8  }
 0xe4a   :  { %1773 = vrot.lane.b32.xlu1 %v15736_v1, %s17901_s28 }
 0xe4e   :  { %1775 = vrot.lane.b32.xlu1 %v15731_v62, %s17901_s28  ;;  %s17909_s28 = smov 16  }
 0xec2   :  { %v1668_v25 = vpop.xlane.xlu1 %1667 }
 0xec3   :  { %v1670_v26 = vsub.f32 %v1662_v15, %v1668_v25  ;;  %v1665_v27 = vpop.xlane.xlu0 %1664 }
 0xec4   :  { %v1669_v33 = vsub.f32 %v1661_v19, %v1665_v27 }
 0xec5   :  { %v1673_v36 = vmul.f32 1.442695, %v1670_v26 }
 0xec6   :  { %v1671_v38 = vmul.f32 1.442695, %v1669_v33  ;;  %v14683_v39 = vpop.permute.xlu1 %14682 }
 0xec7   :  { %15044 = vpow2.f32 %v1673_v36  ;;  %v14685_v42 = vunpack.i.h.bf16 %v14683_v39  ;;  %v14684_v43 = vunpack.i.l.bf16 %v14683_v39 }
 0xec8   :  { %15046 = vpow2.f32 %v1671_v38 }
 0xec9   :  { %v14132_v44 = vpack.c.bf16 %v14685_v42, %v14684_v43 }
 0xeca   :  { %v1774_v58 = vpop.permute.xlu1 %1773 }
 0xecb   :  { %14134 = vmatprep.subr.msk.bf16.mxu1 %vm15641_vm11, %v14132_v44 }
 0xecc   :  { %14137 = vmatpush3.bf16.msk.msra.mxu1 %vm15641_vm11, %v14132_v44 }
 0xece   :  { %v1776_v59 = vpop.permute.xlu1 %1775 }
 0xed1   :  { %v15045_v1 = vpop.eup %15044 }
 0xed2   :  { %v1678_v62 = vsel %vm414_vm8, %v15045_v1, 0.0  ;;  %v15047_v45 = vpop.eup %15046 }
 0xed3   :  { %1679 = vadd.xlane.f32.xlu0 %v1678_v62  ;;  %v1675_v46 = vsel %vm410_vm9, %v15047_v45, 0.0 }
 0xed7   :  { %1676 = vadd.xlane.f32.xlu0 %v1675_v46 }
 0xeed   :  { %14687 = vrot.lane.b32.xlu0 %v15740_v3, %s17913_s8  ;;  %s17981_s8 = smov 80  }
 0xf60   :  { %v1680_v47 = vpop.xlane.xlu0 %1679 }
 0xf61   :  { %15048 = vrcp.f32 %v1680_v47 }
 0xf64   :  { %v1677_v48 = vpop.xlane.xlu0 %1676 }
 0xf65   :  { %15050 = vrcp.f32 %v1677_v48 }
 0xf68   :  { %v14688_v50 = vpop.permute.xlu0 %14687 }
 0xf69   :  { %v14690_v51 = vunpack.i.h.bf16 %v14688_v50  ;;  %v14689_v52 = vunpack.i.l.bf16 %v14688_v50 }
 0xf6b   :  { %v14138_v53 = vpack.c.bf16 %v14690_v51, %v14689_v52  ;;  %v15049_v54 = vpop.eup %15048 }
 0xf6c   :  { %v1684_v57 = vmul.f32 %v15049_v54, %v15045_v1 }
 0xf6d   :  { %14140 = vmatprep.subr.msk.bf16.mxu1 %vm15620_vm7, %v14138_v53 }
 0xf6f   :  { %v15051_v56 = vpop.eup %15050 }
 0xf70   :  { %v1683_v4 = vmul.f32 %v15051_v56, %v15047_v45 }
 0xf72   :  { %13148 = vmatprep.mubr.msk.f32.mxu1 %vm410_vm9, %v1683_v4 }
 0xf73   :  { %13149 = vmatmul.mubr.msk.f32.vlgmr.msra.gmra.mrb[22].mxu1 %vm410_vm9, %v1684_v57 }
 0xf74   :  { %14143 = vmatpush3.bf16.xpose.msk.msra.mxu1 %vm15620_vm7, %v14138_v53  ;;  %13155 = vmatprep.mubr.msk.f32.mxu1 %vm324_vm6, %v1774_v58 }
 0xf75   :  { %14156 = vmatprep.subr.bf16.mxu1 %v15312_v7 }
 0xf7b   :  { %13156 = vmatmul.mubr.msk.f32.vlgmr.msra.gmra.mrb[24].mxu1 %vm324_vm6, %v1776_v59 }
 0xf7c   :  { %13190 = vmatprep.mubr.msk.f32.mxu1 %vm15313_vm0, %v15314_v10 }
0x1046   :  { %v13150_v0 = vpop.f32.mrb[22].mxu1 }
0x1047   :  { %v1764_v6 = vpop.f32.mrb[23].mxu1 }
0x104e   :  { %v13157_v11 = vpop.f32.mrb[24].mxu1 }
0x104f   :  { %v1865_v13 = vmul.f32 0.35355338, %v13157_v11  ;;  %v1855_v15 = vpop.f32.mrb[25].mxu1 }
0x1050   :  { %v1864_v16 = vmul.f32 0.35355338, %v1855_v15 }
0x1051   :  { %v1869_v19 = vsel %vm414_vm8, %v1865_v13, -inf }
0x1052   :  { %1870 = vmax.xlane.f32.xlu1 %v1869_v19  ;;  %v1866_v23 = vsel %vm410_vm9, %v1864_v16, -inf }
0x1053   :  { %1867 = vmax.xlane.f32.xlu0 %v1866_v23 }
0x1063   :  { %14692 = vrot.lane.b32.xlu1 %v15740_v3, %s17903_s7  ;;  %s17905_s7 = smov 24  }
0x1067   :  { %14702 = vrot.lane.b32.xlu1 %v14701_v24, %s17911_s0 }
0x106b   :  { %1133 = vrot.lane.b32.xlu1 %v15713_v29, %s17907_s26 }
0x106f   :  { %1978 = vrot.lane.b32.xlu1 %v15812_v63, %s17907_s26 }
0x1073   :  { %1986 = vrot.lane.b32.xlu1 %v1764_v6, %s17909_s28 }
0x10df   :  { %v1871_v25 = vpop.xlane.xlu1 %1870 }
0x10e0   :  { %v1873_v26 = vsub.f32 %v1865_v13, %v1871_v25  ;;  %v1868_v27 = vpop.xlane.xlu0 %1867 }
0x10e1   :  { %v1872_v3 = vsub.f32 %v1864_v16, %v1868_v27 }
0x10e2   :  { %v1876_v33 = vmul.f32 1.442695, %v1873_v26 }
0x10e3   :  { %v1874_v36 = vmul.f32 1.442695, %v1872_v3  ;;  %v14693_v40 = vpop.permute.xlu1 %14692 }
0x10e4   :  { %v14695_v41 = vunpack.i.h.bf16 %v14693_v40  ;;  %v14694_v38 = vunpack.i.l.bf16 %v14693_v40 }
0x10e5   :  { %15052 = vpow2.f32 %v1874_v36 }
0x10e6   :  { %v14144_v39 = vpack.c.bf16 %v14695_v41, %v14694_v38  ;;  %15054 = vpow2.f32 %v1876_v33 }
0x10e7   :  { %v14703_v1 = vpop.permute.xlu1 %14702 }
0x10e8   :  { %14146 = vmatprep.subr.msk.bf16.mxu0 %vm15641_vm11, %v14144_v39  ;;  %v14705_v62 = vunpack.i.h.bf16 %v14703_v1 }
0x10e9   :  { %14149 = vmatpush3.bf16.msk.msra.mxu0 %vm15641_vm11, %v14144_v39 }
0x10ea   :  { %14150 = vmatprep.subr.bf16.mxu0 %v15312_v7 }
0x10eb   :  { %v1134_v48 = vpop.permute.xlu1 %1133 }
0x10ec   :  { %v1155_v51 = vsel %vm324_vm6, %v15673_v9, %v1134_v48 }
0x10ef   :  { %v15053_v29 = vpop.eup %15052  ;;  %v1979_v15 = vpop.permute.xlu1 %1978 }
0x10f0   :  { %v1878_v63 = vsel %vm410_vm9, %v15053_v29, 0.0  ;;  %v15055_v42 = vpop.eup %15054  ;;  %v2000_v23 = vsel %vm324_vm6, %v15784_v2, %v1979_v15  ;;  %v2187_v15 = vld [vmem:[%s17974_s6 + $0x20] sm:$0xff] }
0x10f1   :  { %1879 = vadd.xlane.f32.xlu0 %v1878_v63  ;;  %v1881_v43 = vsel %vm414_vm8, %v15055_v42, 0.0 }
0x10f3   :  { %v1987_v19 = vpop.permute.xlu1 %1986 }
0x10f4   :  { %v2002_v26 = vsel %vm1157_vm14, %v2000_v23, %v1987_v19  ;;  %v2190_v23 = vld [vmem:[%s17974_s6 + $0x38] sm:$0xff] }
0x10f5   :  { %1882 = vadd.xlane.f32.xlu0 %v1881_v43 }
0x110b   :  { %14697 = vrot.lane.b32.xlu0 %v14696_v20, %s17911_s0 }
0x110f   :  { %1141 = vrot.lane.b32.xlu0 %v15717_v31, %s17909_s28 }
0x1113   :  { %1149 = vrot.lane.b32.xlu0 %v15756_v22, %s17905_s7 }
0x1117   :  { %1135 = vrot.lane.b32.xlu0 %v15711_v28, %s17907_s26 }
0x111b   :  { %1143 = vrot.lane.b32.xlu0 %v15715_v30, %s17909_s28 }
0x111f   :  { %2029 = vrot.lane.b32.xlu0 %v15600_v61, %s17911_s0  ;;  %v14704_v61 = vunpack.i.l.bf16 %v14703_v1  ;;  %s17985_s0 = smov 104  }
0x1121   :  { %v14154_v47 = vpack.c.bf16 %v14705_v62, %v14704_v61 }
0x1123   :  { %1980 = vrot.lane.b32.xlu0 %v15810_v5, %s17907_s26  ;;  %s17975_s26 = sld [smem:[#allocation10_spill]] }
0x1127   :  { %1988 = vrot.lane.b32.xlu0 %v13150_v0, %s17909_s28  ;;  %s17972_s28 = sld [smem:[#allocation7_spill]] }
0x117e   :  { %v1880_v17 = vpop.xlane.xlu0 %1879 }
0x117f   :  { %15056 = vrcp.f32 %v1880_v17  ;;  %v2178_v17 = vld [vmem:[%s17972_s28] sm:$0xff] }
0x1182   :  { %v1883_v18 = vpop.xlane.xlu0 %1882 }
0x1183   :  { %15058 = vrcp.f32 %v1883_v18  ;;  %v2179_v18 = vld [vmem:[%s17972_s28 + $0x8] sm:$0xff] }
0x1186   :  { %v14698_v20 = vpop.permute.xlu0 %14697 }
0x1187   :  { %v14700_v22 = vunpack.i.h.bf16 %v14698_v20  ;;  %v14699_v44 = vunpack.i.l.bf16 %v14698_v20  ;;  %v14157_v20 = vpack.c.bf16 %v2179_v18, %v2178_v17 }
0x1189   :  { %v15057_v31 = vpop.eup %15056  ;;  %v14151_v45 = vpack.c.bf16 %v14700_v22, %v14699_v44  ;;  %14158 = vmatpush3.bf16.msra.mxu1 %v14157_v20  ;;  %v2181_v22 = vld [vmem:[%s17972_s28 + $0x18] sm:$0xff] }
0x118a   :  { %v1886_v28 = vmul.f32 %v15057_v31, %v15053_v29  ;;  %v1142_v46 = vpop.permute.xlu0 %1141  ;;  %v2180_v31 = vld [vmem:[%s17972_s28 + $0x10] sm:$0xff]  ;;  %14159 = vmatprep.subr.bf16.mxu1 %v15312_v7 }
0x118b   :  { %v1158_v52 = vsel %vm1157_vm14, %v1155_v51, %v1142_v46  ;;  %v14160_v44 = vpack.c.bf16 %v2181_v22, %v2180_v31 }
0x118c   :  { %13162 = vmatprep.mubr.msk.f32.mxu0 %vm410_vm9, %v1886_v28 }
0x118d   :  { %v15059_v30 = vpop.eup %15058  ;;  %14161 = vmatpush3.bf16.msra.mxu1 %v14160_v44  ;;  %v16016_v44 = vld [vmem:[%s17976_s2] ss:$0 sm:$0xff]  ;;  %s18005_s2 = sld [smem:[#allocation22_spill]] }
0x118e   :  { %v1887_v5 = vmul.f32 %v15059_v30, %v15055_v42  ;;  %v1150_v50 = vpop.permute.xlu0 %1149  ;;  %14174 = vmatprep.subr.bf16.mxu1 %v15312_v7 }
0x118f   :  { %v1161_v53 = vsel %vm1160_vm13, %v1158_v52, %v1150_v50  ;;  %v15946_v52 = vld [vmem:[%s17973_s9] sm:$0xf] }
0x1190   :  { %13163 = vmatmul.mubr.msk.f32.vlgmr.msra.gmra.mrb[16].mxu0 %vm410_vm9, %v1887_v5  ;;  %v15937_v5 = vshrl.u32 %v101_v34, 7 }
0x1191   :  { %14152 = vmatpush3.bf16.msra.mxu0 %v14151_v45  ;;  %13173 = vmatprep.mubr.msk.f32.mxu0 %vm15313_vm0, %v15314_v10 }
0x1192   :  { %14153 = vmatprep.subr.bf16.mxu0 %v15312_v7  ;;  %v1136_v57 = vpop.permute.xlu0 %1135  ;;  %v15941_v51 = vsub.s32 0, %v15937_v5 }
0x1193   :  { %v1156_v40 = vsel %vm324_vm6, %v15671_v8, %v1136_v57  ;;  %v2183_v57 = vld [vmem:[%s17974_s6] sm:$0xff] }
0x1194   :  { %v15953_v34 = vrot.slane %v15946_v52, %v15941_v51 }
0x1195   :  { %14155 = vmatpush3.bf16.msra.mxu0 %v14154_v47 }
0x1196   :  { %14162 = vmatprep.subr.bf16.mxu0 %v15312_v7  ;;  %v1144_v58 = vpop.permute.xlu0 %1143 }
0x1198   :  { %13174 = vmatmul.mubr.msk.f32.vlgmr.msra.gmra.mrb[18].mxu0 %vm228_vm5, %v1161_v53  ;;  %v15949_v53 = vsub.s32 1, %v15937_v5 }
0x1199   :  { %13176 = vmatprep.mubr.msk.f32.mxu0 %vm15313_vm0, %v15314_v10 }
0x119a   :  { %v15894_v59 = vpop.permute.xlu0 %2029 }
0x119e   :  { %v1981_v13 = vpop.permute.xlu0 %1980 }
0x11a2   :  { %v1989_v16 = vpop.permute.xlu0 %1988 }
0x1263   :  { %v13164_v54 = vpop.f32.mrb[16].mxu0 }
0x1264   :  { %1996 = vrot.lane.b32.xlu0 %v13164_v54, %s17905_s7  ;;  %v1967_v56 = vpop.f32.mrb[17].mxu0 }
0x1265   :  { %1994 = vrot.lane.b32.xlu1 %v1967_v56, %s17905_s7  ;;  %v15957_v56 = vrot.slane %v15946_v52, %v15949_v53 }
0x1269   :  { %1151 = vrot.lane.b32.xlu1 %v15754_v21, %s17905_s7  ;;  %v2001_v21 = vsel %vm324_vm6, %v15782_v14, %v1981_v13  ;;  %v1159_v14 = vsel %vm1157_vm14, %v1156_v40, %v1144_v58  ;;  %v2184_v58 = vld [vmem:[%s17974_s6 + $0x8] sm:$0xff]  ;;  %s17982_s7 = smov 56  }
0x126a   :  { %v2003_v24 = vsel %vm1157_vm14, %v2001_v21, %v1989_v16  ;;  %v2188_v16 = vld [vmem:[%s17974_s6 + $0x28] sm:$0xff]  ;;  %v2189_v21 = vld [vmem:[%s17974_s6 + $0x30] sm:$0xff] }
0x126b   :  { %v2106_v9 = vpop.f32.mrb[18].mxu0  ;;  %v14169_v19 = vpack.c.bf16 %v2188_v16, %v2187_v15  ;;  %v16039_v15 = vld [vmem:[%s17965_s10 + $0x28] sm:$0xff] }
0x126c   :  { %v13175_v4 = vpop.f32.mrb[19].mxu0  ;;  %v2107_v0 = vadd.f32 %v2106_v9, %v15894_v59 }
0x126e   :  { %v2120_v6 = vadd.f32 %v2107_v0, %v15579_v49  ;;  %v2185_v0 = vld [vmem:[%s17974_s6 + $0x10] sm:$0xff] }
0x1270   :  { %v2123_v11 = vsel %vm228_vm5, %v2120_v6, 0.0 }
0x128d   :  { %2124 = vadd.xlane.f32.xlu1 %v2123_v11  ;;  %v2186_v11 = vld [vmem:[%s17974_s6 + $0x18] sm:$0xff] }
0x128e   :  { %v14166_v13 = vpack.c.bf16 %v2186_v11, %v2185_v0 }
0x12d6   :  { %v1997_v25 = vpop.permute.xlu0 %1996 }
0x12d7   :  { %v2005_v49 = vsel %vm1160_vm13, %v2003_v24, %v1997_v25  ;;  %v1995_v27 = vpop.permute.xlu1 %1994  ;;  %v14172_v24 = vpack.c.bf16 %v2190_v23, %v2189_v21  ;;  %v16052_v21 = vld [vmem:[%s17965_s10 + $0x38] sm:$0xff] }
0x12d8   :  { %v2009_v3 = vrot.slane %v2005_v49, 6  ;;  %v2004_v33 = vsel %vm1160_vm13, %v2002_v26, %v1995_v27 }
0x12d9   :  { %v2008_v36 = vrot.slane %v2004_v33, 6 }
0x12db   :  { %v1152_v41 = vpop.permute.xlu1 %1151  ;;  %v2010_v2 = vsel %vm206_vm4, %v2008_v36, %v2009_v3 }
0x12dc   :  { %v1162_v38 = vsel %vm1160_vm13, %v1159_v14, %v1152_v41  ;;  %v16001_v14 = vld [vmem:[%s17975_s26] ss:$0 sm:$0xff] }
0x12dd   :  { %v2012_v39 = vsel %vm206_vm4, %v1162_v38, %v2008_v36 }
0x12de   :  { %13177 = vmatmul.mubr.msk.f32.gmra.mrb[20].mxu0 %vm228_vm5, %v2012_v39 }
0x12df   :  { %13179 = vmatprep.mubr.msk.f32.mxu0 %vm15313_vm0, %v15314_v10 }
0x12e2   :  { %13180 = vmatmul.mubr.msk.f32.gmra.mrb[22].mxu0 %vm228_vm5, %v2010_v2 }
0x12e3   :  { %13215 = vmatprep.mubr.msk.f32.mxu0 %vm15313_vm0, %v15314_v10 }
0x131a   :  { %v2125_v8 = vpop.xlane.xlu1 %2124 }
0x131b   :  { %v2134_v29 = vmul.f32 0.03125, %v2125_v8 }
0x131d   :  { %v2137_v63 = vsub.f32 %v2120_v6, %v2134_v29  ;;  %v14163_v6 = vpack.c.bf16 %v2184_v58, %v2183_v57 }
0x131f   :  { %v2140_v42 = vmul.f32 %v2137_v63, %v2137_v63  ;;  %14164 = vmatpush3.bf16.msra.mxu0 %v14163_v6 }
0x1320   :  { %14165 = vmatprep.subr.bf16.mxu0 %v15312_v7 }
0x1321   :  { %v2143_v43 = vsel %vm228_vm5, %v2140_v42, 0.0 }
0x1322   :  { %2144 = vadd.xlane.f32.xlu1 %v2143_v43 }
0x1323   :  { %14167 = vmatpush3.bf16.msra.mxu0 %v14166_v13  ;;  %v16034_v13 = vld [vmem:[%s17965_s10 + $0x20] sm:$0xff] }
0x1324   :  { %14168 = vmatprep.subr.bf16.mxu0 %v15312_v7  ;;  %v14175_v16 = vpack.c.bf16 %v16039_v15, %v16034_v13 }
0x1327   :  { %14170 = vmatpush3.bf16.msra.mxu0 %v14169_v19  ;;  %v16047_v19 = vld [vmem:[%s17965_s10 + $0x30] sm:$0xff]  ;;  %s17984_s10 = smov 72  }
0x1328   :  { %14171 = vmatprep.subr.bf16.mxu0 %v15312_v7  ;;  %v14178_v23 = vpack.c.bf16 %v16052_v21, %v16047_v19 }
0x132b   :  { %14173 = vmatpush3.bf16.msra.mxu0 %v14172_v24 }
0x13af   :  { %v2145_v28 = vpop.xlane.xlu1 %2144 }
0x13b0   :  { %v2152_v1 = vmul.f32 0.03125, %v2145_v28 }
0x13b1   :  { %v2111_v30 = vpop.f32.mrb[20].mxu0 }
0x13b2   :  { %v2155_v62 = vadd.f32 1e-05, %v2152_v1  ;;  %v2112_v61 = vadd.f32 %v2111_v30, %v15894_v59  ;;  %v13178_v45 = vpop.f32.mrb[21].mxu0 }
0x13b4   :  { %15060 = vrsqrt.f32 %v2155_v62  ;;  %v2121_v46 = vadd.f32 %v2112_v61, %v15586_v55 }
0x13b5   :  { %v2116_v47 = vpop.f32.mrb[22].mxu0 }
0x13b6   :  { %v13181_v48 = vpop.f32.mrb[23].mxu0  ;;  %v2126_v50 = vsel %vm228_vm5, %v2121_v46, 0.0  ;;  %v2117_v49 = vadd.f32 %v2116_v47, %v15894_v59 }
0x13b7   :  { %2127 = vadd.xlane.f32.xlu0 %v2126_v50 }
0x13b8   :  { %v2122_v36 = vadd.f32 %v2117_v49, %v15593_v60 }
0x13ba   :  { %v2130_v40 = vsel %vm2129_vm15, %v2122_v36, 0.0 }
0x13be   :  { %v15061_v55 = vpop.eup %15060 }
0x13bf   :  { %v2161_v54 = vmul.f32 %v15061_v55, %v2137_v63 }
0x13c1   :  { %v2168_v9 = vmul.f32 %v15953_v34, %v2161_v54 }
0x13c3   :  { %v15961_v4 = vadd.f32 %v15957_v56, %v2168_v9 }
0x13c5   :  { %13191 = vmatmul.mubr.msk.f32.vlgmr.msra.gmra.mrb[26].mxu1 %vm228_vm5, %v15961_v4 }
0x13c6   :  { %13193 = vmatprep.mubr.msk.f32.mxu1 %vm15313_vm0, %v15314_v10  ;;  %14176 = vmatpush3.bf16.msra.mxu1 %v14175_v16  ;;  %v16089_v16 = vld [vmem:[%s17967_s29 + $0x1] ss:$0 sm:$0xff]  ;;  %s17977_s29 = smov 96  }
0x13c7   :  { %14177 = vmatprep.subr.bf16.mxu1 %v15312_v7 }
0x13ca   :  { %14179 = vmatpush3.bf16.msra.mxu1 %v14178_v23 }
0x1444   :  { %v2128_v25 = vpop.xlane.xlu0 %2127 }
0x1445   :  { %v2135_v26 = vmul.f32 0.03125, %v2128_v25 }
0x1447   :  { %v2138_v27 = vsub.f32 %v2121_v46, %v2135_v26 }
0x1449   :  { %v2141_v3 = vmul.f32 %v2138_v27, %v2138_v27 }
0x144b   :  { %v2146_v33 = vsel %vm228_vm5, %v2141_v3, 0.0 }
0x144c   :  { %2147 = vadd.xlane.f32.xlu1 %v2146_v33 }
0x1450   :  { %2131 = vadd.xlane.f32.xlu1 %v2130_v40 }
0x1498   :  { %v2273_v41 = vpop.f32.mrb[26].mxu1 }
0x1499   :  { %v2274_v2 = vadd.f32 %v16001_v14, %v2273_v41  ;;  %v13192_v59 = vpop.f32.mrb[27].mxu1 }
0x149b   :  { %v2287_v38 = vmax.f32 %v2274_v2, 0.0 }
0x149d   :  { %13216 = vmatmul.mubr.msk.f32.vlgmr.msra.gmra.mrb[24].mxu0 %vm2296_vm1, %v2287_v38  ;;  %v16061_v38 = vsub.s32 2, %v15937_v5 }
0x149e   :  { %13218 = vmatprep.mubr.msk.f32.mxu0 %vm15313_vm0, %v15314_v10 }
0x14d9   :  { %v2148_v60 = vpop.xlane.xlu1 %2147 }
0x14da   :  { %v2153_v39 = vmul.f32 0.03125, %v2148_v60  ;;  %v2431_v60 = vrot.slane %v15946_v52, %v16061_v38 }
0x14dc   :  { %v2156_v8 = vadd.f32 1e-05, %v2153_v39 }
0x14dd   :  { %v2132_v29 = vpop.xlane.xlu1 %2131 }
0x14de   :  { %15062 = vrsqrt.f32 %v2156_v8  ;;  %v2136_v63 = vmul.f32 0.03125, %v2132_v29 }
0x14e0   :  { %v2139_v42 = vsub.f32 %v2122_v36, %v2136_v63 }
0x14e2   :  { %v2142_v43 = vmul.f32 %v2139_v42, %v2139_v42 }
0x14e4   :  { %v2149_v17 = vsel %vm2129_vm15, %v2142_v43, 0.0 }
0x14e5   :  { %2150 = vadd.xlane.f32.xlu0 %v2149_v17 }
0x14e8   :  { %v15063_v18 = vpop.eup %15062 }
0x14e9   :  { %v2162_v20 = vmul.f32 %v15063_v18, %v2138_v27 }
0x14eb   :  { %v2169_v31 = vmul.f32 %v15953_v34, %v2162_v20 }
0x14ed   :  { %v2176_v22 = vadd.f32 %v15957_v56, %v2169_v31 }
0x14ef   :  { %13194 = vmatmul.mubr.msk.f32.gmra.mrb[28].mxu1 %vm228_vm5, %v2176_v22 }
0x14f0   :  { %13196 = vmatprep.mubr.msk.f32.mxu1 %vm15313_vm0, %v15314_v10 }
0x1570   :  { %v2372_v28 = vpop.f32.mrb[24].mxu0 }
0x1571   :  { %v2373_v1 = vadd.f32 %v16016_v44, %v2372_v28  ;;  %v13217_v30 = vpop.f32.mrb[25].mxu0 }
0x1572   :  { %v2151_v62 = vpop.xlane.xlu0 %2150 }
0x1573   :  { %v2154_v61 = vmul.f32 0.03125, %v2151_v62  ;;  %v2386_v45 = vadd.f32 %v2373_v1, %v15961_v4 }
0x1575   :  { %v2157_v46 = vadd.f32 1e-05, %v2154_v61  ;;  %v2389_v47 = vsel %vm228_vm5, %v2386_v45, 0.0 }
0x1576   :  { %2390 = vadd.xlane.f32.xlu1 %v2389_v47 }
0x1577   :  { %15064 = vrsqrt.f32 %v2157_v46 }
0x1581   :  { %v15065_v48 = vpop.eup %15064 }
0x1582   :  { %v2163_v50 = vmul.f32 %v15065_v48, %v2139_v42 }
0x1584   :  { %v2170_v55 = vmul.f32 %v15953_v34, %v2163_v50 }
0x1586   :  { %v2177_v54 = vadd.f32 %v15957_v56, %v2170_v55 }
0x1588   :  { %13197 = vmatmul.mubr.msk.f32.gmra.mrb[30].mxu1 %vm228_vm5, %v2177_v54 }
0x1589   :  { %13232 = vmatprep.mubr.msk.f32.mxu1 %vm15313_vm0, %v15314_v10 }
0x15c2   :  { %v2278_v9 = vpop.f32.mrb[28].mxu1 }
0x15c3   :  { %v2279_v57 = vadd.f32 %v16001_v14, %v2278_v9  ;;  %v13195_v4 = vpop.f32.mrb[29].mxu1 }
0x15c5   :  { %v2288_v58 = vmax.f32 %v2279_v57, 0.0 }
0x15c7   :  { %13219 = vmatmul.mubr.msk.f32.gmra.mrb[26].mxu0 %vm2296_vm1, %v2288_v58 }
0x15c8   :  { %13221 = vmatprep.mubr.msk.f32.mxu0 %vm15313_vm0, %v15314_v10 }
0x1603   :  { %v2391_v0 = vpop.xlane.xlu1 %2390 }
0x1604   :  { %v2398_v6 = vmul.f32 0.03125, %v2391_v0 }
0x1606   :  { %v2401_v34 = vsub.f32 %v2386_v45, %v2398_v6 }
0x1608   :  { %v2404_v11 = vmul.f32 %v2401_v34, %v2401_v34 }
0x160a   :  { %v2407_v56 = vsel %vm228_vm5, %v2404_v11, 0.0 }
0x160b   :  { %2408 = vadd.xlane.f32.xlu1 %v2407_v56 }
0x165b   :  { %v2283_v24 = vpop.f32.mrb[30].mxu1 }
0x165c   :  { %v2284_v25 = vadd.f32 %v16001_v14, %v2283_v24  ;;  %v13198_v26 = vpop.f32.mrb[31].mxu1  ;;  %v16064_v14 = vsub.s32 3, %v15937_v5 }
0x165e   :  { %v2289_v49 = vmax.f32 %v2284_v25, 0.0  ;;  %v2438_v29 = vrot.slane %v15946_v52, %v16064_v14 }
0x1660   :  { %13222 = vmatmul.mubr.msk.f32.gmra.mrb[28].mxu0 %vm2296_vm1, %v2289_v49 }
0x1698   :  { %v2409_v27 = vpop.xlane.xlu1 %2408 }
0x1699   :  { %v2416_v3 = vmul.f32 0.03125, %v2409_v27 }
0x169a   :  { %v2377_v33 = vpop.f32.mrb[26].mxu0 }
0x169b   :  { %v2419_v36 = vadd.f32 1e-05, %v2416_v3  ;;  %v2378_v40 = vadd.f32 %v16016_v44, %v2377_v33  ;;  %v13220_v41 = vpop.f32.mrb[27].mxu0 }
0x169d   :  { %15066 = vrsqrt.f32 %v2419_v36  ;;  %v2387_v2 = vadd.f32 %v2378_v40, %v2176_v22 }
0x169f   :  { %v2392_v59 = vsel %vm228_vm5, %v2387_v2, 0.0 }
0x16a0   :  { %2393 = vadd.xlane.f32.xlu0 %v2392_v59 }
0x16a7   :  { %v15067_v39 = vpop.eup %15066 }
0x16a8   :  { %v2425_v8 = vmul.f32 %v15067_v39, %v2401_v34 }
0x16aa   :  { %v2432_v63 = vmul.f32 %v2431_v60, %v2425_v8 }
0x16ac   :  { %v16070_v42 = vadd.f32 %v2438_v29, %v2432_v63 }
0x16ae   :  { %13233 = vmatmul.mubr.msk.f32.vlgmr.msra.gmra.mrb[32].mxu1 %vm228_vm5, %v16070_v42 }
0x16af   :  { %13235 = vmatprep.mubr.msk.f32.mxu1 %vm15313_vm0, %v15314_v10 }
0x172d   :  { %v2394_v43 = vpop.xlane.xlu0 %2393 }
0x172e   :  { %v2399_v17 = vmul.f32 0.03125, %v2394_v43 }
0x1730   :  { %v2402_v18 = vsub.f32 %v2387_v2, %v2399_v17 }
0x1732   :  { %v2405_v20 = vmul.f32 %v2402_v18, %v2402_v18 }
0x1733   :  { %v2382_v31 = vpop.f32.mrb[28].mxu0 }
0x1734   :  { %v2383_v22 = vadd.f32 %v16016_v44, %v2382_v31  ;;  %v13223_v28 = vpop.f32.mrb[29].mxu0  ;;  %v2410_v1 = vsel %vm228_vm5, %v2405_v20, 0.0 }
0x1735   :  { %2411 = vadd.xlane.f32.xlu0 %v2410_v1 }
0x1736   :  { %v2388_v52 = vadd.f32 %v2383_v22, %v2177_v54 }
0x1738   :  { %v2395_v30 = vsel %vm2129_vm15, %v2388_v52, 0.0 }
0x1739   :  { %2396 = vadd.xlane.f32.xlu1 %v2395_v30 }
0x1781   :  { %v2532_v62 = vpop.f32.mrb[32].mxu1 }
0x1782   :  { %v13234_v61 = vpop.f32.mrb[33].mxu1  ;;  %v16094_v25 = vadd.f32 %v16089_v16, %v2532_v62 }
0x17c2   :  { %v2412_v45 = vpop.xlane.xlu0 %2411 }
0x17c3   :  { %v2417_v46 = vmul.f32 0.03125, %v2412_v45 }
0x17c5   :  { %v2420_v47 = vadd.f32 1e-05, %v2417_v46 }
0x17c6   :  { %v2397_v48 = vpop.xlane.xlu1 %2396 }
0x17c7   :  { %15068 = vrsqrt.f32 %v2420_v47  ;;  %v2400_v50 = vmul.f32 0.03125, %v2397_v48 }
0x17c9   :  { %v2403_v55 = vsub.f32 %v2388_v52, %v2400_v50 }
0x17cb   :  { %v2406_v9 = vmul.f32 %v2403_v55, %v2403_v55 }
0x17cd   :  { %v2413_v44 = vsel %vm2129_vm15, %v2406_v9, 0.0 }
0x17ce   :  { %2414 = vadd.xlane.f32.xlu0 %v2413_v44 }
0x17d1   :  { %v15069_v57 = vpop.eup %15068 }
0x17d2   :  { %v2426_v4 = vmul.f32 %v15069_v57, %v2402_v18 }
0x17d4   :  { %v2433_v58 = vmul.f32 %v2431_v60, %v2426_v4 }
0x17d6   :  { %v16080_v54 = vadd.f32 %v2438_v29, %v2433_v58 }
0x17d8   :  { %13236 = vmatmul.mubr.msk.f32.gmra.mrb[34].mxu1 %vm228_vm5, %v16080_v54 }
0x17d9   :  { %13238 = vmatprep.mubr.msk.f32.mxu1 %vm15313_vm0, %v15314_v10 }
0x185b   :  { %v2415_v0 = vpop.xlane.xlu0 %2414 }
0x185c   :  { %v2418_v6 = vmul.f32 0.03125, %v2415_v0 }
0x185e   :  { %v2421_v34 = vadd.f32 1e-05, %v2418_v6 }
0x1860   :  { %15070 = vrsqrt.f32 %v2421_v34 }
0x186a   :  { %v15071_v11 = vpop.eup %15070 }
0x186b   :  { %v2427_v56 = vmul.f32 %v15071_v11, %v2403_v55 }
0x186d   :  { %v2434_v23 = vmul.f32 %v2431_v60, %v2427_v56 }
0x186f   :  { %v16091_v24 = vadd.f32 %v2438_v29, %v2434_v23 }
0x1871   :  { %13239 = vmatmul.mubr.msk.f32.gmra.mrb[36].mxu1 %vm228_vm5, %v16091_v24 }
0x1872   :  { %13245 = vmatprep.mubr.msk.f32.mxu1 %vm324_vm6, %v16094_v25 }
0x18ab   :  { %v2537_v26 = vpop.f32.mrb[34].mxu1 }
0x18ac   :  { %v16101_v49 = vadd.f32 %v16089_v16, %v2537_v26  ;;  %v13237_v27 = vpop.f32.mrb[35].mxu1 }
0x18ae   :  { %v16105_v3 = vpack.i.bf16 %v16101_v49, %v16094_v25 }
0x18b0   :  { %14707 = vrot.lane.b32.xlu1 %v16105_v3, %s17977_s29  ;;  %14712 = vrot.lane.b32.xlu0 %v16105_v3, %s17978_s11 }
0x18b4   :  { %2747 = vrot.lane.b32.xlu1 %v16094_v25, %s17979_s5 }
0x18b8   :  { %2749 = vrot.lane.b32.xlu1 %v16101_v49, %s17979_s5 }
0x1922   :  { %v14713_v33 = vpop.permute.xlu0 %14712  ;;  %v14708_v36 = vpop.permute.xlu1 %14707 }
0x1923   :  { %v14715_v40 = vunpack.i.h.bf16 %v14713_v33  ;;  %v14714_v41 = vunpack.i.l.bf16 %v14713_v33  ;;  %v14710_v2 = vunpack.i.h.bf16 %v14708_v36  ;;  %v14709_v59 = vunpack.i.l.bf16 %v14708_v36 }
0x1925   :  { %v14180_v60 = vpack.c.bf16 %v14710_v2, %v14709_v59  ;;  %v14192_v39 = vpack.c.bf16 %v14715_v40, %v14714_v41 }
0x1926   :  { %v2748_v8 = vpop.permute.xlu1 %2747 }
0x1927   :  { %14182 = vmatprep.subr.msk.bf16.mxu1 %vm15620_vm7, %v14180_v60 }
0x1928   :  { %14185 = vmatpush3.bf16.xpose.msk.msra.mxu1 %vm15620_vm7, %v14180_v60 }
0x1929   :  { %14194 = vmatprep.subr.msk.bf16.mxu1 %vm15620_vm7, %v14192_v39 }
0x192a   :  { %v2750_v29 = vpop.permute.xlu1 %2749 }
0x192f   :  { %13246 = vmatmul.mubr.msk.f32.vlgmr.msra.gmra.mrb[38].mxu1 %vm324_vm6, %v16101_v49 }
0x1930   :  { %14197 = vmatpush3.bf16.xpose.msk.msra.mxu1 %vm15620_vm7, %v14192_v39  ;;  %13259 = vmatprep.mubr.msk.f32.mxu1 %vm324_vm6, %v2748_v8 }
0x1937   :  { %13260 = vmatmul.mubr.msk.f32.vlgmr.msra.gmra.mrb[40].mxu1 %vm324_vm6, %v2750_v29 }
0x1944   :  { %v16127_v63 = vpop.f32.mrb[36].mxu1 }
0x1945   :  { %v13240_v43 = vpop.f32.mrb[37].mxu1 }
0x1a02   :  { %v13247_v17 = vpop.f32.mrb[38].mxu1 }
0x1a03   :  { %v2636_v18 = vmul.f32 0.35355338, %v13247_v17  ;;  %v2626_v20 = vpop.f32.mrb[39].mxu1 }
0x1a04   :  { %v2635_v31 = vmul.f32 0.35355338, %v2626_v20 }
0x1a05   :  { %v2640_v22 = vsel %vm414_vm8, %v2636_v18, -inf }
0x1a06   :  { %2641 = vmax.xlane.f32.xlu1 %v2640_v22  ;;  %v2637_v28 = vsel %vm410_vm9, %v2635_v31, -inf }
0x1a07   :  { %2638 = vmax.xlane.f32.xlu0 %v2637_v28 }
0x1a0a   :  { %v13261_v1 = vpop.f32.mrb[40].mxu1 }
0x1a0b   :  { %v2829_v52 = vpop.f32.mrb[41].mxu1  ;;  %v2839_v62 = vmul.f32 0.35355338, %v13261_v1 }
0x1a0c   :  { %v2838_v30 = vmul.f32 0.35355338, %v2829_v52 }
0x1a0d   :  { %v2843_v45 = vsel %vm414_vm8, %v2839_v62, -inf }
0x1a0e   :  { %v2840_v61 = vsel %vm410_vm9, %v2838_v30, -inf }
0x1a0f   :  { %2841 = vmax.xlane.f32.xlu0 %v2840_v61 }
0x1a13   :  { %2844 = vmax.xlane.f32.xlu0 %v2843_v45 }
0x1a17   :  { %14717 = vrot.lane.b32.xlu1 %v16105_v3, %s17980_s30 }
0x1a93   :  { %v2642_v46 = vpop.xlane.xlu1 %2641 }
0x1a94   :  { %v2644_v47 = vsub.f32 %v2636_v18, %v2642_v46  ;;  %v2639_v48 = vpop.xlane.xlu0 %2638 }
0x1a95   :  { %v2643_v50 = vsub.f32 %v2635_v31, %v2639_v48 }
0x1a96   :  { %v2647_v55 = vmul.f32 1.442695, %v2644_v47 }
0x1a97   :  { %v2645_v9 = vmul.f32 1.442695, %v2643_v50  ;;  %v14718_v44 = vpop.permute.xlu1 %14717 }
0x1a98   :  { %15072 = vpow2.f32 %v2647_v55  ;;  %v14720_v57 = vunpack.i.h.bf16 %v14718_v44  ;;  %v14719_v4 = vunpack.i.l.bf16 %v14718_v44 }
0x1a99   :  { %15074 = vpow2.f32 %v2645_v9 }
0x1a9a   :  { %v14186_v58 = vpack.c.bf16 %v14720_v57, %v14719_v4 }
0x1a9c   :  { %14188 = vmatprep.subr.msk.bf16.mxu0 %vm15641_vm11, %v14186_v58  ;;  %v2842_v0 = vpop.xlane.xlu0 %2841 }
0x1a9d   :  { %14191 = vmatpush3.bf16.msk.msra.mxu0 %vm15641_vm11, %v14186_v58  ;;  %v2846_v40 = vsub.f32 %v2838_v30, %v2842_v0 }
0x1a9f   :  { %v2848_v41 = vmul.f32 1.442695, %v2846_v40 }
0x1aa0   :  { %v2845_v6 = vpop.xlane.xlu0 %2844 }
0x1aa1   :  { %v2847_v34 = vsub.f32 %v2839_v62, %v2845_v6 }
0x1aa2   :  { %v15073_v11 = vpop.eup %15072 }
0x1aa3   :  { %v15075_v56 = vpop.eup %15074  ;;  %v2850_v23 = vmul.f32 1.442695, %v2847_v34  ;;  %v2652_v26 = vsel %vm414_vm8, %v15073_v11, 0.0 }
0x1aa4   :  { %2653 = vadd.xlane.f32.xlu0 %v2652_v26  ;;  %v2649_v27 = vsel %vm410_vm9, %v15075_v56, 0.0 }
0x1aa5   :  { %15076 = vpow2.f32 %v2850_v23  ;;  %2650 = vadd.xlane.f32.xlu1 %v2649_v27 }
0x1aa6   :  { %15078 = vpow2.f32 %v2848_v41 }
0x1aaf   :  { %v15077_v33 = vpop.eup %15076 }
0x1ab0   :  { %v2855_v36 = vsel %vm414_vm8, %v15077_v33, 0.0  ;;  %v15079_v2 = vpop.eup %15078 }
0x1ab1   :  { %2856 = vadd.xlane.f32.xlu0 %v2855_v36  ;;  %v2852_v59 = vsel %vm410_vm9, %v15079_v2, 0.0 }
0x1ab6   :  { %14727 = vrot.lane.b32.xlu1 %v16105_v3, %s17981_s8 }
0x1ac7   :  { %14722 = vrot.lane.b32.xlu0 %v16105_v3, %s17982_s7 }
0x1acb   :  { %2952 = vrot.lane.b32.xlu0 %v16101_v49, %s17983_s4 }
0x1ada   :  { %2853 = vadd.xlane.f32.xlu1 %v2852_v59 }
0x1aeb   :  { %2950 = vrot.lane.b32.xlu1 %v16094_v25, %s17983_s4 }
0x1b31   :  { %v2654_v60 = vpop.xlane.xlu0 %2653 }
0x1b32   :  { %15080 = vrcp.f32 %v2654_v60  ;;  %v2651_v39 = vpop.xlane.xlu1 %2650 }
0x1b33   :  { %15082 = vrcp.f32 %v2651_v39 }
0x1b36   :  { %v14728_v20 = vpop.permute.xlu1 %14727 }
0x1b37   :  { %v14730_v22 = vunpack.i.h.bf16 %v14728_v20  ;;  %v14729_v28 = vunpack.i.l.bf16 %v14728_v20 }
0x1b39   :  { %v14204_v62 = vpack.c.bf16 %v14730_v22, %v14729_v28 }
0x1b3c   :  { %v15081_v8 = vpop.eup %15080 }
0x1b3d   :  { %v15083_v29 = vpop.eup %15082  ;;  %v2658_v18 = vmul.f32 %v15081_v8, %v15073_v11 }
0x1b3e   :  { %v2857_v43 = vpop.xlane.xlu0 %2856  ;;  %v2657_v17 = vmul.f32 %v15083_v29, %v15075_v56 }
0x1b3f   :  { %15084 = vrcp.f32 %v2857_v43 }
0x1b40   :  { %13252 = vmatprep.mubr.msk.f32.mxu0 %vm410_vm9, %v2657_v17 }
0x1b41   :  { %13253 = vmatmul.mubr.msk.f32.vlgmr.msra.gmra.mrb[30].mxu0 %vm410_vm9, %v2658_v18 }
0x1b42   :  { %v14723_v31 = vpop.permute.xlu0 %14722 }
0x1b43   :  { %v14725_v1 = vunpack.i.h.bf16 %v14723_v31  ;;  %v14724_v52 = vunpack.i.l.bf16 %v14723_v31 }
0x1b45   :  { %v14198_v30 = vpack.c.bf16 %v14725_v1, %v14724_v52 }
0x1b46   :  { %v2953_v55 = vpop.permute.xlu0 %2952 }
0x1b47   :  { %14200 = vmatprep.subr.msk.bf16.mxu0 %vm15641_vm11, %v14198_v30 }
0x1b48   :  { %14203 = vmatpush3.bf16.msk.msra.mxu0 %vm15641_vm11, %v14198_v30 }
0x1b49   :  { %14206 = vmatprep.subr.msk.bf16.mxu0 %vm15620_vm7, %v14204_v62  ;;  %v15085_v45 = vpop.eup %15084 }
0x1b4a   :  { %v2861_v48 = vmul.f32 %v15085_v45, %v15077_v33 }
0x1b67   :  { %v2854_v61 = vpop.xlane.xlu1 %2853 }
0x1b68   :  { %15086 = vrcp.f32 %v2854_v61 }
0x1b6b   :  { %v2951_v50 = vpop.permute.xlu1 %2950 }
0x1b72   :  { %v15087_v46 = vpop.eup %15086 }
0x1b73   :  { %v2860_v47 = vmul.f32 %v15087_v46, %v15079_v2 }
0x1b75   :  { %13266 = vmatprep.mubr.msk.f32.mxu0 %vm410_vm9, %v2860_v47 }
0x1b76   :  { %13267 = vmatmul.mubr.msk.f32.vlgmr.msra.gmra.mrb[32].mxu0 %vm410_vm9, %v2861_v48 }
0x1b77   :  { %14209 = vmatpush3.bf16.xpose.msk.msra.mxu0 %vm15620_vm7, %v14204_v62  ;;  %13273 = vmatprep.mubr.msk.f32.mxu0 %vm324_vm6, %v2951_v50 }
0x1b7e   :  { %13274 = vmatmul.mubr.msk.f32.vlgmr.msra.gmra.mrb[34].mxu0 %vm324_vm6, %v2953_v55 }
0x1c14   :  { %v16165_v9 = vpop.f32.mrb[30].mxu0 }
0x1c15   :  { %v16167_v44 = vpop.f32.mrb[31].mxu0 }
0x1c49   :  { %v16169_v57 = vpop.f32.mrb[32].mxu0 }
0x1c4a   :  { %v16171_v4 = vpop.f32.mrb[33].mxu0 }
0x1c51   :  { %v13275_v58 = vpop.f32.mrb[34].mxu0 }
0x1c52   :  { %v3042_v0 = vmul.f32 0.35355338, %v13275_v58  ;;  %v3032_v6 = vpop.f32.mrb[35].mxu0 }
0x1c53   :  { %v3041_v34 = vmul.f32 0.35355338, %v3032_v6 }
0x1c54   :  { %v3046_v11 = vsel %vm414_vm8, %v3042_v0, -inf }
0x1c55   :  { %3047 = vmax.xlane.f32.xlu0 %v3046_v11  ;;  %v3043_v56 = vsel %vm410_vm9, %v3041_v34, -inf }
0x1c56   :  { %3044 = vmax.xlane.f32.xlu1 %v3043_v56 }
0x1ce2   :  { %v3048_v23 = vpop.xlane.xlu0 %3047 }
0x1ce3   :  { %v3050_v26 = vsub.f32 %v3042_v0, %v3048_v23  ;;  %v3045_v27 = vpop.xlane.xlu1 %3044 }
0x1ce4   :  { %v3049_v33 = vsub.f32 %v3041_v34, %v3045_v27 }
0x1ce5   :  { %v3053_v36 = vmul.f32 1.442695, %v3050_v26 }
0x1ce6   :  { %v3051_v40 = vmul.f32 1.442695, %v3049_v33 }
0x1ce7   :  { %15088 = vpow2.f32 %v3053_v36 }
0x1ce8   :  { %15090 = vpow2.f32 %v3051_v40 }
0x1cf1   :  { %v15089_v41 = vpop.eup %15088 }
0x1cf2   :  { %v15091_v2 = vpop.eup %15090  ;;  %v3058_v59 = vsel %vm414_vm8, %v15089_v41, 0.0 }
0x1cf3   :  { %3059 = vadd.xlane.f32.xlu1 %v3058_v59  ;;  %v3055_v60 = vsel %vm410_vm9, %v15091_v2, 0.0  ;;  %v3387_v59 = vrot.slane %v16101_v49, 2 }
0x1cf4   :  { %3056 = vadd.xlane.f32.xlu0 %v3055_v60 }
0x1d04   :  { %14737 = vrot.lane.b32.xlu1 %v16105_v3, %s17984_s10 }
0x1d08   :  { %3153 = vrot.lane.b32.xlu1 %v16094_v25, %s17985_s0 }
0x1d0a   :  { %14732 = vrot.lane.b32.xlu0 %v16105_v3, %s17986_s25 }
0x1d0e   :  { %3155 = vrot.lane.b32.xlu0 %v16101_v49, %s17985_s0 }
0x1d80   :  { %v3060_v39 = vpop.xlane.xlu1 %3059 }
0x1d81   :  { %15092 = vrcp.f32 %v3060_v39  ;;  %v3057_v8 = vpop.xlane.xlu0 %3056 }
0x1d82   :  { %15094 = vrcp.f32 %v3057_v8 }
0x1d84   :  { %v14738_v29 = vpop.permute.xlu1 %14737 }
0x1d85   :  { %v14733_v43 = vpop.permute.xlu0 %14732  ;;  %v14740_v17 = vunpack.i.h.bf16 %v14738_v29  ;;  %v14739_v18 = vunpack.i.l.bf16 %v14738_v29 }
0x1d86   :  { %v14735_v20 = vunpack.i.h.bf16 %v14733_v43  ;;  %v14734_v31 = vunpack.i.l.bf16 %v14733_v43 }
0x1d87   :  { %v14216_v28 = vpack.c.bf16 %v14740_v17, %v14739_v18 }
0x1d88   :  { %v14210_v22 = vpack.c.bf16 %v14735_v20, %v14734_v31  ;;  %v3154_v62 = vpop.permute.xlu1 %3153 }
0x1d89   :  { %v3156_v61 = vpop.permute.xlu0 %3155 }
0x1d8a   :  { %14212 = vmatprep.subr.msk.bf16.mxu1 %vm15641_vm11, %v14210_v22 }
0x1d8b   :  { %v15093_v25 = vpop.eup %15092  ;;  %14215 = vmatpush3.bf16.msk.msra.mxu1 %vm15641_vm11, %v14210_v22 }
0x1d8c   :  { %v15095_v1 = vpop.eup %15094  ;;  %14218 = vmatprep.subr.msk.bf16.mxu1 %vm15620_vm7, %v14216_v28  ;;  %v3064_v30 = vmul.f32 %v15093_v25, %v15089_v41  ;;  %v2543_v41 = vadd.f32 %v16089_v16, %v16127_v63 }
0x1d8d   :  { %v3063_v52 = vmul.f32 %v15095_v1, %v15091_v2 }
0x1d8e   :  { %v16207_v2 = vrot.slane %v2543_v41, 2 }
0x1d8f   :  { %13280 = vmatprep.mubr.msk.f32.mxu1 %vm410_vm9, %v3063_v52 }
0x1d90   :  { %13281 = vmatmul.mubr.msk.f32.vlgmr.msra.gmra.mrb[42].mxu1 %vm410_vm9, %v3064_v30  ;;  %v16212_v60 = vsel %vm1164_vm12, %v3387_v59, %v16207_v2 }
0x1d91   :  { %13287 = vmatprep.mubr.msk.f32.mxu1 %vm324_vm6, %v3154_v62  ;;  %v16216_v39 = vpack.i.bf16 %v16207_v2, %v16212_v60 }
0x1d94   :  { %14221 = vmatpush3.bf16.xpose.msk.msra.mxu1 %vm15620_vm7, %v14216_v28 }
0x1d9b   :  { %13288 = vmatmul.mubr.msk.f32.vlgmr.msra.gmra.mrb[44].mxu1 %vm324_vm6, %v3156_v61 }
0x1e63   :  { %v16197_v45 = vpop.f32.mrb[42].mxu1 }
0x1e64   :  { %v16199_v46 = vpop.f32.mrb[43].mxu1 }
0x1e6e   :  { %v13289_v47 = vpop.f32.mrb[44].mxu1 }
0x1e6f   :  { %v3245_v48 = vmul.f32 0.35355338, %v13289_v47  ;;  %v3235_v50 = vpop.f32.mrb[45].mxu1 }
0x1e70   :  { %v3244_v55 = vmul.f32 0.35355338, %v3235_v50 }
0x1e71   :  { %v3249_v58 = vsel %vm414_vm8, %v3245_v48, -inf }
0x1e72   :  { %3250 = vmax.xlane.f32.xlu0 %v3249_v58  ;;  %v3246_v0 = vsel %vm410_vm9, %v3244_v55, -inf }
0x1e73   :  { %3247 = vmax.xlane.f32.xlu1 %v3246_v0 }
0x1eff   :  { %v3251_v6 = vpop.xlane.xlu0 %3250 }
0x1f00   :  { %v3253_v34 = vsub.f32 %v3245_v48, %v3251_v6  ;;  %v3248_v11 = vpop.xlane.xlu1 %3247 }
0x1f01   :  { %v3252_v56 = vsub.f32 %v3244_v55, %v3248_v11 }
0x1f02   :  { %v3256_v23 = vmul.f32 1.442695, %v3253_v34 }
0x1f03   :  { %v3254_v26 = vmul.f32 1.442695, %v3252_v56 }
0x1f04   :  { %15096 = vpow2.f32 %v3256_v23 }
0x1f05   :  { %15098 = vpow2.f32 %v3254_v26 }
0x1f0e   :  { %v15097_v27 = vpop.eup %15096 }
0x1f0f   :  { %v15099_v33 = vpop.eup %15098  ;;  %v3261_v36 = vsel %vm414_vm8, %v15097_v27, 0.0 }
0x1f10   :  { %3262 = vadd.xlane.f32.xlu1 %v3261_v36  ;;  %v3258_v40 = vsel %vm410_vm9, %v15099_v33, 0.0 }
0x1f11   :  { %3259 = vadd.xlane.f32.xlu0 %v3258_v40 }
0x1f21   :  { %14747 = vrot.lane.b32.xlu1 %v16216_v39, %s17977_s29 }
0x1f27   :  { %14742 = vrot.lane.b32.xlu0 %v16105_v3, %s17987_s24 }
0x1f9d   :  { %v3263_v8 = vpop.xlane.xlu1 %3262 }
0x1f9e   :  { %15100 = vrcp.f32 %v3263_v8  ;;  %v3260_v63 = vpop.xlane.xlu0 %3259 }
0x1f9f   :  { %15102 = vrcp.f32 %v3260_v63 }
0x1fa1   :  { %v14748_v29 = vpop.permute.xlu1 %14747 }
0x1fa2   :  { %v14743_v49 = vpop.permute.xlu0 %14742  ;;  %v14750_v43 = vunpack.i.h.bf16 %v14748_v29  ;;  %v14749_v17 = vunpack.i.l.bf16 %v14748_v29 }
0x1fa3   :  { %v14745_v18 = vunpack.i.h.bf16 %v14743_v49  ;;  %v14744_v20 = vunpack.i.l.bf16 %v14743_v49 }
0x1fa4   :  { %v14228_v22 = vpack.c.bf16 %v14750_v43, %v14749_v17 }
0x1fa5   :  { %v14222_v31 = vpack.c.bf16 %v14745_v18, %v14744_v20 }
0x1fa7   :  { %14224 = vmatprep.subr.msk.bf16.mxu0 %vm15641_vm11, %v14222_v31 }
0x1fa8   :  { %v15101_v28 = vpop.eup %15100  ;;  %14227 = vmatpush3.bf16.msk.msra.mxu0 %vm15641_vm11, %v14222_v31 }
0x1fa9   :  { %v15103_v3 = vpop.eup %15102  ;;  %14230 = vmatprep.subr.msk.bf16.mxu0 %vm15620_vm7, %v14228_v22  ;;  %v3267_v1 = vmul.f32 %v15101_v28, %v15097_v27 }
0x1faa   :  { %v3266_v25 = vmul.f32 %v15103_v3, %v15099_v33 }
0x1fac   :  { %13294 = vmatprep.mubr.msk.f32.mxu0 %vm410_vm9, %v3266_v25 }
0x1fad   :  { %13295 = vmatmul.mubr.msk.f32.vlgmr.msra.gmra.mrb[36].mxu0 %vm410_vm9, %v3267_v1 }
0x1fae   :  { %13301 = vmatprep.mubr.msk.f32.mxu0 %vm324_vm6, %v16212_v60 }
0x1fb1   :  { %14233 = vmatpush3.bf16.xpose.msk.msra.mxu0 %vm15620_vm7, %v14228_v22 }
0x1fb8   :  { %13302 = vmatmul.mubr.msk.f32.vlgmr.msra.gmra.mrb[38].mxu0 %vm324_vm6, %v16207_v2 }
0x2080   :  { %v16236_v52 = vpop.f32.mrb[36].mxu0 }
0x2081   :  { %v16238_v30 = vpop.f32.mrb[37].mxu0 }
0x208b   :  { %v13303_v62 = vpop.f32.mrb[38].mxu0 }
0x208c   :  { %v3478_v61 = vmul.f32 0.35355338, %v13303_v62  ;;  %v3468_v47 = vpop.f32.mrb[39].mxu0 }
0x208d   :  { %v3477_v48 = vmul.f32 0.35355338, %v3468_v47 }
0x208e   :  { %v3482_v50 = vsel %vm414_vm8, %v3478_v61, -inf }
0x208f   :  { %3483 = vmax.xlane.f32.xlu0 %v3482_v50  ;;  %v3479_v55 = vsel %vm410_vm9, %v3477_v48, -inf }
0x2090   :  { %3480 = vmax.xlane.f32.xlu1 %v3479_v55 }
0x211c   :  { %v3484_v58 = vpop.xlane.xlu0 %3483 }
0x211d   :  { %v3486_v0 = vsub.f32 %v3478_v61, %v3484_v58  ;;  %v3481_v6 = vpop.xlane.xlu1 %3480 }
0x211e   :  { %v3485_v34 = vsub.f32 %v3477_v48, %v3481_v6 }
0x211f   :  { %v3489_v11 = vmul.f32 1.442695, %v3486_v0 }
0x2120   :  { %v3487_v56 = vmul.f32 1.442695, %v3485_v34 }
0x2121   :  { %15104 = vpow2.f32 %v3489_v11 }
0x2122   :  { %15106 = vpow2.f32 %v3487_v56 }
0x212b   :  { %v15105_v23 = vpop.eup %15104 }
0x212c   :  { %v15107_v26 = vpop.eup %15106  ;;  %v3494_v27 = vsel %vm414_vm8, %v15105_v23, 0.0 }
0x212d   :  { %3495 = vadd.xlane.f32.xlu1 %v3494_v27  ;;  %v3491_v33 = vsel %vm410_vm9, %v15107_v26, 0.0 }
0x212e   :  { %3492 = vadd.xlane.f32.xlu0 %v3491_v33 }
0x213e   :  { %14757 = vrot.lane.b32.xlu1 %v16216_v39, %s17978_s11 }
0x2142   :  { %3589 = vrot.lane.b32.xlu1 %v16212_v60, %s17979_s5 }
0x2144   :  { %14752 = vrot.lane.b32.xlu0 %v16216_v39, %s17980_s30 }
0x2148   :  { %3591 = vrot.lane.b32.xlu0 %v16207_v2, %s17979_s5 }
0x21ba   :  { %v3496_v36 = vpop.xlane.xlu1 %3495 }
0x21bb   :  { %15108 = vrcp.f32 %v3496_v36  ;;  %v3493_v40 = vpop.xlane.xlu0 %3492 }
0x21bc   :  { %15110 = vrcp.f32 %v3493_v40 }
0x21be   :  { %v14758_v41 = vpop.permute.xlu1 %14757 }
0x21bf   :  { %v14753_v59 = vpop.permute.xlu0 %14752  ;;  %v14760_v8 = vunpack.i.h.bf16 %v14758_v41  ;;  %v14759_v63 = vunpack.i.l.bf16 %v14758_v41 }
0x21c0   :  { %v14755_v29 = vunpack.i.h.bf16 %v14753_v59  ;;  %v14754_v49 = vunpack.i.l.bf16 %v14753_v59 }
0x21c1   :  { %v14240_v17 = vpack.c.bf16 %v14760_v8, %v14759_v63 }
0x21c2   :  { %v14234_v43 = vpack.c.bf16 %v14755_v29, %v14754_v49  ;;  %v3590_v28 = vpop.permute.xlu1 %3589 }
0x21c3   :  { %v3592_v3 = vpop.permute.xlu0 %3591 }
0x21c4   :  { %14236 = vmatprep.subr.msk.bf16.mxu1 %vm15641_vm11, %v14234_v43 }
0x21c5   :  { %v15109_v18 = vpop.eup %15108  ;;  %14239 = vmatpush3.bf16.msk.msra.mxu1 %vm15641_vm11, %v14234_v43 }
0x21c6   :  { %v15111_v20 = vpop.eup %15110  ;;  %14242 = vmatprep.subr.msk.bf16.mxu1 %vm15620_vm7, %v14240_v17  ;;  %v3500_v22 = vmul.f32 %v15109_v18, %v15105_v23 }
0x21c7   :  { %v3499_v31 = vmul.f32 %v15111_v20, %v15107_v26 }
0x21c9   :  { %13308 = vmatprep.mubr.msk.f32.mxu1 %vm410_vm9, %v3499_v31 }
0x21ca   :  { %13309 = vmatmul.mubr.msk.f32.vlgmr.msra.gmra.mrb[46].mxu1 %vm410_vm9, %v3500_v22 }
0x21cb   :  { %13315 = vmatprep.mubr.msk.f32.mxu1 %vm324_vm6, %v3590_v28 }
0x21ce   :  { %14245 = vmatpush3.bf16.xpose.msk.msra.mxu1 %vm15620_vm7, %v14240_v17 }
0x21d5   :  { %13316 = vmatmul.mubr.msk.f32.vlgmr.msra.gmra.mrb[48].mxu1 %vm324_vm6, %v3592_v3 }
0x229d   :  { %v16264_v25 = vpop.f32.mrb[46].mxu1 }
0x229e   :  { %v16266_v1 = vpop.f32.mrb[47].mxu1 }
0x22a8   :  { %v13317_v62 = vpop.f32.mrb[48].mxu1 }
0x22a9   :  { %v3681_v61 = vmul.f32 0.35355338, %v13317_v62  ;;  %v3671_v47 = vpop.f32.mrb[49].mxu1 }
0x22aa   :  { %v3680_v48 = vmul.f32 0.35355338, %v3671_v47 }
0x22ab   :  { %v3685_v50 = vsel %vm414_vm8, %v3681_v61, -inf }
0x22ac   :  { %3686 = vmax.xlane.f32.xlu0 %v3685_v50  ;;  %v3682_v55 = vsel %vm410_vm9, %v3680_v48, -inf }
0x22ad   :  { %3683 = vmax.xlane.f32.xlu1 %v3682_v55 }
0x2339   :  { %v3687_v58 = vpop.xlane.xlu0 %3686 }
0x233a   :  { %v3689_v0 = vsub.f32 %v3681_v61, %v3687_v58  ;;  %v3684_v6 = vpop.xlane.xlu1 %3683 }
0x233b   :  { %v3688_v34 = vsub.f32 %v3680_v48, %v3684_v6 }
0x233c   :  { %v3692_v11 = vmul.f32 1.442695, %v3689_v0 }
0x233d   :  { %v3690_v56 = vmul.f32 1.442695, %v3688_v34 }
0x233e   :  { %15112 = vpow2.f32 %v3692_v11 }
0x233f   :  { %15114 = vpow2.f32 %v3690_v56 }
0x2348   :  { %v15113_v23 = vpop.eup %15112 }
0x2349   :  { %v15115_v26 = vpop.eup %15114  ;;  %v3697_v27 = vsel %vm414_vm8, %v15113_v23, 0.0 }
0x234a   :  { %3698 = vadd.xlane.f32.xlu1 %v3697_v27  ;;  %v3694_v33 = vsel %vm410_vm9, %v15115_v26, 0.0 }
0x234b   :  { %3695 = vadd.xlane.f32.xlu0 %v3694_v33 }
0x235b   :  { %14767 = vrot.lane.b32.xlu1 %v16216_v39, %s17981_s8 }
0x235f   :  { %3792 = vrot.lane.b32.xlu1 %v16212_v60, %s17983_s4 }
0x2361   :  { %14762 = vrot.lane.b32.xlu0 %v16216_v39, %s17982_s7 }
0x2365   :  { %3794 = vrot.lane.b32.xlu0 %v16207_v2, %s17983_s4 }
0x23d7   :  { %v3699_v36 = vpop.xlane.xlu1 %3698 }
0x23d8   :  { %15116 = vrcp.f32 %v3699_v36  ;;  %v3696_v40 = vpop.xlane.xlu0 %3695 }
0x23d9   :  { %15118 = vrcp.f32 %v3696_v40 }
0x23db   :  { %v14768_v41 = vpop.permute.xlu1 %14767 }
0x23dc   :  { %v14763_v59 = vpop.permute.xlu0 %14762  ;;  %v14770_v8 = vunpack.i.h.bf16 %v14768_v41  ;;  %v14769_v63 = vunpack.i.l.bf16 %v14768_v41 }
0x23dd   :  { %v14765_v29 = vunpack.i.h.bf16 %v14763_v59  ;;  %v14764_v49 = vunpack.i.l.bf16 %v14763_v59 }
0x23de   :  { %v14252_v17 = vpack.c.bf16 %v14770_v8, %v14769_v63 }
0x23df   :  { %v14246_v43 = vpack.c.bf16 %v14765_v29, %v14764_v49  ;;  %v3793_v28 = vpop.permute.xlu1 %3792 }
0x23e0   :  { %v3795_v3 = vpop.permute.xlu0 %3794 }
0x23e1   :  { %14248 = vmatprep.subr.msk.bf16.mxu0 %vm15641_vm11, %v14246_v43 }
0x23e2   :  { %v15117_v18 = vpop.eup %15116  ;;  %14251 = vmatpush3.bf16.msk.msra.mxu0 %vm15641_vm11, %v14246_v43 }
0x23e3   :  { %v15119_v20 = vpop.eup %15118  ;;  %14254 = vmatprep.subr.msk.bf16.mxu0 %vm15620_vm7, %v14252_v17  ;;  %v3703_v22 = vmul.f32 %v15117_v18, %v15113_v23 }
0x23e4   :  { %v3702_v31 = vmul.f32 %v15119_v20, %v15115_v26 }
0x23e6   :  { %13322 = vmatprep.mubr.msk.f32.mxu0 %vm410_vm9, %v3702_v31 }
0x23e7   :  { %13323 = vmatmul.mubr.msk.f32.vlgmr.msra.gmra.mrb[40].mxu0 %vm410_vm9, %v3703_v22 }
0x23e8   :  { %13329 = vmatprep.mubr.msk.f32.mxu0 %vm324_vm6, %v3793_v28 }
0x23eb   :  { %14257 = vmatpush3.bf16.xpose.msk.msra.mxu0 %vm15620_vm7, %v14252_v17 }
0x23f2   :  { %13330 = vmatmul.mubr.msk.f32.vlgmr.msra.gmra.mrb[42].mxu0 %vm324_vm6, %v3795_v3 }
0x24ba   :  { %v16292_v62 = vpop.f32.mrb[40].mxu0 }
0x24bb   :  { %v16294_v61 = vpop.f32.mrb[41].mxu0 }
0x24c5   :  { %v13331_v47 = vpop.f32.mrb[42].mxu0 }
0x24c6   :  { %v3884_v48 = vmul.f32 0.35355338, %v13331_v47  ;;  %v3874_v50 = vpop.f32.mrb[43].mxu0 }
0x24c7   :  { %v3883_v55 = vmul.f32 0.35355338, %v3874_v50 }
0x24c8   :  { %v3888_v58 = vsel %vm414_vm8, %v3884_v48, -inf }
0x24c9   :  { %3889 = vmax.xlane.f32.xlu0 %v3888_v58  ;;  %v3885_v0 = vsel %vm410_vm9, %v3883_v55, -inf }
0x24ca   :  { %3886 = vmax.xlane.f32.xlu1 %v3885_v0 }
0x2556   :  { %v3890_v6 = vpop.xlane.xlu0 %3889 }
0x2557   :  { %v3892_v34 = vsub.f32 %v3884_v48, %v3890_v6  ;;  %v3887_v11 = vpop.xlane.xlu1 %3886 }
0x2558   :  { %v3891_v56 = vsub.f32 %v3883_v55, %v3887_v11 }
0x2559   :  { %v3895_v23 = vmul.f32 1.442695, %v3892_v34 }
0x255a   :  { %v3893_v26 = vmul.f32 1.442695, %v3891_v56 }
0x255b   :  { %15120 = vpow2.f32 %v3895_v23 }
0x255c   :  { %15122 = vpow2.f32 %v3893_v26 }
0x2565   :  { %v15121_v27 = vpop.eup %15120 }
0x2566   :  { %v15123_v33 = vpop.eup %15122  ;;  %v3900_v36 = vsel %vm414_vm8, %v15121_v27, 0.0 }
0x2567   :  { %3901 = vadd.xlane.f32.xlu1 %v3900_v36  ;;  %v3897_v40 = vsel %vm410_vm9, %v15123_v33, 0.0 }
0x2568   :  { %3898 = vadd.xlane.f32.xlu0 %v3897_v40 }
0x2578   :  { %14777 = vrot.lane.b32.xlu1 %v16216_v39, %s17984_s10 }
0x257c   :  { %3995 = vrot.lane.b32.xlu1 %v16212_v60, %s17985_s0 }
0x257e   :  { %14772 = vrot.lane.b32.xlu0 %v16216_v39, %s17986_s25 }
0x2582   :  { %3997 = vrot.lane.b32.xlu0 %v16207_v2, %s17985_s0 }
0x25f4   :  { %v3902_v41 = vpop.xlane.xlu1 %3901 }
0x25f5   :  { %15124 = vrcp.f32 %v3902_v41  ;;  %v3899_v59 = vpop.xlane.xlu0 %3898 }
0x25f6   :  { %15126 = vrcp.f32 %v3899_v59 }
0x25f8   :  { %v14778_v8 = vpop.permute.xlu1 %14777 }
0x25f9   :  { %v14773_v63 = vpop.permute.xlu0 %14772  ;;  %v14780_v29 = vunpack.i.h.bf16 %v14778_v8  ;;  %v14779_v49 = vunpack.i.l.bf16 %v14778_v8  ;;  %v14786_v8 = vpack.i.bf16 %v16039_v15, %v16034_v13 }
0x25fa   :  { %v14775_v43 = vunpack.i.h.bf16 %v14773_v63  ;;  %v14774_v17 = vunpack.i.l.bf16 %v14773_v63  ;;  %v14791_v63 = vpack.i.bf16 %v16052_v21, %v16047_v19 }
0x25fb   :  { %v14264_v20 = vpack.c.bf16 %v14780_v29, %v14779_v49 }
0x25fc   :  { %v14258_v18 = vpack.c.bf16 %v14775_v43, %v14774_v17  ;;  %v3996_v28 = vpop.permute.xlu1 %3995 }
0x25fd   :  { %v3998_v3 = vpop.permute.xlu0 %3997 }
0x25fe   :  { %14260 = vmatprep.subr.msk.bf16.mxu1 %vm15641_vm11, %v14258_v18 }
0x25ff   :  { %v15125_v60 = vpop.eup %15124  ;;  %14263 = vmatpush3.bf16.msk.msra.mxu1 %vm15641_vm11, %v14258_v18 }
0x2600   :  { %v15127_v2 = vpop.eup %15126  ;;  %14266 = vmatprep.subr.msk.bf16.mxu1 %vm15620_vm7, %v14264_v20  ;;  %v3906_v22 = vmul.f32 %v15125_v60, %v15121_v27 }
0x2601   :  { %v3905_v31 = vmul.f32 %v15127_v2, %v15123_v33 }
0x2603   :  { %13336 = vmatprep.mubr.msk.f32.mxu1 %vm410_vm9, %v3905_v31 }
0x2604   :  { %13337 = vmatmul.mubr.msk.f32.vlgmr.msra.gmra.mrb[50].mxu1 %vm410_vm9, %v3906_v22 }
0x2605   :  { %13343 = vmatprep.mubr.msk.f32.mxu1 %vm324_vm6, %v3996_v28 }
0x2608   :  { %14269 = vmatpush3.bf16.xpose.msk.msra.mxu1 %vm15620_vm7, %v14264_v20 }
0x2609   :  { %14282 = vmatprep.subr.bf16.mxu1 %v15312_v7 }
0x260f   :  { %13344 = vmatmul.mubr.msk.f32.vlgmr.msra.gmra.mrb[52].mxu1 %vm324_vm6, %v3998_v3 }
0x2610   :  { %13378 = vmatprep.mubr.msk.f32.mxu1 %vm15313_vm0, %v15314_v10 }
0x26d7   :  { %v16323_v47 = vpop.f32.mrb[50].mxu1 }
0x26d8   :  { %v3986_v48 = vpop.f32.mrb[51].mxu1 }
0x26e2   :  { %v13345_v50 = vpop.f32.mrb[52].mxu1 }
0x26e3   :  { %v4087_v55 = vmul.f32 0.35355338, %v13345_v50  ;;  %v4077_v58 = vpop.f32.mrb[53].mxu1 }
0x26e4   :  { %v4086_v0 = vmul.f32 0.35355338, %v4077_v58 }
0x26e5   :  { %v4091_v6 = vsel %vm414_vm8, %v4087_v55, -inf }
0x26e6   :  { %4092 = vmax.xlane.f32.xlu0 %v4091_v6  ;;  %v4088_v34 = vsel %vm410_vm9, %v4086_v0, -inf }
0x26e7   :  { %4089 = vmax.xlane.f32.xlu1 %v4088_v34 }
0x2773   :  { %v4093_v11 = vpop.xlane.xlu0 %4092 }
0x2774   :  { %v4095_v56 = vsub.f32 %v4087_v55, %v4093_v11  ;;  %v4090_v23 = vpop.xlane.xlu1 %4089 }
0x2775   :  { %v4094_v26 = vsub.f32 %v4086_v0, %v4090_v23 }
0x2776   :  { %v4098_v27 = vmul.f32 1.442695, %v4095_v56 }
0x2777   :  { %v4096_v33 = vmul.f32 1.442695, %v4094_v26 }
0x2778   :  { %15128 = vpow2.f32 %v4098_v27 }
0x2779   :  { %15130 = vpow2.f32 %v4096_v33 }
0x2782   :  { %v15129_v36 = vpop.eup %15128 }
0x2783   :  { %v15131_v40 = vpop.eup %15130  ;;  %v4103_v41 = vsel %vm414_vm8, %v15129_v36, 0.0 }
0x2784   :  { %4104 = vadd.xlane.f32.xlu1 %v4103_v41  ;;  %v4100_v59 = vsel %vm410_vm9, %v15131_v40, 0.0 }
0x2785   :  { %4101 = vadd.xlane.f32.xlu0 %v4100_v59 }
0x2795   :  { %14787 = vrot.lane.b32.xlu1 %v14786_v8, %s17988_s22 }
0x2799   :  { %14792 = vrot.lane.b32.xlu1 %v14791_v63, %s17988_s22 }
0x279b   :  { %14782 = vrot.lane.b32.xlu0 %v16216_v39, %s17987_s24 }
0x279d   :  { %3366 = vrot.lane.b32.xlu1 %v16199_v46, %s17989_s23 }
0x279f   :  { %3358 = vrot.lane.b32.xlu0 %v16171_v4, %s17990_s20 }
0x27a1   :  { %4200 = vrot.lane.b32.xlu1 %v16294_v61, %s17990_s20 }
0x27a3   :  { %3374 = vrot.lane.b32.xlu0 %v16238_v30, %s17991_s18 }
0x27a5   :  { %3360 = vrot.lane.b32.xlu1 %v16169_v57, %s17990_s20 }
0x27a7   :  { %4208 = vrot.lane.b32.xlu0 %v3986_v48, %s17989_s23 }
0x27a9   :  { %3368 = vrot.lane.b32.xlu1 %v16197_v45, %s17989_s23 }
0x27ab   :  { %3376 = vrot.lane.b32.xlu0 %v16236_v52, %s17991_s18 }
0x27ad   :  { %4202 = vrot.lane.b32.xlu1 %v16292_v62, %s17990_s20 }
0x2811   :  { %v4105_v13 = vpop.xlane.xlu1 %4104 }
0x2812   :  { %15132 = vrcp.f32 %v4105_v13  ;;  %v4102_v15 = vpop.xlane.xlu0 %4101 }
0x2813   :  { %15134 = vrcp.f32 %v4102_v15 }
0x2815   :  { %v14788_v19 = vpop.permute.xlu1 %14787 }
0x2816   :  { %v14783_v21 = vpop.permute.xlu0 %14782  ;;  %v14790_v39 = vunpack.i.h.bf16 %v14788_v19  ;;  %v14789_v30 = vunpack.i.l.bf16 %v14788_v19 }
0x2817   :  { %v14785_v4 = vunpack.i.h.bf16 %v14783_v21  ;;  %v14784_v46 = vunpack.i.l.bf16 %v14783_v21 }
0x2818   :  { %v14277_v62 = vpack.c.bf16 %v14790_v39, %v14789_v30 }
0x2819   :  { %v14270_v57 = vpack.c.bf16 %v14785_v4, %v14784_v46  ;;  %v14793_v61 = vpop.permute.xlu1 %14792 }
0x281a   :  { %v14795_v29 = vunpack.i.h.bf16 %v14793_v61  ;;  %v14794_v49 = vunpack.i.l.bf16 %v14793_v61  ;;  %v3359_v17 = vpop.permute.xlu0 %3358 }
0x281b   :  { %14272 = vmatprep.subr.msk.bf16.mxu0 %vm15641_vm11, %v14270_v57  ;;  %v3380_v2 = vsel %vm324_vm6, %v16167_v44, %v3359_v17 }
0x281c   :  { %v15133_v45 = vpop.eup %15132  ;;  %14275 = vmatpush3.bf16.msk.msra.mxu0 %vm15641_vm11, %v14270_v57  ;;  %v14280_v20 = vpack.c.bf16 %v14795_v29, %v14794_v49 }
0x281d   :  { %v15135_v52 = vpop.eup %15134  ;;  %14276 = vmatprep.subr.bf16.mxu0 %v15312_v7  ;;  %v4109_v18 = vmul.f32 %v15133_v45, %v15129_v36  ;;  %v3367_v60 = vpop.permute.xlu1 %3366  ;;  %v12281_v45 = vld [vmem:[%s17972_s28 + $0x20] sm:$0xff] }
0x281e   :  { %v4108_v43 = vmul.f32 %v15135_v52, %v15131_v40  ;;  %v3382_v31 = vsel %vm1157_vm14, %v3380_v2, %v3367_v60  ;;  %v3375_v22 = vpop.permute.xlu0 %3374  ;;  %v12283_v52 = vld [vmem:[%s17972_s28 + $0x30] sm:$0xff] }
0x281f   :  { %v3384_v28 = vsel %vm1160_vm13, %v3382_v31, %v3375_v22 }
0x2820   :  { %13350 = vmatprep.mubr.msk.f32.mxu0 %vm410_vm9, %v4108_v43 }
0x2821   :  { %13351 = vmatmul.mubr.msk.f32.vlgmr.msra.gmra.mrb[44].mxu0 %vm410_vm9, %v4109_v18  ;;  %v4201_v55 = vpop.permute.xlu1 %4200 }
0x2822   :  { %14278 = vmatpush3.bf16.msra.mxu0 %v14277_v62  ;;  %13361 = vmatprep.mubr.msk.f32.mxu0 %vm15313_vm0, %v15314_v10  ;;  %v4209_v0 = vpop.permute.xlu0 %4208  ;;  %v4222_v11 = vsel %vm324_vm6, %v16266_v1, %v4201_v55  ;;  %v12284_v62 = vld [vmem:[%s17972_s28 + $0x38] sm:$0xff] }
0x2823   :  { %14279 = vmatprep.subr.bf16.mxu0 %v15312_v7  ;;  %v4224_v23 = vsel %vm1157_vm14, %v4222_v11, %v4209_v0  ;;  %v14286_v29 = vpack.c.bf16 %v12284_v62, %v12283_v52  ;;  %v12289_v52 = vld [vmem:[%s17974_s6 + $0x58] sm:$0xff] }
0x2825   :  { %v3361_v58 = vpop.permute.xlu1 %3360 }
0x2826   :  { %14281 = vmatpush3.bf16.msra.mxu0 %v14280_v20  ;;  %v3377_v34 = vpop.permute.xlu0 %3376  ;;  %v3381_v56 = vsel %vm324_vm6, %v16165_v9, %v3361_v58 }
0x2827   :  { %14288 = vmatprep.subr.bf16.mxu0 %v15312_v7 }
0x2829   :  { %13362 = vmatmul.mubr.msk.f32.vlgmr.msra.gmra.mrb[46].mxu0 %vm228_vm5, %v3384_v28  ;;  %v3369_v6 = vpop.permute.xlu1 %3368 }
0x282a   :  { %13364 = vmatprep.mubr.msk.f32.mxu0 %vm15313_vm0, %v15314_v10 }
0x282d   :  { %v4203_v27 = vpop.permute.xlu1 %4202 }
0x282e   :  { %v4223_v40 = vsel %vm324_vm6, %v16264_v25, %v4203_v27 }
0x28f4   :  { %v13352_v3 = vpop.f32.mrb[44].mxu0 }
0x28f5   :  { %4218 = vrot.lane.b32.xlu1 %v13352_v3, %s17991_s18  ;;  %v4189_v48 = vpop.f32.mrb[45].mxu0  ;;  %v4722_v3 = vld [vmem:[%s17873_s3] sm:$0xff] }
0x28f6   :  { %4216 = vrot.lane.b32.xlu0 %v4189_v48, %s17991_s18  ;;  %v4723_v48 = vld [vmem:[%s17873_s3 + $0x8] sm:$0xff] }
0x28fa   :  { %4210 = vrot.lane.b32.xlu0 %v16323_v47, %s17989_s23  ;;  %v3383_v47 = vsel %vm1157_vm14, %v3381_v56, %v3369_v6 }
0x28fb   :  { %v3385_v36 = vsel %vm1160_vm13, %v3383_v47, %v3377_v34 }
0x28fc   :  { %v4328_v44 = vpop.f32.mrb[46].mxu0 }
0x28fd   :  { %v13363_v50 = vpop.f32.mrb[47].mxu0 }
0x28fe   :  { %4251 = vrot.lane.b32.xlu0 %v16089_v16, %s17988_s22 }
0x2967   :  { %v4219_v59 = vpop.permute.xlu1 %4218 }
0x2968   :  { %v4217_v26 = vpop.permute.xlu0 %4216 }
0x2969   :  { %v4226_v33 = vsel %vm1160_vm13, %v4224_v23, %v4217_v26 }
0x296a   :  { %v4230_v16 = vrot.slane %v4226_v33, 6 }
0x296c   :  { %v4211_v41 = vpop.permute.xlu0 %4210  ;;  %v4234_v1 = vsel %vm206_vm4, %v3385_v36, %v4230_v16 }
0x296d   :  { %v4225_v9 = vsel %vm1157_vm14, %v4223_v40, %v4211_v41  ;;  %13365 = vmatmul.mubr.msk.f32.gmra.mrb[48].mxu0 %vm228_vm5, %v4234_v1 }
0x296e   :  { %v4227_v8 = vsel %vm1160_vm13, %v4225_v9, %v4219_v59  ;;  %13367 = vmatprep.mubr.msk.f32.mxu0 %vm15313_vm0, %v15314_v10  ;;  %v4724_v59 = vld [vmem:[%s17873_s3 + $0x10] sm:$0xff]  ;;  %v4725_v9 = vld [vmem:[%s17873_s3 + $0x18] sm:$0xff] }
0x296f   :  { %v4231_v63 = vrot.slane %v4227_v8, 6  ;;  %v14304_v8 = vpack.c.bf16 %v4725_v9, %v4724_v59  ;;  %v12295_v59 = vld [vmem:[%s17975_s26 + $0x1] ss:$0 sm:$0xff]  ;;  %s17993_s26 = sld [smem:[#allocation11_spill]] }
0x2970   :  { %v4252_v13 = vpop.permute.xlu0 %4251 }
0x2971   :  { %v4232_v15 = vsel %vm206_vm4, %v4230_v16, %v4231_v63  ;;  %v4329_v19 = vadd.f32 %v4328_v44, %v4252_v13  ;;  %v4726_v63 = vld [vmem:[%s17873_s3 + $0x20] sm:$0xff]  ;;  %vm4832_vm4 = vcmp.ge.s32.totalorder %v15937_v5, %v15549_v35 }
0x2972   :  { %13368 = vmatmul.mubr.msk.f32.gmra.mrb[50].mxu0 %vm228_vm5, %v4232_v15  ;;  %v4720_v15 = vld [vmem:[%s17874_s1] sm:$0xff] }
0x2973   :  { %v4342_v25 = vadd.f32 %v4329_v19, %v16070_v42  ;;  %13403 = vmatprep.mubr.msk.f32.mxu0 %vm15313_vm0, %v15314_v10  ;;  %v12282_v42 = vld [vmem:[%s17972_s28 + $0x28] sm:$0xff]  ;;  %s17999_s28 = sld [smem:[#allocation17_spill]] }
0x2974   :  { %v14283_v61 = vpack.c.bf16 %v12282_v42, %v12281_v45  ;;  %v4721_v19 = vld [vmem:[%s17874_s1 + $0x8] sm:$0xff]  ;;  %s18002_s1 = sld [smem:[#allocation15_spill]] }
0x2975   :  { %v4345_v21 = vsel %vm228_vm5, %v4342_v25, 0.0  ;;  %v4731_v42 = vld [vmem:[%s17873_s3 + $0x48] sm:$0xff] }
0x2976   :  { %4346 = vadd.xlane.f32.xlu1 %v4345_v21  ;;  %14284 = vmatpush3.bf16.msra.mxu1 %v14283_v61  ;;  %v4728_v21 = vld [vmem:[%s17873_s3 + $0x30] sm:$0xff] }
0x2977   :  { %14285 = vmatprep.subr.bf16.mxu1 %v15312_v7  ;;  %v12288_v61 = vld [vmem:[%s17974_s6 + $0x50] sm:$0xff] }
0x297a   :  { %14287 = vmatpush3.bf16.msra.mxu1 %v14286_v29  ;;  %v4732_v29 = vld [vmem:[%s17873_s3 + $0x50] sm:$0xff] }
0x2a03   :  { %v4347_v4 = vpop.xlane.xlu1 %4346 }
0x2a04   :  { %v4354_v46 = vmul.f32 0.03125, %v4347_v4  ;;  %v4729_v4 = vld [vmem:[%s17873_s3 + $0x38] sm:$0xff] }
0x2a06   :  { %v4357_v57 = vsub.f32 %v4342_v25, %v4354_v46  ;;  %v14312_v46 = vpack.c.bf16 %v4729_v4, %v4728_v21  ;;  %v16579_v21 = vld [vmem:[%s17875_s13 + $0x18] sm:$0xff] }
0x2a08   :  { %v4360_v39 = vmul.f32 %v4357_v57, %v4357_v57 }
0x2a0a   :  { %v4363_v30 = vsel %vm228_vm5, %v4360_v39, 0.0  ;;  %v12287_v39 = vld [vmem:[%s17974_s6 + $0x48] sm:$0xff] }
0x2a0b   :  { %4364 = vadd.xlane.f32.xlu1 %v4363_v30  ;;  %v4730_v30 = vld [vmem:[%s17873_s3 + $0x40] sm:$0xff] }
0x2a0c   :  { %v14316_v62 = vpack.c.bf16 %v4731_v42, %v4730_v30 }
0x2a40   :  { %v4333_v49 = vpop.f32.mrb[48].mxu0 }
0x2a41   :  { %v4334_v43 = vadd.f32 %v4333_v49, %v4252_v13  ;;  %v13366_v17 = vpop.f32.mrb[49].mxu0  ;;  %v4733_v49 = vld [vmem:[%s17873_s3 + $0x58] sm:$0xff] }
0x2a42   :  { %v14320_v17 = vpack.c.bf16 %v4733_v49, %v4732_v29 }
0x2a43   :  { %v4343_v18 = vadd.f32 %v4334_v43, %v16080_v54  ;;  %v14300_v54 = vpack.c.bf16 %v4723_v48, %v4722_v3  ;;  %v14292_v43 = vpack.c.bf16 %v12289_v52, %v12288_v61  ;;  %v12293_v3 = vld [vmem:[%s17974_s6 + $0x78] sm:$0xff]  ;;  %v4736_v48 = vld [vmem:[%s17873_s3 + $0x70] sm:$0xff] }
0x2a45   :  { %v4338_v20 = vpop.f32.mrb[50].mxu0  ;;  %v4348_v60 = vsel %vm228_vm5, %v4343_v18, 0.0  ;;  %14301 = vmatprep.subr.bf16.mxu1 %v14300_v54 }
0x2a46   :  { %v4339_v2 = vadd.f32 %v4338_v20, %v4252_v13  ;;  %4349 = vadd.xlane.f32.xlu0 %v4348_v60  ;;  %v13369_v31 = vpop.f32.mrb[51].mxu0  ;;  %v4727_v13 = vld [vmem:[%s17873_s3 + $0x28] sm:$0xff]  ;;  %v4734_v60 = vld [vmem:[%s17873_s3 + $0x60] sm:$0xff] }
0x2a47   :  { %v14308_v25 = vpack.c.bf16 %v4727_v13, %v4726_v63  ;;  %v12291_v20 = vld [vmem:[%s17974_s6 + $0x68] sm:$0xff] }
0x2a48   :  { %v4344_v22 = vadd.f32 %v4339_v2, %v16091_v24  ;;  %v16427_v24 = vld [vmem:[%s17973_s9 + $0x4] sm:$0xf]  ;;  %v4735_v31 = vld [vmem:[%s17873_s3 + $0x68] sm:$0xff] }
0x2a49   :  { %v16431_v58 = vrot.slane %v16427_v24, %v15941_v51  ;;  %v16435_v34 = vrot.slane %v16427_v24, %v15949_v53 }
0x2a4a   :  { %v4351_v28 = vsel %vm2129_vm15, %v4344_v22, 0.0 }
0x2a4b   :  { %4352 = vadd.xlane.f32.xlu0 %v4351_v28  ;;  %v12292_v28 = vld [vmem:[%s17974_s6 + $0x70] sm:$0xff] }
0x2a98   :  { %v4365_v44 = vpop.xlane.xlu1 %4364 }
0x2a99   :  { %v4372_v50 = vmul.f32 0.03125, %v4365_v44  ;;  %v4737_v44 = vld [vmem:[%s17873_s3 + $0x78] sm:$0xff]  ;;  %s17995_s3 = sld [smem:[#allocation13_spill]] }
0x2a9b   :  { %v4375_v55 = vadd.f32 1e-05, %v4372_v50  ;;  %v14328_v50 = vpack.c.bf16 %v4737_v44, %v4736_v48  ;;  %v16614_v44 = vld [vmem:[%s17876_s14] ss:$0 sm:$0xff] }
0x2a9d   :  { %15136 = vrsqrt.f32 %v4375_v55 }
0x2aa7   :  { %v15137_v0 = vpop.eup %15136 }
0x2aa8   :  { %v4381_v6 = vmul.f32 %v15137_v0, %v4357_v57  ;;  %v12286_v57 = vld [vmem:[%s17974_s6 + $0x40] sm:$0xff] }
0x2aa9   :  { %v14289_v45 = vpack.c.bf16 %v12287_v39, %v12286_v57 }
0x2aaa   :  { %v4388_v11 = vmul.f32 %v16431_v58, %v4381_v6 }
0x2aab   :  { %14290 = vmatpush3.bf16.msra.mxu0 %v14289_v45 }
0x2aac   :  { %v16439_v56 = vadd.f32 %v16435_v34, %v4388_v11  ;;  %14291 = vmatprep.subr.bf16.mxu0 %v15312_v7 }
0x2aae   :  { %13379 = vmatmul.mubr.msk.f32.vlgmr.msra.gmra.mrb[54].mxu1 %vm228_vm5, %v16439_v56 }
0x2aaf   :  { %14303 = vmatpush3.bf16.msra.mxu1 %v14300_v54  ;;  %13381 = vmatprep.mubr.msk.f32.mxu1 %vm15313_vm0, %v15314_v10  ;;  %v14298_v54 = vpack.c.bf16 %v12293_v3, %v12292_v28 }
0x2ab0   :  { %14305 = vmatprep.subr.bf16.mxu1 %v14304_v8  ;;  %14293 = vmatpush3.bf16.msra.mxu0 %v14292_v43 }
0x2ab1   :  { %14294 = vmatprep.subr.bf16.mxu0 %v15312_v7 }
0x2ab3   :  { %14307 = vmatpush3.bf16.msra.mxu1 %v14304_v8 }
0x2ab4   :  { %14309 = vmatprep.subr.bf16.mxu1 %v14308_v25 }
0x2ab7   :  { %14311 = vmatpush3.bf16.msra.mxu1 %v14308_v25 }
0x2ab8   :  { %14313 = vmatprep.subr.bf16.mxu1 %v14312_v46 }
0x2abb   :  { %14315 = vmatpush3.bf16.msra.mxu1 %v14312_v46 }
0x2abc   :  { %14317 = vmatprep.subr.bf16.mxu1 %v14316_v62 }
0x2abf   :  { %14319 = vmatpush3.bf16.msra.mxu1 %v14316_v62 }
0x2ac0   :  { %14321 = vmatprep.subr.bf16.mxu1 %v14320_v17 }
0x2ac3   :  { %14323 = vmatpush3.bf16.msra.mxu1 %v14320_v17 }
0x2ad3   :  { %v4350_v23 = vpop.xlane.xlu0 %4349 }
0x2ad4   :  { %v4355_v47 = vmul.f32 0.03125, %v4350_v23 }
0x2ad6   :  { %v16445_v26 = vsub.f32 %v4343_v18, %v4355_v47  ;;  %v12290_v18 = vld [vmem:[%s17974_s6 + $0x60] sm:$0xff] }
0x2ad7   :  { %v14295_v2 = vpack.c.bf16 %v12291_v20, %v12290_v18  ;;  %v4738_v18 = vld [vmem:[%s17966_s27] sm:$0xff]  ;;  %s17998_s27 = sld [smem:[#allocation16_spill]] }
0x2ad8   :  { %v4353_v27 = vpop.xlane.xlu0 %4352  ;;  %v4361_v33 = vmul.f32 %v16445_v26, %v16445_v26 }
0x2ad9   :  { %v4356_v16 = vmul.f32 0.03125, %v4353_v27  ;;  %14296 = vmatpush3.bf16.msra.mxu0 %v14295_v2 }
0x2ada   :  { %v4366_v36 = vsel %vm228_vm5, %v4361_v33, 0.0  ;;  %14297 = vmatprep.subr.bf16.mxu0 %v15312_v7 }
0x2adb   :  { %v16450_v40 = vsub.f32 %v4344_v22, %v4356_v16  ;;  %4367 = vadd.xlane.f32.xlu0 %v4366_v36  ;;  %v14324_v22 = vpack.c.bf16 %v4735_v31, %v4734_v60 }
0x2add   :  { %v4362_v41 = vmul.f32 %v16450_v40, %v16450_v40  ;;  %14325 = vmatprep.subr.bf16.mxu1 %v14324_v22  ;;  %14299 = vmatpush3.bf16.msra.mxu0 %v14298_v54 }
0x2ade   :  { %14327 = vmatpush3.bf16.msra.mxu1 %v14324_v22 }
0x2adf   :  { %v4369_v1 = vsel %vm2129_vm15, %v4362_v41, 0.0  ;;  %14329 = vmatprep.subr.bf16.mxu1 %v14328_v50 }
0x2ae0   :  { %4370 = vadd.xlane.f32.xlu1 %v4369_v1 }
0x2ae2   :  { %14331 = vmatpush3.bf16.msra.mxu1 %v14328_v50 }
0x2ae3   :  { %13468 = vmatprep.subr.mxu1 %v15314_v10 }
0x2af1   :  { %4740 = vperm.xlu0 %14614, %v4720_v15   ;;  %4743 = vperm.xlu1 %14615, %v4721_v19  }
0x2b68   :  { %v4368_v55 = vpop.xlane.xlu0 %4367 }
0x2b69   :  { %v4373_v0 = vmul.f32 0.03125, %v4368_v55 }
0x2b6b   :  { %v4376_v6 = vadd.f32 1e-05, %v4373_v0 }
0x2b6d   :  { %15138 = vrsqrt.f32 %v4376_v6  ;;  %v4371_v11 = vpop.xlane.xlu1 %4370 }
0x2b6e   :  { %v4374_v23 = vmul.f32 0.03125, %v4371_v11 }
0x2b70   :  { %v4377_v47 = vadd.f32 1e-05, %v4374_v23  ;;  %v4741_v9 = vpop.permute.xlu0 %4740 }
0x2b71   :  { %vm4745_vm2 = vcmp.eq.s32.totalorder %v15549_v35, %v4741_v9 }
0x2b72   :  { %15140 = vrsqrt.f32 %v4377_v47 }
0x2b77   :  { %v15139_v27 = vpop.eup %15138 }
0x2b78   :  { %v4382_v33 = vmul.f32 %v15139_v27, %v16445_v26 }
0x2b7a   :  { %v4389_v16 = vmul.f32 %v16431_v58, %v4382_v33 }
0x2b7c   :  { %v15141_v36 = vpop.eup %15140  ;;  %v16534_v41 = vadd.f32 %v16435_v34, %v4389_v16 }
0x2b7d   :  { %v4383_v1 = vmul.f32 %v15141_v36, %v16450_v40  ;;  %v4744_v40 = vpop.permute.xlu1 %4743 }
0x2b7e   :  { %13382 = vmatmul.mubr.msk.f32.gmra.mrb[56].mxu1 %vm228_vm5, %v16534_v41  ;;  %vm4746_vm3 = vcmp.eq.s32.totalorder %v15549_v35, %v4744_v40 }
0x2b7f   :  { %13384 = vmatprep.mubr.msk.f32.mxu1 %vm15313_vm0, %v15314_v10  ;;  %v4390_v26 = vmul.f32 %v16431_v58, %v4383_v1  ;;  %v16562_v58 = vld [vmem:[%s17875_s13] sm:$0xff] }
0x2b81   :  { %v4497_v8 = vpop.f32.mrb[54].mxu1  ;;  %v16546_v63 = vadd.f32 %v16435_v34, %v4390_v26  ;;  %v16567_v34 = vld [vmem:[%s17875_s13 + $0x8] sm:$0xff] }
0x2b82   :  { %v4498_v13 = vadd.f32 %v12295_v59, %v4497_v8  ;;  %v13380_v15 = vpop.f32.mrb[55].mxu1  ;;  %v14332_v25 = vpack.c.bf16 %v16567_v34, %v16562_v58  ;;  %v14796_v4 = vpack.i.bf16 %v16567_v34, %v16562_v58 }
0x2b83   :  { %13385 = vmatmul.mubr.msk.f32.gmra.mrb[58].mxu1 %vm228_vm5, %v16546_v63 }
0x2b84   :  { %v4511_v19 = vmax.f32 %v4498_v13, 0.0  ;;  %13444 = vmatprep.mubr.msk.f32.mxu1 %vm4745_vm2, %v15315_v37  ;;  %14333 = vmatprep.subr.bf16.mxu0 %v14332_v25 }
0x2b86   :  { %13404 = vmatmul.mubr.msk.f32.vlgmr.msra.gmra.mrb[52].mxu0 %vm2296_vm1, %v4511_v19  ;;  %v15332_v19 = vmov -1e+30  }
0x2b87   :  { %13445 = vmatmul.mubr.msk.f32.vlgmr.msra.gmra.mrb[60].mxu1 %vm4746_vm3, %v15315_v37  ;;  %13406 = vmatprep.mubr.msk.f32.mxu0 %vm15313_vm0, %v15314_v10  ;;  %v16574_v37 = vld [vmem:[%s17875_s13 + $0x10] sm:$0xff] }
0x2b88   :  { %13470 = vmatprep.mubr.msk.f32.mxu1 %vm15313_vm0, %v15314_v10  ;;  %14335 = vmatpush3.bf16.msra.mxu0 %v14332_v25  ;;  %v14336_v46 = vpack.c.bf16 %v16579_v21, %v16574_v37  ;;  %v14801_v57 = vpack.i.bf16 %v16579_v21, %v16574_v37  ;;  %v16694_v25 = vsel %vm4832_vm4, 0.0, %v15332_v19 }
0x2b8a   :  { %14337 = vmatprep.subr.bf16.mxu0 %v14336_v46 }
0x2b8c   :  { %14339 = vmatpush3.bf16.msra.mxu0 %v14336_v46 }
0x2b8d   :  { %13458 = vmatprep.subr.mxu0 %v15314_v10 }
0x2c51   :  { %v4502_v39 = vpop.f32.mrb[56].mxu1 }
0x2c52   :  { %v4503_v30 = vadd.f32 %v12295_v59, %v4502_v39  ;;  %v13383_v45 = vpop.f32.mrb[57].mxu1 }
0x2c54   :  { %v4512_v42 = vmax.f32 %v4503_v30, 0.0 }
0x2c56   :  { %v4507_v61 = vpop.f32.mrb[58].mxu1  ;;  %13407 = vmatmul.mubr.msk.f32.gmra.mrb[54].mxu0 %vm2296_vm1, %v4512_v42 }
0x2c57   :  { %v4508_v52 = vadd.f32 %v12295_v59, %v4507_v61  ;;  %v13386_v62 = vpop.f32.mrb[59].mxu1  ;;  %13409 = vmatprep.mubr.msk.f32.mxu0 %vm15313_vm0, %v15314_v10 }
0x2c59   :  { %v4513_v29 = vmax.f32 %v4508_v52, 0.0  ;;  %v16591_v49 = vpop.f32.mrb[52].mxu0 }
0x2c5a   :  { %v13405_v43 = vpop.f32.mrb[53].mxu0  ;;  %v13446_v17 = vpop.f32.mrb[60].mxu1 }
0x2c5b   :  { %v4827_v20 = vmul.f32 5.656854, %v13446_v17  ;;  %13410 = vmatmul.mubr.msk.f32.gmra.mrb[56].mxu0 %vm2296_vm1, %v4513_v29  ;;  %v4817_v60 = vpop.f32.mrb[61].mxu1 }
0x2c5c   :  { %v4826_v2 = vmul.f32 5.656854, %v4817_v60 }
0x2c5d   :  { %v16599_v22 = vadd.f32 %v4827_v20, %v4738_v18 }
0x2c5e   :  { %v16597_v31 = vadd.f32 %v4826_v2, %v4738_v18 }
0x2c60   :  { %13455 = vmatprep.mubr.msk.f32.mxu0 %vm228_vm5, %v16597_v31 }
0x2c61   :  { %13456 = vmatmul.mubr.msk.f32.vlgmr.msra.gmra.mrb[58].mxu0 %vm228_vm5, %v16599_v22 }
0x2c62   :  { %13460 = vmatprep.mubr.msk.f32.mxu0 %vm15313_vm0, %v15314_v10 }
0x2d29   :  { %v16607_v28 = vpop.f32.mrb[54].mxu0 }
0x2d2a   :  { %v13408_v3 = vpop.f32.mrb[55].mxu0 }
0x2d2e   :  { %v16609_v48 = vpop.f32.mrb[56].mxu0 }
0x2d2f   :  { %v13411_v54 = vpop.f32.mrb[57].mxu0 }
0x2d34   :  { %v13457_v50 = vpop.f32.mrb[58].mxu0 }
0x2d35   :  { %v4918_v55 = vpop.f32.mrb[59].mxu0  ;;  %v16632_v6 = vadd.f32 %v13457_v50, %v16614_v44 }
0x2d36   :  { %v16617_v0 = vadd.f32 %v16614_v44, %v4918_v55 }
0x2d38   :  { %5095 = vrot.lane.b32.xlu0 %v16617_v0, %s17978_s11  ;;  %4928 = vrot.lane.b32.xlu1 %v16617_v0, %s17977_s29 }
0x2d3c   :  { %5262 = vrot.lane.b32.xlu0 %v16617_v0, %s17981_s8  ;;  %5093 = vrot.lane.b32.xlu1 %v16617_v0, %s17979_s5 }
0x2d40   :  { %5429 = vrot.lane.b32.xlu0 %v16617_v0, %s17984_s10  ;;  %5260 = vrot.lane.b32.xlu1 %v16617_v0, %s17983_s4 }
0x2d44   :  { %5610 = vrot.lane.b32.xlu0 %v16632_v6, %s17977_s29  ;;  %5427 = vrot.lane.b32.xlu1 %v16617_v0, %s17985_s0 }
0x2d48   :  { %5775 = vrot.lane.b32.xlu0 %v16632_v6, %s17979_s5  ;;  %5777 = vrot.lane.b32.xlu1 %v16632_v6, %s17978_s11 }
0x2d4c   :  { %5942 = vrot.lane.b32.xlu0 %v16632_v6, %s17983_s4  ;;  %5944 = vrot.lane.b32.xlu1 %v16632_v6, %s17981_s8 }
0x2d50   :  { %6109 = vrot.lane.b32.xlu0 %v16632_v6, %s17985_s0  ;;  %6111 = vrot.lane.b32.xlu1 %v16632_v6, %s17984_s10 }
0x2d54   :  { %5017 = vrot.lane.b32.xlu1 %v16617_v0, %s17980_s30 }
0x2daa   :  { %v5096_v11 = vpop.permute.xlu0 %5095  ;;  %v4929_v23 = vpop.permute.xlu1 %4928 }
0x2dab   :  { %13459 = vmatpush3.xpose.msk.msra.mxu0 %vm324_vm6, %v4929_v23  ;;  %13469 = vmatpush3.xpose.msk.msra.mxu1 %vm324_vm6, %v5096_v11 }
0x2dac   :  { %13478 = vmatprep.subr.mxu1 %v15314_v10  ;;  %13463 = vmatprep.subr.mxu0 %v15314_v10 }
0x2dae   :  { %v5263_v47 = vpop.permute.xlu0 %5262  ;;  %13461 = vmatmul.mubr.msk.f32.vlgmr.msra.gmra.mrb[60].mxu0 %vm324_vm6, %v16617_v0  ;;  %v5094_v27 = vpop.permute.xlu1 %5093 }
0x2daf   :  { %13471 = vmatmul.mubr.msk.f32.vlgmr.msra.gmra.mrb[62].mxu1 %vm324_vm6, %v5094_v27  ;;  %13465 = vmatprep.mubr.msk.f32.mxu0 %vm15313_vm0, %v15314_v10 }
0x2db0   :  { %13479 = vmatpush3.xpose.msk.msra.mxu1 %vm324_vm6, %v5263_v47  ;;  %13480 = vmatprep.mubr.msk.f32.mxu1 %vm15313_vm0, %v15314_v10 }
0x2db1   :  { %13488 = vmatprep.subr.mxu1 %v15314_v10 }
0x2db2   :  { %v5430_v33 = vpop.permute.xlu0 %5429  ;;  %v5261_v16 = vpop.permute.xlu1 %5260 }
0x2db3   :  { %13481 = vmatmul.mubr.msk.f32.vlgmr.msra.gmra.mrb[64].mxu1 %vm324_vm6, %v5261_v16 }
0x2db4   :  { %13489 = vmatpush3.xpose.msk.msra.mxu1 %vm324_vm6, %v5430_v33  ;;  %13490 = vmatprep.mubr.msk.f32.mxu1 %vm15313_vm0, %v15314_v10 }
0x2db5   :  { %13498 = vmatprep.subr.mxu1 %v15314_v10 }
0x2db6   :  { %v5611_v36 = vpop.permute.xlu0 %5610  ;;  %v5428_v1 = vpop.permute.xlu1 %5427 }
0x2db7   :  { %13491 = vmatmul.mubr.msk.f32.vlgmr.msra.gmra.mrb[66].mxu1 %vm324_vm6, %v5428_v1 }
0x2db8   :  { %13499 = vmatpush3.xpose.msk.msra.mxu1 %vm324_vm6, %v5611_v36  ;;  %13500 = vmatprep.mubr.msk.f32.mxu1 %vm15313_vm0, %v15314_v10 }
0x2db9   :  { %13508 = vmatprep.subr.mxu1 %v15314_v10 }
0x2dba   :  { %v5776_v59 = vpop.permute.xlu0 %5775  ;;  %v5778_v26 = vpop.permute.xlu1 %5777 }
0x2dbb   :  { %13501 = vmatmul.mubr.msk.f32.vlgmr.msra.gmra.mrb[68].mxu1 %vm324_vm6, %v16632_v6 }
0x2dbc   :  { %13509 = vmatpush3.xpose.msk.msra.mxu1 %vm324_vm6, %v5778_v26  ;;  %13510 = vmatprep.mubr.msk.f32.mxu1 %vm15313_vm0, %v15314_v10 }
0x2dbd   :  { %13518 = vmatprep.subr.mxu1 %v15314_v10 }
0x2dbe   :  { %v5945_v9 = vpop.permute.xlu1 %5944  ;;  %v5943_v8 = vpop.permute.xlu0 %5942 }
0x2dbf   :  { %13511 = vmatmul.mubr.msk.f32.vlgmr.msra.gmra.mrb[70].mxu1 %vm324_vm6, %v5776_v59 }
0x2dc0   :  { %13519 = vmatpush3.xpose.msk.msra.mxu1 %vm324_vm6, %v5945_v9  ;;  %13520 = vmatprep.mubr.msk.f32.mxu1 %vm15313_vm0, %v15314_v10 }
0x2dc1   :  { %13528 = vmatprep.subr.mxu1 %v15314_v10 }
0x2dc2   :  { %v6112_v13 = vpop.permute.xlu1 %6111  ;;  %v6110_v15 = vpop.permute.xlu0 %6109 }
0x2dc3   :  { %13521 = vmatmul.mubr.msk.f32.vlgmr.msra.gmra.mrb[72].mxu1 %vm324_vm6, %v5943_v8 }
0x2dc4   :  { %13529 = vmatpush3.xpose.msk.msra.mxu1 %vm324_vm6, %v6112_v13  ;;  %13530 = vmatprep.mubr.msk.f32.mxu1 %vm15313_vm0, %v15314_v10 }
0x2dc6   :  { %v5018_v40 = vpop.permute.xlu1 %5017 }
0x2dc7   :  { %13464 = vmatpush3.msra.mxu0 %v5018_v40  ;;  %13531 = vmatmul.mubr.msk.f32.vlgmr.msra.gmra.mrb[74].mxu1 %vm324_vm6, %v6110_v15 }
0x2dc8   :  { %13473 = vmatprep.subr.mxu0 %v15314_v10 }
0x2e81   :  { %v5000_v46 = vpop.f32.mrb[60].mxu0 }
0x2e82   :  { %v5004_v39 = vmul.f32 0.35355338, %v5000_v46  ;;  %v13462_v30 = vpop.f32.mrb[61].mxu0  ;;  %v5167_v45 = vpop.f32.mrb[62].mxu1 }
0x2e83   :  { %v5171_v42 = vmul.f32 0.35355338, %v5167_v45  ;;  %v13472_v61 = vpop.f32.mrb[63].mxu1 }
0x2e84   :  { %v5005_v52 = vadd.f32 %v5004_v39, %v16694_v25 }
0x2e85   :  { %v5172_v62 = vadd.f32 %v5171_v42, %v16694_v25 }
0x2e86   :  { %v5334_v29 = vpop.f32.mrb[64].mxu1  ;;  %v5006_v43 = vsel %vm324_vm6, %v5005_v52, -inf }
0x2e87   :  { %v5338_v17 = vmul.f32 0.35355338, %v5334_v29  ;;  %5007 = vmax.xlane.f32.xlu1 %v5006_v43  ;;  %v13482_v18 = vpop.f32.mrb[65].mxu1  ;;  %v5173_v35 = vsel %vm324_vm6, %v5172_v62, -inf }
0x2e88   :  { %5174 = vmax.xlane.f32.xlu0 %v5173_v35 }
0x2e89   :  { %v5339_v20 = vadd.f32 %v5338_v17, %v16694_v25 }
0x2e8a   :  { %v5501_v60 = vpop.f32.mrb[66].mxu1 }
0x2e8b   :  { %v5505_v2 = vmul.f32 0.35355338, %v5501_v60  ;;  %v13492_v3 = vpop.f32.mrb[67].mxu1  ;;  %v5340_v54 = vsel %vm324_vm6, %v5339_v20, -inf }
0x2e8c   :  { %5341 = vmax.xlane.f32.xlu0 %v5340_v54 }
0x2e8d   :  { %v5506_v50 = vadd.f32 %v5505_v2, %v16694_v25 }
0x2e8e   :  { %v5682_v55 = vpop.f32.mrb[68].mxu1 }
0x2e8f   :  { %v5686_v11 = vmul.f32 0.35355338, %v5682_v55  ;;  %v13502_v23 = vpop.f32.mrb[69].mxu1  ;;  %v5507_v47 = vsel %vm324_vm6, %v5506_v50, -inf }
0x2e90   :  { %5508 = vmax.xlane.f32.xlu1 %v5507_v47 }
0x2e91   :  { %v5687_v27 = vadd.f32 %v5686_v11, %v16694_v25 }
0x2e92   :  { %v5849_v33 = vpop.f32.mrb[70].mxu1 }
0x2e93   :  { %v5853_v16 = vmul.f32 0.35355338, %v5849_v33  ;;  %v13512_v36 = vpop.f32.mrb[71].mxu1  ;;  %v5688_v1 = vsel %vm324_vm6, %v5687_v27, -inf }
0x2e94   :  { %5689 = vmax.xlane.f32.xlu0 %v5688_v1 }
0x2e95   :  { %v5854_v59 = vadd.f32 %v5853_v16, %v16694_v25 }
0x2e96   :  { %v6016_v26 = vpop.f32.mrb[72].mxu1 }
0x2e97   :  { %v6020_v9 = vmul.f32 0.35355338, %v6016_v26  ;;  %v13522_v8 = vpop.f32.mrb[73].mxu1  ;;  %v5855_v13 = vsel %vm324_vm6, %v5854_v59, -inf }
0x2e98   :  { %5856 = vmax.xlane.f32.xlu1 %v5855_v13 }
0x2e99   :  { %v6021_v15 = vadd.f32 %v6020_v9, %v16694_v25 }
0x2e9a   :  { %v6183_v40 = vpop.f32.mrb[74].mxu1 }
0x2e9b   :  { %v13532_v19 = vpop.f32.mrb[75].mxu1  ;;  %v6022_v46 = vsel %vm324_vm6, %v6021_v15, -inf  ;;  %v6187_v39 = vmul.f32 0.35355338, %v6183_v40 }
0x2e9c   :  { %6023 = vmax.xlane.f32.xlu0 %v6022_v46 }
0x2e9d   :  { %v6188_v30 = vadd.f32 %v6187_v39, %v16694_v25 }
0x2e9f   :  { %v6189_v45 = vsel %vm324_vm6, %v6188_v30, -inf }
0x2ea9   :  { %5351 = vrot.lane.b32.xlu1 %v16617_v0, %s17986_s25 }
0x2eb2   :  { %5184 = vrot.lane.b32.xlu0 %v16617_v0, %s17982_s7 }
0x2ecd   :  { %6190 = vmax.xlane.f32.xlu1 %v6189_v45 }
0x2ede   :  { %5518 = vrot.lane.b32.xlu1 %v16617_v0, %s17987_s24 }
0x2f14   :  { %v5008_v42 = vpop.xlane.xlu1 %5007 }
0x2f15   :  { %v5009_v61 = vsub.f32 %v5005_v52, %v5008_v42  ;;  %v5175_v29 = vpop.xlane.xlu0 %5174 }
0x2f16   :  { %v5176_v43 = vsub.f32 %v5172_v62, %v5175_v29 }
0x2f17   :  { %v5010_v17 = vmul.f32 1.442695, %v5009_v61 }
0x2f18   :  { %v5177_v18 = vmul.f32 1.442695, %v5176_v43 }
0x2f19   :  { %15142 = vpow2.f32 %v5010_v17  ;;  %v5342_v35 = vpop.xlane.xlu0 %5341 }
0x2f1a   :  { %15144 = vpow2.f32 %v5177_v18  ;;  %v5343_v60 = vsub.f32 %v5339_v20, %v5342_v35 }
0x2f1c   :  { %v5344_v2 = vmul.f32 1.442695, %v5343_v60 }
0x2f1d   :  { %v5509_v20 = vpop.xlane.xlu1 %5508 }
0x2f1e   :  { %15146 = vpow2.f32 %v5344_v2  ;;  %v5510_v11 = vsub.f32 %v5506_v50, %v5509_v20 }
0x2f20   :  { %v5511_v16 = vmul.f32 1.442695, %v5510_v11 }
0x2f21   :  { %v5690_v23 = vpop.xlane.xlu0 %5689 }
0x2f22   :  { %v5691_v33 = vsub.f32 %v5687_v27, %v5690_v23  ;;  %15148 = vpow2.f32 %v5511_v16 }
0x2f23   :  { %v15143_v3 = vpop.eup %15142 }
0x2f24   :  { %v16718_v54 = vpop.eup %15144  ;;  %v5012_v55 = vsel %vm324_vm6, %v15143_v3, 0.0  ;;  %v5692_v26 = vmul.f32 1.442695, %v5691_v33 }
0x2f25   :  { %5013 = vadd.xlane.f32.xlu0 %v5012_v55  ;;  %v5179_v0 = vsel %vm324_vm6, %v16718_v54, 0.0  ;;  %v5857_v47 = vpop.xlane.xlu1 %5856 }
0x2f26   :  { %5180 = vadd.xlane.f32.xlu1 %v5179_v0  ;;  %v5858_v36 = vsub.f32 %v5854_v59, %v5857_v47  ;;  %15150 = vpow2.f32 %v5692_v26 }
0x2f28   :  { %v16723_v52 = vpop.eup %15146  ;;  %v5859_v9 = vmul.f32 1.442695, %v5858_v36 }
0x2f29   :  { %v5346_v62 = vsel %vm324_vm6, %v16723_v52, 0.0  ;;  %v6024_v1 = vpop.xlane.xlu0 %6023  ;;  %v5352_v40 = vpop.permute.xlu1 %5351 }
0x2f2a   :  { %5347 = vadd.xlane.f32.xlu0 %v5346_v62  ;;  %v6025_v8 = vsub.f32 %v6021_v15, %v6024_v1  ;;  %15152 = vpow2.f32 %v5859_v9 }
0x2f2c   :  { %v6026_v13 = vmul.f32 1.442695, %v6025_v8  ;;  %v15149_v19 = vpop.eup %15148 }
0x2f2d   :  { %v5513_v50 = vsel %vm324_vm6, %v15149_v19, 0.0  ;;  %v5185_v17 = vpop.permute.xlu0 %5184 }
0x2f2e   :  { %15154 = vpow2.f32 %v6026_v13 }
0x2f30   :  { %v16731_v46 = vpop.eup %15150 }
0x2f31   :  { %v5694_v42 = vsel %vm324_vm6, %v16731_v46, 0.0 }
0x2f34   :  { %v16734_v45 = vpop.eup %15152 }
0x2f35   :  { %v5861_v15 = vsel %vm324_vm6, %v16734_v45, 0.0 }
0x2f37   :  { %5699 = vrot.lane.b32.xlu1 %v16632_v6, %s17980_s30 }
0x2f38   :  { %v16740_v61 = vpop.eup %15154 }
0x2f39   :  { %v6028_v29 = vsel %vm324_vm6, %v16740_v61, 0.0 }
0x2f40   :  { %5866 = vrot.lane.b32.xlu0 %v16632_v6, %s17982_s7 }
0x2f5a   :  { %v6191_v39 = vpop.xlane.xlu1 %6190 }
0x2f5b   :  { %v6192_v27 = vsub.f32 %v6188_v30, %v6191_v39  ;;  %5514 = vadd.xlane.f32.xlu1 %v5513_v50 }
0x2f5d   :  { %v6193_v59 = vmul.f32 1.442695, %v6192_v27 }
0x2f5e   :  { %v5519_v18 = vpop.permute.xlu1 %5518 }
0x2f5f   :  { %15156 = vpow2.f32 %v6193_v59  ;;  %5695 = vadd.xlane.f32.xlu0 %v5694_v42  ;;  %5862 = vadd.xlane.f32.xlu1 %v5861_v15 }
0x2f63   :  { %6029 = vadd.xlane.f32.xlu0 %v6028_v29 }
0x2f69   :  { %v16744_v43 = vpop.eup %15156 }
0x2f6a   :  { %v6195_v30 = vsel %vm324_vm6, %v16744_v43, 0.0 }
0x2f6b   :  { %6196 = vadd.xlane.f32.xlu0 %v6195_v30 }
0x2f70   :  { %6033 = vrot.lane.b32.xlu1 %v16632_v6, %s17986_s25 }
0x2f74   :  { %14797 = vrot.lane.b32.xlu1 %v14796_v4, %s17988_s22 }
0x2f81   :  { %6200 = vrot.lane.b32.xlu0 %v16632_v6, %s17987_s24 }
0x2f85   :  { %14802 = vrot.lane.b32.xlu0 %v14801_v57, %s17988_s22 }
0x2fb2   :  { %v5014_v35 = vpop.xlane.xlu0 %5013 }
0x2fb3   :  { %15158 = vrcp.f32 %v5014_v35  ;;  %v5181_v60 = vpop.xlane.xlu1 %5180 }
0x2fb4   :  { %15160 = vrcp.f32 %v5181_v60 }
0x2fb7   :  { %v5348_v2 = vpop.xlane.xlu0 %5347  ;;  %v5700_v4 = vpop.permute.xlu1 %5699 }
0x2fb8   :  { %15162 = vrcp.f32 %v5348_v2 }
0x2fbb   :  { %v5867_v57 = vpop.permute.xlu0 %5866 }
0x2fbd   :  { %v15159_v55 = vpop.eup %15158 }
0x2fbe   :  { %v5016_v0 = vmul.f32 %v15159_v55, %v15143_v3  ;;  %v15161_v58 = vpop.eup %15160 }
0x2fbf   :  { %v5183_v34 = vmul.f32 %v15161_v58, %v16718_v54 }
0x2fc0   :  { %13466 = vmatmul.mubr.msk.f32.vlgmr.msra.gmra.mrb[62].mxu0 %vm324_vm6, %v5016_v0 }
0x2fc1   :  { %13474 = vmatpush3.msra.mxu0 %v5185_v17  ;;  %13475 = vmatprep.mubr.msk.f32.mxu0 %vm15313_vm0, %v15314_v10 }
0x2fc2   :  { %13483 = vmatprep.subr.mxu0 %v15314_v10  ;;  %v15163_v37 = vpop.eup %15162 }
0x2fc3   :  { %v5350_v21 = vmul.f32 %v15163_v37, %v16723_v52 }
0x2fc4   :  { %13476 = vmatmul.mubr.msk.f32.vlgmr.msra.gmra.mrb[64].mxu0 %vm324_vm6, %v5183_v34 }
0x2fc5   :  { %13484 = vmatpush3.msra.mxu0 %v5352_v40  ;;  %13485 = vmatprep.mubr.msk.f32.mxu0 %vm15313_vm0, %v15314_v10 }
0x2fc6   :  { %13493 = vmatprep.subr.mxu0 %v15314_v10 }
0x2fc8   :  { %13486 = vmatmul.mubr.msk.f32.vlgmr.msra.gmra.mrb[66].mxu0 %vm324_vm6, %v5350_v21  ;;  %v16804_v21 = vld [vmem:[%s17993_s26 + $0x1] ss:$0 sm:$0xff] }
0x2fc9   :  { %13494 = vmatpush3.msra.mxu0 %v5519_v18  ;;  %13495 = vmatprep.mubr.msk.f32.mxu0 %vm15313_vm0, %v15314_v10 }
0x2fca   :  { %13503 = vmatprep.subr.mxu0 %v15314_v10 }
0x2fe8   :  { %v5515_v6 = vpop.xlane.xlu1 %5514 }
0x2fe9   :  { %15164 = vrcp.f32 %v5515_v6 }
0x2fec   :  { %v5696_v3 = vpop.xlane.xlu0 %5695  ;;  %v5863_v54 = vpop.xlane.xlu1 %5862 }
0x2fed   :  { %15166 = vrcp.f32 %v5696_v3 }
0x2fee   :  { %15168 = vrcp.f32 %v5863_v54 }
0x2ff0   :  { %v6030_v62 = vpop.xlane.xlu0 %6029  ;;  %v6034_v1 = vpop.permute.xlu1 %6033 }
0x2ff1   :  { %15170 = vrcp.f32 %v6030_v62 }
0x2ff3   :  { %v15165_v20 = vpop.eup %15164 }
0x2ff4   :  { %v5517_v52 = vmul.f32 %v15165_v20, %v15149_v19  ;;  %v14798_v27 = vpop.permute.xlu1 %14797 }
0x2ff5   :  { %v14800_v59 = vunpack.i.h.bf16 %v14798_v27  ;;  %v14799_v42 = vunpack.i.l.bf16 %v14798_v27 }
0x2ff6   :  { %13496 = vmatmul.mubr.msk.f32.vlgmr.msra.gmra.mrb[68].mxu0 %vm324_vm6, %v5517_v52 }
0x2ff7   :  { %v15167_v11 = vpop.eup %15166  ;;  %13504 = vmatpush3.msra.mxu0 %v5700_v4  ;;  %13505 = vmatprep.mubr.msk.f32.mxu0 %vm15313_vm0, %v15314_v10  ;;  %v14340_v15 = vpack.c.bf16 %v14800_v59, %v14799_v42  ;;  %v4601_v4 = vadd.f32 %v16804_v21, %v16607_v28 }
0x2ff8   :  { %v6197_v23 = vpop.xlane.xlu0 %6196  ;;  %13513 = vmatprep.subr.mxu0 %v15314_v10  ;;  %v5698_v47 = vmul.f32 %v15167_v11, %v16731_v46  ;;  %v15169_v33 = vpop.eup %15168 }
0x2ff9   :  { %15172 = vrcp.f32 %v6197_v23  ;;  %v5865_v16 = vmul.f32 %v15169_v33, %v16734_v45  ;;  %14341 = vmatprep.subr.bf16.mxu1 %v14340_v15  ;;  %v4610_v6 = vadd.f32 %v4601_v4, %v16534_v41 }
0x2ffa   :  { %13506 = vmatmul.mubr.msk.f32.vlgmr.msra.gmra.mrb[70].mxu0 %vm324_vm6, %v5698_v47  ;;  %14343 = vmatpush3.bf16.msra.mxu1 %v14340_v15 }
0x2ffb   :  { %13514 = vmatpush3.msra.mxu0 %v5867_v57  ;;  %13515 = vmatprep.mubr.msk.f32.mxu0 %vm15313_vm0, %v15314_v10  ;;  %v15171_v36 = vpop.eup %15170  ;;  %v4596_v57 = vadd.f32 %v16804_v21, %v16591_v49  ;;  %v4615_v54 = vsel %vm228_vm5, %v4610_v6, 0.0 }
0x2ffc   :  { %13523 = vmatprep.subr.mxu0 %v15314_v10  ;;  %v6032_v26 = vmul.f32 %v15171_v36, %v16740_v61  ;;  %v6201_v9 = vpop.permute.xlu0 %6200 }
0x2ffd   :  { %v4609_v3 = vadd.f32 %v4596_v57, %v16439_v56 }
0x2ffe   :  { %13516 = vmatmul.mubr.msk.f32.vlgmr.msra.gmra.mrb[72].mxu0 %vm324_vm6, %v5865_v16 }
0x2fff   :  { %13524 = vmatpush3.msra.mxu0 %v6034_v1  ;;  %13525 = vmatprep.mubr.msk.f32.mxu0 %vm15313_vm0, %v15314_v10  ;;  %v4612_v62 = vsel %vm228_vm5, %v4609_v3, 0.0 }
0x3000   :  { %13533 = vmatprep.subr.mxu0 %v15314_v10  ;;  %v14803_v61 = vpop.permute.xlu0 %14802 }
0x3001   :  { %v14805_v29 = vunpack.i.h.bf16 %v14803_v61 }
0x3002   :  { %13526 = vmatmul.mubr.msk.f32.vlgmr.msra.gmra.mrb[74].mxu0 %vm324_vm6, %v6032_v26 }
0x3003   :  { %v15173_v8 = vpop.eup %15172  ;;  %13534 = vmatpush3.msra.mxu0 %v6201_v9  ;;  %13535 = vmatprep.mubr.msk.f32.mxu0 %vm15313_vm0, %v15314_v10 }
0x3004   :  { %v6199_v13 = vmul.f32 %v15173_v8, %v16744_v43  ;;  %v14804_v43 = vunpack.i.l.bf16 %v14803_v61 }
0x3006   :  { %13536 = vmatmul.mubr.msk.f32.vlgmr.msra.gmra.mrb[76].mxu0 %vm324_vm6, %v6199_v13  ;;  %v14344_v30 = vpack.c.bf16 %v14805_v29, %v14804_v43 }
0x3008   :  { %14345 = vmatprep.subr.bf16.mxu1 %v14344_v30 }
0x3009   :  { %14347 = vmatpush3.bf16.msra.mxu1 %v14344_v30 }
0x300a   :  { %14356 = vmatprep.subr.bf16.mxu1 %v15312_v7 }
0x3093   :  { %v5089_v40 = vpop.f32.mrb[62].mxu0 }
0x3094   :  { %v13467_v19 = vpop.f32.mrb[63].mxu0 }
0x3097   :  { %v5256_v46 = vpop.f32.mrb[64].mxu0 }
0x3098   :  { %5595 = vrot.lane.b32.xlu1 %v5256_v46, %s17990_s20  ;;  %v13477_v39 = vpop.f32.mrb[65].mxu0 }
0x309b   :  { %v5423_v50 = vpop.f32.mrb[66].mxu0 }
0x309c   :  { %5599 = vrot.lane.b32.xlu0 %v5423_v50, %s17989_s23  ;;  %v13487_v45 = vpop.f32.mrb[67].mxu0 }
0x30c9   :  { %v5590_v17 = vpop.f32.mrb[68].mxu0 }
0x30ca   :  { %5603 = vrot.lane.b32.xlu0 %v5590_v17, %s17992_s12  ;;  %v13497_v18 = vpop.f32.mrb[69].mxu0  ;;  %v16830_v17 = vrot.slane %v16427_v24, %v16061_v38 }
0x30cd   :  { %v5771_v35 = vpop.f32.mrb[70].mxu0 }
0x30ce   :  { %v13507_v60 = vpop.f32.mrb[71].mxu0 }
0x30d1   :  { %v5938_v2 = vpop.f32.mrb[72].mxu0 }
0x30d2   :  { %6277 = vrot.lane.b32.xlu1 %v5938_v2, %s17990_s20  ;;  %v13517_v55 = vpop.f32.mrb[73].mxu0 }
0x30d5   :  { %v6105_v0 = vpop.f32.mrb[74].mxu0 }
0x30d6   :  { %6281 = vrot.lane.b32.xlu1 %v6105_v0, %s17989_s23  ;;  %v13527_v58 = vpop.f32.mrb[75].mxu0 }
0x30d9   :  { %v6272_v34 = vpop.f32.mrb[76].mxu0 }
0x30da   :  { %6285 = vrot.lane.b32.xlu0 %v6272_v34, %s17992_s12  ;;  %v13537_v37 = vpop.f32.mrb[77].mxu0 }
0x30f9   :  { %4616 = vadd.xlane.f32.xlu0 %v4615_v54 }
0x30fa   :  { %4613 = vadd.xlane.f32.xlu1 %v4612_v62 }
0x310a   :  { %v5596_v20 = vpop.permute.xlu1 %5595 }
0x310b   :  { %v5606_v11 = vsel %vm324_vm6, %v5089_v40, %v5596_v20 }
0x310e   :  { %v5600_v52 = vpop.permute.xlu0 %5599 }
0x310f   :  { %v5607_v23 = vsel %vm1157_vm14, %v5606_v11, %v5600_v52 }
0x313c   :  { %v5604_v28 = vpop.permute.xlu0 %5603 }
0x313d   :  { %v5608_v47 = vsel %vm1160_vm13, %v5607_v23, %v5604_v28 }
0x313e   :  { %13546 = vmatprep.mubr.msk.f32.mxu1 %vm228_vm5, %v5608_v47 }
0x3144   :  { %v6278_v41 = vpop.permute.xlu1 %6277 }
0x3145   :  { %v6288_v56 = vsel %vm324_vm6, %v5771_v35, %v6278_v41 }
0x3148   :  { %v6282_v49 = vpop.permute.xlu1 %6281 }
0x3149   :  { %v6289_v33 = vsel %vm1157_vm14, %v6288_v56, %v6282_v49 }
0x314c   :  { %v6286_v16 = vpop.permute.xlu0 %6285 }
0x314d   :  { %v6290_v36 = vsel %vm1160_vm13, %v6289_v33, %v6286_v16 }
0x314e   :  { %13547 = vmatmul.mubr.msk.f32.vlgmr.msra.gmra.mrb[76].mxu1 %vm228_vm5, %v6290_v36 }
0x314f   :  { %13568 = vmatprep.mubr.msk.f32.mxu1 %vm15313_vm0, %v15314_v10 }
0x3186   :  { %v4617_v1 = vpop.xlane.xlu0 %4616 }
0x3187   :  { %v4622_v26 = vmul.f32 0.03125, %v4617_v1  ;;  %v4614_v9 = vpop.xlane.xlu1 %4613 }
0x3188   :  { %v4621_v8 = vmul.f32 0.03125, %v4614_v9 }
0x3189   :  { %v4625_v13 = vsub.f32 %v4610_v6, %v4622_v26 }
0x318a   :  { %v4624_v40 = vsub.f32 %v4609_v3, %v4621_v8 }
0x318b   :  { %v4628_v19 = vmul.f32 %v4625_v13, %v4625_v13 }
0x318c   :  { %v4627_v46 = vmul.f32 %v4624_v40, %v4624_v40 }
0x318d   :  { %v4633_v39 = vsel %vm228_vm5, %v4628_v19, 0.0  ;;  %v6431_v19 = vld [vmem:[%s17994_s17] sm:$0xff] }
0x318e   :  { %4634 = vadd.xlane.f32.xlu1 %v4633_v39  ;;  %v4630_v50 = vsel %vm228_vm5, %v4627_v46, 0.0  ;;  %v6432_v46 = vld [vmem:[%s17994_s17 + $0x8] sm:$0xff]  ;;  %v6433_v39 = vld [vmem:[%s17994_s17 + $0x10] sm:$0xff] }
0x318f   :  { %4631 = vadd.xlane.f32.xlu0 %v4630_v50  ;;  %v6434_v50 = vld [vmem:[%s17994_s17 + $0x18] sm:$0xff] }
0x31a5   :  { %6307 = vrot.lane.b32.xlu0 %v16614_v44, %s17988_s22  ;;  %v16834_v44 = vrot.slane %v16427_v24, %v16064_v14 }
0x321b   :  { %v4635_v45 = vpop.xlane.xlu1 %4634 }
0x321c   :  { %v4640_v27 = vmul.f32 0.03125, %v4635_v45  ;;  %v4632_v59 = vpop.xlane.xlu0 %4631  ;;  %v16878_v45 = vpack.i.bf16 %v6432_v46, %v6431_v19 }
0x321d   :  { %v4639_v42 = vmul.f32 0.03125, %v4632_v59  ;;  %v14348_v59 = vpack.c.bf16 %v6432_v46, %v6431_v19 }
0x321e   :  { %v4643_v15 = vadd.f32 1e-05, %v4640_v27  ;;  %v16880_v27 = vpack.i.bf16 %v6434_v50, %v6433_v39 }
0x321f   :  { %v4642_v61 = vadd.f32 1e-05, %v4639_v42  ;;  %14349 = vmatprep.subr.bf16.mxu0 %v14348_v59  ;;  %v14352_v42 = vpack.c.bf16 %v6434_v50, %v6433_v39 }
0x3220   :  { %15174 = vrsqrt.f32 %v4643_v15  ;;  %v6308_v0 = vpop.permute.xlu0 %6307  ;;  %14351 = vmatpush3.bf16.msra.mxu0 %v14348_v59  ;;  %v4606_v15 = vadd.f32 %v16804_v21, %v16609_v48 }
0x3221   :  { %15176 = vrsqrt.f32 %v4642_v61  ;;  %v13548_v29 = vpop.f32.mrb[76].mxu1  ;;  %14353 = vmatprep.subr.bf16.mxu0 %v14352_v42 }
0x3222   :  { %v6382_v43 = vpop.f32.mrb[77].mxu1  ;;  %v6388_v57 = vadd.f32 %v13548_v29, %v6308_v0  ;;  %v16890_v61 = vadd.f32 %v4606_v15, %v16546_v63 }
0x3223   :  { %v6383_v34 = vadd.f32 %v6382_v43, %v6308_v0 }
0x3224   :  { %v6392_v24 = vadd.f32 %v6388_v57, %v16599_v22  ;;  %14355 = vmatpush3.bf16.msra.mxu0 %v14352_v42  ;;  %v4618_v29 = vsel %vm2129_vm15, %v16890_v61, 0.0 }
0x3225   :  { %v6391_v6 = vadd.f32 %v6383_v34, %v16597_v31  ;;  %14362 = vmatprep.subr.bf16.mxu0 %v15312_v7 }
0x3226   :  { %v6396_v62 = vsel %vm228_vm5, %v6392_v24, 0.0 }
0x3227   :  { %v6393_v54 = vsel %vm228_vm5, %v6391_v6, 0.0 }
0x322a   :  { %v15175_v30 = vpop.eup %15174 }
0x322b   :  { %v15177_v18 = vpop.eup %15176  ;;  %v4649_v35 = vmul.f32 %v15175_v30, %v4625_v13 }
0x322c   :  { %v4648_v60 = vmul.f32 %v15177_v18, %v4624_v40 }
0x322d   :  { %v4656_v55 = vmul.f32 %v16830_v17, %v4649_v35 }
0x322e   :  { %v4655_v2 = vmul.f32 %v16830_v17, %v4648_v60 }
0x322f   :  { %v4663_v4 = vadd.f32 %v16834_v44, %v4656_v55 }
0x3230   :  { %v4662_v58 = vadd.f32 %v16834_v44, %v4655_v2 }
0x3231   :  { %v4670_v3 = vsel %vm228_vm5, %v4663_v4, 0.0 }
0x3232   :  { %v4667_v37 = vsel %vm228_vm5, %v4662_v58, 0.0 }
0x3233   :  { %4668 = vadd.xlane.f32.xlu1 %v4667_v37 }
0x3237   :  { %4671 = vadd.xlane.f32.xlu1 %v4670_v3 }
0x323b   :  { %6394 = vadd.xlane.f32.xlu1 %v6393_v54 }
0x323f   :  { %6397 = vadd.xlane.f32.xlu1 %v6396_v62 }
0x32c0   :  { %v4669_v20 = vpop.xlane.xlu1 %4668 }
0x32c1   :  { %v4676_v52 = vmul.f32 0.03125, %v4669_v20 }
0x32c3   :  { %v16846_v11 = vsub.f32 %v4662_v58, %v4676_v52  ;;  %v16898_v52 = vld [vmem:[%s17995_s3] ss:$0 sm:$0xff] }
0x32c4   :  { %v4672_v23 = vpop.xlane.xlu1 %4671 }
0x32c5   :  { %v4677_v28 = vmul.f32 0.03125, %v4672_v23  ;;  %v4682_v31 = vmul.f32 %v16846_v11, %v16846_v11  ;;  %v16903_v23 = vld [vmem:[%s17996_s15] sm:$0x3f] }
0x32c7   :  { %v16850_v47 = vsub.f32 %v4663_v4, %v4677_v28  ;;  %v4685_v41 = vsel %vm228_vm5, %v4682_v31, 0.0 }
0x32c8   :  { %4686 = vadd.xlane.f32.xlu1 %v4685_v41  ;;  %v6395_v22 = vpop.xlane.xlu1 %6394 }
0x32c9   :  { %v6399_v49 = vmul.f32 0.03125, %v6395_v22  ;;  %v4683_v56 = vmul.f32 %v16850_v47, %v16850_v47 }
0x32cb   :  { %v16855_v33 = vsub.f32 %v6391_v6, %v6399_v49  ;;  %v4688_v16 = vsel %vm228_vm5, %v4683_v56, 0.0  ;;  %v16913_v49 = vld [vmem:[%s17995_s3 + $0x1] ss:$0 sm:$0xff] }
0x32cc   :  { %4689 = vadd.xlane.f32.xlu1 %v4688_v16  ;;  %v6398_v36 = vpop.xlane.xlu1 %6397  ;;  %v6428_v16 = vrot.slane %v16903_v23, %v15949_v53 }
0x32cd   :  { %v6400_v1 = vmul.f32 0.03125, %v6398_v36  ;;  %v6403_v26 = vmul.f32 %v16855_v33, %v16855_v33 }
0x32cf   :  { %v16860_v9 = vsub.f32 %v6392_v24, %v6400_v1  ;;  %v6405_v8 = vsel %vm228_vm5, %v6403_v26, 0.0 }
0x32d0   :  { %6406 = vadd.xlane.f32.xlu0 %v6405_v8 }
0x32d1   :  { %v6404_v13 = vmul.f32 %v16860_v9, %v16860_v9 }
0x32d3   :  { %v6408_v40 = vsel %vm228_vm5, %v6404_v13, 0.0 }
0x32d4   :  { %6409 = vadd.xlane.f32.xlu1 %v6408_v40 }
0x32e5   :  { %14807 = vrot.lane.b32.xlu1 %v16878_v45, %s17977_s29 }
0x32e6   :  { %14812 = vrot.lane.b32.xlu0 %v16880_v27, %s17977_s29 }
0x3309   :  { %4619 = vadd.xlane.f32.xlu1 %v4618_v29 }
0x3355   :  { %v4687_v43 = vpop.xlane.xlu1 %4686 }
0x3356   :  { %v4694_v30 = vmul.f32 0.03125, %v4687_v43 }
0x3358   :  { %v4697_v18 = vadd.f32 1e-05, %v4694_v30 }
0x3359   :  { %v4690_v35 = vpop.xlane.xlu1 %4689 }
0x335a   :  { %15178 = vrsqrt.f32 %v4697_v18  ;;  %v4695_v60 = vmul.f32 0.03125, %v4690_v35 }
0x335c   :  { %v4698_v2 = vadd.f32 1e-05, %v4695_v60 }
0x335d   :  { %v6407_v55 = vpop.xlane.xlu0 %6406 }
0x335e   :  { %15180 = vrsqrt.f32 %v4698_v2  ;;  %v6411_v0 = vmul.f32 0.03125, %v6407_v55 }
0x3360   :  { %v6413_v58 = vadd.f32 1e-05, %v6411_v0 }
0x3361   :  { %v6410_v34 = vpop.xlane.xlu1 %6409  ;;  %v14813_v63 = vpop.permute.xlu0 %14812 }
0x3362   :  { %15182 = vrsqrt.f32 %v6413_v58  ;;  %v6412_v48 = vmul.f32 0.03125, %v6410_v34  ;;  %v14815_v57 = vunpack.i.h.bf16 %v14813_v63  ;;  %v14814_v24 = vunpack.i.l.bf16 %v14813_v63 }
0x3364   :  { %v15179_v21 = vpop.eup %15178  ;;  %v6414_v37 = vadd.f32 1e-05, %v6412_v48  ;;  %v14360_v28 = vpack.c.bf16 %v14815_v57, %v14814_v24  ;;  %v16955_v48 = vld [vmem:[%s17997_s21] ss:$0 sm:$0xff] }
0x3365   :  { %v14808_v4 = vpop.permute.xlu1 %14807  ;;  %v4703_v54 = vmul.f32 %v15179_v21, %v16846_v11  ;;  %v6422_v11 = vrot.slane %v16903_v23, %v15941_v51 }
0x3366   :  { %15184 = vrsqrt.f32 %v6414_v37  ;;  %v14810_v6 = vunpack.i.h.bf16 %v14808_v4  ;;  %v14809_v3 = vunpack.i.l.bf16 %v14808_v4 }
0x3367   :  { %v4710_v31 = vmul.f32 %v16898_v52, %v4703_v54 }
0x3368   :  { %v15181_v62 = vpop.eup %15180  ;;  %v14357_v20 = vpack.c.bf16 %v14810_v6, %v14809_v3 }
0x3369   :  { %v4704_v41 = vmul.f32 %v15181_v62, %v16850_v47  ;;  %v16919_v36 = vadd.f32 %v16913_v49, %v4710_v31 }
0x336a   :  { %14358 = vmatpush3.bf16.msra.mxu1 %v14357_v20 }
0x336b   :  { %14359 = vmatprep.subr.bf16.mxu1 %v15312_v7  ;;  %v4711_v26 = vmul.f32 %v16898_v52, %v4704_v41 }
0x336c   :  { %v15183_v22 = vpop.eup %15182 }
0x336d   :  { %v6417_v56 = vmul.f32 %v15183_v22, %v16855_v33  ;;  %v16933_v40 = vadd.f32 %v16913_v49, %v4711_v26 }
0x336e   :  { %14361 = vmatpush3.bf16.msra.mxu1 %v14360_v28 }
0x336f   :  { %v6423_v1 = vmul.f32 %v6422_v11, %v6417_v56  ;;  %14370 = vmatprep.subr.bf16.mxu1 %v15312_v7 }
0x3370   :  { %v15185_v47 = vpop.eup %15184 }
0x3371   :  { %v6418_v8 = vmul.f32 %v15185_v47, %v16860_v9  ;;  %13569 = vmatmul.mubr.msk.f32.vlgmr.msra.gmra.mrb[78].mxu1 %vm228_vm5, %v16919_v36  ;;  %v16926_v13 = vadd.f32 %v6428_v16, %v6423_v1 }
0x3372   :  { %13571 = vmatprep.mubr.msk.f32.mxu1 %vm15313_vm0, %v15314_v10 }
0x3373   :  { %v6424_v33 = vmul.f32 %v6422_v11, %v6418_v8  ;;  %13557 = vmatprep.mubr.msk.f32.mxu0 %vm228_vm5, %v16926_v13 }
0x3375   :  { %v16935_v19 = vadd.f32 %v6428_v16, %v6424_v33  ;;  %13572 = vmatmul.mubr.msk.f32.gmra.mrb[80].mxu1 %vm228_vm5, %v16933_v40 }
0x3376   :  { %13574 = vmatprep.mubr.msk.f32.mxu1 %vm15313_vm0, %v15314_v10 }
0x3377   :  { %13558 = vmatmul.mubr.msk.f32.vlgmr.msra.gmra.mrb[78].mxu0 %vm228_vm5, %v16935_v19 }
0x3378   :  { %13581 = vmatprep.mubr.msk.f32.mxu0 %vm15313_vm0, %v15314_v10 }
0x3396   :  { %v4620_v9 = vpop.xlane.xlu1 %4619 }
0x3397   :  { %v4623_v46 = vmul.f32 0.03125, %v4620_v9 }
0x3399   :  { %v4626_v39 = vsub.f32 %v16890_v61, %v4623_v46 }
0x339b   :  { %v4629_v50 = vmul.f32 %v4626_v39, %v4626_v39 }
0x339d   :  { %v4636_v59 = vsel %vm2129_vm15, %v4629_v50, 0.0 }
0x339e   :  { %4637 = vadd.xlane.f32.xlu0 %v4636_v59 }
0x342b   :  { %v4638_v42 = vpop.xlane.xlu0 %4637 }
0x342c   :  { %v4641_v15 = vmul.f32 0.03125, %v4638_v42 }
0x342e   :  { %v4644_v29 = vadd.f32 1e-05, %v4641_v15 }
0x3430   :  { %15186 = vrsqrt.f32 %v4644_v29 }
0x343a   :  { %v15187_v43 = vpop.eup %15186 }
0x343b   :  { %v4650_v30 = vmul.f32 %v15187_v43, %v4626_v39 }
0x343d   :  { %v4657_v18 = vmul.f32 %v16830_v17, %v4650_v30 }
0x343f   :  { %v4664_v35 = vadd.f32 %v16834_v44, %v4657_v18 }
0x3441   :  { %v4673_v60 = vsel %vm2129_vm15, %v4664_v35, 0.0 }
0x3442   :  { %4674 = vadd.xlane.f32.xlu1 %v4673_v60 }
0x3444   :  { %v6617_v2 = vpop.f32.mrb[78].mxu1 }
0x3445   :  { %v13570_v55 = vpop.f32.mrb[79].mxu1 }
0x3448   :  { %v6622_v61 = vpop.f32.mrb[80].mxu1 }
0x3449   :  { %v13573_v0 = vpop.f32.mrb[81].mxu1 }
0x344a   :  { %v16950_v58 = vpop.f32.mrb[78].mxu0 }
0x344b   :  { %v6514_v34 = vpop.f32.mrb[79].mxu0 }
0x344c   :  { %v16968_v54 = vadd.f32 %v16955_v48, %v6514_v34 }
0x3453   :  { %6539 = vrot.lane.b32.xlu1 %v16955_v48, %s17977_s29 }
0x34cf   :  { %v4675_v17 = vpop.xlane.xlu1 %4674 }
0x34d0   :  { %v4678_v44 = vmul.f32 0.03125, %v4675_v17 }
0x34d2   :  { %v4681_v63 = vsub.f32 %v4664_v35, %v4678_v44 }
0x34d3   :  { %v6540_v21 = vpop.permute.xlu1 %6539 }
0x34d4   :  { %v6618_v37 = vadd.f32 %v6617_v2, %v6540_v21  ;;  %v6623_v4 = vadd.f32 %v6622_v61, %v6540_v21  ;;  %v4684_v57 = vmul.f32 %v4681_v63, %v4681_v63 }
0x34d6   :  { %v4691_v6 = vsel %vm2129_vm15, %v4684_v57, 0.0  ;;  %v16960_v3 = vpack.i.bf16 %v6623_v4, %v6618_v37  ;;  %v14363_v24 = vpack.c.bf16 %v6623_v4, %v6618_v37  ;;  %v7340_v59 = vrot.slane %v6623_v4, 2 }
0x34d7   :  { %4692 = vadd.xlane.f32.xlu1 %v4691_v6 }
0x34d8   :  { %14817 = vrot.lane.b32.xlu0 %v16960_v3, %s17979_s5  ;;  %14365 = vmatpush3.bf16.xpose.msk.msra.mxu0 %vm15620_vm7, %v14363_v24 }
0x34d9   :  { %14366 = vmatprep.subr.bf16.mxu0 %v15312_v7 }
0x34dc   :  { %6802 = vrot.lane.b32.xlu0 %v16968_v54, %s17979_s5 }
0x34df   :  { %13582 = vmatmul.mubr.msk.f32.vlgmr.msra.gmra.mrb[80].mxu0 %vm324_vm6, %v16968_v54 }
0x34e0   :  { %13588 = vmatprep.mubr.msk.f32.mxu0 %vm15313_vm0, %v15314_v10 }
0x354a   :  { %v14818_v62 = vpop.permute.xlu0 %14817 }
0x354b   :  { %v14820_v20 = vunpack.i.h.bf16 %v14818_v62  ;;  %v14819_v28 = vunpack.i.l.bf16 %v14818_v62 }
0x354d   :  { %v14371_v31 = vpack.c.bf16 %v14820_v20, %v14819_v28 }
0x354e   :  { %v6803_v47 = vpop.permute.xlu0 %6802 }
0x354f   :  { %14373 = vmatpush3.bf16.xpose.msk.msra.mxu1 %vm15620_vm7, %v14371_v31 }
0x3550   :  { %14382 = vmatprep.subr.bf16.mxu1 %v15312_v7 }
0x3564   :  { %v4693_v11 = vpop.xlane.xlu1 %4692 }
0x3565   :  { %v4696_v41 = vmul.f32 0.03125, %v4693_v11 }
0x3567   :  { %v4699_v22 = vadd.f32 1e-05, %v4696_v41 }
0x3569   :  { %15188 = vrsqrt.f32 %v4699_v22 }
0x3573   :  { %v15189_v56 = vpop.eup %15188 }
0x3574   :  { %v4705_v16 = vmul.f32 %v15189_v56, %v4681_v63 }
0x3576   :  { %v4712_v1 = vmul.f32 %v16898_v52, %v4705_v16 }
0x3578   :  { %v16981_v26 = vadd.f32 %v16913_v49, %v4712_v1 }
0x357a   :  { %13575 = vmatmul.mubr.msk.f32.gmra.mrb[82].mxu1 %vm228_vm5, %v16981_v26 }
0x357b   :  { %13595 = vmatprep.mubr.msk.f32.mxu1 %vm15313_vm0, %v15314_v10 }
0x357e   :  { %13596 = vmatmul.mubr.msk.f32.vlgmr.msra.gmra.mrb[84].mxu1 %vm324_vm6, %v6803_v47 }
0x357f   :  { %13616 = vmatprep.mubr.msk.f32.mxu1 %vm15313_vm0, %v15314_v10 }
0x35b2   :  { %v6706_v8 = vpop.f32.mrb[80].mxu0 }
0x35b3   :  { %v6710_v33 = vmul.f32 0.35355338, %v6706_v8  ;;  %v13583_v9 = vpop.f32.mrb[81].mxu0 }
0x35b5   :  { %v6711_v52 = vsel %vm410_vm9, %v6710_v33, -inf }
0x35b6   :  { %6712 = vmax.xlane.f32.xlu0 %v6711_v52 }
0x35cc   :  { %14827 = vrot.lane.b32.xlu0 %v16960_v3, %s17978_s11 }
0x3643   :  { %v6713_v60 = vpop.xlane.xlu0 %6712 }
0x3644   :  { %v6714_v2 = vsub.f32 %v6710_v33, %v6713_v60 }
0x3646   :  { %v6715_v55 = vmul.f32 1.442695, %v6714_v2 }
0x3647   :  { %v14828_v62 = vpop.permute.xlu0 %14827 }
0x3648   :  { %15190 = vpow2.f32 %v6715_v55  ;;  %v14830_v20 = vunpack.i.h.bf16 %v14828_v62  ;;  %v14829_v28 = vunpack.i.l.bf16 %v14828_v62 }
0x364a   :  { %v14375_v41 = vpack.c.bf16 %v14830_v20, %v14829_v28 }
0x364d   :  { %v6627_v49 = vpop.f32.mrb[82].mxu1 }
0x364e   :  { %v6628_v46 = vadd.f32 %v6627_v49, %v6540_v21  ;;  %v13576_v39 = vpop.f32.mrb[83].mxu1 }
0x3650   :  { %v16993_v50 = vrot.slane %v6628_v46, 2 }
0x3651   :  { %v6880_v42 = vpop.f32.mrb[84].mxu1 }
0x3652   :  { %v6884_v15 = vmul.f32 0.35355338, %v6880_v42  ;;  %v13597_v29 = vpop.f32.mrb[85].mxu1  ;;  %v16997_v43 = vsel %vm1164_vm12, %v7340_v59, %v16993_v50  ;;  %v15191_v61 = vpop.eup %15190 }
0x3653   :  { %v17001_v30 = vpack.i.bf16 %v16993_v50, %v16997_v43  ;;  %v14395_v18 = vpack.c.bf16 %v16993_v50, %v16997_v43  ;;  %v6717_v0 = vsel %vm410_vm9, %v15191_v61, 0.0 }
0x3654   :  { %v6885_v35 = vsel %vm410_vm9, %v6884_v15, -inf }
0x3655   :  { %6886 = vmax.xlane.f32.xlu1 %v6885_v35 }
0x3666   :  { %14822 = vrot.lane.b32.xlu1 %v16960_v3, %s17977_s29 }
0x368a   :  { %6718 = vadd.xlane.f32.xlu1 %v6717_v0 }
0x369b   :  { %14832 = vrot.lane.b32.xlu1 %v16960_v3, %s17983_s4 }
0x36e2   :  { %v6887_v34 = vpop.xlane.xlu1 %6886 }
0x36e3   :  { %v6888_v17 = vsub.f32 %v6884_v15, %v6887_v34 }
0x36e5   :  { %v6889_v44 = vmul.f32 1.442695, %v6888_v17 }
0x36e6   :  { %v14823_v63 = vpop.permute.xlu1 %14822 }
0x36e7   :  { %15192 = vpow2.f32 %v6889_v44  ;;  %v14825_v21 = vunpack.i.h.bf16 %v14823_v63  ;;  %v14824_v37 = vunpack.i.l.bf16 %v14823_v63 }
0x36e9   :  { %v14367_v4 = vpack.c.bf16 %v14825_v21, %v14824_v37 }
0x36eb   :  { %14369 = vmatpush3.bf16.msk.msra.mxu0 %vm15641_vm11, %v14367_v4 }
0x36ec   :  { %14374 = vmatprep.subr.bf16.mxu0 %v15312_v7 }
0x36f1   :  { %v15193_v57 = vpop.eup %15192 }
0x36f2   :  { %v6891_v6 = vsel %vm410_vm9, %v15193_v57, 0.0 }
0x36f3   :  { %6892 = vadd.xlane.f32.xlu1 %v6891_v6 }
0x3704   :  { %6976 = vrot.lane.b32.xlu1 %v16968_v54, %s17983_s4 }
0x3717   :  { %v6719_v24 = vpop.xlane.xlu1 %6718 }
0x3718   :  { %15194 = vrcp.f32 %v6719_v24 }
0x371b   :  { %v14833_v22 = vpop.permute.xlu1 %14832 }
0x371c   :  { %v14835_v16 = vunpack.i.h.bf16 %v14833_v22  ;;  %v14834_v1 = vunpack.i.l.bf16 %v14833_v22 }
0x371e   :  { %v14379_v33 = vpack.c.bf16 %v14835_v16, %v14834_v1 }
0x3722   :  { %v15195_v31 = vpop.eup %15194 }
0x3723   :  { %v6721_v11 = vmul.f32 %v15195_v31, %v15191_v61 }
0x3725   :  { %13589 = vmatmul.mubr.msk.f32.vlgmr.msra.gmra.mrb[82].mxu0 %vm410_vm9, %v6721_v11 }
0x3726   :  { %14377 = vmatpush3.bf16.msk.msra.mxu0 %vm15641_vm11, %v14375_v41  ;;  %13602 = vmatprep.mubr.msk.f32.mxu0 %vm15313_vm0, %v15314_v10 }
0x3727   :  { %14378 = vmatprep.subr.bf16.mxu0 %v15312_v7 }
0x3780   :  { %v6893_v56 = vpop.xlane.xlu1 %6892 }
0x3781   :  { %15196 = vrcp.f32 %v6893_v56 }
0x3784   :  { %v6977_v9 = vpop.permute.xlu1 %6976 }
0x378b   :  { %v15197_v47 = vpop.eup %15196 }
0x378c   :  { %v6895_v8 = vmul.f32 %v15197_v47, %v15193_v57 }
0x378e   :  { %13603 = vmatmul.mubr.msk.f32.vlgmr.msra.gmra.mrb[84].mxu0 %vm410_vm9, %v6895_v8 }
0x378f   :  { %14381 = vmatpush3.bf16.xpose.msk.msra.mxu0 %vm15620_vm7, %v14379_v33  ;;  %13609 = vmatprep.mubr.msk.f32.mxu0 %vm15313_vm0, %v15314_v10 }
0x3790   :  { %14390 = vmatprep.subr.bf16.mxu0 %v15312_v7 }
0x3796   :  { %13610 = vmatmul.mubr.msk.f32.vlgmr.msra.gmra.mrb[86].mxu0 %vm324_vm6, %v6977_v9 }
0x3797   :  { %13630 = vmatprep.mubr.msk.f32.mxu0 %vm15313_vm0, %v15314_v10 }
0x37f8   :  { %v17032_v52 = vpop.f32.mrb[82].mxu0 }
0x37f9   :  { %v13590_v49 = vpop.f32.mrb[83].mxu0 }
0x3861   :  { %v17034_v46 = vpop.f32.mrb[84].mxu0 }
0x3862   :  { %v13604_v39 = vpop.f32.mrb[85].mxu0 }
0x3869   :  { %v7054_v59 = vpop.f32.mrb[86].mxu0 }
0x386a   :  { %v7058_v42 = vmul.f32 0.35355338, %v7054_v59  ;;  %v13611_v15 = vpop.f32.mrb[87].mxu0 }
0x386c   :  { %v7059_v29 = vsel %vm410_vm9, %v7058_v42, -inf }
0x386d   :  { %7060 = vmax.xlane.f32.xlu1 %v7059_v29 }
0x387e   :  { %14837 = vrot.lane.b32.xlu1 %v16960_v3, %s17981_s8 }
0x3882   :  { %7150 = vrot.lane.b32.xlu1 %v16968_v54, %s17985_s0 }
0x38fa   :  { %v7061_v35 = vpop.xlane.xlu1 %7060 }
0x38fb   :  { %v7062_v60 = vsub.f32 %v7058_v42, %v7061_v35 }
0x38fd   :  { %v7063_v2 = vmul.f32 1.442695, %v7062_v60 }
0x38fe   :  { %v14838_v55 = vpop.permute.xlu1 %14837 }
0x38ff   :  { %15198 = vpow2.f32 %v7063_v2  ;;  %v14840_v61 = vunpack.i.h.bf16 %v14838_v55  ;;  %v14839_v0 = vunpack.i.l.bf16 %v14838_v55 }
0x3901   :  { %v14383_v34 = vpack.c.bf16 %v14840_v61, %v14839_v0 }
0x3902   :  { %v7151_v24 = vpop.permute.xlu1 %7150 }
0x3903   :  { %14385 = vmatpush3.bf16.msk.msra.mxu1 %vm15641_vm11, %v14383_v34 }
0x3904   :  { %14386 = vmatprep.subr.bf16.mxu1 %v15312_v7 }
0x3909   :  { %v15199_v17 = vpop.eup %15198 }
0x390a   :  { %v7065_v44 = vsel %vm410_vm9, %v15199_v17, 0.0 }
0x390b   :  { %7066 = vadd.xlane.f32.xlu0 %v7065_v44 }
0x3921   :  { %14842 = vrot.lane.b32.xlu0 %v16960_v3, %s17985_s0 }
0x3998   :  { %v7067_v54 = vpop.xlane.xlu0 %7066 }
0x3999   :  { %15200 = vrcp.f32 %v7067_v54 }
0x399c   :  { %v14843_v63 = vpop.permute.xlu0 %14842 }
0x399d   :  { %v14845_v21 = vunpack.i.h.bf16 %v14843_v63  ;;  %v14844_v37 = vunpack.i.l.bf16 %v14843_v63 }
0x399f   :  { %v14387_v6 = vpack.c.bf16 %v14845_v21, %v14844_v37 }
0x39a3   :  { %v15201_v4 = vpop.eup %15200 }
0x39a4   :  { %v7069_v57 = vmul.f32 %v15201_v4, %v15199_v17 }
0x39a6   :  { %13617 = vmatmul.mubr.msk.f32.vlgmr.msra.gmra.mrb[86].mxu1 %vm410_vm9, %v7069_v57 }
0x39a7   :  { %14389 = vmatpush3.bf16.xpose.msk.msra.mxu1 %vm15620_vm7, %v14387_v6  ;;  %13623 = vmatprep.mubr.msk.f32.mxu1 %vm15313_vm0, %v15314_v10 }
0x39a8   :  { %14398 = vmatprep.subr.bf16.mxu1 %v15312_v7 }
0x39ae   :  { %13624 = vmatmul.mubr.msk.f32.vlgmr.msra.gmra.mrb[88].mxu1 %vm324_vm6, %v7151_v24 }
0x39af   :  { %13644 = vmatprep.mubr.msk.f32.mxu1 %vm15313_vm0, %v15314_v10 }
0x3a79   :  { %v17056_v62 = vpop.f32.mrb[86].mxu1 }
0x3a7a   :  { %v13618_v20 = vpop.f32.mrb[87].mxu1 }
0x3a81   :  { %v7228_v28 = vpop.f32.mrb[88].mxu1 }
0x3a82   :  { %v7232_v31 = vmul.f32 0.35355338, %v7228_v28  ;;  %v13625_v11 = vpop.f32.mrb[89].mxu1 }
0x3a84   :  { %v7233_v41 = vsel %vm410_vm9, %v7232_v31, -inf }
0x3a85   :  { %7234 = vmax.xlane.f32.xlu1 %v7233_v41 }
0x3b12   :  { %v7235_v22 = vpop.xlane.xlu1 %7234 }
0x3b13   :  { %v7236_v56 = vsub.f32 %v7232_v31, %v7235_v22 }
0x3b15   :  { %v7237_v16 = vmul.f32 1.442695, %v7236_v56 }
0x3b17   :  { %15202 = vpow2.f32 %v7237_v16 }
0x3b21   :  { %v15203_v1 = vpop.eup %15202 }
0x3b22   :  { %v7239_v47 = vsel %vm410_vm9, %v15203_v1, 0.0 }
0x3b23   :  { %7240 = vadd.xlane.f32.xlu0 %v7239_v47 }
0x3b39   :  { %14847 = vrot.lane.b32.xlu0 %v16960_v3, %s17984_s10  ;;  %v17078_v3 = vadd.f32 %v16950_v58, %v16955_v48 }
0x3b3d   :  { %14857 = vrot.lane.b32.xlu0 %v17001_v30, %s17979_s5 }
0x3bb0   :  { %v7241_v8 = vpop.xlane.xlu0 %7240 }
0x3bb1   :  { %15204 = vrcp.f32 %v7241_v8 }
0x3bb4   :  { %v14848_v33 = vpop.permute.xlu0 %14847 }
0x3bb5   :  { %v14850_v9 = vunpack.i.h.bf16 %v14848_v33  ;;  %v14849_v49 = vunpack.i.l.bf16 %v14848_v33 }
0x3bb7   :  { %v14391_v39 = vpack.c.bf16 %v14850_v9, %v14849_v49 }
0x3bb8   :  { %v14858_v63 = vpop.permute.xlu0 %14857 }
0x3bb9   :  { %14393 = vmatpush3.bf16.msk.msra.mxu0 %vm15641_vm11, %v14391_v39  ;;  %v14860_v21 = vunpack.i.h.bf16 %v14858_v63  ;;  %v14859_v37 = vunpack.i.l.bf16 %v14858_v63 }
0x3bba   :  { %14394 = vmatprep.subr.bf16.mxu0 %v15312_v7 }
0x3bbb   :  { %v15205_v59 = vpop.eup %15204  ;;  %v14403_v6 = vpack.c.bf16 %v14860_v21, %v14859_v37 }
0x3bbc   :  { %v7243_v42 = vmul.f32 %v15205_v59, %v15203_v1 }
0x3bbe   :  { %13631 = vmatmul.mubr.msk.f32.vlgmr.msra.gmra.mrb[88].mxu0 %vm410_vm9, %v7243_v42 }
0x3bbf   :  { %13637 = vmatprep.mubr.msk.f32.mxu0 %vm15313_vm0, %v15314_v10 }
0x3bc2   :  { %14397 = vmatpush3.bf16.xpose.msk.msra.mxu0 %vm15620_vm7, %v14395_v18 }
0x3bc3   :  { %14406 = vmatprep.subr.bf16.mxu0 %v15312_v7 }
0x3bc9   :  { %13638 = vmatmul.mubr.msk.f32.vlgmr.msra.gmra.mrb[90].mxu0 %vm324_vm6, %v17078_v3 }
0x3bca   :  { %13658 = vmatprep.mubr.msk.f32.mxu0 %vm15313_vm0, %v15314_v10 }
0x3c91   :  { %v17084_v15 = vpop.f32.mrb[88].mxu0 }
0x3c92   :  { %v13632_v29 = vpop.f32.mrb[89].mxu0 }
0x3c9c   :  { %v7416_v35 = vpop.f32.mrb[90].mxu0 }
0x3c9d   :  { %v7420_v50 = vmul.f32 0.35355338, %v7416_v35  ;;  %v13639_v43 = vpop.f32.mrb[91].mxu0 }
0x3c9f   :  { %v7421_v18 = vsel %vm410_vm9, %v7420_v50, -inf }
0x3ca0   :  { %7422 = vmax.xlane.f32.xlu1 %v7421_v18 }
0x3cb1   :  { %14852 = vrot.lane.b32.xlu1 %v17001_v30, %s17977_s29 }
0x3d2d   :  { %v7423_v58 = vpop.xlane.xlu1 %7422 }
0x3d2e   :  { %v7424_v60 = vsub.f32 %v7420_v50, %v7423_v58 }
0x3d30   :  { %v7425_v2 = vmul.f32 1.442695, %v7424_v60 }
0x3d31   :  { %v14853_v55 = vpop.permute.xlu1 %14852 }
0x3d32   :  { %15206 = vpow2.f32 %v7425_v2  ;;  %v14855_v61 = vunpack.i.h.bf16 %v14853_v55  ;;  %v14854_v0 = vunpack.i.l.bf16 %v14853_v55 }
0x3d34   :  { %v14399_v34 = vpack.c.bf16 %v14855_v61, %v14854_v0 }
0x3d36   :  { %14401 = vmatpush3.bf16.msk.msra.mxu1 %vm15641_vm11, %v14399_v34 }
0x3d37   :  { %14402 = vmatprep.subr.bf16.mxu1 %v15312_v7 }
0x3d3c   :  { %v15207_v17 = vpop.eup %15206 }
0x3d3d   :  { %v7427_v44 = vsel %vm410_vm9, %v15207_v17, 0.0 }
0x3d3e   :  { %7428 = vadd.xlane.f32.xlu1 %v7427_v44 }
0x3d4f   :  { %7512 = vrot.lane.b32.xlu1 %v17078_v3, %s17979_s5 }
0x3dcb   :  { %v7429_v54 = vpop.xlane.xlu1 %7428 }
0x3dcc   :  { %15208 = vrcp.f32 %v7429_v54 }
0x3dcf   :  { %v7513_v24 = vpop.permute.xlu1 %7512 }
0x3dd6   :  { %v15209_v4 = vpop.eup %15208 }
0x3dd7   :  { %v7431_v57 = vmul.f32 %v15209_v4, %v15207_v17 }
0x3dd9   :  { %13645 = vmatmul.mubr.msk.f32.vlgmr.msra.gmra.mrb[90].mxu1 %vm410_vm9, %v7431_v57 }
0x3dda   :  { %14405 = vmatpush3.bf16.xpose.msk.msra.mxu1 %vm15620_vm7, %v14403_v6  ;;  %13651 = vmatprep.mubr.msk.f32.mxu1 %vm15313_vm0, %v15314_v10 }
0x3ddb   :  { %14414 = vmatprep.subr.bf16.mxu1 %v15312_v7 }
0x3de1   :  { %13652 = vmatmul.mubr.msk.f32.vlgmr.msra.gmra.mrb[92].mxu1 %vm324_vm6, %v7513_v24 }
0x3de2   :  { %13672 = vmatprep.mubr.msk.f32.mxu1 %vm15313_vm0, %v15314_v10 }
0x3eac   :  { %v17104_v20 = vpop.f32.mrb[90].mxu1 }
0x3ead   :  { %v13646_v28 = vpop.f32.mrb[91].mxu1 }
0x3eb4   :  { %v7590_v31 = vpop.f32.mrb[92].mxu1 }
0x3eb5   :  { %v7594_v11 = vmul.f32 0.35355338, %v7590_v31  ;;  %v13653_v41 = vpop.f32.mrb[93].mxu1 }
0x3eb7   :  { %v7595_v22 = vsel %vm410_vm9, %v7594_v11, -inf }
0x3eb8   :  { %7596 = vmax.xlane.f32.xlu0 %v7595_v22 }
0x3ece   :  { %14862 = vrot.lane.b32.xlu0 %v17001_v30, %s17978_s11 }
0x3ed2   :  { %7686 = vrot.lane.b32.xlu0 %v17078_v3, %s17983_s4 }
0x3f45   :  { %v7597_v56 = vpop.xlane.xlu0 %7596 }
0x3f46   :  { %v7598_v16 = vsub.f32 %v7594_v11, %v7597_v56 }
0x3f48   :  { %v7599_v1 = vmul.f32 1.442695, %v7598_v16 }
0x3f49   :  { %v14863_v47 = vpop.permute.xlu0 %14862 }
0x3f4a   :  { %15210 = vpow2.f32 %v7599_v1  ;;  %v14865_v8 = vunpack.i.h.bf16 %v14863_v47  ;;  %v14864_v33 = vunpack.i.l.bf16 %v14863_v47 }
0x3f4c   :  { %v14407_v9 = vpack.c.bf16 %v14865_v8, %v14864_v33 }
0x3f4d   :  { %v7687_v58 = vpop.permute.xlu0 %7686 }
0x3f4e   :  { %14409 = vmatpush3.bf16.msk.msra.mxu0 %vm15641_vm11, %v14407_v9 }
0x3f4f   :  { %14410 = vmatprep.subr.bf16.mxu0 %v15312_v7 }
0x3f54   :  { %v15211_v49 = vpop.eup %15210 }
0x3f55   :  { %v7601_v39 = vsel %vm410_vm9, %v15211_v49, 0.0 }
0x3f56   :  { %7602 = vadd.xlane.f32.xlu1 %v7601_v39 }
0x3f67   :  { %14867 = vrot.lane.b32.xlu1 %v17001_v30, %s17983_s4 }
0x3fe3   :  { %v7603_v59 = vpop.xlane.xlu1 %7602 }
0x3fe4   :  { %15212 = vrcp.f32 %v7603_v59 }
0x3fe7   :  { %v14868_v42 = vpop.permute.xlu1 %14867 }
0x3fe8   :  { %v14870_v29 = vunpack.i.h.bf16 %v14868_v42  ;;  %v14869_v35 = vunpack.i.l.bf16 %v14868_v42 }
0x3fea   :  { %v14411_v18 = vpack.c.bf16 %v14870_v29, %v14869_v35 }
0x3fee   :  { %v15213_v50 = vpop.eup %15212 }
0x3fef   :  { %v7605_v43 = vmul.f32 %v15213_v50, %v15211_v49 }
0x3ff1   :  { %13659 = vmatmul.mubr.msk.f32.vlgmr.msra.gmra.mrb[92].mxu0 %vm410_vm9, %v7605_v43 }
0x3ff2   :  { %14413 = vmatpush3.bf16.xpose.msk.msra.mxu0 %vm15620_vm7, %v14411_v18  ;;  %13665 = vmatprep.mubr.msk.f32.mxu0 %vm15313_vm0, %v15314_v10 }
0x3ff3   :  { %14422 = vmatprep.subr.bf16.mxu0 %v15312_v7 }
0x3ff9   :  { %13666 = vmatmul.mubr.msk.f32.vlgmr.msra.gmra.mrb[94].mxu0 %vm324_vm6, %v7687_v58 }
0x3ffa   :  { %13686 = vmatprep.mubr.msk.f32.mxu0 %vm15313_vm0, %v15314_v10 }
0x40c4   :  { %v7682_v60 = vpop.f32.mrb[92].mxu0 }
0x40c5   :  { %v13660_v2 = vpop.f32.mrb[93].mxu0 }
0x40cc   :  { %v7764_v55 = vpop.f32.mrb[94].mxu0 }
0x40cd   :  { %v7768_v61 = vmul.f32 0.35355338, %v7764_v55  ;;  %v13667_v0 = vpop.f32.mrb[95].mxu0 }
0x40cf   :  { %v7769_v34 = vsel %vm410_vm9, %v7768_v61, -inf }
0x40d0   :  { %7770 = vmax.xlane.f32.xlu1 %v7769_v34 }
0x40e1   :  { %14877 = vrot.lane.b32.xlu1 %v17001_v30, %s17985_s0 }
0x40e5   :  { %7860 = vrot.lane.b32.xlu1 %v17078_v3, %s17985_s0 }
0x415d   :  { %v7771_v17 = vpop.xlane.xlu1 %7770 }
0x415e   :  { %v7772_v44 = vsub.f32 %v7768_v61, %v7771_v17 }
0x4160   :  { %v7773_v54 = vmul.f32 1.442695, %v7772_v44 }
0x4161   :  { %v14878_v28 = vpop.permute.xlu1 %14877 }
0x4162   :  { %15214 = vpow2.f32 %v7773_v54  ;;  %v14880_v31 = vunpack.i.h.bf16 %v14878_v28  ;;  %v14879_v11 = vunpack.i.l.bf16 %v14878_v28 }
0x4164   :  { %v14419_v22 = vpack.c.bf16 %v14880_v31, %v14879_v11 }
0x4165   :  { %v7861_v56 = vpop.permute.xlu1 %7860 }
0x416c   :  { %v15215_v63 = vpop.eup %15214 }
0x416d   :  { %v7775_v21 = vsel %vm410_vm9, %v15215_v63, 0.0 }
0x416e   :  { %7776 = vadd.xlane.f32.xlu0 %v7775_v21 }
0x4184   :  { %14872 = vrot.lane.b32.xlu0 %v17001_v30, %s17981_s8 }
0x41fb   :  { %v7777_v37 = vpop.xlane.xlu0 %7776 }
0x41fc   :  { %15216 = vrcp.f32 %v7777_v37 }
0x41ff   :  { %v14873_v4 = vpop.permute.xlu0 %14872 }
0x4200   :  { %v14875_v57 = vunpack.i.h.bf16 %v14873_v4  ;;  %v14874_v6 = vunpack.i.l.bf16 %v14873_v4 }
0x4202   :  { %v14415_v24 = vpack.c.bf16 %v14875_v57, %v14874_v6 }
0x4204   :  { %14417 = vmatpush3.bf16.msk.msra.mxu1 %vm15641_vm11, %v14415_v24 }
0x4205   :  { %14418 = vmatprep.subr.bf16.mxu1 %v15312_v7 }
0x4206   :  { %v15217_v3 = vpop.eup %15216 }
0x4207   :  { %v7779_v41 = vmul.f32 %v15217_v3, %v15215_v63 }
0x4209   :  { %13673 = vmatmul.mubr.msk.f32.vlgmr.msra.gmra.mrb[94].mxu1 %vm410_vm9, %v7779_v41 }
0x420a   :  { %13679 = vmatprep.mubr.msk.f32.mxu1 %vm15313_vm0, %v15314_v10 }
0x420d   :  { %14421 = vmatpush3.bf16.xpose.msk.msra.mxu1 %vm15620_vm7, %v14419_v22 }
0x4214   :  { %13680 = vmatmul.mubr.msk.f32.vlgmr.msra.gmra.mrb[96].mxu1 %vm324_vm6, %v7861_v56 }
0x42dc   :  { %v7856_v16 = vpop.f32.mrb[94].mxu1 }
0x42dd   :  { %v13674_v1 = vpop.f32.mrb[95].mxu1 }
0x42e7   :  { %v7938_v47 = vpop.f32.mrb[96].mxu1 }
0x42e8   :  { %v7942_v8 = vmul.f32 0.35355338, %v7938_v47  ;;  %v13681_v33 = vpop.f32.mrb[97].mxu1 }
0x42ea   :  { %v7943_v9 = vsel %vm410_vm9, %v7942_v8, -inf }
0x42eb   :  { %7944 = vmax.xlane.f32.xlu0 %v7943_v9 }
0x4301   :  { %14882 = vrot.lane.b32.xlu0 %v17001_v30, %s17984_s10 }
0x4305   :  { %14892 = vrot.lane.b32.xlu0 %v16880_v27, %s17988_s22 }
0x4309   :  { %7329 = vrot.lane.b32.xlu0 %v17056_v62, %s17989_s23 }
0x430d   :  { %7333 = vrot.lane.b32.xlu0 %v17084_v15, %s17992_s12 }
0x4378   :  { %v7945_v49 = vpop.xlane.xlu0 %7944 }
0x4379   :  { %v7946_v39 = vsub.f32 %v7942_v8, %v7945_v49 }
0x437b   :  { %v7947_v59 = vmul.f32 1.442695, %v7946_v39 }
0x437c   :  { %v14883_v42 = vpop.permute.xlu0 %14882 }
0x437d   :  { %15218 = vpow2.f32 %v7947_v59  ;;  %v14885_v29 = vunpack.i.h.bf16 %v14883_v42  ;;  %v14884_v35 = vunpack.i.l.bf16 %v14883_v42 }
0x437f   :  { %v14423_v50 = vpack.c.bf16 %v14885_v29, %v14884_v35  ;;  %v8186_v29 = vld [vmem:[%s17998_s27 + $0x8] sm:$0xff] }
0x4380   :  { %v14893_v15 = vpop.permute.xlu0 %14892 }
0x4381   :  { %14425 = vmatpush3.bf16.msk.msra.mxu0 %vm15641_vm11, %v14423_v50  ;;  %v14894_v0 = vunpack.i.l.bf16 %v14893_v15  ;;  %v8187_v50 = vld [vmem:[%s17998_s27 + $0x10] sm:$0xff] }
0x4384   :  { %v7330_v18 = vpop.permute.xlu0 %7329 }
0x4387   :  { %v15219_v30 = vpop.eup %15218 }
0x4388   :  { %v7949_v27 = vsel %vm410_vm9, %v15219_v30, 0.0  ;;  %v7334_v61 = vpop.permute.xlu0 %7333 }
0x4389   :  { %7950 = vadd.xlane.f32.xlu1 %v7949_v27 }
0x439a   :  { %14887 = vrot.lane.b32.xlu1 %v16878_v45, %s17988_s22 }
0x439e   :  { %7325 = vrot.lane.b32.xlu1 %v17034_v46, %s17990_s20 }
0x43a2   :  { %8035 = vrot.lane.b32.xlu1 %v7682_v60, %s17990_s20 }
0x43a6   :  { %8039 = vrot.lane.b32.xlu1 %v7856_v16, %s17989_s23 }
0x43aa   :  { %8061 = vrot.lane.b32.xlu1 %v16955_v48, %s17988_s22  ;;  %v14895_v48 = vunpack.i.h.bf16 %v14893_v15  ;;  %v8191_v15 = vld [vmem:[%s17999_s28 + $0x8] sm:$0xff] }
0x43ac   :  { %v14430_v54 = vpack.c.bf16 %v14895_v48, %v14894_v0 }
0x4416   :  { %v7951_v62 = vpop.xlane.xlu1 %7950 }
0x4417   :  { %15220 = vrcp.f32 %v7951_v62  ;;  %v8190_v62 = vld [vmem:[%s17999_s28] sm:$0xff] }
0x441a   :  { %v14888_v43 = vpop.permute.xlu1 %14887 }
0x441b   :  { %v14890_v34 = vunpack.i.h.bf16 %v14888_v43  ;;  %v14889_v17 = vunpack.i.l.bf16 %v14888_v43  ;;  %v8192_v43 = vld [vmem:[%s17999_s28 + $0x10] sm:$0xff] }
0x441d   :  { %v14426_v44 = vpack.c.bf16 %v14890_v34, %v14889_v17 }
0x441e   :  { %v7326_v58 = vpop.permute.xlu1 %7325 }
0x441f   :  { %v7336_v2 = vsel %vm324_vm6, %v17032_v52, %v7326_v58  ;;  %14427 = vmatprep.subr.bf16.mxu0 %v14426_v44  ;;  %v8193_v58 = vld [vmem:[%s17999_s28 + $0x18] sm:$0xff] }
0x4420   :  { %v7337_v55 = vsel %vm1157_vm14, %v7336_v2, %v7330_v18  ;;  %v14442_v18 = vpack.c.bf16 %v8191_v15, %v8190_v62  ;;  %v14446_v2 = vpack.c.bf16 %v8193_v58, %v8192_v43  ;;  %v17246_v58 = vld [vmem:[%s17875_s13 + $0x28] sm:$0xff] }
0x4421   :  { %v15221_v45 = vpop.eup %15220  ;;  %v7338_v60 = vsel %vm1160_vm13, %v7337_v55, %v7334_v61  ;;  %v8195_v55 = vld [vmem:[%s17999_s28 + $0x28] sm:$0xff] }
0x4422   :  { %v7953_v46 = vmul.f32 %v15221_v45, %v15219_v30  ;;  %v8036_v21 = vpop.permute.xlu1 %8035  ;;  %v8188_v30 = vld [vmem:[%s17998_s27 + $0x18] sm:$0xff]  ;;  %v8194_v45 = vld [vmem:[%s17999_s28 + $0x20] sm:$0xff] }
0x4423   :  { %v8046_v4 = vsel %vm324_vm6, %v17104_v20, %v8036_v21  ;;  %v14438_v27 = vpack.c.bf16 %v8188_v30, %v8187_v50 }
0x4424   :  { %13687 = vmatmul.mubr.msk.f32.vlgmr.msra.gmra.mrb[96].mxu0 %vm410_vm9, %v7953_v46  ;;  %v14450_v46 = vpack.c.bf16 %v8195_v55, %v8194_v45  ;;  %v17255_v55 = vld [vmem:[%s17875_s13 + $0x30] sm:$0xff] }
0x4425   :  { %13697 = vmatprep.mubr.msk.f32.mxu0 %vm228_vm5, %v7338_v60  ;;  %14429 = vmatpush3.bf16.msra.mxu0 %v14426_v44  ;;  %v8176_v44 = vrot.slane %v16903_v23, %v16061_v38 }
0x4426   :  { %14431 = vmatprep.subr.bf16.mxu0 %v14430_v54  ;;  %v8040_v37 = vpop.permute.xlu1 %8039 }
0x4427   :  { %v8047_v57 = vsel %vm1157_vm14, %v8046_v4, %v8040_v37 }
0x4429   :  { %14433 = vmatpush3.bf16.msra.mxu0 %v14430_v54 }
0x442a   :  { %v8062_v28 = vpop.permute.xlu1 %8061  ;;  %14443 = vmatprep.subr.bf16.mxu0 %v14442_v18 }
0x44f7   :  { %v8030_v52 = vpop.f32.mrb[96].mxu0 }
0x44f8   :  { %8043 = vrot.lane.b32.xlu0 %v8030_v52, %s17992_s12  ;;  %v13688_v63 = vpop.f32.mrb[97].mxu0 }
0x44f9   :  { %v8182_v63 = vrot.slane %v16903_v23, %v16064_v14  ;;  %v12386_v23 = vld [vmem:[%s18000_s16] ss:$0 sm:$0xff] }
0x456a   :  { %v8044_v6 = vpop.permute.xlu0 %8043 }
0x456b   :  { %v8048_v24 = vsel %vm1160_vm13, %v8047_v57, %v8044_v6 }
0x456c   :  { %13698 = vmatmul.mubr.msk.f32.vlgmr.msra.gmra.mrb[98].mxu0 %vm228_vm5, %v8048_v24 }
0x456d   :  { %14445 = vmatpush3.bf16.msra.mxu0 %v14442_v18  ;;  %v17241_v18 = vld [vmem:[%s17875_s13 + $0x20] sm:$0xff] }
0x456e   :  { %14447 = vmatprep.subr.bf16.mxu0 %v14446_v2  ;;  %v14896_v45 = vpack.i.bf16 %v17246_v58, %v17241_v18 }
0x4571   :  { %14449 = vmatpush3.bf16.msra.mxu0 %v14446_v2  ;;  %v14458_v2 = vpack.c.bf16 %v17246_v58, %v17241_v18 }
0x4572   :  { %14451 = vmatprep.subr.bf16.mxu0 %v14450_v46 }
0x4575   :  { %14453 = vmatpush3.bf16.msra.mxu0 %v14450_v46  ;;  %v17260_v46 = vld [vmem:[%s17875_s13 + $0x38] sm:$0xff] }
0x463f   :  { %v13699_v3 = vpop.f32.mrb[98].mxu0 }
0x4640   :  { %v8142_v31 = vadd.f32 %v13699_v3, %v8062_v28  ;;  %v8136_v11 = vpop.f32.mrb[99].mxu0  ;;  %v8197_v3 = vld [vmem:[%s17999_s28 + $0x38] sm:$0xff] }
0x4641   :  { %v8137_v41 = vadd.f32 %v8136_v11, %v8062_v28  ;;  %v8196_v28 = vld [vmem:[%s17999_s28 + $0x30] sm:$0xff] }
0x4642   :  { %v8146_v22 = vadd.f32 %v8142_v31, %v16935_v19  ;;  %v14454_v31 = vpack.c.bf16 %v8197_v3, %v8196_v28 }
0x4643   :  { %v8145_v56 = vadd.f32 %v8137_v41, %v16926_v13  ;;  %v8185_v13 = vld [vmem:[%s17998_s27] sm:$0xff] }
0x4644   :  { %v8150_v16 = vsel %vm228_vm5, %v8146_v22, 0.0  ;;  %v14434_v35 = vpack.c.bf16 %v8186_v29, %v8185_v13  ;;  %14455 = vmatprep.subr.bf16.mxu0 %v14454_v31 }
0x4645   :  { %8151 = vadd.xlane.f32.xlu1 %v8150_v16  ;;  %v8147_v20 = vsel %vm228_vm5, %v8145_v56, 0.0  ;;  %14457 = vmatpush3.bf16.msra.mxu0 %v14454_v31 }
0x4646   :  { %8148 = vadd.xlane.f32.xlu0 %v8147_v20  ;;  %14435 = vmatprep.subr.bf16.mxu1 %v14434_v35 }
0x4647   :  { %14437 = vmatpush3.bf16.msra.mxu1 %v14434_v35  ;;  %13751 = vmatprep.subr.mxu0 %v15314_v10 }
0x4648   :  { %14439 = vmatprep.subr.bf16.mxu1 %v14438_v27 }
0x464b   :  { %14441 = vmatpush3.bf16.msra.mxu1 %v14438_v27 }
0x464c   :  { %14459 = vmatprep.subr.bf16.mxu1 %v14458_v2 }
0x46d2   :  { %v8152_v1 = vpop.xlane.xlu1 %8151 }
0x46d3   :  { %v8154_v47 = vmul.f32 0.03125, %v8152_v1  ;;  %v8149_v8 = vpop.xlane.xlu0 %8148  ;;  %v12389_v1 = vld [vmem:[%s18001_s19] ss:$0 sm:$0xff] }
0x46d4   :  { %v8153_v33 = vmul.f32 0.03125, %v8149_v8 }
0x46d5   :  { %v8156_v9 = vsub.f32 %v8146_v22, %v8154_v47 }
0x46d6   :  { %v8155_v49 = vsub.f32 %v8145_v56, %v8153_v33 }
0x46d7   :  { %v8158_v42 = vmul.f32 %v8156_v9, %v8156_v9 }
0x46d8   :  { %v8157_v39 = vmul.f32 %v8155_v49, %v8155_v49 }
0x46d9   :  { %v8162_v19 = vsel %vm228_vm5, %v8158_v42, 0.0 }
0x46da   :  { %v8159_v59 = vsel %vm228_vm5, %v8157_v39, 0.0 }
0x46db   :  { %8160 = vadd.xlane.f32.xlu0 %v8159_v59 }
0x46df   :  { %8163 = vadd.xlane.f32.xlu0 %v8162_v19 }
0x4768   :  { %v8161_v61 = vpop.xlane.xlu0 %8160 }
0x4769   :  { %v8165_v60 = vmul.f32 0.03125, %v8161_v61  ;;  %v14901_v61 = vpack.i.bf16 %v17260_v46, %v17255_v55 }
0x476b   :  { %v8167_v48 = vadd.f32 1e-05, %v8165_v60  ;;  %v14462_v60 = vpack.c.bf16 %v17260_v46, %v17255_v55 }
0x476c   :  { %v8164_v0 = vpop.xlane.xlu0 %8163 }
0x476d   :  { %15222 = vrsqrt.f32 %v8167_v48  ;;  %v8166_v34 = vmul.f32 0.03125, %v8164_v0 }
0x476f   :  { %v8168_v17 = vadd.f32 1e-05, %v8166_v34 }
0x4771   :  { %15224 = vrsqrt.f32 %v8168_v17 }
0x4777   :  { %v15223_v54 = vpop.eup %15222 }
0x4778   :  { %v8171_v52 = vmul.f32 %v15223_v54, %v8155_v49 }
0x477a   :  { %v8177_v21 = vmul.f32 %v8176_v44, %v8171_v52  ;;  %v8405_v52 = vsub.s32 4, %v15937_v5 }
0x477b   :  { %v15225_v37 = vpop.eup %15224 }
0x477c   :  { %v8172_v4 = vmul.f32 %v15225_v37, %v8156_v9  ;;  %v8183_v57 = vadd.f32 %v8182_v63, %v8177_v21  ;;  %v15310_v21 = vld [vmem:[%s17996_s15] sm:$0x3f] }
0x477d   :  { %v8406_v37 = vrot.slane %v15310_v21, %v8405_v52 }
0x477e   :  { %v8178_v6 = vmul.f32 %v8176_v44, %v8172_v4  ;;  %13708 = vmatprep.mubr.msk.f32.mxu1 %vm228_vm5, %v8183_v57 }
0x4780   :  { %v8184_v24 = vadd.f32 %v8182_v63, %v8178_v6  ;;  %v8411_v63 = vsub.s32 5, %v15937_v5 }
0x4782   :  { %13709 = vmatmul.mubr.msk.f32.vlgmr.msra.gmra.mrb[98].mxu1 %vm228_vm5, %v8184_v24  ;;  %v8412_v28 = vrot.slane %v15310_v21, %v8411_v63 }
0x4783   :  { %14461 = vmatpush3.bf16.msra.mxu1 %v14458_v2 }
0x4784   :  { %14463 = vmatprep.subr.bf16.mxu1 %v14462_v60 }
0x4787   :  { %14465 = vmatpush3.bf16.msra.mxu1 %v14462_v60 }
0x4788   :  { %13741 = vmatprep.subr.mxu1 %v15314_v10 }
0x4855   :  { %v13710_v11 = vpop.f32.mrb[98].mxu1 }
0x4856   :  { %v8283_v41 = vadd.f32 %v13710_v11, %v12386_v23  ;;  %v8277_v22 = vpop.f32.mrb[99].mxu1 }
0x4857   :  { %v8278_v56 = vadd.f32 %v12386_v23, %v8277_v22 }
0x4858   :  { %v8287_v20 = vmax.f32 %v8283_v41, 0.0  ;;  %v17289_v41 = vld [vmem:[%s17876_s14 + $0x1] ss:$0 sm:$0xff] }
0x4859   :  { %v8286_v16 = vmax.f32 %v8278_v56, 0.0 }
0x485b   :  { %13727 = vmatprep.mubr.msk.f32.mxu0 %vm2296_vm1, %v8286_v16 }
0x485c   :  { %13728 = vmatmul.mubr.msk.f32.vlgmr.msra.gmra.mrb[100].mxu0 %vm2296_vm1, %v8287_v20 }
0x485d   :  { %13753 = vmatprep.mubr.msk.f32.mxu0 %vm15313_vm0, %v15314_v10 }
0x492f   :  { %v13729_v47 = vpop.f32.mrb[100].mxu0 }
0x4930   :  { %v8372_v8 = vadd.f32 %v13729_v47, %v12389_v1  ;;  %v8366_v33 = vpop.f32.mrb[101].mxu0 }
0x4931   :  { %v8367_v9 = vadd.f32 %v12389_v1, %v8366_v33 }
0x4932   :  { %v8376_v49 = vadd.f32 %v8372_v8, %v8184_v24 }
0x4933   :  { %v8375_v39 = vadd.f32 %v8367_v9, %v8183_v57 }
0x4934   :  { %v8380_v59 = vsel %vm228_vm5, %v8376_v49, 0.0 }
0x4935   :  { %8381 = vadd.xlane.f32.xlu1 %v8380_v59  ;;  %v8377_v42 = vsel %vm228_vm5, %v8375_v39, 0.0 }
0x4936   :  { %8378 = vadd.xlane.f32.xlu0 %v8377_v42 }
0x49c2   :  { %v8382_v19 = vpop.xlane.xlu1 %8381 }
0x49c3   :  { %v8384_v13 = vmul.f32 0.03125, %v8382_v19  ;;  %v8379_v29 = vpop.xlane.xlu0 %8378 }
0x49c4   :  { %v8383_v35 = vmul.f32 0.03125, %v8379_v29 }
0x49c5   :  { %v8386_v50 = vsub.f32 %v8376_v49, %v8384_v13 }
0x49c6   :  { %v8385_v30 = vsub.f32 %v8375_v39, %v8383_v35 }
0x49c7   :  { %v8388_v27 = vmul.f32 %v8386_v50, %v8386_v50 }
0x49c8   :  { %v8387_v62 = vmul.f32 %v8385_v30, %v8385_v30 }
0x49c9   :  { %v8392_v15 = vsel %vm228_vm5, %v8388_v27, 0.0 }
0x49ca   :  { %8393 = vadd.xlane.f32.xlu1 %v8392_v15  ;;  %v8389_v43 = vsel %vm228_vm5, %v8387_v62, 0.0 }
0x49cb   :  { %8390 = vadd.xlane.f32.xlu0 %v8389_v43 }
0x4a57   :  { %v8394_v48 = vpop.xlane.xlu1 %8393 }
0x4a58   :  { %v8396_v0 = vmul.f32 0.03125, %v8394_v48  ;;  %v8391_v34 = vpop.xlane.xlu0 %8390 }
0x4a59   :  { %v8395_v17 = vmul.f32 0.03125, %v8391_v34 }
0x4a5a   :  { %v8398_v44 = vadd.f32 1e-05, %v8396_v0 }
0x4a5b   :  { %v8397_v54 = vadd.f32 1e-05, %v8395_v17 }
0x4a5c   :  { %15226 = vrsqrt.f32 %v8398_v44 }
0x4a5d   :  { %15228 = vrsqrt.f32 %v8397_v54 }
0x4a66   :  { %v15227_v4 = vpop.eup %15226 }
0x4a67   :  { %v15229_v57 = vpop.eup %15228  ;;  %v8402_v6 = vmul.f32 %v15227_v4, %v8386_v50 }
0x4a68   :  { %v8401_v24 = vmul.f32 %v15229_v57, %v8385_v30 }
0x4a69   :  { %v8408_v3 = vmul.f32 %v8406_v37, %v8402_v6 }
0x4a6a   :  { %v8407_v31 = vmul.f32 %v8406_v37, %v8401_v24 }
0x4a6b   :  { %v17278_v11 = vadd.f32 %v8412_v28, %v8408_v3 }
0x4a6c   :  { %v17276_v23 = vadd.f32 %v8412_v28, %v8407_v31 }
0x4a6e   :  { %13738 = vmatprep.mubr.msk.f32.mxu1 %vm228_vm5, %v17276_v23 }
0x4a6f   :  { %13739 = vmatmul.mubr.msk.f32.vlgmr.msra.gmra.mrb[100].mxu1 %vm228_vm5, %v17278_v11 }
0x4a70   :  { %13743 = vmatprep.mubr.msk.f32.mxu1 %vm15313_vm0, %v15314_v10 }
0x4b42   :  { %v13740_v22 = vpop.f32.mrb[100].mxu1 }
0x4b43   :  { %v8502_v56 = vpop.f32.mrb[101].mxu1  ;;  %v17307_v20 = vadd.f32 %v13740_v22, %v17289_v41 }
0x4b44   :  { %v17292_v16 = vadd.f32 %v17289_v41, %v8502_v56 }
0x4b46   :  { %8679 = vrot.lane.b32.xlu1 %v17292_v16, %s17978_s11  ;;  %8512 = vrot.lane.b32.xlu0 %v17292_v16, %s17977_s29 }
0x4b4a   :  { %8677 = vrot.lane.b32.xlu1 %v17292_v16, %s17979_s5  ;;  %8844 = vrot.lane.b32.xlu0 %v17292_v16, %s17983_s4 }
0x4b4e   :  { %8846 = vrot.lane.b32.xlu1 %v17292_v16, %s17981_s8  ;;  %9011 = vrot.lane.b32.xlu0 %v17292_v16, %s17985_s0 }
0x4b52   :  { %9013 = vrot.lane.b32.xlu1 %v17292_v16, %s17984_s10  ;;  %9361 = vrot.lane.b32.xlu0 %v17307_v20, %s17978_s11 }
0x4b56   :  { %9194 = vrot.lane.b32.xlu1 %v17307_v20, %s17977_s29  ;;  %9528 = vrot.lane.b32.xlu0 %v17307_v20, %s17981_s8 }
0x4b5a   :  { %9359 = vrot.lane.b32.xlu1 %v17307_v20, %s17979_s5  ;;  %9695 = vrot.lane.b32.xlu0 %v17307_v20, %s17984_s10 }
0x4b5e   :  { %9526 = vrot.lane.b32.xlu1 %v17307_v20, %s17983_s4 }
0x4b62   :  { %9693 = vrot.lane.b32.xlu1 %v17307_v20, %s17985_s0 }
0x4bb8   :  { %v8680_v1 = vpop.permute.xlu1 %8679  ;;  %v8513_v47 = vpop.permute.xlu0 %8512 }
0x4bb9   :  { %13742 = vmatpush3.xpose.msk.msra.mxu1 %vm324_vm6, %v8513_v47  ;;  %13752 = vmatpush3.xpose.msk.msra.mxu0 %vm324_vm6, %v8680_v1 }
0x4bba   :  { %13761 = vmatprep.subr.mxu0 %v15314_v10  ;;  %13746 = vmatprep.subr.mxu1 %v15314_v10 }
0x4bbc   :  { %v8678_v8 = vpop.permute.xlu1 %8677  ;;  %13744 = vmatmul.mubr.msk.f32.vlgmr.msra.gmra.mrb[102].mxu1 %vm324_vm6, %v17292_v16  ;;  %v8845_v33 = vpop.permute.xlu0 %8844 }
0x4bbd   :  { %13754 = vmatmul.mubr.msk.f32.vlgmr.msra.gmra.mrb[102].mxu0 %vm324_vm6, %v8678_v8  ;;  %13748 = vmatprep.mubr.msk.f32.mxu1 %vm15313_vm0, %v15314_v10 }
0x4bbe   :  { %13763 = vmatprep.mubr.msk.f32.mxu0 %vm15313_vm0, %v15314_v10 }
0x4bc0   :  { %v8847_v9 = vpop.permute.xlu1 %8846  ;;  %v9012_v49 = vpop.permute.xlu0 %9011 }
0x4bc1   :  { %13762 = vmatpush3.xpose.msk.msra.mxu0 %vm324_vm6, %v8847_v9 }
0x4bc2   :  { %13771 = vmatprep.subr.mxu0 %v15314_v10 }
0x4bc4   :  { %v9014_v39 = vpop.permute.xlu1 %9013  ;;  %13764 = vmatmul.mubr.msk.f32.vlgmr.msra.gmra.mrb[104].mxu0 %vm324_vm6, %v8845_v33  ;;  %v9362_v59 = vpop.permute.xlu0 %9361 }
0x4bc5   :  { %13772 = vmatpush3.xpose.msk.msra.mxu0 %vm324_vm6, %v9014_v39  ;;  %13773 = vmatprep.mubr.msk.f32.mxu0 %vm15313_vm0, %v15314_v10 }
0x4bc6   :  { %13781 = vmatprep.subr.mxu0 %v15314_v10 }
0x4bc8   :  { %v9195_v42 = vpop.permute.xlu1 %9194  ;;  %13774 = vmatmul.mubr.msk.f32.vlgmr.msra.gmra.mrb[106].mxu0 %vm324_vm6, %v9012_v49  ;;  %v9529_v13 = vpop.permute.xlu0 %9528 }
0x4bc9   :  { %13782 = vmatpush3.xpose.msk.msra.mxu0 %vm324_vm6, %v9195_v42  ;;  %13783 = vmatprep.mubr.msk.f32.mxu0 %vm15313_vm0, %v15314_v10 }
0x4bca   :  { %13791 = vmatprep.subr.mxu0 %v15314_v10 }
0x4bcc   :  { %v9360_v19 = vpop.permute.xlu1 %9359  ;;  %13784 = vmatmul.mubr.msk.f32.vlgmr.msra.gmra.mrb[108].mxu0 %vm324_vm6, %v17307_v20  ;;  %v9696_v35 = vpop.permute.xlu0 %9695 }
0x4bcd   :  { %13792 = vmatpush3.xpose.msk.msra.mxu0 %vm324_vm6, %v9362_v59  ;;  %13793 = vmatprep.mubr.msk.f32.mxu0 %vm15313_vm0, %v15314_v10 }
0x4bce   :  { %13801 = vmatprep.subr.mxu0 %v15314_v10 }
0x4bd0   :  { %13794 = vmatmul.mubr.msk.f32.vlgmr.msra.gmra.mrb[110].mxu0 %vm324_vm6, %v9360_v19  ;;  %v9527_v29 = vpop.permute.xlu1 %9526 }
0x4bd1   :  { %13802 = vmatpush3.xpose.msk.msra.mxu0 %vm324_vm6, %v9529_v13  ;;  %13803 = vmatprep.mubr.msk.f32.mxu0 %vm15313_vm0, %v15314_v10 }
0x4bd2   :  { %13811 = vmatprep.subr.mxu0 %v15314_v10 }
0x4bd4   :  { %13804 = vmatmul.mubr.msk.f32.vlgmr.msra.gmra.mrb[112].mxu0 %vm324_vm6, %v9527_v29  ;;  %v9694_v50 = vpop.permute.xlu1 %9693 }
0x4bd5   :  { %13812 = vmatpush3.xpose.msk.msra.mxu0 %vm324_vm6, %v9696_v35  ;;  %13813 = vmatprep.mubr.msk.f32.mxu0 %vm15313_vm0, %v15314_v10 }
0x4bd8   :  { %13814 = vmatmul.mubr.msk.f32.vlgmr.msra.gmra.mrb[114].mxu0 %vm324_vm6, %v9694_v50 }
0x4c8f   :  { %v8584_v30 = vpop.f32.mrb[102].mxu1 }
0x4c90   :  { %v8588_v27 = vmul.f32 0.35355338, %v8584_v30  ;;  %v13745_v62 = vpop.f32.mrb[103].mxu1  ;;  %v8751_v15 = vpop.f32.mrb[102].mxu0 }
0x4c91   :  { %v8755_v43 = vmul.f32 0.35355338, %v8751_v15  ;;  %v13755_v2 = vpop.f32.mrb[103].mxu0 }
0x4c92   :  { %v8589_v60 = vadd.f32 %v8588_v27, %v16694_v25 }
0x4c93   :  { %v8756_v48 = vadd.f32 %v8755_v43, %v16694_v25 }
0x4c94   :  { %v8590_v0 = vsel %vm324_vm6, %v8589_v60, -inf }
0x4c95   :  { %8591 = vmax.xlane.f32.xlu0 %v8590_v0  ;;  %v8757_v34 = vsel %vm324_vm6, %v8756_v48, -inf }
0x4c96   :  { %8758 = vmax.xlane.f32.xlu1 %v8757_v34 }
0x4c97   :  { %v8918_v17 = vpop.f32.mrb[104].mxu0 }
0x4c98   :  { %v8922_v44 = vmul.f32 0.35355338, %v8918_v17  ;;  %v13765_v54 = vpop.f32.mrb[105].mxu0 }
0x4c9a   :  { %v17369_v21 = vadd.f32 %v8922_v44, %v16694_v25 }
0x4c9b   :  { %v9085_v37 = vpop.f32.mrb[106].mxu0 }
0x4c9c   :  { %v9089_v4 = vmul.f32 0.35355338, %v9085_v37  ;;  %v13775_v57 = vpop.f32.mrb[107].mxu0  ;;  %v8924_v6 = vsel %vm324_vm6, %v17369_v21, -inf }
0x4c9d   :  { %8925 = vmax.xlane.f32.xlu0 %v8924_v6 }
0x4c9e   :  { %v9090_v24 = vadd.f32 %v9089_v4, %v16694_v25 }
0x4c9f   :  { %v9266_v28 = vpop.f32.mrb[108].mxu0 }
0x4ca0   :  { %v9270_v3 = vmul.f32 0.35355338, %v9266_v28  ;;  %v13785_v31 = vpop.f32.mrb[109].mxu0  ;;  %v9091_v22 = vsel %vm324_vm6, %v9090_v24, -inf }
0x4ca1   :  { %9092 = vmax.xlane.f32.xlu0 %v9091_v22 }
0x4ca2   :  { %v9271_v56 = vadd.f32 %v9270_v3, %v16694_v25 }
0x4ca3   :  { %v9433_v1 = vpop.f32.mrb[110].mxu0 }
0x4ca4   :  { %v9437_v47 = vmul.f32 0.35355338, %v9433_v1  ;;  %v13795_v8 = vpop.f32.mrb[111].mxu0  ;;  %v9272_v33 = vsel %vm324_vm6, %v9271_v56, -inf }
0x4ca5   :  { %9273 = vmax.xlane.f32.xlu0 %v9272_v33 }
0x4ca6   :  { %v9438_v9 = vadd.f32 %v9437_v47, %v16694_v25 }
0x4ca7   :  { %v9600_v49 = vpop.f32.mrb[112].mxu0 }
0x4ca8   :  { %v9604_v39 = vmul.f32 0.35355338, %v9600_v49  ;;  %v13805_v59 = vpop.f32.mrb[113].mxu0  ;;  %v9439_v42 = vsel %vm324_vm6, %v9438_v9, -inf }
0x4ca9   :  { %9440 = vmax.xlane.f32.xlu1 %v9439_v42 }
0x4caa   :  { %v9605_v19 = vadd.f32 %v9604_v39, %v16694_v25 }
0x4cab   :  { %v9767_v13 = vpop.f32.mrb[114].mxu0 }
0x4cac   :  { %v13815_v29 = vpop.f32.mrb[115].mxu0  ;;  %v9606_v35 = vsel %vm324_vm6, %v9605_v19, -inf  ;;  %v9771_v50 = vmul.f32 0.35355338, %v9767_v13 }
0x4cad   :  { %9607 = vmax.xlane.f32.xlu0 %v9606_v35 }
0x4cae   :  { %v9772_v30 = vadd.f32 %v9771_v50, %v16694_v25 }
0x4cb0   :  { %v9773_v27 = vsel %vm324_vm6, %v9772_v30, -inf }
0x4cba   :  { %8601 = vrot.lane.b32.xlu1 %v17292_v16, %s17980_s30 }
0x4cde   :  { %9774 = vmax.xlane.f32.xlu1 %v9773_v27 }
0x4cef   :  { %8935 = vrot.lane.b32.xlu1 %v17292_v16, %s17986_s25 }
0x4cf3   :  { %9102 = vrot.lane.b32.xlu1 %v17292_v16, %s17987_s24 }
0x4cf7   :  { %9283 = vrot.lane.b32.xlu1 %v17307_v20, %s17980_s30 }
0x4d22   :  { %v8592_v62 = vpop.xlane.xlu0 %8591 }
0x4d23   :  { %v8593_v15 = vsub.f32 %v8589_v60, %v8592_v62  ;;  %v8759_v43 = vpop.xlane.xlu1 %8758 }
0x4d24   :  { %v8760_v2 = vsub.f32 %v8756_v48, %v8759_v43 }
0x4d25   :  { %v8594_v0 = vmul.f32 1.442695, %v8593_v15 }
0x4d26   :  { %v8761_v34 = vmul.f32 1.442695, %v8760_v2 }
0x4d27   :  { %15230 = vpow2.f32 %v8594_v0 }
0x4d28   :  { %15232 = vpow2.f32 %v8761_v34 }
0x4d2a   :  { %v8926_v25 = vpop.xlane.xlu0 %8925 }
0x4d2b   :  { %v8927_v3 = vsub.f32 %v17369_v21, %v8926_v25 }
0x4d2d   :  { %v8928_v22 = vmul.f32 1.442695, %v8927_v3 }
0x4d2e   :  { %v9093_v17 = vpop.xlane.xlu0 %9092 }
0x4d2f   :  { %v9094_v44 = vsub.f32 %v9090_v24, %v9093_v17 }
0x4d31   :  { %v15231_v54 = vpop.eup %15230  ;;  %v9095_v37 = vmul.f32 1.442695, %v9094_v44 }
0x4d32   :  { %v17391_v4 = vpop.eup %15232  ;;  %v8596_v57 = vsel %vm324_vm6, %v15231_v54, 0.0  ;;  %v9274_v31 = vpop.xlane.xlu0 %9273 }
0x4d33   :  { %15234 = vpow2.f32 %v9095_v37  ;;  %8597 = vadd.xlane.f32.xlu0 %v8596_v57  ;;  %v8763_v60 = vsel %vm324_vm6, %v17391_v4, 0.0  ;;  %v9275_v1 = vsub.f32 %v9271_v56, %v9274_v31 }
0x4d34   :  { %8764 = vadd.xlane.f32.xlu1 %v8763_v60  ;;  %15236 = vpow2.f32 %v8928_v22 }
0x4d35   :  { %v9276_v8 = vmul.f32 1.442695, %v9275_v1 }
0x4d36   :  { %v9441_v48 = vpop.xlane.xlu1 %9440 }
0x4d37   :  { %15238 = vpow2.f32 %v9276_v8  ;;  %v9442_v49 = vsub.f32 %v9438_v9, %v9441_v48 }
0x4d39   :  { %v9443_v59 = vmul.f32 1.442695, %v9442_v49 }
0x4d3a   :  { %v8602_v6 = vpop.permute.xlu1 %8601  ;;  %v9608_v47 = vpop.xlane.xlu0 %9607 }
0x4d3b   :  { %13747 = vmatpush3.msra.mxu1 %v8602_v6  ;;  %v9609_v33 = vsub.f32 %v9605_v19, %v9608_v47 }
0x4d3c   :  { %13756 = vmatprep.subr.mxu1 %v15314_v10 }
0x4d3d   :  { %v17397_v28 = vpop.eup %15234  ;;  %v9610_v39 = vmul.f32 1.442695, %v9609_v33 }
0x4d3e   :  { %v9097_v24 = vsel %vm324_vm6, %v17397_v28, 0.0  ;;  %v15237_v42 = vpop.eup %15236 }
0x4d3f   :  { %9098 = vadd.xlane.f32.xlu1 %v9097_v24  ;;  %15240 = vpow2.f32 %v9610_v39 }
0x4d40   :  { %15242 = vpow2.f32 %v9443_v59 }
0x4d41   :  { %v17407_v13 = vpop.eup %15238 }
0x4d42   :  { %v9278_v56 = vsel %vm324_vm6, %v17407_v13, 0.0 }
0x4d49   :  { %8768 = vrot.lane.b32.xlu0 %v17292_v16, %s17982_s7  ;;  %v8930_v16 = vsel %vm324_vm6, %v15237_v42, 0.0  ;;  %v17411_v29 = vpop.eup %15240 }
0x4d4a   :  { %v9612_v9 = vsel %vm324_vm6, %v17411_v29, 0.0  ;;  %v17415_v50 = vpop.eup %15242 }
0x4d4b   :  { %v9445_v27 = vsel %vm324_vm6, %v17415_v50, 0.0 }
0x4d50   :  { %9450 = vrot.lane.b32.xlu1 %v17307_v20, %s17982_s7 }
0x4d68   :  { %8931 = vadd.xlane.f32.xlu0 %v8930_v16 }
0x4d6b   :  { %v9775_v21 = vpop.xlane.xlu1 %9774 }
0x4d6c   :  { %v9776_v35 = vsub.f32 %v9772_v30, %v9775_v21  ;;  %9279 = vadd.xlane.f32.xlu0 %v9278_v56 }
0x4d6e   :  { %v9777_v19 = vmul.f32 1.442695, %v9776_v35 }
0x4d6f   :  { %v8936_v30 = vpop.permute.xlu1 %8935 }
0x4d70   :  { %15244 = vpow2.f32 %v9777_v19  ;;  %9613 = vadd.xlane.f32.xlu0 %v9612_v9 }
0x4d73   :  { %v9103_v43 = vpop.permute.xlu1 %9102 }
0x4d74   :  { %9446 = vadd.xlane.f32.xlu1 %v9445_v27 }
0x4d77   :  { %v9284_v2 = vpop.permute.xlu1 %9283 }
0x4d7a   :  { %v17419_v62 = vpop.eup %15244 }
0x4d7b   :  { %v9779_v15 = vsel %vm324_vm6, %v17419_v62, 0.0 }
0x4d7c   :  { %9780 = vadd.xlane.f32.xlu0 %v9779_v15 }
0x4d85   :  { %9784 = vrot.lane.b32.xlu1 %v17307_v20, %s17987_s24 }
0x4d89   :  { %14902 = vrot.lane.b32.xlu1 %v14901_v61, %s17988_s22 }
0x4d92   :  { %9617 = vrot.lane.b32.xlu0 %v17307_v20, %s17986_s25 }
0x4d96   :  { %14897 = vrot.lane.b32.xlu0 %v14896_v45, %s17988_s22 }
0x4dc0   :  { %v8598_v0 = vpop.xlane.xlu0 %8597 }
0x4dc1   :  { %15246 = vrcp.f32 %v8598_v0  ;;  %v8765_v34 = vpop.xlane.xlu1 %8764 }
0x4dc2   :  { %15248 = vrcp.f32 %v8765_v34 }
0x4dc4   :  { %v8769_v55 = vpop.permute.xlu0 %8768 }
0x4dcb   :  { %v15247_v25 = vpop.eup %15246 }
0x4dcc   :  { %v8600_v17 = vmul.f32 %v15247_v25, %v15231_v54  ;;  %v15249_v44 = vpop.eup %15248  ;;  %v9099_v58 = vpop.xlane.xlu1 %9098 }
0x4dcd   :  { %v8767_v18 = vmul.f32 %v15249_v44, %v17391_v4 }
0x4dce   :  { %13749 = vmatmul.mubr.msk.f32.vlgmr.msra.gmra.mrb[104].mxu1 %vm324_vm6, %v8600_v17 }
0x4dcf   :  { %13757 = vmatpush3.msra.mxu1 %v8769_v55  ;;  %13758 = vmatprep.mubr.msk.f32.mxu1 %vm15313_vm0, %v15314_v10 }
0x4dd0   :  { %13766 = vmatprep.subr.mxu1 %v15314_v10  ;;  %v9451_v61 = vpop.permute.xlu1 %9450 }
0x4dd2   :  { %13759 = vmatmul.mubr.msk.f32.vlgmr.msra.gmra.mrb[106].mxu1 %vm324_vm6, %v8767_v18 }
0x4dd3   :  { %13767 = vmatpush3.msra.mxu1 %v8936_v30  ;;  %13768 = vmatprep.mubr.msk.f32.mxu1 %vm15313_vm0, %v15314_v10 }
0x4dd4   :  { %13776 = vmatprep.subr.mxu1 %v15314_v10 }
0x4df5   :  { %v8932_v45 = vpop.xlane.xlu0 %8931 }
0x4df6   :  { %15250 = vrcp.f32 %v8932_v45 }
0x4df7   :  { %15252 = vrcp.f32 %v9099_v58 }
0x4df9   :  { %v9280_v46 = vpop.xlane.xlu0 %9279 }
0x4dfa   :  { %15254 = vrcp.f32 %v9280_v46 }
0x4dfd   :  { %v9614_v37 = vpop.xlane.xlu0 %9613 }
0x4e00   :  { %v15251_v20 = vpop.eup %15250 }
0x4e01   :  { %v8934_v54 = vmul.f32 %v15251_v20, %v15237_v42  ;;  %v9447_v4 = vpop.xlane.xlu1 %9446  ;;  %v15253_v57 = vpop.eup %15252 }
0x4e02   :  { %15256 = vrcp.f32 %v9447_v4  ;;  %v9101_v60 = vmul.f32 %v15253_v57, %v17397_v28 }
0x4e03   :  { %13769 = vmatmul.mubr.msk.f32.vlgmr.msra.gmra.mrb[108].mxu1 %vm324_vm6, %v8934_v54  ;;  %15258 = vrcp.f32 %v9614_v37 }
0x4e04   :  { %13777 = vmatpush3.msra.mxu1 %v9103_v43  ;;  %13778 = vmatprep.mubr.msk.f32.mxu1 %vm15313_vm0, %v15314_v10  ;;  %v15255_v48 = vpop.eup %15254 }
0x4e05   :  { %13786 = vmatprep.subr.mxu1 %v15314_v10  ;;  %v9282_v6 = vmul.f32 %v15255_v48, %v17407_v13  ;;  %v9785_v47 = vpop.permute.xlu1 %9784 }
0x4e07   :  { %13779 = vmatmul.mubr.msk.f32.vlgmr.msra.gmra.mrb[110].mxu1 %vm324_vm6, %v9101_v60 }
0x4e08   :  { %13787 = vmatpush3.msra.mxu1 %v9284_v2  ;;  %13788 = vmatprep.mubr.msk.f32.mxu1 %vm15313_vm0, %v15314_v10 }
0x4e09   :  { %v9781_v24 = vpop.xlane.xlu0 %9780  ;;  %13796 = vmatprep.subr.mxu1 %v15314_v10  ;;  %v14903_v16 = vpop.permute.xlu1 %14902 }
0x4e0a   :  { %15260 = vrcp.f32 %v9781_v24  ;;  %v14905_v13 = vunpack.i.h.bf16 %v14903_v16  ;;  %v14904_v21 = vunpack.i.l.bf16 %v14903_v16 }
0x4e0b   :  { %13789 = vmatmul.mubr.msk.f32.vlgmr.msra.gmra.mrb[112].mxu1 %vm324_vm6, %v9282_v6 }
0x4e0c   :  { %v15257_v3 = vpop.eup %15256  ;;  %13797 = vmatpush3.msra.mxu1 %v9451_v61  ;;  %13798 = vmatprep.mubr.msk.f32.mxu1 %vm15313_vm0, %v15314_v10  ;;  %v14470_v56 = vpack.c.bf16 %v14905_v13, %v14904_v21 }
0x4e0d   :  { %v9449_v28 = vmul.f32 %v15257_v3, %v17415_v50  ;;  %v9618_v31 = vpop.permute.xlu0 %9617  ;;  %13806 = vmatprep.subr.mxu1 %v15314_v10  ;;  %v15259_v22 = vpop.eup %15258 }
0x4e0e   :  { %v9616_v1 = vmul.f32 %v15259_v22, %v17411_v29 }
0x4e0f   :  { %13799 = vmatmul.mubr.msk.f32.vlgmr.msra.gmra.mrb[114].mxu1 %vm324_vm6, %v9449_v28 }
0x4e10   :  { %13807 = vmatpush3.msra.mxu1 %v9618_v31  ;;  %13808 = vmatprep.mubr.msk.f32.mxu1 %vm15313_vm0, %v15314_v10 }
0x4e11   :  { %13816 = vmatprep.subr.mxu1 %v15314_v10  ;;  %v14898_v49 = vpop.permute.xlu0 %14897 }
0x4e12   :  { %v14900_v39 = vunpack.i.h.bf16 %v14898_v49  ;;  %v14899_v59 = vunpack.i.l.bf16 %v14898_v49 }
0x4e13   :  { %13809 = vmatmul.mubr.msk.f32.vlgmr.msra.gmra.mrb[116].mxu1 %vm324_vm6, %v9616_v1 }
0x4e14   :  { %v15261_v8 = vpop.eup %15260  ;;  %13817 = vmatpush3.msra.mxu1 %v9785_v47  ;;  %13818 = vmatprep.mubr.msk.f32.mxu1 %vm15313_vm0, %v15314_v10  ;;  %v14466_v42 = vpack.c.bf16 %v14900_v39, %v14899_v59  ;;  %v12427_v47 = vld [vmem:[%s17994_s17 + $0x20] sm:$0xff] }
0x4e15   :  { %v9783_v33 = vmul.f32 %v15261_v8, %v17419_v62  ;;  %v12428_v8 = vld [vmem:[%s17994_s17 + $0x28] sm:$0xff] }
0x4e16   :  { %14467 = vmatprep.subr.bf16.mxu0 %v14466_v42 }
0x4e17   :  { %13819 = vmatmul.mubr.msk.f32.vlgmr.msra.gmra.mrb[118].mxu1 %vm324_vm6, %v9783_v33  ;;  %14469 = vmatpush3.bf16.msra.mxu0 %v14466_v42  ;;  %v17498_v33 = vpack.i.bf16 %v12428_v8, %v12427_v47 }
0x4e18   :  { %14471 = vmatprep.subr.bf16.mxu0 %v14470_v56 }
0x4e1b   :  { %14473 = vmatpush3.bf16.msra.mxu0 %v14470_v56 }
0x4e1c   :  { %14482 = vmatprep.subr.bf16.mxu0 %v15312_v7 }
0x4ea1   :  { %v8673_v29 = vpop.f32.mrb[104].mxu1 }
0x4ea2   :  { %v13750_v35 = vpop.f32.mrb[105].mxu1 }
0x4ea3   :  { %v12429_v35 = vld [vmem:[%s17994_s17 + $0x30] sm:$0xff] }
0x4ea5   :  { %v8840_v19 = vpop.f32.mrb[106].mxu1 }
0x4ea6   :  { %9179 = vrot.lane.b32.xlu0 %v8840_v19, %s17990_s20  ;;  %v13760_v9 = vpop.f32.mrb[107].mxu1  ;;  %v12430_v19 = vld [vmem:[%s17994_s17 + $0x38] sm:$0xff] }
0x4ed6   :  { %v9007_v50 = vpop.f32.mrb[108].mxu1 }
0x4ed7   :  { %9183 = vrot.lane.b32.xlu1 %v9007_v50, %s17989_s23  ;;  %v13770_v27 = vpop.f32.mrb[109].mxu1 }
0x4eda   :  { %v9174_v62 = vpop.f32.mrb[110].mxu1 }
0x4edb   :  { %9187 = vrot.lane.b32.xlu1 %v9174_v62, %s17992_s12  ;;  %v13780_v15 = vpop.f32.mrb[111].mxu1  ;;  %v17510_v62 = vpack.i.bf16 %v12430_v19, %v12429_v35 }
0x4edc   :  { %v14474_v15 = vpack.c.bf16 %v12428_v8, %v12427_v47 }
0x4ede   :  { %v9355_v30 = vpop.f32.mrb[112].mxu1  ;;  %14475 = vmatprep.subr.bf16.mxu1 %v14474_v15 }
0x4edf   :  { %v13790_v43 = vpop.f32.mrb[113].mxu1  ;;  %14477 = vmatpush3.bf16.msra.mxu1 %v14474_v15 }
0x4ee0   :  { %v17519_v43 = vld [vmem:[%s18002_s1 + $0x1] ss:$0 sm:$0xff] }
0x4ee2   :  { %v9522_v2 = vpop.f32.mrb[114].mxu1 }
0x4ee3   :  { %9861 = vrot.lane.b32.xlu0 %v9522_v2, %s17990_s20  ;;  %v13800_v0 = vpop.f32.mrb[115].mxu1 }
0x4ee6   :  { %v9689_v34 = vpop.f32.mrb[116].mxu1 }
0x4ee7   :  { %9865 = vrot.lane.b32.xlu0 %v9689_v34, %s17989_s23  ;;  %v13810_v25 = vpop.f32.mrb[117].mxu1 }
0x4eea   :  { %v9856_v17 = vpop.f32.mrb[118].mxu1 }
0x4eeb   :  { %9869 = vrot.lane.b32.xlu1 %v9856_v17, %s17992_s12  ;;  %v13820_v44 = vpop.f32.mrb[119].mxu1  ;;  %9891 = vrot.lane.b32.xlu0 %v17289_v41, %s17988_s22 }
0x4f18   :  { %v9180_v55 = vpop.permute.xlu0 %9179 }
0x4f19   :  { %v9190_v58 = vsel %vm324_vm6, %v8673_v29, %v9180_v55 }
0x4f49   :  { %v9184_v18 = vpop.permute.xlu1 %9183 }
0x4f4a   :  { %v9191_v45 = vsel %vm1157_vm14, %v9190_v58, %v9184_v18 }
0x4f4d   :  { %v9188_v46 = vpop.permute.xlu1 %9187 }
0x4f4e   :  { %v9192_v61 = vsel %vm1160_vm13, %v9191_v45, %v9188_v46  ;;  %v17526_v46 = vld [vmem:[%s17996_s15 + $0x8] sm:$0x3f] }
0x4f4f   :  { %13829 = vmatprep.mubr.msk.f32.mxu0 %vm228_vm5, %v9192_v61 }
0x4f55   :  { %v9862_v20 = vpop.permute.xlu0 %9861 }
0x4f56   :  { %v9872_v37 = vsel %vm324_vm6, %v9355_v30, %v9862_v20  ;;  %v14478_v30 = vpack.c.bf16 %v12430_v19, %v12429_v35 }
0x4f58   :  { %14479 = vmatprep.subr.bf16.mxu1 %v14478_v30 }
0x4f59   :  { %v9866_v54 = vpop.permute.xlu0 %9865  ;;  %14481 = vmatpush3.bf16.msra.mxu1 %v14478_v30 }
0x4f5a   :  { %v9873_v4 = vsel %vm1157_vm14, %v9872_v37, %v9866_v54  ;;  %14488 = vmatprep.subr.bf16.mxu1 %v15312_v7  ;;  %v10006_v54 = vrot.slane %v17526_v46, %v15941_v51 }
0x4f5d   :  { %v9870_v57 = vpop.permute.xlu1 %9869  ;;  %v9892_v60 = vpop.permute.xlu0 %9891 }
0x4f5e   :  { %v9874_v41 = vsel %vm1160_vm13, %v9873_v4, %v9870_v57 }
0x4f5f   :  { %13830 = vmatmul.mubr.msk.f32.vlgmr.msra.gmra.mrb[116].mxu0 %vm228_vm5, %v9874_v41  ;;  %v10012_v41 = vrot.slane %v17526_v46, %v15949_v53 }
0x4f60   :  { %13851 = vmatprep.mubr.msk.f32.mxu0 %vm15313_vm0, %v15314_v10 }
0x5032   :  { %v13831_v48 = vpop.f32.mrb[116].mxu0 }
0x5033   :  { %v9972_v6 = vadd.f32 %v13831_v48, %v9892_v60  ;;  %v9966_v24 = vpop.f32.mrb[117].mxu0 }
0x5034   :  { %v9967_v3 = vadd.f32 %v9966_v24, %v9892_v60 }
0x5035   :  { %v9976_v28 = vadd.f32 %v9972_v6, %v17278_v11 }
0x5036   :  { %v9975_v31 = vadd.f32 %v9967_v3, %v17276_v23 }
0x5037   :  { %v9980_v22 = vsel %vm228_vm5, %v9976_v28, 0.0 }
0x5038   :  { %9981 = vadd.xlane.f32.xlu0 %v9980_v22  ;;  %v9977_v1 = vsel %vm228_vm5, %v9975_v31, 0.0 }
0x5039   :  { %9978 = vadd.xlane.f32.xlu1 %v9977_v1 }
0x504a   :  { %14907 = vrot.lane.b32.xlu1 %v17498_v33, %s17977_s29 }
0x504e   :  { %10125 = vrot.lane.b32.xlu1 %v17519_v43, %s17977_s29 }
0x50c5   :  { %v9982_v23 = vpop.xlane.xlu0 %9981 }
0x50c6   :  { %v9984_v11 = vmul.f32 0.03125, %v9982_v23  ;;  %v9979_v49 = vpop.xlane.xlu1 %9978 }
0x50c7   :  { %v9983_v39 = vmul.f32 0.03125, %v9979_v49 }
0x50c8   :  { %v9986_v59 = vsub.f32 %v9976_v28, %v9984_v11 }
0x50c9   :  { %v9985_v42 = vsub.f32 %v9975_v31, %v9983_v39 }
0x50ca   :  { %v9988_v16 = vmul.f32 %v9986_v59, %v9986_v59  ;;  %v14908_v29 = vpop.permute.xlu1 %14907 }
0x50cb   :  { %v9987_v21 = vmul.f32 %v9985_v42, %v9985_v42  ;;  %v14910_v9 = vunpack.i.h.bf16 %v14908_v29  ;;  %v14909_v50 = vunpack.i.l.bf16 %v14908_v29 }
0x50cc   :  { %v9992_v13 = vsel %vm228_vm5, %v9988_v16, 0.0 }
0x50cd   :  { %9993 = vadd.xlane.f32.xlu0 %v9992_v13  ;;  %v9989_v56 = vsel %vm228_vm5, %v9987_v21, 0.0  ;;  %v14483_v27 = vpack.c.bf16 %v14910_v9, %v14909_v50 }
0x50cf   :  { %14484 = vmatpush3.bf16.msra.mxu0 %v14483_v27 }
0x50d0   :  { %14485 = vmatprep.subr.bf16.mxu0 %v15312_v7 }
0x50d1   :  { %9990 = vadd.xlane.f32.xlu0 %v9989_v56 }
0x50e7   :  { %14912 = vrot.lane.b32.xlu0 %v17510_v62, %s17977_s29 }
0x515a   :  { %v9994_v2 = vpop.xlane.xlu0 %9993 }
0x515b   :  { %v9996_v0 = vmul.f32 0.03125, %v9994_v2 }
0x515d   :  { %v9998_v34 = vadd.f32 1e-05, %v9996_v0 }
0x515e   :  { %v9991_v25 = vpop.xlane.xlu0 %9990 }
0x515f   :  { %15262 = vrsqrt.f32 %v9998_v34  ;;  %v9995_v17 = vmul.f32 0.03125, %v9991_v25 }
0x5161   :  { %v9997_v44 = vadd.f32 1e-05, %v9995_v17 }
0x5162   :  { %v14913_v55 = vpop.permute.xlu0 %14912 }
0x5163   :  { %15264 = vrsqrt.f32 %v9997_v44  ;;  %v14915_v18 = vunpack.i.h.bf16 %v14913_v55  ;;  %v14914_v58 = vunpack.i.l.bf16 %v14913_v55 }
0x5165   :  { %v14486_v45 = vpack.c.bf16 %v14915_v18, %v14914_v58 }
0x5167   :  { %14487 = vmatpush3.bf16.msra.mxu0 %v14486_v45 }
0x5168   :  { %14496 = vmatprep.subr.bf16.mxu0 %v15312_v7 }
0x5169   :  { %v15263_v61 = vpop.eup %15262 }
0x516a   :  { %13852 = vmatmul.mubr.msk.f32.vlgmr.msra.gmra.mrb[118].mxu0 %vm228_vm5, %v16919_v36  ;;  %v10002_v20 = vmul.f32 %v15263_v61, %v9986_v59 }
0x516b   :  { %13854 = vmatprep.mubr.msk.f32.mxu0 %vm15313_vm0, %v15314_v10 }
0x516c   :  { %v10008_v57 = vmul.f32 %v10006_v54, %v10002_v20 }
0x516d   :  { %v15265_v37 = vpop.eup %15264 }
0x516e   :  { %13855 = vmatmul.mubr.msk.f32.gmra.mrb[120].mxu0 %vm228_vm5, %v16933_v40  ;;  %v10001_v4 = vmul.f32 %v15265_v37, %v9985_v42  ;;  %v17545_v48 = vadd.f32 %v10012_v41, %v10008_v57  ;;  %v10126_v40 = vpop.permute.xlu1 %10125 }
0x516f   :  { %13857 = vmatprep.mubr.msk.f32.mxu0 %vm15313_vm0, %v15314_v10 }
0x5170   :  { %v10007_v36 = vmul.f32 %v10006_v54, %v10001_v4 }
0x5172   :  { %13858 = vmatmul.mubr.msk.f32.gmra.mrb[122].mxu0 %vm228_vm5, %v16981_v26  ;;  %v17543_v60 = vadd.f32 %v10012_v41, %v10007_v36 }
0x5173   :  { %13878 = vmatprep.mubr.msk.f32.mxu0 %vm15313_vm0, %v15314_v10 }
0x5174   :  { %13840 = vmatprep.mubr.msk.f32.mxu1 %vm228_vm5, %v17543_v60 }
0x5175   :  { %13841 = vmatmul.mubr.msk.f32.vlgmr.msra.gmra.mrb[120].mxu1 %vm228_vm5, %v17545_v48 }
0x5176   :  { %13864 = vmatprep.mubr.msk.f32.mxu1 %vm15313_vm0, %v15314_v10 }
0x523d   :  { %v10194_v51 = vpop.f32.mrb[118].mxu0 }
0x523e   :  { %v13853_v53 = vpop.f32.mrb[119].mxu0  ;;  %v10195_v6 = vadd.f32 %v10194_v51, %v10126_v40 }
0x5241   :  { %v10199_v26 = vpop.f32.mrb[120].mxu0 }
0x5242   :  { %v10200_v24 = vadd.f32 %v10199_v26, %v10126_v40  ;;  %v13856_v3 = vpop.f32.mrb[121].mxu0 }
0x5244   :  { %v17555_v28 = vpack.i.bf16 %v10200_v24, %v10195_v6  ;;  %v14489_v31 = vpack.c.bf16 %v10200_v24, %v10195_v6  ;;  %v10917_v11 = vrot.slane %v10200_v24, 2 }
0x5245   :  { %v10204_v22 = vpop.f32.mrb[122].mxu0 }
0x5246   :  { %v10205_v1 = vadd.f32 %v10204_v22, %v10126_v40  ;;  %14917 = vrot.lane.b32.xlu1 %v17555_v28, %s17979_s5  ;;  %v13859_v47 = vpop.f32.mrb[123].mxu0  ;;  %14491 = vmatpush3.bf16.xpose.msk.msra.mxu1 %vm15620_vm7, %v14489_v31 }
0x5247   :  { %14492 = vmatprep.subr.bf16.mxu1 %v15312_v7 }
0x5248   :  { %v17562_v8 = vrot.slane %v10205_v1, 2  ;;  %v17564_v23 = vpop.f32.mrb[120].mxu1 }
0x5249   :  { %v10100_v49 = vpop.f32.mrb[121].mxu1 }
0x524a   :  { %v17567_v39 = vadd.f32 %v17519_v43, %v10100_v49  ;;  %v17571_v59 = vsel %vm1164_vm12, %v10917_v11, %v17562_v8 }
0x524b   :  { %v17575_v42 = vpack.i.bf16 %v17562_v8, %v17571_v59  ;;  %v14521_v16 = vpack.c.bf16 %v17562_v8, %v17571_v59 }
0x524c   :  { %10379 = vrot.lane.b32.xlu1 %v17567_v39, %s17979_s5 }
0x524d   :  { %13865 = vmatmul.mubr.msk.f32.vlgmr.msra.gmra.mrb[122].mxu1 %vm324_vm6, %v17567_v39 }
0x524e   :  { %13871 = vmatprep.mubr.msk.f32.mxu1 %vm15313_vm0, %v15314_v10 }
0x52b8   :  { %v14918_v13 = vpop.permute.xlu1 %14917 }
0x52b9   :  { %v14920_v21 = vunpack.i.h.bf16 %v14918_v13  ;;  %v14919_v56 = vunpack.i.l.bf16 %v14918_v13 }
0x52bb   :  { %v14497_v29 = vpack.c.bf16 %v14920_v21, %v14919_v56 }
0x52bd   :  { %14499 = vmatpush3.bf16.xpose.msk.msra.mxu0 %vm15620_vm7, %v14497_v29 }
0x52be   :  { %14508 = vmatprep.subr.bf16.mxu0 %v15312_v7  ;;  %v10380_v35 = vpop.permute.xlu1 %10379 }
0x52c4   :  { %13879 = vmatmul.mubr.msk.f32.vlgmr.msra.gmra.mrb[124].mxu0 %vm324_vm6, %v10380_v35 }
0x52c5   :  { %13899 = vmatprep.mubr.msk.f32.mxu0 %vm15313_vm0, %v15314_v10 }
0x5320   :  { %v10283_v19 = vpop.f32.mrb[122].mxu1 }
0x5321   :  { %v10287_v9 = vmul.f32 0.35355338, %v10283_v19  ;;  %v13866_v50 = vpop.f32.mrb[123].mxu1 }
0x5323   :  { %v10288_v27 = vsel %vm410_vm9, %v10287_v9, -inf }
0x5324   :  { %10289 = vmax.xlane.f32.xlu0 %v10288_v27 }
0x5397   :  { %v10457_v15 = vpop.f32.mrb[124].mxu0 }
0x5398   :  { %v10461_v30 = vmul.f32 0.35355338, %v10457_v15  ;;  %v13880_v2 = vpop.f32.mrb[125].mxu0 }
0x539a   :  { %v10462_v0 = vsel %vm410_vm9, %v10461_v30, -inf }
0x539b   :  { %10463 = vmax.xlane.f32.xlu1 %v10462_v0 }
0x53ac   :  { %14927 = vrot.lane.b32.xlu1 %v17555_v28, %s17978_s11 }
0x53b0   :  { %14932 = vrot.lane.b32.xlu1 %v17555_v28, %s17983_s4 }
0x53b1   :  { %v10290_v34 = vpop.xlane.xlu0 %10289 }
0x53b2   :  { %v10291_v25 = vsub.f32 %v10287_v9, %v10290_v34 }
0x53b4   :  { %v10292_v17 = vmul.f32 1.442695, %v10291_v25  ;;  %10553 = vrot.lane.b32.xlu1 %v17567_v39, %s17983_s4 }
0x53b6   :  { %15266 = vpow2.f32 %v10292_v17 }
0x53c0   :  { %v15267_v44 = vpop.eup %15266 }
0x53c1   :  { %v10294_v55 = vsel %vm410_vm9, %v15267_v44, 0.0 }
0x53c2   :  { %10295 = vadd.xlane.f32.xlu0 %v10294_v55 }
0x5428   :  { %v10464_v18 = vpop.xlane.xlu1 %10463 }
0x5429   :  { %v10465_v58 = vsub.f32 %v10461_v30, %v10464_v18 }
0x542b   :  { %v10466_v45 = vmul.f32 1.442695, %v10465_v58 }
0x542c   :  { %v14928_v4 = vpop.permute.xlu1 %14927 }
0x542d   :  { %15268 = vpow2.f32 %v10466_v45  ;;  %v14930_v53 = vunpack.i.h.bf16 %v14928_v4  ;;  %v14929_v40 = vunpack.i.l.bf16 %v14928_v4 }
0x542f   :  { %v14501_v3 = vpack.c.bf16 %v14930_v53, %v14929_v40 }
0x5430   :  { %v14933_v31 = vpop.permute.xlu1 %14932 }
0x5431   :  { %v14935_v1 = vunpack.i.h.bf16 %v14933_v31  ;;  %v14934_v47 = vunpack.i.l.bf16 %v14933_v31 }
0x5433   :  { %v14505_v11 = vpack.c.bf16 %v14935_v1, %v14934_v47 }
0x5434   :  { %v10554_v49 = vpop.permute.xlu1 %10553 }
0x5437   :  { %v15269_v61 = vpop.eup %15268 }
0x5438   :  { %v10468_v20 = vsel %vm410_vm9, %v15269_v61, 0.0 }
0x5439   :  { %10469 = vadd.xlane.f32.xlu0 %v10468_v20 }
0x544f   :  { %14922 = vrot.lane.b32.xlu0 %v17555_v28, %s17977_s29  ;;  %v10296_v54 = vpop.xlane.xlu0 %10295 }
0x5450   :  { %15270 = vrcp.f32 %v10296_v54 }
0x545a   :  { %v15271_v51 = vpop.eup %15270 }
0x545b   :  { %v10298_v6 = vmul.f32 %v15271_v51, %v15267_v44 }
0x54c6   :  { %v10470_v37 = vpop.xlane.xlu0 %10469 }
0x54c7   :  { %15272 = vrcp.f32 %v10470_v37 }
0x54ca   :  { %v14923_v57 = vpop.permute.xlu0 %14922 }
0x54cb   :  { %v14925_v41 = vunpack.i.h.bf16 %v14923_v57  ;;  %v14924_v36 = vunpack.i.l.bf16 %v14923_v57 }
0x54cd   :  { %v14493_v26 = vpack.c.bf16 %v14925_v41, %v14924_v36 }
0x54cf   :  { %14495 = vmatpush3.bf16.msk.msra.mxu1 %vm15641_vm11, %v14493_v26 }
0x54d0   :  { %14500 = vmatprep.subr.bf16.mxu1 %v15312_v7 }
0x54d1   :  { %v15273_v24 = vpop.eup %15272 }
0x54d2   :  { %13872 = vmatmul.mubr.msk.f32.vlgmr.msra.gmra.mrb[124].mxu1 %vm410_vm9, %v10298_v6  ;;  %v10472_v22 = vmul.f32 %v15273_v24, %v15269_v61 }
0x54d3   :  { %14503 = vmatpush3.bf16.msk.msra.mxu1 %vm15641_vm11, %v14501_v3  ;;  %13885 = vmatprep.mubr.msk.f32.mxu1 %vm15313_vm0, %v15314_v10  ;;  %v17655_v3 = vadd.f32 %v17564_v23, %v17519_v43 }
0x54d4   :  { %14504 = vmatprep.subr.bf16.mxu1 %v15312_v7 }
0x54d6   :  { %13886 = vmatmul.mubr.msk.f32.vlgmr.msra.gmra.mrb[126].mxu1 %vm410_vm9, %v10472_v22 }
0x54d7   :  { %13892 = vmatprep.mubr.msk.f32.mxu1 %vm15313_vm0, %v15314_v10 }
0x54dc   :  { %14507 = vmatpush3.bf16.xpose.msk.msra.mxu1 %vm15620_vm7, %v14505_v11 }
0x54dd   :  { %14516 = vmatprep.subr.bf16.mxu1 %v15312_v7 }
0x54e3   :  { %13893 = vmatmul.mubr.msk.f32.vlgmr.msra.gmra.mrb[128].mxu1 %vm324_vm6, %v10554_v49 }
0x54e4   :  { %13913 = vmatprep.mubr.msk.f32.mxu1 %vm15313_vm0, %v15314_v10 }
0x55a5   :  { %v17621_v13 = vpop.f32.mrb[124].mxu1 }
0x55a6   :  { %v13873_v21 = vpop.f32.mrb[125].mxu1 }
0x55a9   :  { %v17623_v56 = vpop.f32.mrb[126].mxu1 }
0x55aa   :  { %v13887_v29 = vpop.f32.mrb[127].mxu1 }
0x55b6   :  { %v10631_v35 = vpop.f32.mrb[128].mxu1 }
0x55b7   :  { %v10635_v19 = vmul.f32 0.35355338, %v10631_v35  ;;  %v13894_v9 = vpop.f32.mrb[129].mxu1 }
0x55b9   :  { %v10636_v50 = vsel %vm410_vm9, %v10635_v19, -inf }
0x55ba   :  { %10637 = vmax.xlane.f32.xlu0 %v10636_v50 }
0x55d0   :  { %14937 = vrot.lane.b32.xlu0 %v17555_v28, %s17981_s8 }
0x55d4   :  { %10727 = vrot.lane.b32.xlu0 %v17567_v39, %s17985_s0 }
0x5647   :  { %v10638_v27 = vpop.xlane.xlu0 %10637 }
0x5648   :  { %v10639_v15 = vsub.f32 %v10635_v19, %v10638_v27 }
0x564a   :  { %v10640_v30 = vmul.f32 1.442695, %v10639_v15 }
0x564b   :  { %v14938_v2 = vpop.permute.xlu0 %14937 }
0x564c   :  { %15274 = vpow2.f32 %v10640_v30  ;;  %v14940_v0 = vunpack.i.h.bf16 %v14938_v2  ;;  %v14939_v34 = vunpack.i.l.bf16 %v14938_v2 }
0x564e   :  { %v14509_v25 = vpack.c.bf16 %v14940_v0, %v14939_v34 }
0x564f   :  { %v10728_v54 = vpop.permute.xlu0 %10727 }
0x5650   :  { %14511 = vmatpush3.bf16.msk.msra.mxu0 %vm15641_vm11, %v14509_v25 }
0x5651   :  { %14512 = vmatprep.subr.bf16.mxu0 %v15312_v7 }
0x5656   :  { %v15275_v17 = vpop.eup %15274 }
0x5657   :  { %v10642_v44 = vsel %vm410_vm9, %v15275_v17, 0.0 }
0x5658   :  { %10643 = vadd.xlane.f32.xlu1 %v10642_v44 }
0x5669   :  { %14942 = vrot.lane.b32.xlu1 %v17555_v28, %s17985_s0 }
0x56e5   :  { %v10644_v39 = vpop.xlane.xlu1 %10643 }
0x56e6   :  { %15276 = vrcp.f32 %v10644_v39 }
0x56e9   :  { %v14943_v55 = vpop.permute.xlu1 %14942 }
0x56ea   :  { %v14945_v18 = vunpack.i.h.bf16 %v14943_v55  ;;  %v14944_v58 = vunpack.i.l.bf16 %v14943_v55 }
0x56ec   :  { %v14513_v20 = vpack.c.bf16 %v14945_v18, %v14944_v58 }
0x56f0   :  { %v15277_v45 = vpop.eup %15276 }
0x56f1   :  { %v10646_v61 = vmul.f32 %v15277_v45, %v15275_v17 }
0x56f3   :  { %13900 = vmatmul.mubr.msk.f32.vlgmr.msra.gmra.mrb[126].mxu0 %vm410_vm9, %v10646_v61 }
0x56f4   :  { %14515 = vmatpush3.bf16.xpose.msk.msra.mxu0 %vm15620_vm7, %v14513_v20  ;;  %13906 = vmatprep.mubr.msk.f32.mxu0 %vm15313_vm0, %v15314_v10 }
0x56f5   :  { %14524 = vmatprep.subr.bf16.mxu0 %v15312_v7 }
0x56fb   :  { %13907 = vmatmul.mubr.msk.f32.vlgmr.msra.gmra.mrb[128].mxu0 %vm324_vm6, %v10728_v54 }
0x56fc   :  { %13927 = vmatprep.mubr.msk.f32.mxu0 %vm15313_vm0, %v15314_v10 }
0x57c6   :  { %v17645_v37 = vpop.f32.mrb[126].mxu0 }
0x57c7   :  { %v13901_v4 = vpop.f32.mrb[127].mxu0 }
0x57ce   :  { %v10805_v57 = vpop.f32.mrb[128].mxu0 }
0x57cf   :  { %v10809_v41 = vmul.f32 0.35355338, %v10805_v57  ;;  %v13908_v36 = vpop.f32.mrb[129].mxu0 }
0x57d1   :  { %v10810_v51 = vsel %vm410_vm9, %v10809_v41, -inf }
0x57d2   :  { %10811 = vmax.xlane.f32.xlu1 %v10810_v51 }
0x585f   :  { %v10812_v53 = vpop.xlane.xlu1 %10811 }
0x5860   :  { %v10813_v40 = vsub.f32 %v10809_v41, %v10812_v53 }
0x5862   :  { %v10814_v26 = vmul.f32 1.442695, %v10813_v40 }
0x5864   :  { %15278 = vpow2.f32 %v10814_v26 }
0x586e   :  { %v15279_v6 = vpop.eup %15278 }
0x586f   :  { %v10816_v24 = vsel %vm410_vm9, %v15279_v6, 0.0 }
0x5870   :  { %10817 = vadd.xlane.f32.xlu0 %v10816_v24 }
0x5886   :  { %14947 = vrot.lane.b32.xlu0 %v17555_v28, %s17984_s10 }
0x588a   :  { %14957 = vrot.lane.b32.xlu0 %v17575_v42, %s17979_s5 }
0x588e   :  { %11089 = vrot.lane.b32.xlu0 %v17655_v3, %s17979_s5 }
0x58fd   :  { %v10818_v31 = vpop.xlane.xlu0 %10817 }
0x58fe   :  { %15280 = vrcp.f32 %v10818_v31 }
0x5901   :  { %v14948_v22 = vpop.permute.xlu0 %14947 }
0x5902   :  { %v14950_v1 = vunpack.i.h.bf16 %v14948_v22  ;;  %v14949_v47 = vunpack.i.l.bf16 %v14948_v22 }
0x5904   :  { %v14517_v11 = vpack.c.bf16 %v14950_v1, %v14949_v47 }
0x5905   :  { %v14958_v25 = vpop.permute.xlu0 %14957 }
0x5906   :  { %14519 = vmatpush3.bf16.msk.msra.mxu1 %vm15641_vm11, %v14517_v11  ;;  %v14960_v44 = vunpack.i.h.bf16 %v14958_v25  ;;  %v14959_v39 = vunpack.i.l.bf16 %v14958_v25 }
0x5907   :  { %14520 = vmatprep.subr.bf16.mxu1 %v15312_v7 }
0x5908   :  { %v15281_v28 = vpop.eup %15280  ;;  %v14529_v18 = vpack.c.bf16 %v14960_v44, %v14959_v39 }
0x5909   :  { %v10820_v49 = vmul.f32 %v15281_v28, %v15279_v6  ;;  %v11090_v58 = vpop.permute.xlu0 %11089 }
0x590b   :  { %13914 = vmatmul.mubr.msk.f32.vlgmr.msra.gmra.mrb[130].mxu1 %vm410_vm9, %v10820_v49 }
0x590c   :  { %13920 = vmatprep.mubr.msk.f32.mxu1 %vm15313_vm0, %v15314_v10 }
0x590f   :  { %14523 = vmatpush3.bf16.xpose.msk.msra.mxu1 %vm15620_vm7, %v14521_v16 }
0x5910   :  { %14532 = vmatprep.subr.bf16.mxu1 %v15312_v7 }
0x5916   :  { %13921 = vmatmul.mubr.msk.f32.vlgmr.msra.gmra.mrb[132].mxu1 %vm324_vm6, %v17655_v3 }
0x5917   :  { %13941 = vmatprep.mubr.msk.f32.mxu1 %vm15313_vm0, %v15314_v10 }
0x59de   :  { %v17675_v23 = vpop.f32.mrb[130].mxu1 }
0x59df   :  { %v13915_v21 = vpop.f32.mrb[131].mxu1 }
0x59e9   :  { %v10993_v29 = vpop.f32.mrb[132].mxu1 }
0x59ea   :  { %v10997_v35 = vmul.f32 0.35355338, %v10993_v29  ;;  %v13922_v19 = vpop.f32.mrb[133].mxu1 }
0x59ec   :  { %v10998_v9 = vsel %vm410_vm9, %v10997_v35, -inf }
0x59ed   :  { %10999 = vmax.xlane.f32.xlu1 %v10998_v9 }
0x5a7a   :  { %v11000_v8 = vpop.xlane.xlu1 %10999 }
0x5a7b   :  { %v11001_v59 = vsub.f32 %v10997_v35, %v11000_v8 }
0x5a7d   :  { %v11002_v16 = vmul.f32 1.442695, %v11001_v59 }
0x5a7f   :  { %15282 = vpow2.f32 %v11002_v16 }
0x5a89   :  { %v15283_v50 = vpop.eup %15282 }
0x5a8a   :  { %v11004_v27 = vsel %vm410_vm9, %v15283_v50, 0.0 }
0x5a8b   :  { %11005 = vadd.xlane.f32.xlu1 %v11004_v27 }
0x5a9c   :  { %14952 = vrot.lane.b32.xlu1 %v17575_v42, %s17977_s29 }
0x5b18   :  { %v11006_v15 = vpop.xlane.xlu1 %11005 }
0x5b19   :  { %15284 = vrcp.f32 %v11006_v15 }
0x5b1c   :  { %v14953_v30 = vpop.permute.xlu1 %14952 }
0x5b1d   :  { %v14955_v2 = vunpack.i.h.bf16 %v14953_v30  ;;  %v14954_v0 = vunpack.i.l.bf16 %v14953_v30 }
0x5b1f   :  { %v14525_v34 = vpack.c.bf16 %v14955_v2, %v14954_v0 }
0x5b21   :  { %14527 = vmatpush3.bf16.msk.msra.mxu0 %vm15641_vm11, %v14525_v34 }
0x5b22   :  { %14528 = vmatprep.subr.bf16.mxu0 %v15312_v7 }
0x5b23   :  { %v15285_v17 = vpop.eup %15284 }
0x5b24   :  { %v11008_v55 = vmul.f32 %v15285_v17, %v15283_v50 }
0x5b26   :  { %13928 = vmatmul.mubr.msk.f32.vlgmr.msra.gmra.mrb[130].mxu0 %vm410_vm9, %v11008_v55 }
0x5b27   :  { %13934 = vmatprep.mubr.msk.f32.mxu0 %vm15313_vm0, %v15314_v10 }
0x5b2a   :  { %14531 = vmatpush3.bf16.xpose.msk.msra.mxu0 %vm15620_vm7, %v14529_v18 }
0x5b2b   :  { %14540 = vmatprep.subr.bf16.mxu0 %v15312_v7 }
0x5b31   :  { %13935 = vmatmul.mubr.msk.f32.vlgmr.msra.gmra.mrb[132].mxu0 %vm324_vm6, %v11090_v58 }
0x5b32   :  { %13955 = vmatprep.mubr.msk.f32.mxu0 %vm15313_vm0, %v15314_v10 }
0x5bf9   :  { %v17693_v45 = vpop.f32.mrb[130].mxu0 }
0x5bfa   :  { %v13929_v61 = vpop.f32.mrb[131].mxu0 }
0x5c04   :  { %v11167_v20 = vpop.f32.mrb[132].mxu0 }
0x5c05   :  { %v11171_v54 = vmul.f32 0.35355338, %v11167_v20  ;;  %v13936_v4 = vpop.f32.mrb[133].mxu0 }
0x5c07   :  { %v11172_v57 = vsel %vm410_vm9, %v11171_v54, -inf }
0x5c08   :  { %11173 = vmax.xlane.f32.xlu1 %v11172_v57 }
0x5c19   :  { %14967 = vrot.lane.b32.xlu1 %v17575_v42, %s17983_s4 }
0x5c1d   :  { %11263 = vrot.lane.b32.xlu1 %v17655_v3, %s17983_s4 }
0x5c95   :  { %v11174_v41 = vpop.xlane.xlu1 %11173 }
0x5c96   :  { %v11175_v36 = vsub.f32 %v11171_v54, %v11174_v41 }
0x5c98   :  { %v11176_v51 = vmul.f32 1.442695, %v11175_v36 }
0x5c99   :  { %v14968_v1 = vpop.permute.xlu1 %14967 }
0x5c9a   :  { %15286 = vpow2.f32 %v11176_v51  ;;  %v14970_v11 = vunpack.i.h.bf16 %v14968_v1  ;;  %v14969_v28 = vunpack.i.l.bf16 %v14968_v1 }
0x5c9c   :  { %v14537_v21 = vpack.c.bf16 %v14970_v11, %v14969_v28 }
0x5c9d   :  { %v11264_v29 = vpop.permute.xlu1 %11263 }
0x5ca4   :  { %v15287_v53 = vpop.eup %15286 }
0x5ca5   :  { %v11178_v40 = vsel %vm410_vm9, %v15287_v53, 0.0 }
0x5ca6   :  { %11179 = vadd.xlane.f32.xlu0 %v11178_v40 }
0x5cbc   :  { %14962 = vrot.lane.b32.xlu0 %v17575_v42, %s17978_s11 }
0x5d33   :  { %v11180_v26 = vpop.xlane.xlu0 %11179 }
0x5d34   :  { %15288 = vrcp.f32 %v11180_v26 }
0x5d37   :  { %v14963_v6 = vpop.permute.xlu0 %14962 }
0x5d38   :  { %v14965_v24 = vunpack.i.h.bf16 %v14963_v6  ;;  %v14964_v31 = vunpack.i.l.bf16 %v14963_v6 }
0x5d3a   :  { %v14533_v22 = vpack.c.bf16 %v14965_v24, %v14964_v31 }
0x5d3c   :  { %14535 = vmatpush3.bf16.msk.msra.mxu1 %vm15641_vm11, %v14533_v22 }
0x5d3d   :  { %14536 = vmatprep.subr.bf16.mxu1 %v15312_v7 }
0x5d3e   :  { %v15289_v47 = vpop.eup %15288 }
0x5d3f   :  { %v11182_v49 = vmul.f32 %v15289_v47, %v15287_v53 }
0x5d41   :  { %13942 = vmatmul.mubr.msk.f32.vlgmr.msra.gmra.mrb[134].mxu1 %vm410_vm9, %v11182_v49 }
0x5d42   :  { %13948 = vmatprep.mubr.msk.f32.mxu1 %vm15313_vm0, %v15314_v10 }
0x5d45   :  { %14539 = vmatpush3.bf16.xpose.msk.msra.mxu1 %vm15620_vm7, %v14537_v21 }
0x5d46   :  { %14548 = vmatprep.subr.bf16.mxu1 %v15312_v7 }
0x5d4c   :  { %13949 = vmatmul.mubr.msk.f32.vlgmr.msra.gmra.mrb[136].mxu1 %vm324_vm6, %v11264_v29 }
0x5d4d   :  { %13969 = vmatprep.mubr.msk.f32.mxu1 %vm15313_vm0, %v15314_v10 }
0x5e14   :  { %v11259_v35 = vpop.f32.mrb[134].mxu1 }
0x5e15   :  { %v13943_v19 = vpop.f32.mrb[135].mxu1 }
0x5e1f   :  { %v11341_v9 = vpop.f32.mrb[136].mxu1 }
0x5e20   :  { %v11345_v8 = vmul.f32 0.35355338, %v11341_v9  ;;  %v13950_v59 = vpop.f32.mrb[137].mxu1 }
0x5e22   :  { %v11346_v16 = vsel %vm410_vm9, %v11345_v8, -inf }
0x5e23   :  { %11347 = vmax.xlane.f32.xlu0 %v11346_v16 }
0x5e39   :  { %14972 = vrot.lane.b32.xlu0 %v17575_v42, %s17981_s8 }
0x5e3d   :  { %11437 = vrot.lane.b32.xlu0 %v17655_v3, %s17985_s0 }
0x5eb0   :  { %v11348_v50 = vpop.xlane.xlu0 %11347 }
0x5eb1   :  { %v11349_v27 = vsub.f32 %v11345_v8, %v11348_v50 }
0x5eb3   :  { %v11350_v15 = vmul.f32 1.442695, %v11349_v27 }
0x5eb4   :  { %v14973_v30 = vpop.permute.xlu0 %14972 }
0x5eb5   :  { %15290 = vpow2.f32 %v11350_v15  ;;  %v14975_v2 = vunpack.i.h.bf16 %v14973_v30  ;;  %v14974_v0 = vunpack.i.l.bf16 %v14973_v30 }
0x5eb7   :  { %v14541_v34 = vpack.c.bf16 %v14975_v2, %v14974_v0 }
0x5eb9   :  { %14543 = vmatpush3.bf16.msk.msra.mxu0 %vm15641_vm11, %v14541_v34 }
0x5eba   :  { %14544 = vmatprep.subr.bf16.mxu0 %v15312_v7  ;;  %v11438_v7 = vpop.permute.xlu0 %11437 }
0x5ebf   :  { %v15291_v25 = vpop.eup %15290 }
0x5ec0   :  { %v11352_v17 = vsel %vm410_vm9, %v15291_v25, 0.0 }
0x5ec1   :  { %11353 = vadd.xlane.f32.xlu1 %v11352_v17 }
0x5ed2   :  { %14977 = vrot.lane.b32.xlu1 %v17575_v42, %s17985_s0 }
0x5f4e   :  { %v11354_v3 = vpop.xlane.xlu1 %11353 }
0x5f4f   :  { %15292 = vrcp.f32 %v11354_v3 }
0x5f52   :  { %v14978_v44 = vpop.permute.xlu1 %14977 }
0x5f53   :  { %v14980_v39 = vunpack.i.h.bf16 %v14978_v44  ;;  %v14979_v55 = vunpack.i.l.bf16 %v14978_v44 }
0x5f55   :  { %v14545_v61 = vpack.c.bf16 %v14980_v39, %v14979_v55 }
0x5f59   :  { %v15293_v18 = vpop.eup %15292 }
0x5f5a   :  { %v11356_v58 = vmul.f32 %v15293_v18, %v15291_v25 }
0x5f5c   :  { %13956 = vmatmul.mubr.msk.f32.vlgmr.msra.gmra.mrb[134].mxu0 %vm410_vm9, %v11356_v58 }
0x5f5d   :  { %14547 = vmatpush3.bf16.xpose.msk.msra.mxu0 %vm15620_vm7, %v14545_v61  ;;  %13962 = vmatprep.mubr.msk.f32.mxu0 %vm15313_vm0, %v15314_v10 }
0x5f64   :  { %13963 = vmatmul.mubr.msk.f32.vlgmr.msra.gmra.mrb[136].mxu0 %vm324_vm6, %v11438_v7 }
0x602f   :  { %v11433_v20 = vpop.f32.mrb[134].mxu0 }
0x6030   :  { %v13957_v54 = vpop.f32.mrb[135].mxu0 }
0x6037   :  { %v11515_v4 = vpop.f32.mrb[136].mxu0 }
0x6038   :  { %v11519_v57 = vmul.f32 0.35355338, %v11515_v4  ;;  %v13964_v41 = vpop.f32.mrb[137].mxu0  ;;  %v12481_v4 = vld [vmem:[%s17998_s27 + $0x28] sm:$0xff] }
0x6039   :  { %v12482_v41 = vld [vmem:[%s17998_s27 + $0x30] sm:$0xff] }
0x603a   :  { %v11520_v36 = vsel %vm410_vm9, %v11519_v57, -inf }
0x603b   :  { %11521 = vmax.xlane.f32.xlu1 %v11520_v36  ;;  %v12483_v36 = vld [vmem:[%s17998_s27 + $0x38] sm:$0xff] }
0x604c   :  { %14987 = vrot.lane.b32.xlu1 %v17498_v33, %s17988_s22 }
0x6050   :  { %14992 = vrot.lane.b32.xlu1 %v17510_v62, %s17988_s22 }
0x6054   :  { %10906 = vrot.lane.b32.xlu1 %v17645_v37, %s17989_s23 }
0x6058   :  { %10910 = vrot.lane.b32.xlu1 %v17675_v23, %s17992_s12 }
0x60c8   :  { %v11522_v10 = vpop.xlane.xlu1 %11521 }
0x60c9   :  { %v11523_v12 = vsub.f32 %v11519_v57, %v11522_v10  ;;  %v14564_v10 = vpack.c.bf16 %v12483_v36, %v12482_v41 }
0x60cb   :  { %v11524_v51 = vmul.f32 1.442695, %v11523_v12  ;;  %v12485_v12 = vld [vmem:[%s17999_s28 + $0x40] sm:$0xff] }
0x60cc   :  { %v14988_v33 = vpop.permute.xlu1 %14987 }
0x60cd   :  { %15294 = vpow2.f32 %v11524_v51  ;;  %v14990_v23 = vunpack.i.h.bf16 %v14988_v33  ;;  %v14989_v26 = vunpack.i.l.bf16 %v14988_v33  ;;  %v12486_v51 = vld [vmem:[%s17999_s28 + $0x48] sm:$0xff]  ;;  %v12488_v33 = vld [vmem:[%s17999_s28 + $0x58] sm:$0xff] }
0x60d0   :  { %v14993_v37 = vpop.permute.xlu1 %14992 }
0x60d1   :  { %v14994_v47 = vunpack.i.l.bf16 %v14993_v37 }
0x60d4   :  { %v10907_v22 = vpop.permute.xlu1 %10906 }
0x60d7   :  { %v15295_v53 = vpop.eup %15294 }
0x60d8   :  { %v11526_v40 = vsel %vm410_vm9, %v15295_v53, 0.0 }
0x60d9   :  { %11527 = vadd.xlane.f32.xlu0 %v11526_v40  ;;  %v14568_v40 = vpack.c.bf16 %v12486_v51, %v12485_v12  ;;  %v11987_v12 = vrot.slane %v17526_v46, %v8405_v52 }
0x60ef   :  { %14982 = vrot.lane.b32.xlu0 %v17575_v42, %s17984_s10  ;;  %v14552_v42 = vpack.c.bf16 %v14990_v23, %v14989_v26  ;;  %v12490_v23 = vld [vmem:[%s17999_s28 + $0x68] sm:$0xff]  ;;  %s18004_s10 = sld [smem:[#allocation21_spill]] }
0x60f3   :  { %10902 = vrot.lane.b32.xlu0 %v17623_v56, %s17990_s20  ;;  %v14995_v56 = vunpack.i.h.bf16 %v14993_v37  ;;  %v12489_v37 = vld [vmem:[%s17999_s28 + $0x60] sm:$0xff] }
0x60f4   :  { %v14576_v26 = vpack.c.bf16 %v12490_v23, %v12489_v37 }
0x60f5   :  { %v14556_v21 = vpack.c.bf16 %v14995_v56, %v14994_v47  ;;  %v11753_v56 = vrot.slane %v17526_v46, %v16061_v38  ;;  %v12492_v38 = vld [vmem:[%s17999_s28 + $0x78] sm:$0xff] }
0x60f7   :  { %11612 = vrot.lane.b32.xlu0 %v11259_v35, %s17990_s20  ;;  %v10911_v35 = vpop.permute.xlu1 %10910 }
0x60fb   :  { %11616 = vrot.lane.b32.xlu0 %v11433_v20, %s17989_s23 }
0x60ff   :  { %11638 = vrot.lane.b32.xlu0 %v17519_v43, %s17988_s22 }
0x6166   :  { %v11528_v62 = vpop.xlane.xlu0 %11527 }
0x6167   :  { %15296 = vrcp.f32 %v11528_v62 }
0x616a   :  { %v14983_v6 = vpop.permute.xlu0 %14982 }
0x616b   :  { %v14985_v24 = vunpack.i.h.bf16 %v14983_v6  ;;  %v14984_v31 = vunpack.i.l.bf16 %v14983_v6 }
0x616d   :  { %v14549_v1 = vpack.c.bf16 %v14985_v24, %v14984_v31 }
0x616e   :  { %v10903_v11 = vpop.permute.xlu0 %10902 }
0x616f   :  { %v10913_v28 = vsel %vm324_vm6, %v17621_v13, %v10903_v11  ;;  %14551 = vmatpush3.bf16.msk.msra.mxu1 %vm15641_vm11, %v14549_v1 }
0x6170   :  { %14553 = vmatprep.subr.bf16.mxu1 %v14552_v42  ;;  %v10914_v49 = vsel %vm1157_vm14, %v10913_v28, %v10907_v22  ;;  %v11759_v28 = vrot.slane %v17526_v46, %v16064_v14  ;;  %v12494_v14 = vld [vmem:[%s18000_s16 + $0x1] ss:$0 sm:$0xff] }
0x6171   :  { %v15297_v43 = vpop.eup %15296  ;;  %v10915_v19 = vsel %vm1160_vm13, %v10914_v49, %v10911_v35 }
0x6172   :  { %v11530_v29 = vmul.f32 %v15297_v43, %v15295_v53  ;;  %v11613_v9 = vpop.permute.xlu0 %11612  ;;  %v12487_v53 = vld [vmem:[%s17999_s28 + $0x50] sm:$0xff] }
0x6173   :  { %v11623_v59 = vsel %vm324_vm6, %v17693_v45, %v11613_v9  ;;  %v14572_v62 = vpack.c.bf16 %v12488_v33, %v12487_v53  ;;  %v11993_v33 = vrot.slane %v17526_v46, %v8411_v63 }
0x6174   :  { %13970 = vmatmul.mubr.msk.f32.vlgmr.msra.gmra.mrb[138].mxu1 %vm410_vm9, %v11530_v29 }
0x6175   :  { %13980 = vmatprep.mubr.msk.f32.mxu1 %vm228_vm5, %v10915_v19  ;;  %14555 = vmatpush3.bf16.msra.mxu1 %v14552_v42 }
0x6176   :  { %14557 = vmatprep.subr.bf16.mxu1 %v14556_v21  ;;  %v11617_v8 = vpop.permute.xlu0 %11616 }
0x6177   :  { %v11624_v16 = vsel %vm1157_vm14, %v11623_v59, %v11617_v8 }
0x6179   :  { %14559 = vmatpush3.bf16.msra.mxu1 %v14556_v21 }
0x617a   :  { %v11639_v15 = vpop.permute.xlu0 %11638  ;;  %14569 = vmatprep.subr.bf16.mxu1 %v14568_v40 }
0x6247   :  { %v11607_v13 = vpop.f32.mrb[138].mxu1 }
0x6248   :  { %11620 = vrot.lane.b32.xlu1 %v11607_v13, %s17992_s12  ;;  %v13971_v32 = vpop.f32.mrb[139].mxu1  ;;  %v12491_v13 = vld [vmem:[%s17999_s28 + $0x70] sm:$0xff] }
0x6249   :  { %v14580_v32 = vpack.c.bf16 %v12492_v38, %v12491_v13 }
0x62ba   :  { %v11621_v50 = vpop.permute.xlu1 %11620 }
0x62bb   :  { %v11625_v27 = vsel %vm1160_vm13, %v11624_v16, %v11621_v50 }
0x62bc   :  { %13981 = vmatmul.mubr.msk.f32.vlgmr.msra.gmra.mrb[140].mxu1 %vm228_vm5, %v11625_v27 }
0x62bd   :  { %14571 = vmatpush3.bf16.msra.mxu1 %v14568_v40 }
0x62be   :  { %14573 = vmatprep.subr.bf16.mxu1 %v14572_v62 }
0x62c1   :  { %14575 = vmatpush3.bf16.msra.mxu1 %v14572_v62 }
0x62c2   :  { %14577 = vmatprep.subr.bf16.mxu1 %v14576_v26 }
0x62c5   :  { %14579 = vmatpush3.bf16.msra.mxu1 %v14576_v26 }
0x62c6   :  { %14581 = vmatprep.subr.bf16.mxu1 %v14580_v32 }
0x62c9   :  { %14583 = vmatpush3.bf16.msra.mxu1 %v14580_v32 }
0x638f   :  { %v13982_v30 = vpop.f32.mrb[140].mxu1 }
0x6390   :  { %v11719_v2 = vadd.f32 %v13982_v30, %v11639_v15  ;;  %v11713_v0 = vpop.f32.mrb[141].mxu1 }
0x6391   :  { %v11714_v34 = vadd.f32 %v11713_v0, %v11639_v15  ;;  %v12497_v15 = vld [vmem:[%s18001_s19 + $0x1] ss:$0 sm:$0xff]  ;;  %s18003_s19 = sld [smem:[#allocation20_spill]] }
0x6392   :  { %v11723_v25 = vadd.f32 %v11719_v2, %v17545_v48 }
0x6393   :  { %v11722_v17 = vadd.f32 %v11714_v34, %v17543_v60  ;;  %v12480_v60 = vld [vmem:[%s17998_s27 + $0x20] sm:$0xff]  ;;  %s18006_s27 = sld [smem:[#allocation23_spill]] }
0x6394   :  { %v11727_v3 = vsel %vm228_vm5, %v11723_v25, 0.0  ;;  %v14560_v57 = vpack.c.bf16 %v12481_v4, %v12480_v60 }
0x6395   :  { %11728 = vadd.xlane.f32.xlu0 %v11727_v3  ;;  %v11724_v45 = vsel %vm228_vm5, %v11722_v17, 0.0 }
0x6396   :  { %11725 = vadd.xlane.f32.xlu1 %v11724_v45  ;;  %14561 = vmatprep.subr.bf16.mxu0 %v14560_v57 }
0x6397   :  { %14563 = vmatpush3.bf16.msra.mxu0 %v14560_v57 }
0x6398   :  { %14565 = vmatprep.subr.bf16.mxu0 %v14564_v10 }
0x639b   :  { %14567 = vmatpush3.bf16.msra.mxu0 %v14564_v10 }
0x6422   :  { %v11729_v44 = vpop.xlane.xlu0 %11728 }
0x6423   :  { %v11731_v39 = vmul.f32 0.03125, %v11729_v44  ;;  %v11726_v55 = vpop.xlane.xlu1 %11725 }
0x6424   :  { %v11730_v18 = vmul.f32 0.03125, %v11726_v55 }
0x6425   :  { %v11733_v58 = vsub.f32 %v11723_v25, %v11731_v39 }
0x6426   :  { %v11732_v61 = vsub.f32 %v11722_v17, %v11730_v18 }
0x6427   :  { %v11735_v54 = vmul.f32 %v11733_v58, %v11733_v58 }
0x6428   :  { %v11734_v7 = vmul.f32 %v11732_v61, %v11732_v61 }
0x6429   :  { %v11739_v48 = vsel %vm228_vm5, %v11735_v54, 0.0 }
0x642a   :  { %v11736_v20 = vsel %vm228_vm5, %v11734_v7, 0.0 }
0x642b   :  { %11737 = vadd.xlane.f32.xlu0 %v11736_v20 }
0x642f   :  { %11740 = vadd.xlane.f32.xlu0 %v11739_v48 }
0x64b8   :  { %v11738_v6 = vpop.xlane.xlu0 %11737 }
0x64b9   :  { %v11742_v24 = vmul.f32 0.03125, %v11738_v6 }
0x64bb   :  { %v11744_v31 = vadd.f32 1e-05, %v11742_v24 }
0x64bc   :  { %v11741_v42 = vpop.xlane.xlu0 %11740 }
0x64bd   :  { %15298 = vrsqrt.f32 %v11744_v31  ;;  %v11743_v22 = vmul.f32 0.03125, %v11741_v42 }
0x64bf   :  { %v11745_v1 = vadd.f32 1e-05, %v11743_v22 }
0x64c1   :  { %15300 = vrsqrt.f32 %v11745_v1 }
0x64c7   :  { %v15299_v47 = vpop.eup %15298 }
0x64c8   :  { %v11748_v11 = vmul.f32 %v15299_v47, %v11732_v61 }
0x64ca   :  { %v11754_v43 = vmul.f32 %v11753_v56, %v11748_v11 }
0x64cb   :  { %v15301_v49 = vpop.eup %15300 }
0x64cc   :  { %v11749_v21 = vmul.f32 %v15301_v49, %v11733_v58  ;;  %v11760_v29 = vadd.f32 %v11759_v28, %v11754_v43  ;;  %v12037_v43 = vld [vmem:[%s18003_s19 + $0x8] sm:$0xff] }
0x64ce   :  { %v11755_v35 = vmul.f32 %v11753_v56, %v11749_v21  ;;  %13991 = vmatprep.mubr.msk.f32.mxu0 %vm228_vm5, %v11760_v29  ;;  %v12038_v21 = vld [vmem:[%s18003_s19 + $0x10] sm:$0xff] }
0x64d0   :  { %v11761_v19 = vadd.f32 %v11759_v28, %v11755_v35  ;;  %v12036_v28 = vld [vmem:[%s18003_s19] sm:$0xff] }
0x64d1   :  { %v14584_v49 = vpack.c.bf16 %v12037_v43, %v12036_v28 }
0x64d2   :  { %13992 = vmatmul.mubr.msk.f32.vlgmr.msra.gmra.mrb[138].mxu0 %vm228_vm5, %v11761_v19 }
0x64d3   :  { %14585 = vmatprep.subr.bf16.mxu0 %v14584_v49 }
0x64d4   :  { %14587 = vmatpush3.bf16.msra.mxu0 %v14584_v49 }
0x65a5   :  { %v13993_v9 = vpop.f32.mrb[138].mxu0 }
0x65a6   :  { %v11864_v8 = vadd.f32 %v13993_v9, %v12494_v14  ;;  %v11858_v59 = vpop.f32.mrb[139].mxu0 }
0x65a7   :  { %v11859_v16 = vadd.f32 %v12494_v14, %v11858_v59  ;;  %v12500_v59 = vld [vmem:[%s18004_s10] ss:$0 sm:$0xff] }
0x65a8   :  { %v11868_v27 = vmax.f32 %v11864_v8, 0.0 }
0x65a9   :  { %v11867_v50 = vmax.f32 %v11859_v16, 0.0 }
0x65ab   :  { %14010 = vmatprep.mubr.msk.f32.mxu1 %vm2296_vm1, %v11867_v50 }
0x65ac   :  { %14011 = vmatmul.mubr.msk.f32.vlgmr.msra.gmra.mrb[142].mxu1 %vm2296_vm1, %v11868_v27 }
0x667f   :  { %v14012_v30 = vpop.f32.mrb[142].mxu1 }
0x6680   :  { %v11953_v2 = vadd.f32 %v14012_v30, %v12497_v15  ;;  %v11947_v0 = vpop.f32.mrb[143].mxu1 }
0x6681   :  { %v11948_v34 = vadd.f32 %v12497_v15, %v11947_v0  ;;  %v12501_v15 = vld [vmem:[%s18004_s10 + $0x1] ss:$0 sm:$0xff] }
0x6682   :  { %v11957_v25 = vadd.f32 %v11953_v2, %v11761_v19 }
0x6683   :  { %v11956_v17 = vadd.f32 %v11948_v34, %v11760_v29  ;;  %v12039_v29 = vld [vmem:[%s18003_s19 + $0x18] sm:$0xff] }
0x6684   :  { %v11961_v3 = vsel %vm228_vm5, %v11957_v25, 0.0  ;;  %v14588_v35 = vpack.c.bf16 %v12039_v29, %v12038_v21 }
0x6685   :  { %11962 = vadd.xlane.f32.xlu0 %v11961_v3  ;;  %v11958_v45 = vsel %vm228_vm5, %v11956_v17, 0.0 }
0x6686   :  { %11959 = vadd.xlane.f32.xlu1 %v11958_v45  ;;  %14589 = vmatprep.subr.bf16.mxu0 %v14588_v35 }
0x6687   :  { %14591 = vmatpush3.bf16.msra.mxu0 %v14588_v35 }
0x6712   :  { %v11963_v44 = vpop.xlane.xlu0 %11962 }
0x6713   :  { %v11965_v39 = vmul.f32 0.03125, %v11963_v44  ;;  %v11960_v55 = vpop.xlane.xlu1 %11959 }
0x6714   :  { %v11964_v18 = vmul.f32 0.03125, %v11960_v55 }
0x6715   :  { %v11967_v58 = vsub.f32 %v11957_v25, %v11965_v39  ;;  %v12502_v25 = vld [vmem:[%s18005_s2] ss:$0 sm:$0xff] }
0x6716   :  { %v11966_v61 = vsub.f32 %v11956_v17, %v11964_v18 }
0x6717   :  { %v11969_v7 = vmul.f32 %v11967_v58, %v11967_v58 }
0x6718   :  { %v11968_v20 = vmul.f32 %v11966_v61, %v11966_v61 }
0x6719   :  { %v11973_v54 = vsel %vm228_vm5, %v11969_v7, 0.0 }
0x671a   :  { %11974 = vadd.xlane.f32.xlu0 %v11973_v54  ;;  %v11970_v48 = vsel %vm228_vm5, %v11968_v20, 0.0 }
0x671b   :  { %11971 = vadd.xlane.f32.xlu1 %v11970_v48 }
0x67a7   :  { %v11975_v60 = vpop.xlane.xlu0 %11974 }
0x67a8   :  { %v11977_v4 = vmul.f32 0.03125, %v11975_v60  ;;  %v11972_v57 = vpop.xlane.xlu1 %11971 }
0x67a9   :  { %v11976_v41 = vmul.f32 0.03125, %v11972_v57 }
0x67aa   :  { %v11979_v36 = vadd.f32 1e-05, %v11977_v4 }
0x67ab   :  { %v11978_v10 = vadd.f32 1e-05, %v11976_v41 }
0x67ac   :  { %15302 = vrsqrt.f32 %v11979_v36 }
0x67ad   :  { %15304 = vrsqrt.f32 %v11978_v10 }
0x67b6   :  { %v15303_v51 = vpop.eup %15302 }
0x67b7   :  { %v15305_v53 = vpop.eup %15304  ;;  %v11983_v40 = vmul.f32 %v15303_v51, %v11967_v58 }
0x67b8   :  { %v11982_v62 = vmul.f32 %v15305_v53, %v11966_v61 }
0x67b9   :  { %v11989_v37 = vmul.f32 %v11987_v12, %v11983_v40 }
0x67ba   :  { %v11988_v23 = vmul.f32 %v11987_v12, %v11982_v62 }
0x67bb   :  { %v11995_v26 = vadd.f32 %v11993_v33, %v11989_v37 }
0x67bc   :  { %v11994_v6 = vadd.f32 %v11993_v33, %v11988_v23 }
0x67bd   :  { %v12001_v24 = vsel %vm228_vm5, %v11995_v26, 0.0 }
0x67be   :  { %12002 = vadd.xlane.f32.xlu0 %v12001_v24  ;;  %v11998_v31 = vsel %vm228_vm5, %v11994_v6, 0.0 }
0x67bf   :  { %11999 = vadd.xlane.f32.xlu1 %v11998_v31 }
0x684b   :  { %v12003_v42 = vpop.xlane.xlu0 %12002 }
0x684c   :  { %v12005_v52 = vmul.f32 0.03125, %v12003_v42  ;;  %v12000_v22 = vpop.xlane.xlu1 %11999 }
0x684d   :  { %v12004_v1 = vmul.f32 0.03125, %v12000_v22 }
0x684e   :  { %v12007_v56 = vsub.f32 %v11995_v26, %v12005_v52 }
0x684f   :  { %v12006_v47 = vsub.f32 %v11994_v6, %v12004_v1 }
0x6850   :  { %v12009_v5 = vmul.f32 %v12007_v56, %v12007_v56 }
0x6851   :  { %v12008_v11 = vmul.f32 %v12006_v47, %v12006_v47 }
0x6852   :  { %v12013_v63 = vsel %vm228_vm5, %v12009_v5, 0.0 }
0x6853   :  { %12014 = vadd.xlane.f32.xlu0 %v12013_v63  ;;  %v12010_v46 = vsel %vm228_vm5, %v12008_v11, 0.0 }
0x6854   :  { %12011 = vadd.xlane.f32.xlu1 %v12010_v46 }
0x68e0   :  { %v12015_v19 = vpop.xlane.xlu0 %12014 }
0x68e1   :  { %v12017_v13 = vmul.f32 0.03125, %v12015_v19  ;;  %v12012_v38 = vpop.xlane.xlu1 %12011 }
0x68e2   :  { %v12016_v32 = vmul.f32 0.03125, %v12012_v38 }
0x68e3   :  { %v12019_v14 = vadd.f32 1e-05, %v12017_v13 }
0x68e4   :  { %v12018_v9 = vadd.f32 1e-05, %v12016_v32 }
0x68e5   :  { %15306 = vrsqrt.f32 %v12019_v14 }
0x68e6   :  { %15308 = vrsqrt.f32 %v12018_v9 }
0x68ef   :  { %v15307_v8 = vpop.eup %15306 }
0x68f0   :  { %v15309_v16 = vpop.eup %15308  ;;  %v12023_v50 = vmul.f32 %v15307_v8, %v12007_v56 }
0x68f1   :  { %v12022_v27 = vmul.f32 %v15309_v16, %v12006_v47 }
0x68f2   :  { %v12029_v30 = vmul.f32 %v12500_v59, %v12023_v50 }
0x68f3   :  { %v12028_v2 = vmul.f32 %v12500_v59, %v12022_v27 }
0x68f4   :  { %v12035_v34 = vadd.f32 %v12501_v15, %v12029_v30 }
0x68f5   :  { %v12034_v0 = vadd.f32 %v12501_v15, %v12028_v2 }
0x68f7   :  { %14021 = vmatprep.mubr.msk.f32.mxu0 %vm228_vm5, %v12034_v0 }
0x68f8   :  { %14022 = vmatmul.mubr.msk.f32.vlgmr.msra.gmra.mrb[140].mxu0 %vm228_vm5, %v12035_v34 }
0x69cb   :  { %v14023_v17 = vpop.f32.mrb[140].mxu0 }
0x69cc   :  { %v12125_v3 = vadd.f32 %v14023_v17, %v12502_v25  ;;  %v12119_v45 = vpop.f32.mrb[141].mxu0 }
0x69cd   :  { %v12120_v44 = vadd.f32 %v12502_v25, %v12119_v45 }
0x69ce   :  { %12505 = vst [vmem:[%s18006_s27 + $0x8] sm:$0xff] %v12125_v3 }
0x69cf   :  { %12128 = vst [vmem:[%s18006_s27] sm:$0xff] %v12120_v44 }

</bundles_post_ra>
